<compile_context>
chip_gen: v5e
topology: v5e:2x2
jax: 0.10.0
libtpu: 0.0.40
codegen_flags: <defaults>
</compile_context>

<pallas_src>
import jax
import jax.numpy as jnp
from jax.experimental import pallas as pl
from jax.experimental.pallas import tpu as pltpu


# ---------------------------------------------------------------------------
# Kernel A: fused conv1+ReLU -> (in-VMEM halo pad) -> conv2+ReLU -> 2x2 maxpool
# ---------------------------------------------------------------------------

def _features_kernel(x_ref, w1_ref, b1_ref, w2_ref, b2_ref, o_ref, xpad_ref):
    # x_ref   : (1, H+2, W+2, Cin)  zero-padded NHWC input, one batch element
    # w1_ref  : (3, 3, Cin, C)      HWIO conv1 weights (f32)
    # b1_ref  : (1, C)
    # w2_ref  : (3, 3, C, C)        HWIO conv2 weights (f32)
    # b2_ref  : (1, C)
    # o_ref   : (1, Hp*Wp, C)       pooled features, (spatial, channel), bf16
    # xpad_ref: (H+2, W+2, C)       VMEM scratch: halo-padded conv1 output
    Hp2, Wp2, C = xpad_ref.shape
    H, W = Hp2 - 2, Wp2 - 2
    Hp, Wp = H // 2, W // 2
    Cin = x_ref.shape[3]

    # ---- conv1 (Cin -> C) as 9 shifted (H*W, Cin) @ (Cin, C) MXU matmuls ----
    x = x_ref[0]                                   # (H+2, W+2, Cin) f32
    acc = jnp.zeros((H * W, C), jnp.float32)
    for dy in range(3):
        for dx in range(3):
            patch = x[dy:dy + H, dx:dx + W, :].reshape(H * W, Cin)
            acc = acc + jnp.dot(patch, w1_ref[dy, dx],
                                preferred_element_type=jnp.float32)
    a1 = jnp.maximum(acc + b1_ref[...], 0.0)       # (H*W, C) f32

    # ---- in-kernel halo pad of conv1 output (stays in VMEM, no HBM round trip) ----
    xpad_ref[...] = jnp.zeros_like(xpad_ref)
    xpad_ref[1:H + 1, 1:W + 1, :] = a1.reshape(H, W, C)

    # ---- conv2 (C -> C), same 9-tap decomposition, reading the VMEM scratch ----
    acc = jnp.zeros((H * W, C), jnp.float32)
    for dy in range(3):
        for dx in range(3):
            patch = xpad_ref[dy:dy + H, dx:dx + W, :].reshape(H * W, C)
            acc = acc + jnp.dot(patch, w2_ref[dy, dx],
                                preferred_element_type=jnp.float32)
    a2 = jnp.maximum(acc + b2_ref[...], 0.0)       # (H*W, C) f32

    # ---- 2x2 / stride-2 max pool; emit (spatial, channel) features in bf16 ----
    y = a2.reshape(Hp, 2, Wp, 2, C)
    pooled = jnp.max(jnp.max(y, axis=3), axis=1)   # (Hp, Wp, C)
    o_ref[...] = pooled.reshape(1, Hp * Wp, C).astype(o_ref.dtype)


def _features(x_pad, w1, b1, w2, b2):
    # x_pad: (N, H+2, W+2, Cin) f32 (zero padded); returns (N, Hp*Wp, C) bf16
    N, Hp2, Wp2, Cin = x_pad.shape
    H, W = Hp2 - 2, Wp2 - 2
    C = w1.shape[-1]
    S = (H // 2) * (W // 2)
    return pl.pallas_call(
        _features_kernel,
        out_shape=jax.ShapeDtypeStruct((N, S, C), jnp.bfloat16),
        grid=(N,),
        in_specs=[
            pl.BlockSpec((1, Hp2, Wp2, Cin), lambda n: (n, 0, 0, 0)),
            pl.BlockSpec(w1.shape, lambda n: (0, 0, 0, 0)),   # resident (constant map)
            pl.BlockSpec(b1.shape, lambda n: (0, 0)),
            pl.BlockSpec(w2.shape, lambda n: (0, 0, 0, 0)),
            pl.BlockSpec(b2.shape, lambda n: (0, 0)),
        ],
        out_specs=pl.BlockSpec((1, S, C), lambda n: (n, 0, 0)),
        scratch_shapes=[pltpu.VMEM((Hp2, Wp2, C), jnp.float32)],
        compiler_params=pltpu.CompilerParams(
            dimension_semantics=("parallel",),       # batch axis -> both TCs on v7x
            vmem_limit_bytes=32 * 1024 * 1024),
    )(x_pad, w1, b1, w2, b2)


# ---------------------------------------------------------------------------
# Kernel B: 3-layer MLP head, whole batch, bf16 weights resident in VMEM
# ---------------------------------------------------------------------------

def _mlp_kernel(x_ref, w1_ref, b1_ref, w2_ref, b2_ref, w3_ref, b3_ref, o_ref):
    # Linear(F,256) -> ReLU -> Linear(256,256) -> ReLU -> Linear(256,10)
    # bf16 operands, f32 accumulation, f32 bias/ReLU epilogue.
    h = jnp.dot(x_ref[...], w1_ref[...], preferred_element_type=jnp.float32)
    h = jnp.maximum(h + b1_ref[...], 0.0).astype(w2_ref.dtype)
    h = jnp.dot(h, w2_ref[...], preferred_element_type=jnp.float32)
    h = jnp.maximum(h + b2_ref[...], 0.0).astype(w3_ref.dtype)
    o_ref[...] = (jnp.dot(h, w3_ref[...], preferred_element_type=jnp.float32)
                  + b3_ref[...])


def _full_spec(shape):
    zeros = (0,) * len(shape)
    return pl.BlockSpec(shape, lambda n, z=zeros: z)


def _mlp(x, w1, b1, w2, b2, w3, b3):
    N, F = x.shape
    O = w3.shape[1]
    return pl.pallas_call(
        _mlp_kernel,
        out_shape=jax.ShapeDtypeStruct((N, O), jnp.float32),
        grid=(1,),
        in_specs=[
            _full_spec((N, F)),
            _full_spec(w1.shape), _full_spec(b1.shape),
            _full_spec(w2.shape), _full_spec(b2.shape),
            _full_spec(w3.shape), _full_spec(b3.shape),
        ],
        out_specs=_full_spec((N, O)),
        compiler_params=pltpu.CompilerParams(
            dimension_semantics=("arbitrary",),
            vmem_limit_bytes=32 * 1024 * 1024),
    )(x, w1, b1, w2, b2, w3, b3)


# ---------------------------------------------------------------------------
# Forward pass (wrapper): one tiny pad+transpose, two fused kernels, free reshape
# ---------------------------------------------------------------------------

def conv_model_forward(x_nchw, p):
    # x_nchw: (N, 3, in_dim, in_dim), matching the PyTorch module's input.
    N = x_nchw.shape[0]
    # 6 KB input: NCHW -> NHWC + halo pad, fused into one trivial XLA copy.
    x = jnp.transpose(x_nchw, (0, 2, 3, 1)).astype(jnp.float32)
    x = jnp.pad(x, ((0, 0), (1, 1), (1, 1), (0, 0)))
    feats = _features(x, p["w_conv1"], p["b_conv1"], p["w_conv2"], p["b_conv2"])
    # (N, S, C) contiguous -> (N, S*C) is a free bitcast; torch's (C,H,W) flatten
    # ordering is absorbed into the pre-permuted fc1 weight rows (see prepare_params).
    flat = feats.reshape(N, -1)
    return _mlp(flat,
                p["w_fc1"], p["b_fc1"],
                p["w_fc2"], p["b_fc2"],
                p["w_fc3"], p["b_fc3"])


# ---------------------------------------------------------------------------
# Parameters: torch-layout init (synthetic) + conversion to kernel layouts
# ---------------------------------------------------------------------------

def init_torch_params(key, in_dim):
    ks = jax.random.split(key, 10)
    feat = 64 * (in_dim // 2) ** 2

    def w(k, shape, fan_in):
        return jax.random.normal(k, shape, jnp.float32) / jnp.sqrt(float(fan_in))

    return {
        # torch layouts: conv (Cout, Cin, kh, kw); linear (out, in)
        "w_conv1": w(ks[0], (64, 3, 3, 3), 3 * 9),
        "b_conv1": 0.01 * jax.random.normal(ks[1], (64,), jnp.float32),
        "w_conv2": w(ks[2], (64, 64, 3, 3), 64 * 9),
        "b_conv2": 0.01 * jax.random.normal(ks[3], (64,), jnp.float32),
        "w_fc1": w(ks[4], (256, feat), feat),
        "b_fc1": 0.01 * jax.random.normal(ks[5], (256,), jnp.float32),
        "w_fc2": w(ks[6], (256, 256), 256),
        "b_fc2": 0.01 * jax.random.normal(ks[7], (256,), jnp.float32),
        "w_fc3": w(ks[8], (10, 256), 256),
        "b_fc3": 0.01 * jax.random.normal(ks[9], (10,), jnp.float32),
    }


def prepare_params(tp, in_dim):
    C = 64
    S = (in_dim // 2) ** 2
    # Kernel features are ordered k = s*C + c (s = h*Wp + w). torch.flatten on NCHW is
    # f = c*S + s. Permute fc1 rows once so W1p[s*C + c, o] == Wt1[o, c*S + s].
    w_fc1 = (tp["w_fc1"].reshape(256, C, S)   # [o, c, s]
             .transpose(2, 1, 0)              # [s, c, o]
             .reshape(S * C, 256))            # row = s*C + c
    return {
        "w_conv1": jnp.transpose(tp["w_conv1"], (2, 3, 1, 0)),   # OIHW -> HWIO, f32
        "b_conv1": tp["b_conv1"].reshape(1, -1),
        "w_conv2": jnp.transpose(tp["w_conv2"], (2, 3, 1, 0)),
        "b_conv2": tp["b_conv2"].reshape(1, -1),
        "w_fc1": w_fc1.astype(jnp.bfloat16),
        "b_fc1": tp["b_fc1"].reshape(1, -1),
        "w_fc2": tp["w_fc2"].T.astype(jnp.bfloat16),
        "b_fc2": tp["b_fc2"].reshape(1, -1),
        "w_fc3": tp["w_fc3"].T.astype(jnp.bfloat16),
        "b_fc3": tp["b_fc3"].reshape(1, -1),
    }


# ---------------------------------------------------------------------------
# Pure-JAX reference (torch semantics) for a numerical sanity check
# ---------------------------------------------------------------------------

def torch_reference_forward(x, tp):
    dn = ("NCHW", "OIHW", "NCHW")
    y = jax.lax.conv_general_dilated(x, tp["w_conv1"], (1, 1), ((1, 1), (1, 1)),
                                     dimension_numbers=dn)
    y = jnp.maximum(y + tp["b_conv1"][None, :, None, None], 0.0)
    y = jax.lax.conv_general_dilated(y, tp["w_conv2"], (1, 1), ((1, 1), (1, 1)),
                                     dimension_numbers=dn)
    y = jnp.maximum(y + tp["b_conv2"][None, :, None, None], 0.0)
    n, c, h, w = y.shape
    y = y.reshape(n, c, h // 2, 2, w // 2, 2).max(axis=(3, 5))   # MaxPool2d(2,2)
    y = y.reshape(n, -1)                                          # torch.flatten(x, 1)
    y = jnp.maximum(y @ tp["w_fc1"].T + tp["b_fc1"], 0.0)
    y = jnp.maximum(y @ tp["w_fc2"].T + tp["b_fc2"], 0.0)
    return y @ tp["w_fc3"].T + tp["b_fc3"]


if __name__ == "__main__":
    in_dim = 16
    key = jax.random.PRNGKey(0)
    kx, kp = jax.random.split(key)
    x = jax.random.normal(kx, (2, 3, in_dim, in_dim), jnp.float32)

    tparams = init_torch_params(kp, in_dim)
    kparams = prepare_params(tparams, in_dim)

    fwd = jax.jit(conv_model_forward)
    out = jax.block_until_ready(fwd(x, kparams))
    assert out.shape == (2, 10), out.shape
    assert bool(jnp.all(jnp.isfinite(out)))

    # Numerical check vs. f32 reference (loose tolerance: fc weights/features are bf16).
    ref = torch_reference_forward(x, tparams)
    max_err = float(jnp.max(jnp.abs(out - ref)))
    tol = 5e-2 + 5e-2 * float(jnp.max(jnp.abs(ref)))
    assert max_err <= tol, (max_err, tol)

    print("KERNEL_OK")
</pallas_src>

<mosaic_0001>
module attributes {stable_mosaic.version = 11 : i64} {
  func.func @_features_kernel(%arg0: i32, %arg1: memref<1x18x18x3xf32, #tpu.memory_space<vmem>>, %arg2: memref<3x3x3x64xf32, #tpu.memory_space<vmem>>, %arg3: memref<1x64xf32, #tpu.memory_space<vmem>>, %arg4: memref<3x3x64x64xf32, #tpu.memory_space<vmem>>, %arg5: memref<1x64xf32, #tpu.memory_space<vmem>>, %arg6: memref<1x64x64xbf16, #tpu.memory_space<vmem>>, %arg7: memref<18x18x64xf32, #tpu.memory_space<vmem>>) attributes {dimension_semantics = [#tpu.dimension_semantics<parallel>], iteration_bounds = array<i64: 2>, scalar_prefetch = 0 : i64, scratch_operands = 1 : i64, tpu.core_type = #tpu.core_type<tc>, window_params = [{transform_indices = @transform_0, window_bounds = array<i64: 1, 18, 18, 3>}, {pipeline_mode = #tpu.pipeline_mode<synchronous>, transform_indices = @transform_1, window_bounds = array<i64: 3, 3, 3, 64>}, {pipeline_mode = #tpu.pipeline_mode<synchronous>, transform_indices = @transform_2, window_bounds = array<i64: 1, 64>}, {pipeline_mode = #tpu.pipeline_mode<synchronous>, transform_indices = @transform_3, window_bounds = array<i64: 3, 3, 64, 64>}, {pipeline_mode = #tpu.pipeline_mode<synchronous>, transform_indices = @transform_4, window_bounds = array<i64: 1, 64>}, {transform_indices = @transform_5, window_bounds = array<i64: 1, 64, 64>}]} {
    %c0 = arith.constant 0 : index
    %c0_0 = arith.constant 0 : index
    %c0_1 = arith.constant 0 : index
    %c0_2 = arith.constant 0 : index
    %0 = vector.load %arg1[%c0, %c0_0, %c0_1, %c0_2] : memref<1x18x18x3xf32, #tpu.memory_space<vmem>>, vector<1x18x18x3xf32>
    %1 = vector.shape_cast %0 : vector<1x18x18x3xf32> to vector<18x18x3xf32>
    %cst = arith.constant 0.000000e+00 : f32
    %2 = vector.broadcast %cst : f32 to vector<256x64xf32>
    %3 = vector.extract_strided_slice %1 {offsets = [0, 0, 0], sizes = [16, 16, 3], strides = [1, 1, 1]} : vector<18x18x3xf32> to vector<16x16x3xf32>
    %4 = vector.shape_cast %3 : vector<16x16x3xf32> to vector<256x3xf32>
    %c0_3 = arith.constant 0 : index
    %c0_4 = arith.constant 0 : index
    %c0_5 = arith.constant 0 : index
    %c0_6 = arith.constant 0 : index
    %5 = vector.load %arg2[%c0_3, %c0_4, %c0_5, %c0_6] : memref<3x3x3x64xf32, #tpu.memory_space<vmem>>, vector<1x1x3x64xf32>
    %6 = vector.shape_cast %5 : vector<1x1x3x64xf32> to vector<3x64xf32>
    %cst_7 = arith.constant dense<0.000000e+00> : vector<256x64xf32>
    %7 = tpu.matmul %4, %6, %cst_7 {dimension_numbers = #tpu.dot_dimension_numbers<[1], [0], [0], [1], [0, 0, 1, 1], [], []>} : vector<256x3xf32>, vector<3x64xf32>, vector<256x64xf32> -> vector<256x64xf32>
    %8 = arith.addf %2, %7 : vector<256x64xf32>
    %9 = vector.extract_strided_slice %1 {offsets = [0, 1, 0], sizes = [16, 16, 3], strides = [1, 1, 1]} : vector<18x18x3xf32> to vector<16x16x3xf32>
    %10 = vector.shape_cast %9 : vector<16x16x3xf32> to vector<256x3xf32>
    %c0_8 = arith.constant 0 : index
    %c1 = arith.constant 1 : index
    %c0_9 = arith.constant 0 : index
    %c0_10 = arith.constant 0 : index
    %11 = vector.load %arg2[%c0_8, %c1, %c0_9, %c0_10] : memref<3x3x3x64xf32, #tpu.memory_space<vmem>>, vector<1x1x3x64xf32>
    %12 = vector.shape_cast %11 : vector<1x1x3x64xf32> to vector<3x64xf32>
    %cst_11 = arith.constant dense<0.000000e+00> : vector<256x64xf32>
    %13 = tpu.matmul %10, %12, %cst_11 {dimension_numbers = #tpu.dot_dimension_numbers<[1], [0], [0], [1], [0, 0, 1, 1], [], []>} : vector<256x3xf32>, vector<3x64xf32>, vector<256x64xf32> -> vector<256x64xf32>
    %14 = arith.addf %8, %13 : vector<256x64xf32>
    %15 = vector.extract_strided_slice %1 {offsets = [0, 2, 0], sizes = [16, 16, 3], strides = [1, 1, 1]} : vector<18x18x3xf32> to vector<16x16x3xf32>
    %16 = vector.shape_cast %15 : vector<16x16x3xf32> to vector<256x3xf32>
    %c0_12 = arith.constant 0 : index
    %c2 = arith.constant 2 : index
    %c0_13 = arith.constant 0 : index
    %c0_14 = arith.constant 0 : index
    %17 = vector.load %arg2[%c0_12, %c2, %c0_13, %c0_14] : memref<3x3x3x64xf32, #tpu.memory_space<vmem>>, vector<1x1x3x64xf32>
    %18 = vector.shape_cast %17 : vector<1x1x3x64xf32> to vector<3x64xf32>
    %cst_15 = arith.constant dense<0.000000e+00> : vector<256x64xf32>
    %19 = tpu.matmul %16, %18, %cst_15 {dimension_numbers = #tpu.dot_dimension_numbers<[1], [0], [0], [1], [0, 0, 1, 1], [], []>} : vector<256x3xf32>, vector<3x64xf32>, vector<256x64xf32> -> vector<256x64xf32>
    %20 = arith.addf %14, %19 : vector<256x64xf32>
    %21 = vector.extract_strided_slice %1 {offsets = [1, 0, 0], sizes = [16, 16, 3], strides = [1, 1, 1]} : vector<18x18x3xf32> to vector<16x16x3xf32>
    %22 = vector.shape_cast %21 : vector<16x16x3xf32> to vector<256x3xf32>
    %c1_16 = arith.constant 1 : index
    %c0_17 = arith.constant 0 : index
    %c0_18 = arith.constant 0 : index
    %c0_19 = arith.constant 0 : index
    %23 = vector.load %arg2[%c1_16, %c0_17, %c0_18, %c0_19] : memref<3x3x3x64xf32, #tpu.memory_space<vmem>>, vector<1x1x3x64xf32>
    %24 = vector.shape_cast %23 : vector<1x1x3x64xf32> to vector<3x64xf32>
    %cst_20 = arith.constant dense<0.000000e+00> : vector<256x64xf32>
    %25 = tpu.matmul %22, %24, %cst_20 {dimension_numbers = #tpu.dot_dimension_numbers<[1], [0], [0], [1], [0, 0, 1, 1], [], []>} : vector<256x3xf32>, vector<3x64xf32>, vector<256x64xf32> -> vector<256x64xf32>
    %26 = arith.addf %20, %25 : vector<256x64xf32>
    %27 = vector.extract_strided_slice %1 {offsets = [1, 1, 0], sizes = [16, 16, 3], strides = [1, 1, 1]} : vector<18x18x3xf32> to vector<16x16x3xf32>
    %28 = vector.shape_cast %27 : vector<16x16x3xf32> to vector<256x3xf32>
    %c1_21 = arith.constant 1 : index
    %c1_22 = arith.constant 1 : index
    %c0_23 = arith.constant 0 : index
    %c0_24 = arith.constant 0 : index
    %29 = vector.load %arg2[%c1_21, %c1_22, %c0_23, %c0_24] : memref<3x3x3x64xf32, #tpu.memory_space<vmem>>, vector<1x1x3x64xf32>
    %30 = vector.shape_cast %29 : vector<1x1x3x64xf32> to vector<3x64xf32>
    %cst_25 = arith.constant dense<0.000000e+00> : vector<256x64xf32>
    %31 = tpu.matmul %28, %30, %cst_25 {dimension_numbers = #tpu.dot_dimension_numbers<[1], [0], [0], [1], [0, 0, 1, 1], [], []>} : vector<256x3xf32>, vector<3x64xf32>, vector<256x64xf32> -> vector<256x64xf32>
    %32 = arith.addf %26, %31 : vector<256x64xf32>
    %33 = vector.extract_strided_slice %1 {offsets = [1, 2, 0], sizes = [16, 16, 3], strides = [1, 1, 1]} : vector<18x18x3xf32> to vector<16x16x3xf32>
    %34 = vector.shape_cast %33 : vector<16x16x3xf32> to vector<256x3xf32>
    %c1_26 = arith.constant 1 : index
    %c2_27 = arith.constant 2 : index
    %c0_28 = arith.constant 0 : index
    %c0_29 = arith.constant 0 : index
    %35 = vector.load %arg2[%c1_26, %c2_27, %c0_28, %c0_29] : memref<3x3x3x64xf32, #tpu.memory_space<vmem>>, vector<1x1x3x64xf32>
    %36 = vector.shape_cast %35 : vector<1x1x3x64xf32> to vector<3x64xf32>
    %cst_30 = arith.constant dense<0.000000e+00> : vector<256x64xf32>
    %37 = tpu.matmul %34, %36, %cst_30 {dimension_numbers = #tpu.dot_dimension_numbers<[1], [0], [0], [1], [0, 0, 1, 1], [], []>} : vector<256x3xf32>, vector<3x64xf32>, vector<256x64xf32> -> vector<256x64xf32>
    %38 = arith.addf %32, %37 : vector<256x64xf32>
    %39 = vector.extract_strided_slice %1 {offsets = [2, 0, 0], sizes = [16, 16, 3], strides = [1, 1, 1]} : vector<18x18x3xf32> to vector<16x16x3xf32>
    %40 = vector.shape_cast %39 : vector<16x16x3xf32> to vector<256x3xf32>
    %c2_31 = arith.constant 2 : index
    %c0_32 = arith.constant 0 : index
    %c0_33 = arith.constant 0 : index
    %c0_34 = arith.constant 0 : index
    %41 = vector.load %arg2[%c2_31, %c0_32, %c0_33, %c0_34] : memref<3x3x3x64xf32, #tpu.memory_space<vmem>>, vector<1x1x3x64xf32>
    %42 = vector.shape_cast %41 : vector<1x1x3x64xf32> to vector<3x64xf32>
    %cst_35 = arith.constant dense<0.000000e+00> : vector<256x64xf32>
    %43 = tpu.matmul %40, %42, %cst_35 {dimension_numbers = #tpu.dot_dimension_numbers<[1], [0], [0], [1], [0, 0, 1, 1], [], []>} : vector<256x3xf32>, vector<3x64xf32>, vector<256x64xf32> -> vector<256x64xf32>
    %44 = arith.addf %38, %43 : vector<256x64xf32>
    %45 = vector.extract_strided_slice %1 {offsets = [2, 1, 0], sizes = [16, 16, 3], strides = [1, 1, 1]} : vector<18x18x3xf32> to vector<16x16x3xf32>
    %46 = vector.shape_cast %45 : vector<16x16x3xf32> to vector<256x3xf32>
    %c2_36 = arith.constant 2 : index
    %c1_37 = arith.constant 1 : index
    %c0_38 = arith.constant 0 : index
    %c0_39 = arith.constant 0 : index
    %47 = vector.load %arg2[%c2_36, %c1_37, %c0_38, %c0_39] : memref<3x3x3x64xf32, #tpu.memory_space<vmem>>, vector<1x1x3x64xf32>
    %48 = vector.shape_cast %47 : vector<1x1x3x64xf32> to vector<3x64xf32>
    %cst_40 = arith.constant dense<0.000000e+00> : vector<256x64xf32>
    %49 = tpu.matmul %46, %48, %cst_40 {dimension_numbers = #tpu.dot_dimension_numbers<[1], [0], [0], [1], [0, 0, 1, 1], [], []>} : vector<256x3xf32>, vector<3x64xf32>, vector<256x64xf32> -> vector<256x64xf32>
    %50 = arith.addf %44, %49 : vector<256x64xf32>
    %51 = vector.extract_strided_slice %1 {offsets = [2, 2, 0], sizes = [16, 16, 3], strides = [1, 1, 1]} : vector<18x18x3xf32> to vector<16x16x3xf32>
    %52 = vector.shape_cast %51 : vector<16x16x3xf32> to vector<256x3xf32>
    %c2_41 = arith.constant 2 : index
    %c2_42 = arith.constant 2 : index
    %c0_43 = arith.constant 0 : index
    %c0_44 = arith.constant 0 : index
    %53 = vector.load %arg2[%c2_41, %c2_42, %c0_43, %c0_44] : memref<3x3x3x64xf32, #tpu.memory_space<vmem>>, vector<1x1x3x64xf32>
    %54 = vector.shape_cast %53 : vector<1x1x3x64xf32> to vector<3x64xf32>
    %cst_45 = arith.constant dense<0.000000e+00> : vector<256x64xf32>
    %55 = tpu.matmul %52, %54, %cst_45 {dimension_numbers = #tpu.dot_dimension_numbers<[1], [0], [0], [1], [0, 0, 1, 1], [], []>} : vector<256x3xf32>, vector<3x64xf32>, vector<256x64xf32> -> vector<256x64xf32>
    %56 = arith.addf %50, %55 : vector<256x64xf32>
    %c0_46 = arith.constant 0 : index
    %c0_47 = arith.constant 0 : index
    %57 = vector.load %arg3[%c0_46, %c0_47] : memref<1x64xf32, #tpu.memory_space<vmem>>, vector<1x64xf32>
    %58 = vector.broadcast %57 : vector<1x64xf32> to vector<256x64xf32>
    %59 = arith.addf %56, %58 : vector<256x64xf32>
    %cst_48 = arith.constant 0.000000e+00 : f32
    %60 = vector.broadcast %cst_48 : f32 to vector<256x64xf32>
    %61 = arith.maximumf %59, %60 : vector<256x64xf32>
    %cst_49 = arith.constant 0.000000e+00 : f32
    %62 = vector.broadcast %cst_49 : f32 to vector<18x18x64xf32>
    %c0_50 = arith.constant 0 : index
    %c0_51 = arith.constant 0 : index
    %c0_52 = arith.constant 0 : index
    %63 = vector.load %arg7[%c0_50, %c0_51, %c0_52] : memref<18x18x64xf32, #tpu.memory_space<vmem>>, vector<18x18x64xf32>
    tpu.vector_store %arg7[%c0_50, %c0_51, %c0_52], %62 {strides = array<i32>} : memref<18x18x64xf32, #tpu.memory_space<vmem>>, vector<18x18x64xf32>,
    %64 = vector.shape_cast %61 : vector<256x64xf32> to vector<16x16x64xf32>
    %c1_53 = arith.constant 1 : index
    %c1_54 = arith.constant 1 : index
    %c0_55 = arith.constant 0 : index
    %65 = vector.load %arg7[%c1_53, %c1_54, %c0_55] : memref<18x18x64xf32, #tpu.memory_space<vmem>>, vector<16x16x64xf32>
    tpu.vector_store %arg7[%c1_53, %c1_54, %c0_55], %64 {strides = array<i32>} : memref<18x18x64xf32, #tpu.memory_space<vmem>>, vector<16x16x64xf32>,
    %cst_56 = arith.constant 0.000000e+00 : f32
    %66 = vector.broadcast %cst_56 : f32 to vector<256x64xf32>
    %c0_57 = arith.constant 0 : index
    %c0_58 = arith.constant 0 : index
    %c0_59 = arith.constant 0 : index
    %67 = vector.load %arg7[%c0_57, %c0_58, %c0_59] : memref<18x18x64xf32, #tpu.memory_space<vmem>>, vector<16x16x64xf32>
    %68 = vector.shape_cast %67 : vector<16x16x64xf32> to vector<256x64xf32>
    %c0_60 = arith.constant 0 : index
    %c0_61 = arith.constant 0 : index
    %c0_62 = arith.constant 0 : index
    %c0_63 = arith.constant 0 : index
    %69 = vector.load %arg4[%c0_60, %c0_61, %c0_62, %c0_63] : memref<3x3x64x64xf32, #tpu.memory_space<vmem>>, vector<1x1x64x64xf32>
    %70 = vector.shape_cast %69 : vector<1x1x64x64xf32> to vector<64x64xf32>
    %cst_64 = arith.constant dense<0.000000e+00> : vector<256x64xf32>
    %71 = tpu.matmul %68, %70, %cst_64 {dimension_numbers = #tpu.dot_dimension_numbers<[1], [0], [0], [1], [0, 0, 1, 1], [], []>} : vector<256x64xf32>, vector<64x64xf32>, vector<256x64xf32> -> vector<256x64xf32>
    %72 = arith.addf %66, %71 : vector<256x64xf32>
    %c0_65 = arith.constant 0 : index
    %c1_66 = arith.constant 1 : index
    %c0_67 = arith.constant 0 : index
    %73 = vector.load %arg7[%c0_65, %c1_66, %c0_67] : memref<18x18x64xf32, #tpu.memory_space<vmem>>, vector<16x16x64xf32>
    %74 = vector.shape_cast %73 : vector<16x16x64xf32> to vector<256x64xf32>
    %c0_68 = arith.constant 0 : index
    %c1_69 = arith.constant 1 : index
    %c0_70 = arith.constant 0 : index
    %c0_71 = arith.constant 0 : index
    %75 = vector.load %arg4[%c0_68, %c1_69, %c0_70, %c0_71] : memref<3x3x64x64xf32, #tpu.memory_space<vmem>>, vector<1x1x64x64xf32>
    %76 = vector.shape_cast %75 : vector<1x1x64x64xf32> to vector<64x64xf32>
    %cst_72 = arith.constant dense<0.000000e+00> : vector<256x64xf32>
    %77 = tpu.matmul %74, %76, %cst_72 {dimension_numbers = #tpu.dot_dimension_numbers<[1], [0], [0], [1], [0, 0, 1, 1], [], []>} : vector<256x64xf32>, vector<64x64xf32>, vector<256x64xf32> -> vector<256x64xf32>
    %78 = arith.addf %72, %77 : vector<256x64xf32>
    %c0_73 = arith.constant 0 : index
    %c2_74 = arith.constant 2 : index
    %c0_75 = arith.constant 0 : index
    %79 = vector.load %arg7[%c0_73, %c2_74, %c0_75] : memref<18x18x64xf32, #tpu.memory_space<vmem>>, vector<16x16x64xf32>
    %80 = vector.shape_cast %79 : vector<16x16x64xf32> to vector<256x64xf32>
    %c0_76 = arith.constant 0 : index
    %c2_77 = arith.constant 2 : index
    %c0_78 = arith.constant 0 : index
    %c0_79 = arith.constant 0 : index
    %81 = vector.load %arg4[%c0_76, %c2_77, %c0_78, %c0_79] : memref<3x3x64x64xf32, #tpu.memory_space<vmem>>, vector<1x1x64x64xf32>
    %82 = vector.shape_cast %81 : vector<1x1x64x64xf32> to vector<64x64xf32>
    %cst_80 = arith.constant dense<0.000000e+00> : vector<256x64xf32>
    %83 = tpu.matmul %80, %82, %cst_80 {dimension_numbers = #tpu.dot_dimension_numbers<[1], [0], [0], [1], [0, 0, 1, 1], [], []>} : vector<256x64xf32>, vector<64x64xf32>, vector<256x64xf32> -> vector<256x64xf32>
    %84 = arith.addf %78, %83 : vector<256x64xf32>
    %c1_81 = arith.constant 1 : index
    %c0_82 = arith.constant 0 : index
    %c0_83 = arith.constant 0 : index
    %85 = vector.load %arg7[%c1_81, %c0_82, %c0_83] : memref<18x18x64xf32, #tpu.memory_space<vmem>>, vector<16x16x64xf32>
    %86 = vector.shape_cast %85 : vector<16x16x64xf32> to vector<256x64xf32>
    %c1_84 = arith.constant 1 : index
    %c0_85 = arith.constant 0 : index
    %c0_86 = arith.constant 0 : index
    %c0_87 = arith.constant 0 : index
    %87 = vector.load %arg4[%c1_84, %c0_85, %c0_86, %c0_87] : memref<3x3x64x64xf32, #tpu.memory_space<vmem>>, vector<1x1x64x64xf32>
    %88 = vector.shape_cast %87 : vector<1x1x64x64xf32> to vector<64x64xf32>
    %cst_88 = arith.constant dense<0.000000e+00> : vector<256x64xf32>
    %89 = tpu.matmul %86, %88, %cst_88 {dimension_numbers = #tpu.dot_dimension_numbers<[1], [0], [0], [1], [0, 0, 1, 1], [], []>} : vector<256x64xf32>, vector<64x64xf32>, vector<256x64xf32> -> vector<256x64xf32>
    %90 = arith.addf %84, %89 : vector<256x64xf32>
    %c1_89 = arith.constant 1 : index
    %c1_90 = arith.constant 1 : index
    %c0_91 = arith.constant 0 : index
    %91 = vector.load %arg7[%c1_89, %c1_90, %c0_91] : memref<18x18x64xf32, #tpu.memory_space<vmem>>, vector<16x16x64xf32>
    %92 = vector.shape_cast %91 : vector<16x16x64xf32> to vector<256x64xf32>
    %c1_92 = arith.constant 1 : index
    %c1_93 = arith.constant 1 : index
    %c0_94 = arith.constant 0 : index
    %c0_95 = arith.constant 0 : index
    %93 = vector.load %arg4[%c1_92, %c1_93, %c0_94, %c0_95] : memref<3x3x64x64xf32, #tpu.memory_space<vmem>>, vector<1x1x64x64xf32>
    %94 = vector.shape_cast %93 : vector<1x1x64x64xf32> to vector<64x64xf32>
    %cst_96 = arith.constant dense<0.000000e+00> : vector<256x64xf32>
    %95 = tpu.matmul %92, %94, %cst_96 {dimension_numbers = #tpu.dot_dimension_numbers<[1], [0], [0], [1], [0, 0, 1, 1], [], []>} : vector<256x64xf32>, vector<64x64xf32>, vector<256x64xf32> -> vector<256x64xf32>
    %96 = arith.addf %90, %95 : vector<256x64xf32>
    %c1_97 = arith.constant 1 : index
    %c2_98 = arith.constant 2 : index
    %c0_99 = arith.constant 0 : index
    %97 = vector.load %arg7[%c1_97, %c2_98, %c0_99] : memref<18x18x64xf32, #tpu.memory_space<vmem>>, vector<16x16x64xf32>
    %98 = vector.shape_cast %97 : vector<16x16x64xf32> to vector<256x64xf32>
    %c1_100 = arith.constant 1 : index
    %c2_101 = arith.constant 2 : index
    %c0_102 = arith.constant 0 : index
    %c0_103 = arith.constant 0 : index
    %99 = vector.load %arg4[%c1_100, %c2_101, %c0_102, %c0_103] : memref<3x3x64x64xf32, #tpu.memory_space<vmem>>, vector<1x1x64x64xf32>
    %100 = vector.shape_cast %99 : vector<1x1x64x64xf32> to vector<64x64xf32>
    %cst_104 = arith.constant dense<0.000000e+00> : vector<256x64xf32>
    %101 = tpu.matmul %98, %100, %cst_104 {dimension_numbers = #tpu.dot_dimension_numbers<[1], [0], [0], [1], [0, 0, 1, 1], [], []>} : vector<256x64xf32>, vector<64x64xf32>, vector<256x64xf32> -> vector<256x64xf32>
    %102 = arith.addf %96, %101 : vector<256x64xf32>
    %c2_105 = arith.constant 2 : index
    %c0_106 = arith.constant 0 : index
    %c0_107 = arith.constant 0 : index
    %103 = vector.load %arg7[%c2_105, %c0_106, %c0_107] : memref<18x18x64xf32, #tpu.memory_space<vmem>>, vector<16x16x64xf32>
    %104 = vector.shape_cast %103 : vector<16x16x64xf32> to vector<256x64xf32>
    %c2_108 = arith.constant 2 : index
    %c0_109 = arith.constant 0 : index
    %c0_110 = arith.constant 0 : index
    %c0_111 = arith.constant 0 : index
    %105 = vector.load %arg4[%c2_108, %c0_109, %c0_110, %c0_111] : memref<3x3x64x64xf32, #tpu.memory_space<vmem>>, vector<1x1x64x64xf32>
    %106 = vector.shape_cast %105 : vector<1x1x64x64xf32> to vector<64x64xf32>
    %cst_112 = arith.constant dense<0.000000e+00> : vector<256x64xf32>
    %107 = tpu.matmul %104, %106, %cst_112 {dimension_numbers = #tpu.dot_dimension_numbers<[1], [0], [0], [1], [0, 0, 1, 1], [], []>} : vector<256x64xf32>, vector<64x64xf32>, vector<256x64xf32> -> vector<256x64xf32>
    %108 = arith.addf %102, %107 : vector<256x64xf32>
    %c2_113 = arith.constant 2 : index
    %c1_114 = arith.constant 1 : index
    %c0_115 = arith.constant 0 : index
    %109 = vector.load %arg7[%c2_113, %c1_114, %c0_115] : memref<18x18x64xf32, #tpu.memory_space<vmem>>, vector<16x16x64xf32>
    %110 = vector.shape_cast %109 : vector<16x16x64xf32> to vector<256x64xf32>
    %c2_116 = arith.constant 2 : index
    %c1_117 = arith.constant 1 : index
    %c0_118 = arith.constant 0 : index
    %c0_119 = arith.constant 0 : index
    %111 = vector.load %arg4[%c2_116, %c1_117, %c0_118, %c0_119] : memref<3x3x64x64xf32, #tpu.memory_space<vmem>>, vector<1x1x64x64xf32>
    %112 = vector.shape_cast %111 : vector<1x1x64x64xf32> to vector<64x64xf32>
    %cst_120 = arith.constant dense<0.000000e+00> : vector<256x64xf32>
    %113 = tpu.matmul %110, %112, %cst_120 {dimension_numbers = #tpu.dot_dimension_numbers<[1], [0], [0], [1], [0, 0, 1, 1], [], []>} : vector<256x64xf32>, vector<64x64xf32>, vector<256x64xf32> -> vector<256x64xf32>
    %114 = arith.addf %108, %113 : vector<256x64xf32>
    %c2_121 = arith.constant 2 : index
    %c2_122 = arith.constant 2 : index
    %c0_123 = arith.constant 0 : index
    %115 = vector.load %arg7[%c2_121, %c2_122, %c0_123] : memref<18x18x64xf32, #tpu.memory_space<vmem>>, vector<16x16x64xf32>
    %116 = vector.shape_cast %115 : vector<16x16x64xf32> to vector<256x64xf32>
    %c2_124 = arith.constant 2 : index
    %c2_125 = arith.constant 2 : index
    %c0_126 = arith.constant 0 : index
    %c0_127 = arith.constant 0 : index
    %117 = vector.load %arg4[%c2_124, %c2_125, %c0_126, %c0_127] : memref<3x3x64x64xf32, #tpu.memory_space<vmem>>, vector<1x1x64x64xf32>
    %118 = vector.shape_cast %117 : vector<1x1x64x64xf32> to vector<64x64xf32>
    %cst_128 = arith.constant dense<0.000000e+00> : vector<256x64xf32>
    %119 = tpu.matmul %116, %118, %cst_128 {dimension_numbers = #tpu.dot_dimension_numbers<[1], [0], [0], [1], [0, 0, 1, 1], [], []>} : vector<256x64xf32>, vector<64x64xf32>, vector<256x64xf32> -> vector<256x64xf32>
    %120 = arith.addf %114, %119 : vector<256x64xf32>
    %c0_129 = arith.constant 0 : index
    %c0_130 = arith.constant 0 : index
    %121 = vector.load %arg5[%c0_129, %c0_130] : memref<1x64xf32, #tpu.memory_space<vmem>>, vector<1x64xf32>
    %122 = vector.broadcast %121 : vector<1x64xf32> to vector<256x64xf32>
    %123 = arith.addf %120, %122 : vector<256x64xf32>
    %cst_131 = arith.constant 0.000000e+00 : f32
    %124 = vector.broadcast %cst_131 : f32 to vector<256x64xf32>
    %125 = arith.maximumf %123, %124 : vector<256x64xf32>
    %126 = vector.shape_cast %125 : vector<256x64xf32> to vector<8x2x8x2x64xf32>
    %cst_132 = arith.constant dense<0xFF800000> : vector<8x2x8x64xf32>
    %127 = vector.multi_reduction <maximumf>, %126, %cst_132 [3] : vector<8x2x8x2x64xf32> to vector<8x2x8x64xf32>
    %cst_133 = arith.constant dense<0xFF800000> : vector<8x8x64xf32>
    %128 = vector.multi_reduction <maximumf>, %127, %cst_133 [1] : vector<8x2x8x64xf32> to vector<8x8x64xf32>
    %129 = vector.shape_cast %128 : vector<8x8x64xf32> to vector<1x64x64xf32>
    %130 = arith.truncf %129 : vector<1x64x64xf32> to vector<1x64x64xbf16>
    %c0_134 = arith.constant 0 : index
    %c0_135 = arith.constant 0 : index
    %c0_136 = arith.constant 0 : index
    %131 = vector.load %arg6[%c0_134, %c0_135, %c0_136] : memref<1x64x64xbf16, #tpu.memory_space<vmem>>, vector<1x64x64xbf16>
    tpu.vector_store %arg6[%c0_134, %c0_135, %c0_136], %130 {strides = array<i32>} : memref<1x64x64xbf16, #tpu.memory_space<vmem>>, vector<1x64x64xbf16>,
    return
  }
  func.func @transform_0(%arg0: i32) -> (i32, i32, i32, i32) {
    %c0_i32 = arith.constant 0 : i32
    %c0_i32_0 = arith.constant 0 : i32
    %c0_i32_1 = arith.constant 0 : i32
    %c0_i32_2 = arith.constant 0 : i32
    return %arg0, %c0_i32, %c0_i32_0, %c0_i32_1 : i32, i32, i32, i32
  }
  func.func @transform_1(%arg0: i32) -> (i32, i32, i32, i32) {
    %c0_i32 = arith.constant 0 : i32
    %c0_i32_0 = arith.constant 0 : i32
    %c0_i32_1 = arith.constant 0 : i32
    %c0_i32_2 = arith.constant 0 : i32
    %c0_i32_3 = arith.constant 0 : i32
    return %c0_i32, %c0_i32_0, %c0_i32_1, %c0_i32_2 : i32, i32, i32, i32
  }
  func.func @transform_2(%arg0: i32) -> (i32, i32) {
    %c0_i32 = arith.constant 0 : i32
    %c0_i32_0 = arith.constant 0 : i32
    %c0_i32_1 = arith.constant 0 : i32
    return %c0_i32, %c0_i32_0 : i32, i32
  }
  func.func @transform_3(%arg0: i32) -> (i32, i32, i32, i32) {
    %c0_i32 = arith.constant 0 : i32
    %c0_i32_0 = arith.constant 0 : i32
    %c0_i32_1 = arith.constant 0 : i32
    %c0_i32_2 = arith.constant 0 : i32
    %c0_i32_3 = arith.constant 0 : i32
    return %c0_i32, %c0_i32_0, %c0_i32_1, %c0_i32_2 : i32, i32, i32, i32
  }
  func.func @transform_4(%arg0: i32) -> (i32, i32) {
    %c0_i32 = arith.constant 0 : i32
    %c0_i32_0 = arith.constant 0 : i32
    %c0_i32_1 = arith.constant 0 : i32
    return %c0_i32, %c0_i32_0 : i32, i32
  }
  func.func @transform_5(%arg0: i32) -> (i32, i32, i32) {
    %c0_i32 = arith.constant 0 : i32
    %c0_i32_0 = arith.constant 0 : i32
    %c0_i32_1 = arith.constant 0 : i32
    return %arg0, %c0_i32, %c0_i32_0 : i32, i32, i32
  }
}

module attributes {stable_mosaic.version = 11 : i64} {
  func.func @_mlp_kernel(%arg0: i32, %arg1: memref<2x4096xbf16, #tpu.memory_space<vmem>>, %arg2: memref<4096x256xbf16, #tpu.memory_space<vmem>>, %arg3: memref<1x256xf32, #tpu.memory_space<vmem>>, %arg4: memref<256x256xbf16, #tpu.memory_space<vmem>>, %arg5: memref<1x256xf32, #tpu.memory_space<vmem>>, %arg6: memref<256x10xbf16, #tpu.memory_space<vmem>>, %arg7: memref<1x10xf32, #tpu.memory_space<vmem>>, %arg8: memref<2x10xf32, #tpu.memory_space<vmem>>) attributes {dimension_semantics = [#tpu.dimension_semantics<arbitrary>], iteration_bounds = array<i64: 1>, scalar_prefetch = 0 : i64, scratch_operands = 0 : i64, tpu.core_type = #tpu.core_type<tc>, window_params = [{pipeline_mode = #tpu.pipeline_mode<synchronous>, transform_indices = @transform_0, window_bounds = array<i64: 2, 4096>}, {pipeline_mode = #tpu.pipeline_mode<synchronous>, transform_indices = @transform_1, window_bounds = array<i64: 4096, 256>}, {pipeline_mode = #tpu.pipeline_mode<synchronous>, transform_indices = @transform_2, window_bounds = array<i64: 1, 256>}, {pipeline_mode = #tpu.pipeline_mode<synchronous>, transform_indices = @transform_3, window_bounds = array<i64: 256, 256>}, {pipeline_mode = #tpu.pipeline_mode<synchronous>, transform_indices = @transform_4, window_bounds = array<i64: 1, 256>}, {pipeline_mode = #tpu.pipeline_mode<synchronous>, transform_indices = @transform_5, window_bounds = array<i64: 256, 10>}, {pipeline_mode = #tpu.pipeline_mode<synchronous>, transform_indices = @transform_6, window_bounds = array<i64: 1, 10>}, {pipeline_mode = #tpu.pipeline_mode<synchronous>, transform_indices = @transform_7, window_bounds = array<i64: 2, 10>}]} {
    %c0 = arith.constant 0 : index
    %c0_0 = arith.constant 0 : index
    %0 = vector.load %arg1[%c0, %c0_0] : memref<2x4096xbf16, #tpu.memory_space<vmem>>, vector<2x4096xbf16>
    %c0_1 = arith.constant 0 : index
    %c0_2 = arith.constant 0 : index
    %1 = vector.load %arg2[%c0_1, %c0_2] : memref<4096x256xbf16, #tpu.memory_space<vmem>>, vector<4096x256xbf16>
    %cst = arith.constant dense<0.000000e+00> : vector<2x256xf32>
    %2 = tpu.matmul %0, %1, %cst {dimension_numbers = #tpu.dot_dimension_numbers<[1], [0], [0], [1], [0, 0, 1, 1], [], []>} : vector<2x4096xbf16>, vector<4096x256xbf16>, vector<2x256xf32> -> vector<2x256xf32>
    %c0_3 = arith.constant 0 : index
    %c0_4 = arith.constant 0 : index
    %3 = vector.load %arg3[%c0_3, %c0_4] : memref<1x256xf32, #tpu.memory_space<vmem>>, vector<1x256xf32>
    %4 = vector.broadcast %3 : vector<1x256xf32> to vector<2x256xf32>
    %5 = arith.addf %2, %4 : vector<2x256xf32>
    %cst_5 = arith.constant 0.000000e+00 : f32
    %6 = vector.broadcast %cst_5 : f32 to vector<2x256xf32>
    %7 = arith.maximumf %5, %6 : vector<2x256xf32>
    %8 = arith.truncf %7 : vector<2x256xf32> to vector<2x256xbf16>
    %c0_6 = arith.constant 0 : index
    %c0_7 = arith.constant 0 : index
    %9 = vector.load %arg4[%c0_6, %c0_7] : memref<256x256xbf16, #tpu.memory_space<vmem>>, vector<256x256xbf16>
    %cst_8 = arith.constant dense<0.000000e+00> : vector<2x256xf32>
    %10 = tpu.matmul %8, %9, %cst_8 {dimension_numbers = #tpu.dot_dimension_numbers<[1], [0], [0], [1], [0, 0, 1, 1], [], []>} : vector<2x256xbf16>, vector<256x256xbf16>, vector<2x256xf32> -> vector<2x256xf32>
    %c0_9 = arith.constant 0 : index
    %c0_10 = arith.constant 0 : index
    %11 = vector.load %arg5[%c0_9, %c0_10] : memref<1x256xf32, #tpu.memory_space<vmem>>, vector<1x256xf32>
    %12 = vector.broadcast %11 : vector<1x256xf32> to vector<2x256xf32>
    %13 = arith.addf %10, %12 : vector<2x256xf32>
    %cst_11 = arith.constant 0.000000e+00 : f32
    %14 = vector.broadcast %cst_11 : f32 to vector<2x256xf32>
    %15 = arith.maximumf %13, %14 : vector<2x256xf32>
    %16 = arith.truncf %15 : vector<2x256xf32> to vector<2x256xbf16>
    %c0_12 = arith.constant 0 : index
    %c0_13 = arith.constant 0 : index
    %17 = vector.load %arg6[%c0_12, %c0_13] : memref<256x10xbf16, #tpu.memory_space<vmem>>, vector<256x10xbf16>
    %cst_14 = arith.constant dense<0.000000e+00> : vector<2x10xf32>
    %18 = tpu.matmul %16, %17, %cst_14 {dimension_numbers = #tpu.dot_dimension_numbers<[1], [0], [0], [1], [0, 0, 1, 1], [], []>} : vector<2x256xbf16>, vector<256x10xbf16>, vector<2x10xf32> -> vector<2x10xf32>
    %c0_15 = arith.constant 0 : index
    %c0_16 = arith.constant 0 : index
    %19 = vector.load %arg7[%c0_15, %c0_16] : memref<1x10xf32, #tpu.memory_space<vmem>>, vector<1x10xf32>
    %20 = vector.broadcast %19 : vector<1x10xf32> to vector<2x10xf32>
    %21 = arith.addf %18, %20 : vector<2x10xf32>
    %c0_17 = arith.constant 0 : index
    %c0_18 = arith.constant 0 : index
    %22 = vector.load %arg8[%c0_17, %c0_18] : memref<2x10xf32, #tpu.memory_space<vmem>>, vector<2x10xf32>
    tpu.vector_store %arg8[%c0_17, %c0_18], %21 {strides = array<i32>} : memref<2x10xf32, #tpu.memory_space<vmem>>, vector<2x10xf32>,
    return
  }
  func.func @transform_0(%arg0: i32) -> (i32, i32) {
    %c0_i32 = arith.constant 0 : i32
    %c0_i32_0 = arith.constant 0 : i32
    %c0_i32_1 = arith.constant 0 : i32
    return %c0_i32, %c0_i32_0 : i32, i32
  }
  func.func @transform_1(%arg0: i32) -> (i32, i32) {
    %c0_i32 = arith.constant 0 : i32
    %c0_i32_0 = arith.constant 0 : i32
    %c0_i32_1 = arith.constant 0 : i32
    return %c0_i32, %c0_i32_0 : i32, i32
  }
  func.func @transform_2(%arg0: i32) -> (i32, i32) {
    %c0_i32 = arith.constant 0 : i32
    %c0_i32_0 = arith.constant 0 : i32
    %c0_i32_1 = arith.constant 0 : i32
    return %c0_i32, %c0_i32_0 : i32, i32
  }
  func.func @transform_3(%arg0: i32) -> (i32, i32) {
    %c0_i32 = arith.constant 0 : i32
    %c0_i32_0 = arith.constant 0 : i32
    %c0_i32_1 = arith.constant 0 : i32
    return %c0_i32, %c0_i32_0 : i32, i32
  }
  func.func @transform_4(%arg0: i32) -> (i32, i32) {
    %c0_i32 = arith.constant 0 : i32
    %c0_i32_0 = arith.constant 0 : i32
    %c0_i32_1 = arith.constant 0 : i32
    return %c0_i32, %c0_i32_0 : i32, i32
  }
  func.func @transform_5(%arg0: i32) -> (i32, i32) {
    %c0_i32 = arith.constant 0 : i32
    %c0_i32_0 = arith.constant 0 : i32
    %c0_i32_1 = arith.constant 0 : i32
    return %c0_i32, %c0_i32_0 : i32, i32
  }
  func.func @transform_6(%arg0: i32) -> (i32, i32) {
    %c0_i32 = arith.constant 0 : i32
    %c0_i32_0 = arith.constant 0 : i32
    %c0_i32_1 = arith.constant 0 : i32
    return %c0_i32, %c0_i32_0 : i32, i32
  }
  func.func @transform_7(%arg0: i32) -> (i32, i32) {
    %c0_i32 = arith.constant 0 : i32
    %c0_i32_0 = arith.constant 0 : i32
    %c0_i32_1 = arith.constant 0 : i32
    return %c0_i32, %c0_i32_0 : i32, i32
  }
}

</mosaic_0001>

<bundles_post_ra>
// kernel: conv_model_forward.3
= control target key start
LH: loop header
LB: loop body
LE: loop exit
PB: predicated region body
PF: predicated region fallthrough
CT: control target
= control target key end

     0   :  { %12 = vsyncpa [#allocation3], 0  ;;  %s7759_s0 = inlined_call_operand.vmem [shape: bf16[2,4096], index: 0, kind: input, shape index: {}]   ;;  %s7760_s1 = inlined_call_operand.hbm [shape: bf16[4096,256], index: 1, kind: input, shape index: {}]   ;;  %s7761_s2 = inlined_call_operand.hbm [shape: f32[1,256], index: 2, kind: input, shape index: {}]   ;;  %s7762_s3 = inlined_call_operand.hbm [shape: bf16[256,256], index: 3, kind: input, shape index: {}]   ;;  %s7763_s4 = inlined_call_operand.hbm [shape: f32[1,256], index: 4, kind: input, shape index: {}]   ;;  %s7764_s5 = inlined_call_operand.vmem [shape: bf16[256,10], index: 5, kind: input, shape index: {}]   ;;  %s7765_s6 = inlined_call_operand.hbm [shape: f32[1,10], index: 6, kind: input, shape index: {}]   ;;  %s7766_s7 = inlined_call_operand.hbm [shape: f32[2,10], index: 7, kind: output, shape index: {}]  }
   0x1   :  { %13 = vsyncpa [#allocation6], 0 }
   0x2   :  { %14 = vsyncpa [#allocation9], 0  ;;  %s36_s26 = sshll.u32 %s7761_s2, 4  ;;  %s37_s26 = int_to_ptr.hbm [resolvable:$true] %s36_s26 }
   0x3   :  { %15 = vsyncpa [#allocation4], 0  ;;  %s7492_s27 = smov [#allocation5]   ;;  %s60_s8 = sshll.u32 %s7763_s4, 4  ;;  %s61_s8 = int_to_ptr.hbm [resolvable:$true] %s60_s8 }
   0x4   :  { %s38_s28 = sshll.u32 %s7492_s27, 4  ;;  %s7493_s9 = smov [#allocation8]   ;;  %s39_s28 = int_to_ptr.vmem [resolvable:$true] %s38_s28 }
   0x5   :  { %41 = dma.hbm_to_vmem [thread:$0]  %s37_s26, 32, %s39_s28, [#allocation6]  }
   0x6   :  { %s62_s10 = sshll.u32 %s7493_s9, 4  ;;  %s22_s13 = sshll.u32 %s7760_s1, 4  ;;  %s63_s10 = int_to_ptr.vmem [resolvable:$true] %s62_s10  ;;  %s23_s13 = int_to_ptr.hbm [resolvable:$true] %s22_s13 }
   0x7   :  { %65 = dma.hbm_to_vmem [thread:$0]  %s61_s8, 32, %s63_s10, [#allocation9]  }
   0x8   :  { %s7494_s2 = smov [#allocation2]   ;;  %s46_s17 = sshll.u32 %s7762_s3, 4  ;;  %s47_s17 = int_to_ptr.hbm [resolvable:$true] %s46_s17 }
   0x9   :  { %s24_s14 = sshll.u32 %s7494_s2, 4  ;;  %s7495_s18 = smov 128   ;;  %s25_s14 = int_to_ptr.vmem [resolvable:$true] %s24_s14 }
   0xa   :  { %s7496_s4 = smov 8   ;;  %s7497_s19 = smov [#allocation7]  }
   0xb   :  { %30 = dma.hbm_to_vmem [thread:$0]  %s23_s13, 65536, %s25_s14, [#allocation3], %s7495_s18, %s7495_s18, %s7496_s4  }
   0xc   :  { %s48_s20 = sshll.u32 %s7497_s19, 4  ;;  %s73_s1 = sshll.u32 %s7765_s6, 4  ;;  %s49_s20 = int_to_ptr.vmem [resolvable:$true] %s48_s20  ;;  %s74_s1 = int_to_ptr.hbm [resolvable:$true] %s73_s1 }
   0xd   :  { %54 = dma.hbm_to_vmem [thread:$0]  %s47_s17, 4096, %s49_s20, [#allocation6], %s7495_s18, %s7495_s18, %s7496_s4  }
   0xe   :  { %s7498_s23 = smov [#allocation10]  }
   0xf   :  { %s75_s24 = sshll.u32 %s7498_s23, 4  ;;  %s76_s24 = int_to_ptr.vmem [resolvable:$true] %s75_s24 }
  0x10   :  { %78 = dma.hbm_to_vmem [thread:$0]  %s74_s1, 16, %s76_s24, [#allocation9]  }
  0x11   :  { %7484 = dma.done.wait [#allocation3], 65536  }
  0x12   :  { %7485 = vsyncadd [#allocation3], 4294901760 }
  0x13   :  { %7486 = dma.done.wait [#allocation6], 4128  }
  0x14   :  { %7487 = vsyncadd [#allocation6], 4294963168 }
  0x15   :  { %7488 = dma.done.wait [#allocation9], 48  }
  0x16   :  { %7489 = vsyncadd [#allocation9], 4294967248  ;;  %v4580_v0 = vld [vmem:[#allocation2 + $0x70] sm:$0xf]  ;;  %v6777_v1 = vld [vmem:[#allocation2 + $0x74] sm:$0xf0] }
  0x17   :  { %v4644_v2 = vld [vmem:[#allocation2 + $0xf0] sm:$0xf]  ;;  %v4581_v3 = vor.u32 %v6777_v1, %v4580_v0  ;;  %v6793_v4 = vld [vmem:[#allocation2 + $0xf4] sm:$0xf0]  ;;  %v4572_v11 = vld [vmem:[#allocation2 + $0x60] sm:$0xf] }
  0x18   :  { %v4708_v5 = vld [vmem:[#allocation2 + $0x170] sm:$0xf]  ;;  %v6809_v6 = vld [vmem:[#allocation2 + $0x174] sm:$0xf0]  ;;  %v4645_v7 = vor.u32 %v6793_v4, %v4644_v2  ;;  %v6775_v13 = vld [vmem:[#allocation2 + $0x64] sm:$0xf0] }
  0x19   :  { %v4709_v8 = vor.u32 %v6809_v6, %v4708_v5  ;;  %v4772_v9 = vld [vmem:[#allocation2 + $0x1f0] sm:$0xf]  ;;  %v6825_v10 = vld [vmem:[#allocation2 + $0x1f4] sm:$0xf0]  ;;  %3253 = vmatpush.bf16.msra.mxu0 %v4581_v3  ;;  %v4636_v14 = vld [vmem:[#allocation2 + $0xe0] sm:$0xf]  ;;  %v4573_v16 = vor.u32 %v6775_v13, %v4572_v11 }
  0x1a   :  { %v4773_v12 = vor.u32 %v6825_v10, %v4772_v9  ;;  %v6791_v15 = vld [vmem:[#allocation2 + $0xe4] sm:$0xf0]  ;;  %3266 = vmatpush.bf16.msra.mxu1 %v4645_v7  ;;  %v4700_v18 = vld [vmem:[#allocation2 + $0x160] sm:$0xf]  ;;  %v4564_v23 = vld [vmem:[#allocation2 + $0x50] sm:$0xf] }
  0x1b   :  { %3279 = vmatpush.bf16.msra.mxu2 %v4709_v8  ;;  %v4637_v17 = vor.u32 %v6791_v15, %v4636_v14  ;;  %v6807_v19 = vld [vmem:[#allocation2 + $0x164] sm:$0xf0]  ;;  %v4764_v20 = vld [vmem:[#allocation2 + $0x1e0] sm:$0xf]  ;;  %v6773_v24 = vld [vmem:[#allocation2 + $0x54] sm:$0xf0] }
  0x1c   :  { %3292 = vmatpush.bf16.msra.mxu3 %v4773_v12  ;;  %v4701_v21 = vor.u32 %v6807_v19, %v4700_v18  ;;  %v6823_v22 = vld [vmem:[#allocation2 + $0x1e4] sm:$0xf0]  ;;  %v4628_v26 = vld [vmem:[#allocation2 + $0xd0] sm:$0xf]  ;;  %v6789_v27 = vld [vmem:[#allocation2 + $0xd4] sm:$0xf0]  ;;  %v4565_v29 = vor.u32 %v6773_v24, %v4564_v23 }
  0x1d   :  { %v4765_v25 = vor.u32 %v6823_v22, %v4764_v20  ;;  %v4692_v28 = vld [vmem:[#allocation2 + $0x150] sm:$0xf]  ;;  %3254 = vmatpush.bf16.msra.mxu0 %v4573_v16  ;;  %v6805_v30 = vld [vmem:[#allocation2 + $0x154] sm:$0xf0]  ;;  %v4629_v33 = vor.u32 %v6789_v27, %v4628_v26  ;;  %v4556_v35 = vld [vmem:[#allocation2 + $0x40] sm:$0xf] }
  0x1e   :  { %v4756_v31 = vld [vmem:[#allocation2 + $0x1d0] sm:$0xf]  ;;  %v6821_v32 = vld [vmem:[#allocation2 + $0x1d4] sm:$0xf0]  ;;  %3267 = vmatpush.bf16.msra.mxu1 %v4637_v17  ;;  %v4693_v34 = vor.u32 %v6805_v30, %v4692_v28  ;;  %v6771_v36 = vld [vmem:[#allocation2 + $0x44] sm:$0xf0] }
  0x1f   :  { %3280 = vmatpush.bf16.msra.mxu2 %v4701_v21  ;;  %v4620_v37 = vld [vmem:[#allocation2 + $0xc0] sm:$0xf]  ;;  %v4757_v38 = vor.u32 %v6821_v32, %v4756_v31  ;;  %v6787_v39 = vld [vmem:[#allocation2 + $0xc4] sm:$0xf0]  ;;  %v4557_v44 = vor.u32 %v6771_v36, %v4556_v35  ;;  %v4548_v47 = vld [vmem:[#allocation2 + $0x30] sm:$0xf] }
  0x20   :  { %3293 = vmatpush.bf16.msra.mxu3 %v4765_v25  ;;  %v4684_v40 = vld [vmem:[#allocation2 + $0x140] sm:$0xf]  ;;  %v6803_v41 = vld [vmem:[#allocation2 + $0x144] sm:$0xf0]  ;;  %v4621_v45 = vor.u32 %v6787_v39, %v4620_v37  ;;  %v6769_v48 = vld [vmem:[#allocation2 + $0x34] sm:$0xf0] }
  0x21   :  { %v4748_v42 = vld [vmem:[#allocation2 + $0x1c0] sm:$0xf]  ;;  %v6819_v43 = vld [vmem:[#allocation2 + $0x1c4] sm:$0xf0]  ;;  %3255 = vmatpush.bf16.msra.mxu0 %v4565_v29  ;;  %v4685_v46 = vor.u32 %v6803_v41, %v4684_v40  ;;  %v4612_v49 = vld [vmem:[#allocation2 + $0xb0] sm:$0xf]  ;;  %v4549_v56 = vor.u32 %v6769_v48, %v4548_v47 }
  0x22   :  { %3268 = vmatpush.bf16.msra.mxu1 %v4629_v33  ;;  %v4749_v50 = vor.u32 %v6819_v43, %v4748_v42  ;;  %v6785_v51 = vld [vmem:[#allocation2 + $0xb4] sm:$0xf0]  ;;  %v4676_v52 = vld [vmem:[#allocation2 + $0x130] sm:$0xf]  ;;  %v4540_v59 = vld [vmem:[#allocation2 + $0x20] sm:$0xf] }
  0x23   :  { %3281 = vmatpush.bf16.msra.mxu2 %v4693_v34  ;;  %v6801_v53 = vld [vmem:[#allocation2 + $0x134] sm:$0xf0]  ;;  %v4740_v54 = vld [vmem:[#allocation2 + $0x1b0] sm:$0xf]  ;;  %v4613_v57 = vor.u32 %v6785_v51, %v4612_v49  ;;  %v6767_v60 = vld [vmem:[#allocation2 + $0x24] sm:$0xf0] }
  0x24   :  { %3294 = vmatpush.bf16.msra.mxu3 %v4757_v38  ;;  %v6817_v55 = vld [vmem:[#allocation2 + $0x1b4] sm:$0xf0]  ;;  %v4677_v58 = vor.u32 %v6801_v53, %v4676_v52  ;;  %v4604_v61 = vld [vmem:[#allocation2 + $0xa0] sm:$0xf]  ;;  %v6783_v63 = vld [vmem:[#allocation2 + $0xa4] sm:$0xf0]  ;;  %v4541_v4 = vor.u32 %v6767_v60, %v4540_v59 }
  0x25   :  { %3256 = vmatpush.bf16.msra.mxu0 %v4557_v44  ;;  %v4741_v62 = vor.u32 %v6817_v55, %v4740_v54  ;;  %v4668_v0 = vld [vmem:[#allocation2 + $0x120] sm:$0xf]  ;;  %v6799_v1 = vld [vmem:[#allocation2 + $0x124] sm:$0xf0]  ;;  %v4605_v5 = vor.u32 %v6783_v63, %v4604_v61  ;;  %v4532_v7 = vld [vmem:[#allocation2 + $0x10] sm:$0xf] }
  0x26   :  { %3269 = vmatpush.bf16.msra.mxu1 %v4621_v45  ;;  %v4732_v2 = vld [vmem:[#allocation2 + $0x1a0] sm:$0xf]  ;;  %v6815_v3 = vld [vmem:[#allocation2 + $0x1a4] sm:$0xf0]  ;;  %v4669_v6 = vor.u32 %v6799_v1, %v4668_v0  ;;  %v6765_v8 = vld [vmem:[#allocation2 + $0x14] sm:$0xf0] }
  0x27   :  { %3282 = vmatpush.bf16.msra.mxu2 %v4685_v46  ;;  %v4596_v9 = vld [vmem:[#allocation2 + $0x90] sm:$0xf]  ;;  %v4733_v10 = vor.u32 %v6815_v3, %v4732_v2  ;;  %v6781_v11 = vld [vmem:[#allocation2 + $0x94] sm:$0xf0]  ;;  %v4533_v16 = vor.u32 %v6765_v8, %v4532_v7  ;;  %v4524_v17 = vld [vmem:[#allocation2] sm:$0xf] }
  0x28   :  { %3295 = vmatpush.bf16.msra.mxu3 %v4749_v50  ;;  %v4660_v12 = vld [vmem:[#allocation2 + $0x110] sm:$0xf]  ;;  %v6797_v13 = vld [vmem:[#allocation2 + $0x114] sm:$0xf0]  ;;  %v6763_v18 = vld [vmem:[#allocation2 + $0x4] sm:$0xf0]  ;;  %v4597_v19 = vor.u32 %v6781_v11, %v4596_v9 }
  0x29   :  { %3257 = vmatpush.bf16.msra.mxu0 %v4549_v56  ;;  %v4724_v14 = vld [vmem:[#allocation2 + $0x190] sm:$0xf]  ;;  %v6813_v15 = vld [vmem:[#allocation2 + $0x194] sm:$0xf0]  ;;  %v4661_v20 = vor.u32 %v6797_v13, %v4660_v12  ;;  %v4588_v21 = vld [vmem:[#allocation2 + $0x80] sm:$0xf]  ;;  %v4525_v31 = vor.u32 %v6763_v18, %v4524_v17 }
  0x2a   :  { %3270 = vmatpush.bf16.msra.mxu1 %v4613_v57  ;;  %v6779_v22 = vld [vmem:[#allocation2 + $0x84] sm:$0xf0]  ;;  %v4652_v23 = vld [vmem:[#allocation2 + $0x100] sm:$0xf]  ;;  %v4725_v24 = vor.u32 %v6813_v15, %v4724_v14  ;;  %v4836_v28 = vld [vmem:[#allocation2 + $0x270] sm:$0xf] }
  0x2b   :  { %3283 = vmatpush.bf16.msra.mxu2 %v4677_v58  ;;  %v6795_v25 = vld [vmem:[#allocation2 + $0x104] sm:$0xf0]  ;;  %v4716_v26 = vld [vmem:[#allocation2 + $0x180] sm:$0xf]  ;;  %v6841_v29 = vld [vmem:[#allocation2 + $0x274] sm:$0xf0]  ;;  %v4589_v35 = vor.u32 %v6779_v22, %v4588_v21 }
  0x2c   :  { %3296 = vmatpush.bf16.msra.mxu3 %v4741_v62  ;;  %v6811_v27 = vld [vmem:[#allocation2 + $0x184] sm:$0xf0]  ;;  %v4900_v30 = vld [vmem:[#allocation2 + $0x2f0] sm:$0xf]  ;;  %v6857_v32 = vld [vmem:[#allocation2 + $0x2f4] sm:$0xf0]  ;;  %v4653_v36 = vor.u32 %v6795_v25, %v4652_v23  ;;  %v4837_v40 = vor.u32 %v6841_v29, %v4836_v28 }
  0x2d   :  { %3258 = vmatpush.bf16.msra.mxu0 %v4541_v4  ;;  %v4964_v33 = vld [vmem:[#allocation2 + $0x370] sm:$0xf]  ;;  %v6873_v34 = vld [vmem:[#allocation2 + $0x374] sm:$0xf0]  ;;  %v4717_v39 = vor.u32 %v6811_v27, %v4716_v26  ;;  %v4901_v41 = vor.u32 %v6857_v32, %v4900_v30  ;;  %v4828_v43 = vld [vmem:[#allocation2 + $0x260] sm:$0xf] }
  0x2e   :  { %3271 = vmatpush.bf16.msra.mxu1 %v4605_v5  ;;  %v5028_v37 = vld [vmem:[#allocation2 + $0x3f0] sm:$0xf]  ;;  %v6889_v38 = vld [vmem:[#allocation2 + $0x3f4] sm:$0xf0]  ;;  %v4965_v42 = vor.u32 %v6873_v34, %v4964_v33  ;;  %v6839_v44 = vld [vmem:[#allocation2 + $0x264] sm:$0xf0] }
  0x2f   :  { %3284 = vmatpush.bf16.msra.mxu2 %v4669_v6  ;;  %v4892_v45 = vld [vmem:[#allocation2 + $0x2e0] sm:$0xf]  ;;  %v5029_v46 = vor.u32 %v6889_v38, %v5028_v37  ;;  %v6855_v47 = vld [vmem:[#allocation2 + $0x2e4] sm:$0xf0]  ;;  %v4829_v52 = vor.u32 %v6839_v44, %v4828_v43  ;;  %v4820_v55 = vld [vmem:[#allocation2 + $0x250] sm:$0xf] }
  0x30   :  { %3297 = vmatpush.bf16.msra.mxu3 %v4733_v10  ;;  %v4956_v48 = vld [vmem:[#allocation2 + $0x360] sm:$0xf]  ;;  %v6871_v49 = vld [vmem:[#allocation2 + $0x364] sm:$0xf0]  ;;  %v4893_v53 = vor.u32 %v6855_v47, %v4892_v45  ;;  %v6837_v56 = vld [vmem:[#allocation2 + $0x254] sm:$0xf0] }
  0x31   :  { %3259 = vmatpush.bf16.msra.mxu0 %v4533_v16  ;;  %v5020_v50 = vld [vmem:[#allocation2 + $0x3e0] sm:$0xf]  ;;  %v6887_v51 = vld [vmem:[#allocation2 + $0x3e4] sm:$0xf0]  ;;  %v4957_v54 = vor.u32 %v6871_v49, %v4956_v48  ;;  %v4884_v57 = vld [vmem:[#allocation2 + $0x2d0] sm:$0xf]  ;;  %v4821_v0 = vor.u32 %v6837_v56, %v4820_v55 }
  0x32   :  { %3272 = vmatpush.bf16.msra.mxu1 %v4597_v19  ;;  %v5021_v58 = vor.u32 %v6887_v51, %v5020_v50  ;;  %v6853_v59 = vld [vmem:[#allocation2 + $0x2d4] sm:$0xf0]  ;;  %v4948_v60 = vld [vmem:[#allocation2 + $0x350] sm:$0xf]  ;;  %v4812_v1 = vld [vmem:[#allocation2 + $0x240] sm:$0xf] }
  0x33   :  { %3285 = vmatpush.bf16.msra.mxu2 %v4661_v20  ;;  %v6869_v61 = vld [vmem:[#allocation2 + $0x354] sm:$0xf0]  ;;  %v5012_v62 = vld [vmem:[#allocation2 + $0x3d0] sm:$0xf]  ;;  %v4885_v3 = vor.u32 %v6853_v59, %v4884_v57  ;;  %v6835_v5 = vld [vmem:[#allocation2 + $0x244] sm:$0xf0] }
  0x34   :  { %3298 = vmatpush.bf16.msra.mxu3 %v4725_v24  ;;  %v6885_v63 = vld [vmem:[#allocation2 + $0x3d4] sm:$0xf0]  ;;  %v4949_v4 = vor.u32 %v6869_v61, %v4948_v60  ;;  %v4876_v6 = vld [vmem:[#allocation2 + $0x2c0] sm:$0xf]  ;;  %v6851_v8 = vld [vmem:[#allocation2 + $0x2c4] sm:$0xf0]  ;;  %v4813_v13 = vor.u32 %v6835_v5, %v4812_v1 }
  0x35   :  { %3260 = vmatpush.bf16.msra.mxu0 %v4525_v31  ;;  %v99_v2 = vld [vmem:[%s7759_s0] sm:$0xff]  ;;  %v5013_v7 = vor.u32 %v6885_v63, %v5012_v62  ;;  %v4940_v9 = vld [vmem:[#allocation2 + $0x340] sm:$0xf]  ;;  %v6867_v10 = vld [vmem:[#allocation2 + $0x344] sm:$0xf0]  ;;  %v4877_v14 = vor.u32 %v6851_v8, %v4876_v6  ;;  %s4510_s13 = sshll.u32 %s7766_s7, 4  ;;  %s4511_s13 = int_to_ptr.hbm [resolvable:$true] %s4510_s13 }
  0x36   :  { %3273 = vmatpush.bf16.msra.mxu1 %v4589_v35  ;;  %622 = vst [vmem:[#allocation1] ss:$9 sm:$0xff] %v99_v2  ;;  %v5004_v11 = vld [vmem:[#allocation2 + $0x3c0] sm:$0xf]  ;;  %v6883_v12 = vld [vmem:[#allocation2 + $0x3c4] sm:$0xf0]  ;;  %v4941_v15 = vor.u32 %v6867_v10, %v4940_v9 }
  0x37   :  { %3286 = vmatpush.bf16.msra.mxu2 %v4653_v36  ;;  %v4804_v16 = vld [vmem:[#allocation2 + $0x230] sm:$0xf]  ;;  %v6833_v17 = vld [vmem:[#allocation2 + $0x234] sm:$0xf0]  ;;  %v5005_v19 = vor.u32 %v6883_v12, %v5004_v11  ;;  %v4796_v25 = vld [vmem:[#allocation2 + $0x220] sm:$0xf] }
  0x38   :  { %3299 = vmatpush.bf16.msra.mxu3 %v4717_v39  ;;  %v4868_v18 = vld [vmem:[#allocation2 + $0x2b0] sm:$0xf]  ;;  %v6849_v20 = vld [vmem:[#allocation2 + $0x2b4] sm:$0xf0]  ;;  %v4805_v26 = vor.u32 %v6833_v17, %v4804_v16  ;;  %v6831_v32 = vld [vmem:[#allocation2 + $0x224] sm:$0xf0] }
  0x39   :  { %3305 = vmatpush.bf16.msrb.mxu0 %v4837_v40  ;;  %v4932_v21 = vld [vmem:[#allocation2 + $0x330] sm:$0xf]  ;;  %v6865_v22 = vld [vmem:[#allocation2 + $0x334] sm:$0xf0]  ;;  %v4869_v30 = vor.u32 %v6849_v20, %v4868_v18  ;;  %v4860_v33 = vld [vmem:[#allocation2 + $0x2a0] sm:$0xf] }
  0x3a   :  { %3318 = vmatpush.bf16.msrb.mxu1 %v4901_v41  ;;  %v4996_v23 = vld [vmem:[#allocation2 + $0x3b0] sm:$0xf]  ;;  %v6881_v24 = vld [vmem:[#allocation2 + $0x3b4] sm:$0xf0]  ;;  %v4933_v31 = vor.u32 %v6865_v22, %v4932_v21  ;;  %v6847_v36 = vld [vmem:[#allocation2 + $0x2a4] sm:$0xf0]  ;;  %v4797_v41 = vor.u32 %v6831_v32, %v4796_v25 }
  0x3b   :  { %3331 = vmatpush.bf16.msrb.mxu2 %v4965_v42  ;;  %v4997_v35 = vor.u32 %v6881_v24, %v4996_v23  ;;  %v4924_v37 = vld [vmem:[#allocation2 + $0x320] sm:$0xf]  ;;  %v6863_v38 = vld [vmem:[#allocation2 + $0x324] sm:$0xf0]  ;;  %v4861_v42 = vor.u32 %v6847_v36, %v4860_v33  ;;  %v4788_v44 = vld [vmem:[#allocation2 + $0x210] sm:$0xf] }
  0x3c   :  { %3344 = vmatpush.bf16.msrb.mxu3 %v5029_v46  ;;  %v4988_v39 = vld [vmem:[#allocation2 + $0x3a0] sm:$0xf]  ;;  %v6879_v40 = vld [vmem:[#allocation2 + $0x3a4] sm:$0xf0]  ;;  %v4925_v43 = vor.u32 %v6863_v38, %v4924_v37  ;;  %v6829_v45 = vld [vmem:[#allocation2 + $0x214] sm:$0xf0] }
  0x3d   :  { %3306 = vmatpush.bf16.msrb.mxu0 %v4829_v52  ;;  %v7558_v27 = vld [vmem:[#allocation1 + $0x12] sm:$0xff]  ;;  %v7560_v28 = vld [vmem:[#allocation1] sm:$0xff]  ;;  %v7564_v34 = vld [vmem:[#allocation1 + $0x9] sm:$0xff]  ;;  %v4989_v47 = vor.u32 %v6879_v40, %v4988_v39  ;;  %vm4501_vm0 = vcmask 74752  }
  0x3e   :  { %3319 = vmatpush.bf16.msrb.mxu1 %v4893_v53  ;;  %v7562_v29 = vld [vmem:[#allocation1 + $0x1b] sm:$0xff]  ;;  %3287 = vmatmul.bf16.vlgmr.msra.gmra.mxu2 %v7558_v27  ;;  %v4789_v53 = vor.u32 %v6829_v45, %v4788_v44  ;;  %v6827_v55 = vld [vmem:[#allocation2 + $0x204] sm:$0xf0]  ;;  %v4908_v60 = vld [vmem:[#allocation2 + $0x300] sm:$0xf] }
  0x3f   :  { %3332 = vmatpush.bf16.msrb.mxu2 %v4957_v54  ;;  %3261 = vmatmul.bf16.vlgmr.msra.gmra.mxu0 %v7560_v28  ;;  %v4852_v46 = vld [vmem:[#allocation2 + $0x290] sm:$0xf]  ;;  %v6845_v48 = vld [vmem:[#allocation2 + $0x294] sm:$0xf0]  ;;  %v4780_v54 = vld [vmem:[#allocation2 + $0x200] sm:$0xf] }
  0x40   :  { %3345 = vmatpush.bf16.msrb.mxu3 %v5021_v58  ;;  %3274 = vmatmul.bf16.vlgmr.msra.gmra.mxu1 %v7564_v34  ;;  %v4916_v49 = vld [vmem:[#allocation2 + $0x310] sm:$0xf]  ;;  %v6861_v50 = vld [vmem:[#allocation2 + $0x314] sm:$0xf0]  ;;  %v4853_v56 = vor.u32 %v6845_v48, %v4852_v46  ;;  %v4844_v58 = vld [vmem:[#allocation2 + $0x280] sm:$0xf] }
  0x41   :  { %3307 = vmatpush.bf16.msrb.mxu0 %v4821_v0  ;;  %3300 = vmatmul.bf16.vlgmr.msra.gmra.mxu3 %v7562_v29  ;;  %v4980_v51 = vld [vmem:[#allocation2 + $0x390] sm:$0xf]  ;;  %v6877_v52 = vld [vmem:[#allocation2 + $0x394] sm:$0xf0]  ;;  %v4917_v57 = vor.u32 %v6861_v50, %v4916_v49  ;;  %v6843_v59 = vld [vmem:[#allocation2 + $0x284] sm:$0xf0] }
  0x42   :  { %3320 = vmatpush.bf16.msrb.mxu1 %v4885_v3  ;;  %v4981_v61 = vor.u32 %v6877_v52, %v4980_v51  ;;  %v6859_v62 = vld [vmem:[#allocation2 + $0x304] sm:$0xf0]  ;;  %v4972_v63 = vld [vmem:[#allocation2 + $0x380] sm:$0xf]  ;;  %v5092_v1 = vld [vmem:[#allocation2 + $0x470] sm:$0xf]  ;;  %v4845_v8 = vor.u32 %v6843_v59, %v4844_v58 }
  0x43   :  { %3333 = vmatpush.bf16.msrb.mxu2 %v4949_v4  ;;  %v6875_v0 = vld [vmem:[#allocation2 + $0x384] sm:$0xf0]  ;;  %v6905_v2 = vld [vmem:[#allocation2 + $0x474] sm:$0xf0]  ;;  %v5156_v3 = vld [vmem:[#allocation2 + $0x4f0] sm:$0xf]  ;;  %v4781_v4 = vor.u32 %v6827_v55, %v4780_v54  ;;  %v4909_v9 = vor.u32 %v6859_v62, %v4908_v60 }
  0x44   :  { %3346 = vmatpush.bf16.msrb.mxu3 %v5013_v7  ;;  %v6921_v5 = vld [vmem:[#allocation2 + $0x4f4] sm:$0xf0]  ;;  %v5220_v6 = vld [vmem:[#allocation2 + $0x570] sm:$0xf]  ;;  %v4973_v12 = vor.u32 %v6875_v0, %v4972_v63  ;;  %v5084_v16 = vld [vmem:[#allocation2 + $0x460] sm:$0xf] }
  0x45   :  { %3308 = vmatpush.bf16.msrb.mxu0 %v4813_v13  ;;  %v6937_v7 = vld [vmem:[#allocation2 + $0x574] sm:$0xf0]  ;;  %v5284_v10 = vld [vmem:[#allocation2 + $0x5f0] sm:$0xf]  ;;  %v5093_v13 = vor.u32 %v6905_v2, %v5092_v1  ;;  %v6903_v17 = vld [vmem:[#allocation2 + $0x464] sm:$0xf0] }
  0x46   :  { %3321 = vmatpush.bf16.msrb.mxu1 %v4877_v14  ;;  %v6953_v11 = vld [vmem:[#allocation2 + $0x5f4] sm:$0xf0]  ;;  %v5157_v14 = vor.u32 %v6921_v5, %v5156_v3  ;;  %v5148_v18 = vld [vmem:[#allocation2 + $0x4e0] sm:$0xf]  ;;  %v6919_v20 = vld [vmem:[#allocation2 + $0x4e4] sm:$0xf0] }
  0x47   :  { %3334 = vmatpush.bf16.msrb.mxu2 %v4941_v15  ;;  %v5221_v15 = vor.u32 %v6937_v7, %v5220_v6  ;;  %v5212_v21 = vld [vmem:[#allocation2 + $0x560] sm:$0xf]  ;;  %v6935_v22 = vld [vmem:[#allocation2 + $0x564] sm:$0xf0]  ;;  %v7570_v25 = vld [vmem:[#allocation1 + $0x36] sm:$0xff]  ;;  %v5149_v33 = vor.u32 %v6919_v20, %v5148_v18 }
  0x48   :  { %3347 = vmatpush.bf16.msrb.mxu3 %v5005_v19  ;;  %v5285_v19 = vor.u32 %v6953_v11, %v5284_v10  ;;  %v5276_v23 = vld [vmem:[#allocation2 + $0x5e0] sm:$0xf]  ;;  %v6951_v24 = vld [vmem:[#allocation2 + $0x5e4] sm:$0xf0]  ;;  %v7574_v32 = vld [vmem:[#allocation1 + $0x3f] sm:$0xff] }
  0x49   :  { %3309 = vmatpush.bf16.msrb.mxu0 %v4805_v26  ;;  %v5085_v26 = vor.u32 %v6903_v17, %v5084_v16  ;;  %v6901_v36 = vld [vmem:[#allocation2 + $0x454] sm:$0xf0]  ;;  %v5140_v37 = vld [vmem:[#allocation2 + $0x4d0] sm:$0xf]  ;;  %v7576_v38 = vld [vmem:[#allocation1 + $0x2d] sm:$0xff]  ;;  %v5277_v39 = vor.u32 %v6951_v24, %v5276_v23 }
  0x4a   :  { %3322 = vmatpush.bf16.msrb.mxu1 %v4869_v30  ;;  %v5076_v30 = vld [vmem:[#allocation2 + $0x450] sm:$0xf]  ;;  %v6917_v40 = vld [vmem:[#allocation2 + $0x4d4] sm:$0xf0]  ;;  %v5068_v48 = vld [vmem:[#allocation2 + $0x440] sm:$0xf] }
  0x4b   :  { %3335 = vmatpush.bf16.msrb.mxu2 %v4933_v31  ;;  %v7572_v31 = vld [vmem:[#allocation1 + $0x24] sm:$0xff]  ;;  %v6949_v44 = vld [vmem:[#allocation2 + $0x5d4] sm:$0xf0]  ;;  %v5077_v45 = vor.u32 %v6901_v36, %v5076_v30  ;;  %v5141_v46 = vor.u32 %v6917_v40, %v5140_v37  ;;  %v6899_v49 = vld [vmem:[#allocation2 + $0x444] sm:$0xf0] }
  0x4c   :  { %3348 = vmatpush.bf16.msrb.mxu3 %v4997_v35  ;;  %v5213_v35 = vor.u32 %v6935_v22, %v5212_v21  ;;  %v5132_v50 = vld [vmem:[#allocation2 + $0x4c0] sm:$0xf]  ;;  %v6915_v52 = vld [vmem:[#allocation2 + $0x4c4] sm:$0xf0]  ;;  %v5069_v58 = vor.u32 %v6899_v49, %v5068_v48  ;;  %v6897_v62 = vld [vmem:[#allocation2 + $0x434] sm:$0xf0] }
  0x4d   :  { %3310 = vmatpush.bf16.msrb.mxu0 %v4797_v41  ;;  %v5204_v41 = vld [vmem:[#allocation2 + $0x550] sm:$0xf]  ;;  %v6931_v54 = vld [vmem:[#allocation2 + $0x544] sm:$0xf0]  ;;  %v5260_v55 = vld [vmem:[#allocation2 + $0x5c0] sm:$0xf]  ;;  %v5133_v59 = vor.u32 %v6915_v52, %v5132_v50 }
  0x4e   :  { %3323 = vmatpush.bf16.msrb.mxu1 %v4861_v42  ;;  %v6933_v42 = vld [vmem:[#allocation2 + $0x554] sm:$0xf0]  ;;  %v5124_v63 = vld [vmem:[#allocation2 + $0x4b0] sm:$0xf]  ;;  %v6895_v10 = vld [vmem:[#allocation2 + $0x424] sm:$0xf0] }
  0x4f   :  { %3336 = vmatpush.bf16.msrb.mxu2 %v4925_v43  ;;  %v5268_v43 = vld [vmem:[#allocation2 + $0x5d0] sm:$0xf]  ;;  %v6913_v1 = vld [vmem:[#allocation2 + $0x4b4] sm:$0xf0]  ;;  %v5116_v11 = vld [vmem:[#allocation2 + $0x4a0] sm:$0xf] }
  0x50   :  { %3349 = vmatpush.bf16.msrb.mxu3 %v4989_v47  ;;  %v5205_v47 = vor.u32 %v6933_v42, %v5204_v41  ;;  %v5269_v51 = vor.u32 %v6949_v44, %v5268_v43  ;;  %v5188_v2 = vld [vmem:[#allocation2 + $0x530] sm:$0xf]  ;;  %v6929_v3 = vld [vmem:[#allocation2 + $0x534] sm:$0xf0]  ;;  %v5125_v7 = vor.u32 %v6913_v1, %v5124_v63  ;;  %v5244_v16 = vld [vmem:[#allocation2 + $0x5a0] sm:$0xf] }
  0x51   :  { %3311 = vmatpush.bf16.msrb.mxu0 %v4789_v53  ;;  %v5196_v53 = vld [vmem:[#allocation2 + $0x540] sm:$0xf]  ;;  %v6945_v5 = vld [vmem:[#allocation2 + $0x5b4] sm:$0xf0]  ;;  %v6943_v17 = vld [vmem:[#allocation2 + $0x5a4] sm:$0xf0] }
  0x52   :  { %3324 = vmatpush.bf16.msrb.mxu1 %v4853_v56  ;;  %v6947_v56 = vld [vmem:[#allocation2 + $0x5c4] sm:$0xf0]  ;;  %v5197_v60 = vor.u32 %v6931_v54, %v5196_v53  ;;  %v5044_v21 = vld [vmem:[#allocation2 + $0x410] sm:$0xf]  ;;  %v6893_v22 = vld [vmem:[#allocation2 + $0x414] sm:$0xf0]  ;;  %v5245_v24 = vor.u32 %v6943_v17, %v5244_v16 }
  0x53   :  { %3337 = vmatpush.bf16.msrb.mxu2 %v4917_v57  ;;  %v100_v57 = vld [vmem:[%s7759_s0 + $0x8] sm:$0xff]  ;;  %v5261_v0 = vor.u32 %v6947_v56, %v5260_v55  ;;  %v5108_v23 = vld [vmem:[#allocation2 + $0x490] sm:$0xf]  ;;  %v6941_v36 = vld [vmem:[#allocation2 + $0x594] sm:$0xf0]  ;;  %v5045_v37 = vor.u32 %v6893_v22, %v5044_v21 }
  0x54   :  { %3350 = vmatpush.bf16.msrb.mxu3 %v4981_v61  ;;  %632 = vst [vmem:[#allocation1] ss:$9 sm:$0xff] %v100_v57  ;;  %v5060_v61 = vld [vmem:[#allocation2 + $0x430] sm:$0xf]  ;;  %v6891_v40 = vld [vmem:[#allocation2 + $0x404] sm:$0xf0] }
  0x55   :  { %3312 = vmatpush.bf16.msrb.mxu0 %v4781_v4  ;;  %v5252_v4 = vld [vmem:[#allocation2 + $0x5b0] sm:$0xf]  ;;  %v5061_v6 = vor.u32 %v6897_v62, %v5060_v61  ;;  %v5100_v43 = vld [vmem:[#allocation2 + $0x480] sm:$0xf]  ;;  %v6907_v44 = vld [vmem:[#allocation2 + $0x484] sm:$0xf0] }
  0x56   :  { %3325 = vmatpush.bf16.msrb.mxu1 %v4845_v8  ;;  %v5189_v8 = vor.u32 %v6929_v3, %v5188_v2  ;;  %v5172_v30 = vld [vmem:[#allocation2 + $0x510] sm:$0xf]  ;;  %v5228_v48 = vld [vmem:[#allocation2 + $0x580] sm:$0xf]  ;;  %v6939_v49 = vld [vmem:[#allocation2 + $0x584] sm:$0xf0]  ;;  %v5101_v57 = vor.u32 %v6907_v44, %v5100_v43 }
  0x57   :  { %3338 = vmatpush.bf16.msrb.mxu2 %v4909_v9  ;;  %v5052_v9 = vld [vmem:[#allocation2 + $0x420] sm:$0xf]  ;;  %v5348_v50 = vld [vmem:[#allocation2 + $0x670] sm:$0xf]  ;;  %v6985_v54 = vld [vmem:[#allocation2 + $0x6f4] sm:$0xf0]  ;;  %v5229_v61 = vor.u32 %v6939_v49, %v5228_v48 }
  0x58   :  { %3351 = vmatpush.bf16.msrb.mxu3 %v4973_v12  ;;  %3313 = vmatmul.bf16.vlgmr.msrb.gmra.mxu0 %v7572_v31  ;;  %v5253_v12 = vor.u32 %v6945_v5, %v5252_v4  ;;  %v5053_v18 = vor.u32 %v6895_v10, %v5052_v9  ;;  %v5412_v52 = vld [vmem:[#allocation2 + $0x6f0] sm:$0xf]  ;;  %v7001_v56 = vld [vmem:[#allocation2 + $0x774] sm:$0xf0]  ;;  %v5340_v1 = vld [vmem:[#allocation2 + $0x660] sm:$0xf] }
  0x59   :  { %3357 = vmatpush.bf16.msra.mxu0 %v5093_v13  ;;  %3326 = vmatmul.bf16.vlgmr.msrb.gmra.mxu1 %v7576_v38  ;;  %v6911_v13 = vld [vmem:[#allocation2 + $0x4a4] sm:$0xf0]  ;;  %v5476_v55 = vld [vmem:[#allocation2 + $0x770] sm:$0xf]  ;;  %v5413_v63 = vor.u32 %v6985_v54, %v5412_v52  ;;  %v5404_v3 = vld [vmem:[#allocation2 + $0x6e0] sm:$0xf] }
  0x5a   :  { %3370 = vmatpush.bf16.msra.mxu1 %v5157_v14  ;;  %3339 = vmatmul.bf16.vlgmr.msrb.gmra.mxu2 %v7570_v25  ;;  %v5180_v14 = vld [vmem:[#allocation2 + $0x520] sm:$0xf]  ;;  %v6967_v2 = vld [vmem:[#allocation2 + $0x664] sm:$0xf0]  ;;  %v6981_v21 = vld [vmem:[#allocation2 + $0x6d4] sm:$0xf0] }
  0x5b   :  { %3383 = vmatpush.bf16.msra.mxu2 %v5221_v15  ;;  %3352 = vmatmul.bf16.vlgmr.msrb.gmra.mxu3 %v7574_v32  ;;  %v6927_v15 = vld [vmem:[#allocation2 + $0x524] sm:$0xf0]  ;;  %v5532_v9 = vld [vmem:[#allocation2 + $0x7e0] sm:$0xf]  ;;  %v5460_v22 = vld [vmem:[#allocation2 + $0x750] sm:$0xf] }
  0x5c   :  { %3396 = vmatpush.bf16.msra.mxu3 %v5285_v19  ;;  %v5117_v19 = vor.u32 %v6911_v13, %v5116_v11  ;;  %v5181_v20 = vor.u32 %v6927_v15, %v5180_v14  ;;  %v6983_v5 = vld [vmem:[#allocation2 + $0x6e4] sm:$0xf0]  ;;  %v5341_v13 = vor.u32 %v6967_v2, %v5340_v1  ;;  %v5332_v14 = vld [vmem:[#allocation2 + $0x650] sm:$0xf]  ;;  %v5516_v44 = vld [vmem:[#allocation2 + $0x7c0] sm:$0xf] }
  0x5d   :  { %3358 = vmatpush.bf16.msra.mxu0 %v5085_v26  ;;  %v6909_v26 = vld [vmem:[#allocation2 + $0x494] sm:$0xf0]  ;;  %v7015_v10 = vld [vmem:[#allocation2 + $0x7e4] sm:$0xf0]  ;;  %v5405_v16 = vor.u32 %v6983_v5, %v5404_v3  ;;  %v5316_v49 = vld [vmem:[#allocation2 + $0x630] sm:$0xf] }
  0x5e   :  { %3371 = vmatpush.bf16.msra.mxu1 %v5149_v33  ;;  %v6925_v33 = vld [vmem:[#allocation2 + $0x514] sm:$0xf0]  ;;  %v5109_v41 = vor.u32 %v6909_v26, %v5108_v23  ;;  %v7587_v11 = vld [vmem:[#allocation1 + $0x12] sm:$0xff]  ;;  %v5436_v2 = vld [vmem:[#allocation2 + $0x720] sm:$0xf] }
  0x5f   :  { %3384 = vmatpush.bf16.msra.mxu2 %v5213_v35  ;;  %v5236_v35 = vld [vmem:[#allocation2 + $0x590] sm:$0xf]  ;;  %v5173_v42 = vor.u32 %v6925_v33, %v5172_v30  ;;  %v6997_v23 = vld [vmem:[#allocation2 + $0x754] sm:$0xf0]  ;;  %v6995_v43 = vld [vmem:[#allocation2 + $0x744] sm:$0xf0] }
  0x60   :  { %3397 = vmatpush.bf16.msra.mxu3 %v5277_v39  ;;  %v5036_v39 = vld [vmem:[#allocation2 + $0x400] sm:$0xf]  ;;  %v7591_v15 = vld [vmem:[#allocation1 + $0x1b] sm:$0xff]  ;;  %v6975_v1 = vld [vmem:[#allocation2 + $0x6a4] sm:$0xf0] }
  0x61   :  { %3359 = vmatpush.bf16.msra.mxu0 %v5077_v45  ;;  %v5164_v45 = vld [vmem:[#allocation2 + $0x500] sm:$0xf]  ;;  %v5037_v53 = vor.u32 %v6891_v40, %v5036_v39  ;;  %v7013_v26 = vld [vmem:[#allocation2 + $0x7d4] sm:$0xf0]  ;;  %v5444_v54 = vld [vmem:[#allocation2 + $0x730] sm:$0xf] }
  0x62   :  { %3372 = vmatpush.bf16.msra.mxu1 %v5141_v46  ;;  %v5237_v46 = vor.u32 %v6941_v36, %v5236_v35  ;;  %v5461_v35 = vor.u32 %v6997_v23, %v5460_v22  ;;  %v5324_v36 = vld [vmem:[#allocation2 + $0x640] sm:$0xf]  ;;  %v6991_v3 = vld [vmem:[#allocation2 + $0x724] sm:$0xf0] }
  0x63   :  { %3385 = vmatpush.bf16.msra.mxu2 %v5205_v47  ;;  %v6923_v47 = vld [vmem:[#allocation2 + $0x504] sm:$0xf0]  ;;  %v5388_v39 = vld [vmem:[#allocation2 + $0x6c0] sm:$0xf] }
  0x64   :  { %3398 = vmatpush.bf16.msra.mxu3 %v5269_v51  ;;  %v6969_v51 = vld [vmem:[#allocation2 + $0x674] sm:$0xf0]  ;;  %v7007_v5 = vld [vmem:[#allocation2 + $0x7a4] sm:$0xf0]  ;;  %v5292_v22 = vld [vmem:[#allocation2 + $0x600] sm:$0xf] }
  0x65   :  { %3360 = vmatpush.bf16.msra.mxu0 %v5069_v58  ;;  %v5165_v58 = vor.u32 %v6923_v47, %v5164_v45  ;;  %v5349_v62 = vor.u32 %v6969_v51, %v5348_v50  ;;  %v7011_v45 = vld [vmem:[#allocation2 + $0x7c4] sm:$0xf0]  ;;  %v6961_v50 = vld [vmem:[#allocation2 + $0x634] sm:$0xf0]  ;;  %v5380_v51 = vld [vmem:[#allocation2 + $0x6b0] sm:$0xf] }
  0x66   :  { %3373 = vmatpush.bf16.msra.mxu1 %v5133_v59  ;;  %v5540_v59 = vld [vmem:[#allocation2 + $0x7f0] sm:$0xf]  ;;  %v5517_v52 = vor.u32 %v7011_v45, %v5516_v44  ;;  %v6955_v23 = vld [vmem:[#allocation2 + $0x604] sm:$0xf0]  ;;  %v7049_v45 = vld [vmem:[#allocation2 + $0x8f4] sm:$0xf0] }
  0x67   :  { %3386 = vmatpush.bf16.msra.mxu2 %v5197_v60  ;;  %v7017_v60 = vld [vmem:[#allocation2 + $0x7f4] sm:$0xf0]  ;;  %v5668_v44 = vld [vmem:[#allocation2 + $0x8f0] sm:$0xf] }
  0x68   :  { %3399 = vmatpush.bf16.msra.mxu3 %v5261_v0  ;;  %v5477_v0 = vor.u32 %v7001_v56, %v5476_v55  ;;  %v5541_v4 = vor.u32 %v7017_v60, %v5540_v59  ;;  %v6993_v55 = vld [vmem:[#allocation2 + $0x734] sm:$0xf0]  ;;  %v5508_v56 = vld [vmem:[#allocation2 + $0x7b0] sm:$0xf] }
  0x69   :  { %3361 = vmatpush.bf16.msra.mxu0 %v5061_v6  ;;  %v5468_v6 = vld [vmem:[#allocation2 + $0x760] sm:$0xf]  ;;  %v5445_v60 = vor.u32 %v6993_v55, %v5444_v54 }
  0x6a   :  { %3374 = vmatpush.bf16.msra.mxu1 %v5125_v7  ;;  %v6999_v7 = vld [vmem:[#allocation2 + $0x764] sm:$0xf0] }
  0x6b   :  { %3387 = vmatpush.bf16.msra.mxu2 %v5189_v8  ;;  %v7585_v8 = vld [vmem:[#allocation1] sm:$0xff]  ;;  %v5469_v17 = vor.u32 %v6999_v7, %v5468_v6  ;;  %v5300_v7 = vld [vmem:[#allocation2 + $0x610] sm:$0xf] }
  0x6c   :  { %3400 = vmatpush.bf16.msra.mxu3 %v5253_v12  ;;  %v7589_v12 = vld [vmem:[#allocation1 + $0x9] sm:$0xff] }
  0x6d   :  { %3362 = vmatpush.bf16.msra.mxu0 %v5053_v18  ;;  %v6965_v18 = vld [vmem:[#allocation2 + $0x654] sm:$0xf0] }
  0x6e   :  { %3375 = vmatpush.bf16.msra.mxu1 %v5117_v19  ;;  %v5396_v19 = vld [vmem:[#allocation2 + $0x6d0] sm:$0xf]  ;;  %v5333_v30 = vor.u32 %v6965_v18, %v5332_v14 }
  0x6f   :  { %3388 = vmatpush.bf16.msra.mxu2 %v5181_v20  ;;  %v5533_v20 = vor.u32 %v7015_v10, %v5532_v9  ;;  %v5397_v33 = vor.u32 %v6981_v21, %v5396_v19  ;;  %v5437_v10 = vor.u32 %v6991_v3, %v5436_v2  ;;  %v5364_v14 = vld [vmem:[#allocation2 + $0x690] sm:$0xf]  ;;  %v6989_v19 = vld [vmem:[#allocation2 + $0x714] sm:$0xf0]  ;;  %v7047_v2 = vld [vmem:[#allocation2 + $0x8e4] sm:$0xf0] }
  0x70   :  { %3401 = vmatpush.bf16.msra.mxu3 %v5245_v24  ;;  %v5524_v24 = vld [vmem:[#allocation2 + $0x7d0] sm:$0xf]  ;;  %v7005_v21 = vld [vmem:[#allocation2 + $0x794] sm:$0xf0]  ;;  %v5724_v3 = vld [vmem:[#allocation2 + $0x960] sm:$0xf] }
  0x71   :  { %3363 = vmatpush.bf16.msra.mxu0 %v5045_v37  ;;  %v6963_v37 = vld [vmem:[#allocation2 + $0x644] sm:$0xf0]  ;;  %v5525_v40 = vor.u32 %v7013_v26, %v5524_v24  ;;  %v5428_v18 = vld [vmem:[#allocation2 + $0x710] sm:$0xf]  ;;  %v5356_v26 = vld [vmem:[#allocation2 + $0x680] sm:$0xf] }
  0x72   :  { %3376 = vmatpush.bf16.msra.mxu1 %v5109_v41  ;;  %v6979_v41 = vld [vmem:[#allocation2 + $0x6c4] sm:$0xf0] }
  0x73   :  { %3389 = vmatpush.bf16.msra.mxu2 %v5173_v42  ;;  %v5452_v42 = vld [vmem:[#allocation2 + $0x740] sm:$0xf]  ;;  %v5389_v47 = vor.u32 %v6979_v41, %v5388_v39  ;;  %v5604_v41 = vld [vmem:[#allocation2 + $0x870] sm:$0xf] }
  0x74   :  { %3402 = vmatpush.bf16.msra.mxu3 %v5237_v46  ;;  %v5325_v46 = vor.u32 %v6963_v37, %v5324_v36  ;;  %v5453_v48 = vor.u32 %v6995_v43, %v5452_v42  ;;  %v5429_v37 = vor.u32 %v6989_v19, %v5428_v18  ;;  %v5484_v39 = vld [vmem:[#allocation2 + $0x780] sm:$0xf]  ;;  %v7033_v42 = vld [vmem:[#allocation2 + $0x874] sm:$0xf0]  ;;  %v5716_v19 = vld [vmem:[#allocation2 + $0x950] sm:$0xf] }
  0x75   :  { %3364 = vmatpush.bf16.msra.mxu0 %v5037_v53  ;;  %v6977_v53 = vld [vmem:[#allocation2 + $0x6b4] sm:$0xf0] }
  0x76   :  { %3377 = vmatpush.bf16.msra.mxu1 %v5101_v57  ;;  %v7009_v57 = vld [vmem:[#allocation2 + $0x7b4] sm:$0xf0]  ;;  %v5381_v59 = vor.u32 %v6977_v53, %v5380_v51  ;;  %v5293_v51 = vor.u32 %v6955_v23, %v5292_v22 }
  0x77   :  { %3390 = vmatpush.bf16.msra.mxu2 %v5165_v58  ;;  %v5317_v58 = vor.u32 %v6961_v50, %v5316_v49  ;;  %v7603_v49 = vld [vmem:[#allocation1 + $0x3f] sm:$0xff]  ;;  %v101_v50 = vld [vmem:[%s7759_s0 + $0x10] sm:$0xff] }
  0x78   :  { %3403 = vmatpush.bf16.msra.mxu3 %v5229_v61  ;;  %3365 = vmatmul.bf16.vlgmr.msra.gmra.mxu0 %v7585_v8  ;;  %v5308_v61 = vld [vmem:[#allocation2 + $0x620] sm:$0xf]  ;;  %v7065_v53 = vld [vmem:[#allocation2 + $0x974] sm:$0xf0] }
  0x79   :  { %3409 = vmatpush.bf16.msrb.mxu0 %v5349_v62  ;;  %3378 = vmatmul.bf16.vlgmr.msra.gmra.mxu1 %v7589_v12  ;;  %v6959_v62 = vld [vmem:[#allocation2 + $0x624] sm:$0xf0]  ;;  %v7045_v18 = vld [vmem:[#allocation2 + $0x8d4] sm:$0xf0] }
  0x7a   :  { %3422 = vmatpush.bf16.msrb.mxu1 %v5413_v63  ;;  %3391 = vmatmul.bf16.vlgmr.msra.gmra.mxu2 %v7587_v11  ;;  %v5372_v63 = vld [vmem:[#allocation2 + $0x6a0] sm:$0xf]  ;;  %v5309_v6 = vor.u32 %v6959_v62, %v5308_v61  ;;  %v7077_v22 = vld [vmem:[#allocation2 + $0x9d4] sm:$0xf0] }
  0x7b   :  { %3435 = vmatpush.bf16.msrb.mxu2 %v5477_v0  ;;  %3404 = vmatmul.bf16.vlgmr.msra.gmra.mxu3 %v7591_v15  ;;  %v5509_v0 = vor.u32 %v7009_v57, %v5508_v56  ;;  %v5373_v9 = vor.u32 %v6975_v1, %v5372_v63  ;;  %v5796_v56 = vld [vmem:[#allocation2 + $0x9f0] sm:$0xf]  ;;  %v7081_v57 = vld [vmem:[#allocation2 + $0x9f4] sm:$0xf0]  ;;  %v5596_v62 = vld [vmem:[#allocation2 + $0x860] sm:$0xf] }
  0x7c   :  { %3448 = vmatpush.bf16.msrb.mxu3 %v5541_v4  ;;  %v5500_v4 = vld [vmem:[#allocation2 + $0x7a0] sm:$0xf]  ;;  %v7031_v63 = vld [vmem:[#allocation2 + $0x864] sm:$0xf0]  ;;  %v5797_v1 = vor.u32 %v7081_v57, %v5796_v56  ;;  %v7057_v56 = vld [vmem:[#allocation2 + $0x934] sm:$0xf0] }
  0x7d   :  { %3410 = vmatpush.bf16.msrb.mxu0 %v5341_v13  ;;  %v6957_v13 = vld [vmem:[#allocation2 + $0x614] sm:$0xf0]  ;;  %v5764_v57 = vld [vmem:[#allocation2 + $0x9b0] sm:$0xf] }
  0x7e   :  { %3423 = vmatpush.bf16.msrb.mxu1 %v5405_v16  ;;  %v6973_v16 = vld [vmem:[#allocation2 + $0x694] sm:$0xf0]  ;;  %v5301_v24 = vor.u32 %v6957_v13, %v5300_v7  ;;  %v5597_v7 = vor.u32 %v7031_v63, %v5596_v62  ;;  %v5588_v13 = vld [vmem:[#allocation2 + $0x850] sm:$0xf]  ;;  %v5564_v62 = vld [vmem:[#allocation2 + $0x820] sm:$0xf] }
  0x7f   :  { %3436 = vmatpush.bf16.msrb.mxu2 %v5469_v17  ;;  %v5501_v17 = vor.u32 %v7007_v5, %v5500_v4  ;;  %v5365_v36 = vor.u32 %v6973_v16, %v5364_v14  ;;  %v7063_v4 = vld [vmem:[#allocation2 + $0x964] sm:$0xf0]  ;;  %v5788_v5 = vld [vmem:[#allocation2 + $0x9e0] sm:$0xf]  ;;  %v7029_v14 = vld [vmem:[#allocation2 + $0x854] sm:$0xf0] }
  0x80   :  { %3449 = vmatpush.bf16.msrb.mxu3 %v5533_v20  ;;  %v5492_v20 = vld [vmem:[#allocation2 + $0x790] sm:$0xf]  ;;  %v5589_v23 = vor.u32 %v7029_v14, %v5588_v13  ;;  %v7023_v63 = vld [vmem:[#allocation2 + $0x824] sm:$0xf0]  ;;  %v7021_v14 = vld [vmem:[#allocation2 + $0x814] sm:$0xf0] }
  0x81   :  { %3411 = vmatpush.bf16.msrb.mxu0 %v5333_v30  ;;  %v6971_v30 = vld [vmem:[#allocation2 + $0x684] sm:$0xf0]  ;;  %v5493_v43 = vor.u32 %v7005_v21, %v5492_v20  ;;  %v5652_v16 = vld [vmem:[#allocation2 + $0x8d0] sm:$0xf]  ;;  %v7061_v20 = vld [vmem:[#allocation2 + $0x954] sm:$0xf0] }
  0x82   :  { %3424 = vmatpush.bf16.msrb.mxu1 %v5397_v33  ;;  %v5420_v33 = vld [vmem:[#allocation2 + $0x700] sm:$0xf]  ;;  %v5357_v54 = vor.u32 %v6971_v30, %v5356_v26  ;;  %v5780_v21 = vld [vmem:[#allocation2 + $0x9d0] sm:$0xf]  ;;  %v5717_v26 = vor.u32 %v7061_v20, %v5716_v19  ;;  %v7053_v20 = vld [vmem:[#allocation2 + $0x914] sm:$0xf0] }
  0x83   :  { %3437 = vmatpush.bf16.msrb.mxu2 %v5461_v35  ;;  %v6987_v35 = vld [vmem:[#allocation2 + $0x704] sm:$0xf0]  ;;  %v5580_v30 = vld [vmem:[#allocation2 + $0x840] sm:$0xf]  ;;  %v5556_v13 = vld [vmem:[#allocation2 + $0x810] sm:$0xf] }
  0x84   :  { %3450 = vmatpush.bf16.msrb.mxu3 %v5525_v40  ;;  %v7003_v40 = vld [vmem:[#allocation2 + $0x784] sm:$0xf0]  ;;  %v5421_v55 = vor.u32 %v6987_v35, %v5420_v33  ;;  %v5644_v35 = vld [vmem:[#allocation2 + $0x8c0] sm:$0xf]  ;;  %v5684_v19 = vld [vmem:[#allocation2 + $0x910] sm:$0xf] }
  0x85   :  { %3412 = vmatpush.bf16.msrb.mxu0 %v5325_v46  ;;  %v7597_v46 = vld [vmem:[#allocation1 + $0x24] sm:$0xff]  ;;  %v7027_v33 = vld [vmem:[#allocation2 + $0x844] sm:$0xf0] }
  0x86   :  { %3425 = vmatpush.bf16.msrb.mxu1 %v5389_v47  ;;  %v7599_v47 = vld [vmem:[#allocation1 + $0x36] sm:$0xff] }
  0x87   :  { %3438 = vmatpush.bf16.msrb.mxu2 %v5453_v48  ;;  %v7601_v48 = vld [vmem:[#allocation1 + $0x2d] sm:$0xff] }
  0x88   :  { %3451 = vmatpush.bf16.msrb.mxu3 %v5517_v52  ;;  %v5732_v52 = vld [vmem:[#allocation2 + $0x970] sm:$0xf]  ;;  %642 = vst [vmem:[#allocation1] ss:$9 sm:$0xff] %v101_v50 }
  0x89   :  { %3413 = vmatpush.bf16.msrb.mxu0 %v5317_v58  ;;  %v5485_v58 = vor.u32 %v7003_v40, %v5484_v39  ;;  %v5733_v61 = vor.u32 %v7065_v53, %v5732_v52  ;;  %v5708_v39 = vld [vmem:[#allocation2 + $0x940] sm:$0xf]  ;;  %v7059_v40 = vld [vmem:[#allocation2 + $0x944] sm:$0xf0]  ;;  %v5572_v50 = vld [vmem:[#allocation2 + $0x830] sm:$0xf] }
  0x8a   :  { %3426 = vmatpush.bf16.msrb.mxu1 %v5381_v59  ;;  %v5605_v59 = vor.u32 %v7033_v42, %v5604_v41  ;;  %v5772_v41 = vld [vmem:[#allocation2 + $0x9c0] sm:$0xf]  ;;  %v7075_v42 = vld [vmem:[#allocation2 + $0x9c4] sm:$0xf0]  ;;  %v5636_v52 = vld [vmem:[#allocation2 + $0x8b0] sm:$0xf] }
  0x8b   :  { %3439 = vmatpush.bf16.msrb.mxu2 %v5445_v60  ;;  %v5669_v60 = vor.u32 %v7049_v45, %v5668_v44  ;;  %v5709_v45 = vor.u32 %v7059_v40, %v5708_v39  ;;  %v5773_v53 = vor.u32 %v7075_v42, %v5772_v41  ;;  %v7051_v40 = vld [vmem:[#allocation2 + $0x904] sm:$0xf0]  ;;  %v5740_v41 = vld [vmem:[#allocation2 + $0x980] sm:$0xf] }
  0x8c   :  { %3452 = vmatpush.bf16.msrb.mxu3 %v5509_v0  ;;  %v5660_v0 = vld [vmem:[#allocation2 + $0x8e0] sm:$0xf]  ;;  %v7067_v42 = vld [vmem:[#allocation2 + $0x984] sm:$0xf0] }
  0x8d   :  { %3414 = vmatpush.bf16.msrb.mxu0 %v5309_v6  ;;  %v7079_v6 = vld [vmem:[#allocation2 + $0x9e4] sm:$0xf0] }
  0x8e   :  { %3427 = vmatpush.bf16.msrb.mxu1 %v5373_v9  ;;  %v5661_v9 = vor.u32 %v7047_v2, %v5660_v0  ;;  %v5628_v0 = vld [vmem:[#allocation2 + $0x8a0] sm:$0xf]  ;;  %v7039_v2 = vld [vmem:[#allocation2 + $0x8a4] sm:$0xf0] }
  0x8f   :  { %3440 = vmatpush.bf16.msrb.mxu2 %v5437_v10  ;;  %v5725_v10 = vor.u32 %v7063_v4, %v5724_v3  ;;  %v5692_v3 = vld [vmem:[#allocation2 + $0x920] sm:$0xf]  ;;  %v7055_v4 = vld [vmem:[#allocation2 + $0x924] sm:$0xf0] }
  0x90   :  { %3453 = vmatpush.bf16.msrb.mxu3 %v5501_v17  ;;  %v5789_v17 = vor.u32 %v7079_v6, %v5788_v5  ;;  %v5756_v5 = vld [vmem:[#allocation2 + $0x9a0] sm:$0xf]  ;;  %v7071_v6 = vld [vmem:[#allocation2 + $0x9a4] sm:$0xf0] }
  0x91   :  { %3415 = vmatpush.bf16.msrb.mxu0 %v5301_v24  ;;  %v5653_v24 = vor.u32 %v7045_v18, %v5652_v16  ;;  %v5620_v16 = vld [vmem:[#allocation2 + $0x890] sm:$0xf]  ;;  %v7037_v18 = vld [vmem:[#allocation2 + $0x894] sm:$0xf0] }
  0x92   :  { %3428 = vmatpush.bf16.msrb.mxu1 %v5365_v36  ;;  %v5781_v36 = vor.u32 %v7077_v22, %v5780_v21  ;;  %v5748_v21 = vld [vmem:[#allocation2 + $0x990] sm:$0xf]  ;;  %v7069_v22 = vld [vmem:[#allocation2 + $0x994] sm:$0xf0] }
  0x93   :  { %3441 = vmatpush.bf16.msrb.mxu2 %v5429_v37  ;;  %v7043_v37 = vld [vmem:[#allocation2 + $0x8c4] sm:$0xf0]  ;;  %v5749_v39 = vor.u32 %v7069_v22, %v5748_v21  ;;  %v7109_v22 = vld [vmem:[#allocation2 + $0xad4] sm:$0xf0] }
  0x94   :  { %3454 = vmatpush.bf16.msrb.mxu3 %v5493_v43  ;;  %v5581_v43 = vor.u32 %v7027_v33, %v5580_v30  ;;  %v5645_v44 = vor.u32 %v7043_v37, %v5644_v35  ;;  %v5621_v30 = vor.u32 %v7037_v18, %v5620_v16  ;;  %v5685_v33 = vor.u32 %v7053_v20, %v5684_v19  ;;  %v5612_v35 = vld [vmem:[#allocation2 + $0x880] sm:$0xf]  ;;  %v5844_v18 = vld [vmem:[#allocation2 + $0xa50] sm:$0xf]  ;;  %v7093_v19 = vld [vmem:[#allocation2 + $0xa54] sm:$0xf0] }
  0x95   :  { %3416 = vmatpush.bf16.msrb.mxu0 %v5293_v51  ;;  %v7025_v51 = vld [vmem:[#allocation2 + $0x834] sm:$0xf0]  ;;  %v5676_v37 = vld [vmem:[#allocation2 + $0x900] sm:$0xf]  ;;  %v5908_v20 = vld [vmem:[#allocation2 + $0xad0] sm:$0xf] }
  0x96   :  { %3429 = vmatpush.bf16.msrb.mxu1 %v5357_v54  ;;  %v7041_v54 = vld [vmem:[#allocation2 + $0x8b4] sm:$0xf0] }
  0x97   :  { %3442 = vmatpush.bf16.msrb.mxu2 %v5421_v55  ;;  %v5700_v55 = vld [vmem:[#allocation2 + $0x930] sm:$0xf] }
  0x98   :  { %3455 = vmatpush.bf16.msrb.mxu3 %v5485_v58  ;;  %3417 = vmatmul.bf16.vlgmr.msrb.gmra.mxu0 %v7597_v46  ;;  %v7073_v58 = vld [vmem:[#allocation2 + $0x9b4] sm:$0xf0] }
  0x99   :  { %3461 = vmatpush.bf16.msra.mxu0 %v5605_v59  ;;  %3430 = vmatmul.bf16.vlgmr.msrb.gmra.mxu1 %v7601_v48  ;;  %v5573_v59 = vor.u32 %v7025_v51, %v5572_v50  ;;  %v7113_v51 = vld [vmem:[#allocation2 + $0xaf4] sm:$0xf0] }
  0x9a   :  { %3474 = vmatpush.bf16.msra.mxu1 %v5669_v60  ;;  %3443 = vmatmul.bf16.vlgmr.msrb.gmra.mxu2 %v7599_v47  ;;  %v5637_v60 = vor.u32 %v7041_v54, %v5636_v52  ;;  %v5988_v52 = vld [vmem:[#allocation2 + $0xb70] sm:$0xf] }
  0x9b   :  { %3487 = vmatpush.bf16.msra.mxu2 %v5733_v61  ;;  %3456 = vmatmul.bf16.vlgmr.msrb.gmra.mxu3 %v7603_v49  ;;  %v5701_v61 = vor.u32 %v7057_v56, %v5700_v55  ;;  %v5677_v55 = vor.u32 %v7051_v40, %v5676_v37  ;;  %v6052_v56 = vld [vmem:[#allocation2 + $0xbf0] sm:$0xf]  ;;  %v5836_v37 = vld [vmem:[#allocation2 + $0xa40] sm:$0xf] }
  0x9c   :  { %3500 = vmatpush.bf16.msra.mxu3 %v5797_v1  ;;  %v5765_v1 = vor.u32 %v7073_v58, %v5764_v57  ;;  %v7145_v57 = vld [vmem:[#allocation2 + $0xbf4] sm:$0xf0]  ;;  %v5741_v58 = vor.u32 %v7067_v42, %v5740_v41  ;;  %v5900_v40 = vld [vmem:[#allocation2 + $0xac0] sm:$0xf]  ;;  %v7107_v42 = vld [vmem:[#allocation2 + $0xac4] sm:$0xf0] }
  0x9d   :  { %3462 = vmatpush.bf16.msra.mxu0 %v5597_v7  ;;  %v5565_v7 = vor.u32 %v7023_v63, %v5564_v62  ;;  %v5852_v62 = vld [vmem:[#allocation2 + $0xa60] sm:$0xf]  ;;  %v7095_v63 = vld [vmem:[#allocation2 + $0xa64] sm:$0xf0] }
  0x9e   :  { %3475 = vmatpush.bf16.msra.mxu1 %v5661_v9  ;;  %v5629_v9 = vor.u32 %v7039_v2, %v5628_v0  ;;  %v5916_v0 = vld [vmem:[#allocation2 + $0xae0] sm:$0xf]  ;;  %v7111_v2 = vld [vmem:[#allocation2 + $0xae4] sm:$0xf0] }
  0x9f   :  { %3488 = vmatpush.bf16.msra.mxu2 %v5725_v10  ;;  %v5693_v10 = vor.u32 %v7055_v4, %v5692_v3  ;;  %v5980_v3 = vld [vmem:[#allocation2 + $0xb60] sm:$0xf]  ;;  %v7127_v4 = vld [vmem:[#allocation2 + $0xb64] sm:$0xf0]  ;;  %v5917_v16 = vor.u32 %v7111_v2, %v5916_v0 }
  0xa0   :  { %3501 = vmatpush.bf16.msra.mxu3 %v5789_v17  ;;  %v5757_v17 = vor.u32 %v7071_v6, %v5756_v5  ;;  %v7612_v5 = vld [vmem:[#allocation1] sm:$0xff]  ;;  %v6044_v6 = vld [vmem:[#allocation2 + $0xbe0] sm:$0xf] }
  0xa1   :  { %3463 = vmatpush.bf16.msra.mxu0 %v5589_v23  ;;  %v5557_v23 = vor.u32 %v7021_v14, %v5556_v13  ;;  %v7618_v13 = vld [vmem:[#allocation1 + $0x1b] sm:$0xff]  ;;  %v5853_v14 = vor.u32 %v7095_v63, %v5852_v62  ;;  %v5820_v0 = vld [vmem:[#allocation2 + $0xa20] sm:$0xf] }
  0xa2   :  { %3476 = vmatpush.bf16.msra.mxu1 %v5653_v24  ;;  %v5548_v24 = vld [vmem:[#allocation2 + $0x800] sm:$0xf]  ;;  %v7137_v62 = vld [vmem:[#allocation2 + $0xbb4] sm:$0xf0] }
  0xa3   :  { %3489 = vmatpush.bf16.msra.mxu2 %v5717_v26  ;;  %v7019_v26 = vld [vmem:[#allocation2 + $0x804] sm:$0xf0] }
  0xa4   :  { %3502 = vmatpush.bf16.msra.mxu3 %v5781_v36  ;;  %v7035_v36 = vld [vmem:[#allocation2 + $0x884] sm:$0xf0]  ;;  %v5549_v50 = vor.u32 %v7019_v26, %v5548_v24  ;;  %v7125_v24 = vld [vmem:[#allocation2 + $0xb54] sm:$0xf0]  ;;  %v6036_v26 = vld [vmem:[#allocation2 + $0xbd0] sm:$0xf] }
  0xa5   :  { %3464 = vmatpush.bf16.msra.mxu0 %v5581_v43  ;;  %v5860_v43 = vld [vmem:[#allocation2 + $0xa70] sm:$0xf]  ;;  %v5613_v54 = vor.u32 %v7035_v36, %v5612_v35  ;;  %v5909_v35 = vor.u32 %v7109_v22, %v5908_v20  ;;  %v7085_v22 = vld [vmem:[#allocation2 + $0xa14] sm:$0xf0] }
  0xa6   :  { %3477 = vmatpush.bf16.msra.mxu1 %v5645_v44  ;;  %v7097_v44 = vld [vmem:[#allocation2 + $0xa74] sm:$0xf0] }
  0xa7   :  { %3490 = vmatpush.bf16.msra.mxu2 %v5709_v45  ;;  %v5924_v45 = vld [vmem:[#allocation2 + $0xaf0] sm:$0xf] }
  0xa8   :  { %3503 = vmatpush.bf16.msra.mxu3 %v5773_v53  ;;  %v7129_v53 = vld [vmem:[#allocation2 + $0xb74] sm:$0xf0] }
  0xa9   :  { %3465 = vmatpush.bf16.msra.mxu0 %v5573_v59  ;;  %v5861_v59 = vor.u32 %v7097_v44, %v5860_v43  ;;  %v5964_v43 = vld [vmem:[#allocation2 + $0xb40] sm:$0xf]  ;;  %v7123_v44 = vld [vmem:[#allocation2 + $0xb44] sm:$0xf0] }
  0xaa   :  { %3478 = vmatpush.bf16.msra.mxu1 %v5637_v60  ;;  %v5925_v60 = vor.u32 %v7113_v51, %v5924_v45  ;;  %v6028_v45 = vld [vmem:[#allocation2 + $0xbc0] sm:$0xf] }
  0xab   :  { %3491 = vmatpush.bf16.msra.mxu2 %v5701_v61  ;;  %v5989_v61 = vor.u32 %v7129_v53, %v5988_v52  ;;  %v5901_v52 = vor.u32 %v7107_v42, %v5900_v40  ;;  %v5965_v53 = vor.u32 %v7123_v44, %v5964_v43  ;;  %v7133_v40 = vld [vmem:[#allocation2 + $0xb94] sm:$0xf0]  ;;  %v7083_v42 = vld [vmem:[#allocation2 + $0xa04] sm:$0xf0]  ;;  %v5868_v44 = vld [vmem:[#allocation2 + $0xa80] sm:$0xf] }
  0xac   :  { %3504 = vmatpush.bf16.msra.mxu3 %v5765_v1  ;;  %v6053_v1 = vor.u32 %v7145_v57, %v6052_v56  ;;  %v5892_v56 = vld [vmem:[#allocation2 + $0xab0] sm:$0xf] }
  0xad   :  { %3466 = vmatpush.bf16.msra.mxu0 %v5565_v7  ;;  %v7143_v7 = vld [vmem:[#allocation2 + $0xbe4] sm:$0xf0] }
  0xae   :  { %3479 = vmatpush.bf16.msra.mxu1 %v5629_v9  ;;  %v7614_v9 = vld [vmem:[#allocation1 + $0x12] sm:$0xff]  ;;  %v6045_v21 = vor.u32 %v7143_v7, %v6044_v6 }
  0xaf   :  { %3492 = vmatpush.bf16.msra.mxu2 %v5693_v10  ;;  %v7616_v10 = vld [vmem:[#allocation1 + $0x9] sm:$0xff] }
  0xb0   :  { %3505 = vmatpush.bf16.msra.mxu3 %v5757_v17  ;;  %v5981_v17 = vor.u32 %v7127_v4, %v5980_v3  ;;  %v7087_v3 = vld [vmem:[#allocation2 + $0xa24] sm:$0xf0]  ;;  %v5884_v4 = vld [vmem:[#allocation2 + $0xaa0] sm:$0xf] }
  0xb1   :  { %3467 = vmatpush.bf16.msra.mxu0 %v5557_v23  ;;  %v5972_v23 = vld [vmem:[#allocation2 + $0xb50] sm:$0xf]  ;;  %v7103_v6 = vld [vmem:[#allocation2 + $0xaa4] sm:$0xf0]  ;;  %v5821_v20 = vor.u32 %v7087_v3, %v5820_v0  ;;  %v7624_v0 = vld [vmem:[#allocation1 + $0x24] sm:$0xff] }
  0xb2   :  { %3480 = vmatpush.bf16.msra.mxu1 %v5621_v30  ;;  %v7141_v30 = vld [vmem:[#allocation2 + $0xbd4] sm:$0xf0]  ;;  %v5973_v36 = vor.u32 %v7125_v24, %v5972_v23  ;;  %v5885_v23 = vor.u32 %v7103_v6, %v5884_v4  ;;  %v102_v6 = vld [vmem:[%s7759_s0 + $0x18] sm:$0xff] }
  0xb3   :  { %3493 = vmatpush.bf16.msra.mxu2 %v5685_v33  ;;  %v5845_v33 = vor.u32 %v7093_v19, %v5844_v18  ;;  %v6037_v41 = vor.u32 %v7141_v30, %v6036_v26  ;;  %v6012_v18 = vld [vmem:[#allocation2 + $0xba0] sm:$0xf]  ;;  %v7135_v19 = vld [vmem:[#allocation2 + $0xba4] sm:$0xf0]  ;;  %v5876_v26 = vld [vmem:[#allocation2 + $0xa90] sm:$0xf] }
  0xb4   :  { %3506 = vmatpush.bf16.msra.mxu3 %v5749_v39  ;;  %v7091_v39 = vld [vmem:[#allocation2 + $0xa44] sm:$0xf0]  ;;  %v7101_v30 = vld [vmem:[#allocation2 + $0xa94] sm:$0xf0] }
  0xb5   :  { %3468 = vmatpush.bf16.msra.mxu0 %v5549_v50  ;;  %v7139_v50 = vld [vmem:[#allocation2 + $0xbc4] sm:$0xf0]  ;;  %v5837_v51 = vor.u32 %v7091_v39, %v5836_v37  ;;  %v7117_v37 = vld [vmem:[#allocation2 + $0xb14] sm:$0xf0]  ;;  %v6004_v39 = vld [vmem:[#allocation2 + $0xb90] sm:$0xf] }
  0xb6   :  { %3481 = vmatpush.bf16.msra.mxu1 %v5613_v54  ;;  %v5828_v54 = vld [vmem:[#allocation2 + $0xa30] sm:$0xf]  ;;  %v6029_v57 = vor.u32 %v7139_v50, %v6028_v45  ;;  %v7099_v45 = vld [vmem:[#allocation2 + $0xa84] sm:$0xf0]  ;;  %v5932_v50 = vld [vmem:[#allocation2 + $0xb00] sm:$0xf] }
  0xb7   :  { %3494 = vmatpush.bf16.msra.mxu2 %v5677_v55  ;;  %v7089_v55 = vld [vmem:[#allocation2 + $0xa34] sm:$0xf0] }
  0xb8   :  { %3507 = vmatpush.bf16.msra.mxu3 %v5741_v58  ;;  %3469 = vmatmul.bf16.vlgmr.msra.gmra.mxu0 %v7612_v5  ;;  %v7105_v58 = vld [vmem:[#allocation2 + $0xab4] sm:$0xf0]  ;;  %v5829_v63 = vor.u32 %v7089_v55, %v5828_v54  ;;  %v5996_v55 = vld [vmem:[#allocation2 + $0xb80] sm:$0xf] }
  0xb9   :  { %3513 = vmatpush.bf16.msrb.mxu0 %v5861_v59  ;;  %3482 = vmatmul.bf16.vlgmr.msra.gmra.mxu1 %v7616_v10  ;;  %v5956_v59 = vld [vmem:[#allocation2 + $0xb30] sm:$0xf]  ;;  %v7630_v3 = vld [vmem:[#allocation1 + $0x3f] sm:$0xff] }
  0xba   :  { %3526 = vmatpush.bf16.msrb.mxu1 %v5925_v60  ;;  %3495 = vmatmul.bf16.vlgmr.msra.gmra.mxu2 %v7614_v9  ;;  %v7121_v60 = vld [vmem:[#allocation2 + $0xb34] sm:$0xf0] }
  0xbb   :  { %3539 = vmatpush.bf16.msrb.mxu2 %v5989_v61  ;;  %3508 = vmatmul.bf16.vlgmr.msra.gmra.mxu3 %v7618_v13  ;;  %v6020_v61 = vld [vmem:[#allocation2 + $0xbb0] sm:$0xf]  ;;  %v5957_v2 = vor.u32 %v7121_v60, %v5956_v59 }
  0xbc   :  { %3552 = vmatpush.bf16.msrb.mxu3 %v6053_v1  ;;  %v5893_v1 = vor.u32 %v7105_v58, %v5892_v56  ;;  %v6021_v7 = vor.u32 %v7137_v62, %v6020_v61  ;;  %v7131_v56 = vld [vmem:[#allocation2 + $0xb84] sm:$0xf0]  ;;  %v7161_v58 = vld [vmem:[#allocation2 + $0xc74] sm:$0xf0]  ;;  %v6005_v61 = vor.u32 %v7133_v40, %v6004_v39  ;;  %v6180_v62 = vld [vmem:[#allocation2 + $0xcf0] sm:$0xf] }
  0xbd   :  { %3514 = vmatpush.bf16.msrb.mxu0 %v5853_v14  ;;  %v5948_v14 = vld [vmem:[#allocation2 + $0xb20] sm:$0xf]  ;;  %v3275_v60 = vpop.f32.mrf.mxu1  ;;  %v7175_v40 = vld [vmem:[#allocation2 + $0xce4] sm:$0xf0] }
  0xbe   :  { %3527 = vmatpush.bf16.msrb.mxu1 %v5917_v16  ;;  %v7119_v16 = vld [vmem:[#allocation2 + $0xb24] sm:$0xf0] }
  0xbf   :  { %3540 = vmatpush.bf16.msrb.mxu2 %v5981_v17  ;;  %v615_v17 = vld [vmem:[#allocation5] sm:$0x3]  ;;  %v5949_v24 = vor.u32 %v7119_v16, %v5948_v14  ;;  %v6244_v14 = vld [vmem:[#allocation2 + $0xd70] sm:$0xf]  ;;  %v7193_v16 = vld [vmem:[#allocation2 + $0xd74] sm:$0xf0] }
  0xc0   :  { %3553 = vmatpush.bf16.msrb.mxu3 %v6045_v21  ;;  %v5812_v21 = vld [vmem:[#allocation2 + $0xa10] sm:$0xf] }
  0xc1   :  { %3515 = vmatpush.bf16.msrb.mxu0 %v5845_v33  ;;  %v617_v33 = vperm.slane %v615_v17, 0  ;;  %v5813_v43 = vor.u32 %v7085_v22, %v5812_v21  ;;  %v5869_v17 = vor.u32 %v7099_v45, %v5868_v44  ;;  %v3288_v21 = vpop.f32.mrf.mxu2  ;;  %v5997_v22 = vor.u32 %v7131_v56, %v5996_v55  ;;  %v6300_v45 = vld [vmem:[#allocation2 + $0xde0] sm:$0xf]  ;;  %v6100_v55 = vld [vmem:[#allocation2 + $0xc50] sm:$0xf] }
  0xc2   :  { %3528 = vmatpush.bf16.msrb.mxu1 %v5909_v35  ;;  %v6013_v35 = vor.u32 %v7135_v19, %v6012_v18  ;;  %v6308_v19 = vld [vmem:[#allocation2 + $0xdf0] sm:$0xf]  ;;  %v7157_v56 = vld [vmem:[#allocation2 + $0xc54] sm:$0xf0] }
  0xc3   :  { %3541 = vmatpush.bf16.msrb.mxu2 %v5973_v36  ;;  %v5940_v36 = vld [vmem:[#allocation2 + $0xb10] sm:$0xf] }
  0xc4   :  { %3554 = vmatpush.bf16.msrb.mxu3 %v6037_v41  ;;  %v5804_v41 = vld [vmem:[#allocation2 + $0xa00] sm:$0xf]  ;;  %v5941_v54 = vor.u32 %v7117_v37, %v5940_v36  ;;  %v7159_v36 = vld [vmem:[#allocation2 + $0xc64] sm:$0xf0] }
  0xc5   :  { %3516 = vmatpush.bf16.msrb.mxu0 %v5837_v51  ;;  %v7115_v51 = vld [vmem:[#allocation2 + $0xb04] sm:$0xf0]  ;;  %v6172_v37 = vld [vmem:[#allocation2 + $0xce0] sm:$0xf] }
  0xc6   :  { %3529 = vmatpush.bf16.msrb.mxu1 %v5901_v52  ;;  %v3262_v52 = vpop.f32.mrf.mxu0  ;;  %v5933_v18 = vor.u32 %v7115_v51, %v5932_v50  ;;  %v7207_v50 = vld [vmem:[#allocation2 + $0xde4] sm:$0xf0]  ;;  %v3277_v51 = vpop.f32.mrf.mxu1 }
  0xc7   :  { %3542 = vmatpush.bf16.msrb.mxu2 %v5965_v53  ;;  %v5877_v53 = vor.u32 %v7101_v30, %v5876_v26  ;;  %v3263_v59 = vadd.f32 %v3262_v52, %v617_v33  ;;  %v3301_v26 = vpop.f32.mrf.mxu3  ;;  %v6245_v33 = vor.u32 %v7193_v16, %v6244_v14  ;;  %v7185_v51 = vld [vmem:[#allocation2 + $0xd34] sm:$0xf0] }
  0xc8   :  { %3555 = vmatpush.bf16.msrb.mxu3 %v6029_v57  ;;  %v6116_v57 = vld [vmem:[#allocation2 + $0xc70] sm:$0xf] }
  0xc9   :  { %3517 = vmatpush.bf16.msrb.mxu0 %v5829_v63  ;;  %v7177_v63 = vld [vmem:[#allocation2 + $0xcf4] sm:$0xf0]  ;;  %v3276_v4 = vadd.f32 %v3275_v60, %v3263_v59  ;;  %v6228_v60 = vld [vmem:[#allocation2 + $0xd50] sm:$0xf] }
  0xca   :  { %3530 = vmatpush.bf16.msrb.mxu1 %v5893_v1  ;;  %v7626_v1 = vld [vmem:[#allocation1 + $0x36] sm:$0xff]  ;;  %v6181_v30 = vor.u32 %v7177_v63, %v6180_v62  ;;  %v7173_v59 = vld [vmem:[#allocation2 + $0xcd4] sm:$0xf0] }
  0xcb   :  { %3543 = vmatpush.bf16.msrb.mxu2 %v5957_v2  ;;  %v7628_v2 = vld [vmem:[#allocation1 + $0x2d] sm:$0xff]  ;;  %v6292_v62 = vld [vmem:[#allocation2 + $0xdd0] sm:$0xf]  ;;  %v7205_v63 = vld [vmem:[#allocation2 + $0xdd4] sm:$0xf0] }
  0xcc   :  { %3556 = vmatpush.bf16.msrb.mxu3 %v6021_v7  ;;  %v5805_v7 = vor.u32 %v7083_v42, %v5804_v41  ;;  %652 = vst [vmem:[#allocation1] ss:$9 sm:$0xff] %v102_v6  ;;  %v6236_v41 = vld [vmem:[#allocation2 + $0xd60] sm:$0xf]  ;;  %v7191_v42 = vld [vmem:[#allocation2 + $0xd64] sm:$0xf0]  ;;  %v6101_v6 = vor.u32 %v7157_v56, %v6100_v55 }
  0xcd   :  { %3518 = vmatpush.bf16.msrb.mxu0 %v5821_v20  ;;  %v7209_v20 = vld [vmem:[#allocation2 + $0xdf4] sm:$0xf0] }
  0xce   :  { %3531 = vmatpush.bf16.msrb.mxu1 %v5885_v23  ;;  %v6117_v23 = vor.u32 %v7161_v58, %v6116_v57  ;;  %v6309_v39 = vor.u32 %v7209_v20, %v6308_v19  ;;  %v3264_v44 = vpop.f32.mrf.mxu0  ;;  %v6164_v57 = vld [vmem:[#allocation2 + $0xcd0] sm:$0xf]  ;;  %v6301_v58 = vor.u32 %v7207_v50, %v6300_v45  ;;  %v6156_v19 = vld [vmem:[#allocation2 + $0xcc0] sm:$0xf]  ;;  %v6293_v20 = vor.u32 %v7205_v63, %v6292_v62  ;;  %v7169_v45 = vld [vmem:[#allocation2 + $0xcb4] sm:$0xf0] }
  0xcf   :  { %3544 = vmatpush.bf16.msrb.mxu2 %v5949_v24  ;;  %v3289_v24 = vadd.f32 %v3288_v21, %v3276_v4  ;;  %v3290_v4 = vpop.f32.mrf.mxu2  ;;  %v6165_v14 = vor.u32 %v7173_v59, %v6164_v57  ;;  %v7171_v21 = vld [vmem:[#allocation2 + $0xcc4] sm:$0xf0]  ;;  %v6212_v50 = vld [vmem:[#allocation2 + $0xd30] sm:$0xf]  ;;  %v6204_v63 = vld [vmem:[#allocation2 + $0xd20] sm:$0xf] }
  0xd0   :  { %3557 = vmatpush.bf16.msrb.mxu3 %v6013_v35  ;;  %v6108_v35 = vld [vmem:[#allocation2 + $0xc60] sm:$0xf]  ;;  %v6213_v57 = vor.u32 %v7185_v51, %v6212_v50  ;;  %v7151_v59 = vld [vmem:[#allocation2 + $0xc24] sm:$0xf0] }
  0xd1   :  { %3519 = vmatpush.bf16.msrb.mxu0 %v5813_v43  ;;  %v3302_v43 = vadd.f32 %v3301_v26, %v3289_v24  ;;  %v6109_v52 = vor.u32 %v7159_v36, %v6108_v35  ;;  %v6284_v24 = vld [vmem:[#allocation2 + $0xdc0] sm:$0xf]  ;;  %v7203_v26 = vld [vmem:[#allocation2 + $0xdc4] sm:$0xf0]  ;;  %v6157_v35 = vor.u32 %v7171_v21, %v6156_v19 }
  0xd2   :  { %3532 = vmatpush.bf16.msrb.mxu1 %v5877_v53  ;;  %v6173_v53 = vor.u32 %v7175_v40, %v6172_v37  ;;  %v6084_v37 = vld [vmem:[#allocation2 + $0xc30] sm:$0xf]  ;;  %v6285_v44 = vor.u32 %v7203_v26, %v6284_v24  ;;  %v7167_v62 = vld [vmem:[#allocation2 + $0xca4] sm:$0xf0]  ;;  %v6124_v50 = vld [vmem:[#allocation2 + $0xc80] sm:$0xf] }
  0xd3   :  { %3545 = vmatpush.bf16.msrb.mxu2 %v5941_v54  ;;  %v6237_v54 = vor.u32 %v7191_v42, %v6236_v41  ;;  %v6148_v40 = vld [vmem:[#allocation2 + $0xcb0] sm:$0xf]  ;;  %v7183_v4 = vld [vmem:[#allocation2 + $0xd24] sm:$0xf0] }
  0xd4   :  { %3558 = vmatpush.bf16.msrb.mxu3 %v6005_v61  ;;  %v7189_v61 = vld [vmem:[#allocation2 + $0xd54] sm:$0xf0]  ;;  %v6149_v56 = vor.u32 %v7169_v45, %v6148_v40  ;;  %v6205_v21 = vor.u32 %v7183_v4, %v6204_v63  ;;  %v6132_v24 = vld [vmem:[#allocation2 + $0xc90] sm:$0xf]  ;;  %v7163_v51 = vld [vmem:[#allocation2 + $0xc84] sm:$0xf0] }
  0xd5   :  { %3520 = vmatpush.bf16.msrb.mxu0 %v5805_v7  ;;  %v3303_v7 = vpop.f32.mrf.mxu3  ;;  %v6229_v16 = vor.u32 %v7189_v61, %v6228_v60  ;;  %v6140_v60 = vld [vmem:[#allocation2 + $0xca0] sm:$0xf]  ;;  %v6500_v63 = vld [vmem:[#allocation2 + $0xf70] sm:$0xf]  ;;  %v7257_v4 = vld [vmem:[#allocation2 + $0xf74] sm:$0xf0] }
  0xd6   :  { %3533 = vmatpush.bf16.msrb.mxu1 %v5869_v17  ;;  %v6092_v17 = vld [vmem:[#allocation2 + $0xc40] sm:$0xf]  ;;  %v3327_v42 = vpop.f32.mrf.mxu1 }
  0xd7   :  { %3546 = vmatpush.bf16.msrb.mxu2 %v5933_v18  ;;  %v7155_v18 = vld [vmem:[#allocation2 + $0xc44] sm:$0xf0] }
  0xd8   :  { %3559 = vmatpush.bf16.msrb.mxu3 %v5997_v22  ;;  %3521 = vmatmul.bf16.vlgmr.msrb.gmra.mxu0 %v7624_v0  ;;  %v6220_v22 = vld [vmem:[#allocation2 + $0xd40] sm:$0xf] }
  0xd9   :  { %3565 = vmatpush.bf16.msra.mxu0 %v6117_v23  ;;  %3534 = vmatmul.bf16.vlgmr.msrb.gmra.mxu1 %v7628_v2  ;;  %v7187_v23 = vld [vmem:[#allocation2 + $0xd44] sm:$0xf0] }
  0xda   :  { %3578 = vmatpush.bf16.msra.mxu1 %v6181_v30  ;;  %3547 = vmatmul.bf16.vlgmr.msrb.gmra.mxu2 %v7626_v1  ;;  %v6093_v30 = vor.u32 %v7155_v18, %v6092_v17  ;;  %v6221_v36 = vor.u32 %v7187_v23, %v6220_v22  ;;  %v6068_v22 = vld [vmem:[#allocation2 + $0xc10] sm:$0xf]  ;;  %v7149_v23 = vld [vmem:[#allocation2 + $0xc14] sm:$0xf0] }
  0xdb   :  { %3591 = vmatpush.bf16.msra.mxu2 %v6245_v33  ;;  %3560 = vmatmul.bf16.vlgmr.msrb.gmra.mxu3 %v7630_v3  ;;  %v3314_v33 = vpop.f32.mrf.mxu0  ;;  %v6069_v40 = vor.u32 %v7149_v23, %v6068_v22  ;;  %v6364_v22 = vld [vmem:[#allocation2 + $0xe60] sm:$0xf]  ;;  %v7223_v23 = vld [vmem:[#allocation2 + $0xe64] sm:$0xf0] }
  0xdc   :  { %3604 = vmatpush.bf16.msra.mxu3 %v6309_v39  ;;  %v7153_v39 = vld [vmem:[#allocation2 + $0xc34] sm:$0xf0]  ;;  %v3315_v41 = vadd.f32 %v3314_v33, %v3302_v43 }
  0xdd   :  { %3566 = vmatpush.bf16.msra.mxu0 %v6109_v52  ;;  %v6276_v52 = vld [vmem:[#allocation2 + $0xdb0] sm:$0xf]  ;;  %v6085_v55 = vor.u32 %v7153_v39, %v6084_v37  ;;  %v3340_v61 = vpop.f32.mrf.mxu2  ;;  %v7165_v33 = vld [vmem:[#allocation2 + $0xc94] sm:$0xf0] }
  0xde   :  { %3579 = vmatpush.bf16.msra.mxu1 %v6173_v53  ;;  %v7201_v53 = vld [vmem:[#allocation2 + $0xdb4] sm:$0xf0]  ;;  %v3353_v7 = vpop.f32.mrf.mxu3  ;;  %v3329_v26 = vpop.f32.mrf.mxu1  ;;  %v6260_v37 = vld [vmem:[#allocation2 + $0xd90] sm:$0xf] }
  0xdf   :  { %3592 = vmatpush.bf16.msra.mxu2 %v6237_v54  ;;  %v3328_v54 = vadd.f32 %v3327_v42, %v3315_v41  ;;  %v6277_v43 = vor.u32 %v7201_v53, %v6276_v52  ;;  %v7197_v39 = vld [vmem:[#allocation2 + $0xd94] sm:$0xf0]  ;;  %v6060_v41 = vld [vmem:[#allocation2 + $0xc00] sm:$0xf]  ;;  %v7147_v42 = vld [vmem:[#allocation2 + $0xc04] sm:$0xf0] }
  0xe0   :  { %3605 = vmatpush.bf16.msra.mxu3 %v6301_v58  ;;  %v6076_v58 = vld [vmem:[#allocation2 + $0xc20] sm:$0xf] }
  0xe1   :  { %3567 = vmatpush.bf16.msra.mxu0 %v6101_v6  ;;  %v3341_v6 = vadd.f32 %v3340_v61, %v3328_v54  ;;  %v6077_v17 = vor.u32 %v7151_v59, %v6076_v58  ;;  %v6188_v52 = vld [vmem:[#allocation2 + $0xd00] sm:$0xf]  ;;  %v6261_v54 = vor.u32 %v7197_v39, %v6260_v37  ;;  %v6372_v59 = vld [vmem:[#allocation2 + $0xe70] sm:$0xf]  ;;  %v7271_v39 = vld [vmem:[#allocation2 + $0xfe4] sm:$0xf0] }
  0xe2   :  { %3580 = vmatpush.bf16.msra.mxu1 %v6165_v14  ;;  %v6268_v14 = vld [vmem:[#allocation2 + $0xda0] sm:$0xf]  ;;  %v6436_v61 = vld [vmem:[#allocation2 + $0xef0] sm:$0xf] }
  0xe3   :  { %3593 = vmatpush.bf16.msra.mxu2 %v6229_v16  ;;  %v7199_v16 = vld [vmem:[#allocation2 + $0xda4] sm:$0xf0]  ;;  %v7639_v18 = vadd.f32 %v3353_v7, %v3341_v6  ;;  %v3316_v19 = vpop.f32.mrf.mxu0  ;;  %v6125_v6 = vor.u32 %v7163_v51, %v6124_v50  ;;  %v6556_v37 = vld [vmem:[#allocation2 + $0xfe0] sm:$0xf]  ;;  %v6356_v51 = vld [vmem:[#allocation2 + $0xe50] sm:$0xf] }
  0xe4   :  { %3606 = vmatpush.bf16.msra.mxu3 %v6293_v20  ;;  %v6141_v20 = vor.u32 %v7167_v62, %v6140_v60  ;;  %v7225_v60 = vld [vmem:[#allocation2 + $0xe74] sm:$0xf0] }
  0xe5   :  { %3568 = vmatpush.bf16.msra.mxu0 %v6093_v30  ;;  %v6269_v30 = vor.u32 %v7199_v16, %v6268_v14  ;;  %v3342_v53 = vpop.f32.mrf.mxu2  ;;  %v7241_v62 = vld [vmem:[#allocation2 + $0xef4] sm:$0xf0]  ;;  %v6564_v14 = vld [vmem:[#allocation2 + $0xff0] sm:$0xf]  ;;  %v6373_v19 = vor.u32 %v7225_v60, %v6372_v59 }
  0xe6   :  { %3581 = vmatpush.bf16.msra.mxu1 %v6157_v35  ;;  %v6196_v35 = vld [vmem:[#allocation2 + $0xd10] sm:$0xf]  ;;  %v3355_v58 = vpop.f32.mrf.mxu3  ;;  %v7273_v16 = vld [vmem:[#allocation2 + $0xff4] sm:$0xf0] }
  0xe7   :  { %3594 = vmatpush.bf16.msra.mxu2 %v6221_v36  ;;  %v7181_v36 = vld [vmem:[#allocation2 + $0xd14] sm:$0xf0]  ;;  %v6565_v26 = vor.u32 %v7273_v16, %v6564_v14  ;;  %v6420_v53 = vld [vmem:[#allocation2 + $0xed0] sm:$0xf]  ;;  %v6476_v14 = vld [vmem:[#allocation2 + $0xf40] sm:$0xf] }
  0xe8   :  { %3607 = vmatpush.bf16.msra.mxu3 %v6285_v44  ;;  %v6133_v44 = vor.u32 %v7165_v33, %v6132_v24  ;;  %v6197_v45 = vor.u32 %v7181_v36, %v6196_v35  ;;  %v6428_v24 = vld [vmem:[#allocation2 + $0xee0] sm:$0xf]  ;;  %v7255_v35 = vld [vmem:[#allocation2 + $0xf64] sm:$0xf0]  ;;  %v653_v36 = vld [vmem:[#allocation1] sm:$0xff] }
  0xe9   :  { %3569 = vmatpush.bf16.msra.mxu0 %v6085_v55  ;;  %v7179_v55 = vld [vmem:[#allocation2 + $0xd04] sm:$0xf0]  ;;  %v6492_v33 = vld [vmem:[#allocation2 + $0xf60] sm:$0xf]  ;;  %v6548_v58 = vld [vmem:[#allocation2 + $0xfd0] sm:$0xf] }
  0xea   :  { %3582 = vmatpush.bf16.msra.mxu1 %v6149_v56  ;;  %v6252_v56 = vld [vmem:[#allocation2 + $0xd80] sm:$0xf]  ;;  %v6189_v7 = vor.u32 %v7179_v55, %v6188_v52  ;;  %v6493_v50 = vor.u32 %v7255_v35, %v6492_v33  ;;  %v7221_v52 = vld [vmem:[#allocation2 + $0xe54] sm:$0xf0]  ;;  %v7251_v16 = vld [vmem:[#allocation2 + $0xf44] sm:$0xf0] }
  0xeb   :  { %3595 = vmatpush.bf16.msra.mxu2 %v6213_v57  ;;  %v7195_v57 = vld [vmem:[#allocation2 + $0xd84] sm:$0xf0]  ;;  %v7237_v55 = vld [vmem:[#allocation2 + $0xed4] sm:$0xf0]  ;;  %v6357_v60 = vor.u32 %v7221_v52, %v6356_v51  ;;  %v6404_v35 = vld [vmem:[#allocation2 + $0xeb0] sm:$0xf] }
  0xec   :  { %3608 = vmatpush.bf16.msra.mxu3 %v6277_v43  ;;  %v6061_v43 = vor.u32 %v7147_v42, %v6060_v41  ;;  %v654_v41 = vld [vmem:[#allocation1 + $0x9] sm:$0xff]  ;;  %v656_v42 = vld [vmem:[#allocation1 + $0x1b] sm:$0xff] }
  0xed   :  { %3570 = vmatpush.bf16.msra.mxu0 %v6077_v17  ;;  %v6253_v17 = vor.u32 %v7195_v57, %v6252_v56  ;;  %v6484_v56 = vld [vmem:[#allocation2 + $0xf50] sm:$0xf]  ;;  %v7253_v57 = vld [vmem:[#allocation2 + $0xf54] sm:$0xf0]  ;;  %v6332_v51 = vld [vmem:[#allocation2 + $0xe20] sm:$0xf] }
  0xee   :  { %3583 = vmatpush.bf16.msra.mxu1 %v6141_v20  ;;  %v6437_v20 = vor.u32 %v7241_v62, %v6436_v61  ;;  %v7269_v59 = vld [vmem:[#allocation2 + $0xfd4] sm:$0xf0]  ;;  %v6421_v61 = vor.u32 %v7237_v55, %v6420_v53  ;;  %v6348_v62 = vld [vmem:[#allocation2 + $0xe40] sm:$0xf]  ;;  %v7215_v52 = vld [vmem:[#allocation2 + $0xe24] sm:$0xf0] }
  0xef   :  { %3596 = vmatpush.bf16.msra.mxu2 %v6205_v21  ;;  %v6501_v21 = vor.u32 %v7257_v4, %v6500_v63  ;;  %v7219_v63 = vld [vmem:[#allocation2 + $0xe44] sm:$0xf0]  ;;  %v6412_v4 = vld [vmem:[#allocation2 + $0xec0] sm:$0xf]  ;;  %v7217_v33 = vld [vmem:[#allocation2 + $0xe34] sm:$0xf0] }
  0xf0   :  { %3609 = vmatpush.bf16.msra.mxu3 %v6269_v30  ;;  %v7239_v30 = vld [vmem:[#allocation2 + $0xee4] sm:$0xf0]  ;;  %v6396_v53 = vld [vmem:[#allocation2 + $0xea0] sm:$0xf] }
  0xf1   :  { %3571 = vmatpush.bf16.msra.mxu0 %v6069_v40  ;;  %v655_v40 = vld [vmem:[#allocation1 + $0x12] sm:$0xff] }
  0xf2   :  { %3584 = vmatpush.bf16.msra.mxu1 %v6133_v44  ;;  %v6365_v44 = vor.u32 %v7223_v23, %v6364_v22  ;;  %v6349_v22 = vor.u32 %v7219_v63, %v6348_v62  ;;  %v6333_v63 = vor.u32 %v7215_v52, %v6332_v51  ;;  %v6776_v51 = vld [vmem:[#allocation2 + $0x74] sm:$0xf]  ;;  %v4582_v52 = vld [vmem:[#allocation2 + $0x78] sm:$0xf0] }
  0xf3   :  { %3597 = vmatpush.bf16.msra.mxu2 %v6197_v45  ;;  %v6429_v45 = vor.u32 %v7239_v30, %v6428_v24  ;;  %v6340_v30 = vld [vmem:[#allocation2 + $0xe30] sm:$0xf] }
  0xf4   :  { %3610 = vmatpush.bf16.msra.mxu3 %v6261_v54  ;;  %v6557_v54 = vor.u32 %v7271_v39, %v6556_v37  ;;  %v7233_v39 = vld [vmem:[#allocation2 + $0xeb4] sm:$0xf0] }
  0xf5   :  { %3572 = vmatpush.bf16.msra.mxu0 %v6061_v43  ;;  %v6485_v43 = vor.u32 %v7253_v57, %v6484_v56  ;;  %v7231_v56 = vld [vmem:[#allocation2 + $0xea4] sm:$0xf0]  ;;  %v6460_v57 = vld [vmem:[#allocation2 + $0xf20] sm:$0xf] }
  0xf6   :  { %3585 = vmatpush.bf16.msra.mxu1 %v6125_v6  ;;  %v6549_v6 = vor.u32 %v7269_v59, %v6548_v58  ;;  %v3379_v23 = vpop.f32.mrf.mxu1  ;;  %v7247_v58 = vld [vmem:[#allocation2 + $0xf24] sm:$0xf0] }
  0xf7   :  { %3598 = vmatpush.bf16.msra.mxu2 %v6189_v7  ;;  %v7235_v7 = vld [vmem:[#allocation2 + $0xec4] sm:$0xf0] }
  0xf8   :  { %3611 = vmatpush.bf16.msra.mxu3 %v6253_v17  ;;  %3573 = vmatmul.bf16.vlgmr.msra.gmra.mxu0 %v653_v36  ;;  %v3366_v17 = vpop.f32.mrf.mxu0  ;;  %v6413_v24 = vor.u32 %v7235_v7, %v6412_v4  ;;  %v6397_v7 = vor.u32 %v7231_v56, %v6396_v53  ;;  %v6792_v53 = vld [vmem:[#allocation2 + $0xf4] sm:$0xf]  ;;  %v4646_v56 = vld [vmem:[#allocation2 + $0xf8] sm:$0xf0] }
  0xf9   :  { %3617 = vmatpush.bf16.msrb.mxu0 %v6373_v19  ;;  %3586 = vmatmul.bf16.vlgmr.msra.gmra.mxu1 %v654_v41  ;;  %v6540_v19 = vld [vmem:[#allocation2 + $0xfc0] sm:$0xf]  ;;  %v7249_v41 = vld [vmem:[#allocation2 + $0xf34] sm:$0xf0] }
  0xfa   :  { %3630 = vmatpush.bf16.msrb.mxu1 %v6437_v20  ;;  %3599 = vmatmul.bf16.vlgmr.msra.gmra.mxu2 %v655_v40  ;;  %v7267_v20 = vld [vmem:[#allocation2 + $0xfc4] sm:$0xf0]  ;;  %v6468_v40 = vld [vmem:[#allocation2 + $0xf30] sm:$0xf] }
  0xfb   :  { %3643 = vmatpush.bf16.msrb.mxu2 %v6501_v21  ;;  %3612 = vmatmul.bf16.vlgmr.msra.gmra.mxu3 %v656_v42  ;;  %v3367_v21 = vadd.f32 %v3366_v17, %v7639_v18  ;;  %v6541_v36 = vor.u32 %v7267_v20, %v6540_v19  ;;  %v6532_v42 = vld [vmem:[#allocation2 + $0xfb0] sm:$0xf]  ;;  %v6405_v18 = vor.u32 %v7233_v39, %v6404_v35  ;;  %v7213_v17 = vld [vmem:[#allocation2 + $0xe14] sm:$0xf0]  ;;  %v7211_v35 = vld [vmem:[#allocation2 + $0xe04] sm:$0xf0] }
  0xfc   :  { %3656 = vmatpush.bf16.msrb.mxu3 %v6565_v26  ;;  %v6477_v26 = vor.u32 %v7251_v16, %v6476_v14  ;;  %v6461_v14 = vor.u32 %v7247_v58, %v6460_v57  ;;  %v6324_v16 = vld [vmem:[#allocation2 + $0xe10] sm:$0xf]  ;;  %v6380_v39 = vld [vmem:[#allocation2 + $0xe80] sm:$0xf]  ;;  %v6808_v57 = vld [vmem:[#allocation2 + $0x174] sm:$0xf] }
  0xfd   :  { %3618 = vmatpush.bf16.msrb.mxu0 %v6365_v44  ;;  %v3380_v37 = vadd.f32 %v3379_v23, %v3367_v21  ;;  %v7265_v44 = vld [vmem:[#allocation2 + $0xfb4] sm:$0xf0]  ;;  %v3392_v55 = vpop.f32.mrf.mxu2  ;;  %v6388_v19 = vld [vmem:[#allocation2 + $0xe90] sm:$0xf]  ;;  %v4710_v58 = vld [vmem:[#allocation2 + $0x178] sm:$0xf0] }
  0xfe   :  { %3631 = vmatpush.bf16.msrb.mxu1 %v6429_v45  ;;  %v6341_v45 = vor.u32 %v7217_v33, %v6340_v30  ;;  %v3381_v4 = vpop.f32.mrf.mxu1  ;;  %v7229_v21 = vld [vmem:[#allocation2 + $0xe94] sm:$0xf0]  ;;  %v6325_v30 = vor.u32 %v7213_v17, %v6324_v16  ;;  %v6316_v33 = vld [vmem:[#allocation2 + $0xe00] sm:$0xf]  ;;  %v4574_v16 = vld [vmem:[#allocation2 + $0x68] sm:$0xf0] }
  0xff   :  { %3644 = vmatpush.bf16.msrb.mxu2 %v6493_v50  ;;  %v6469_v50 = vor.u32 %v7249_v41, %v6468_v40  ;;  %v3393_v59 = vadd.f32 %v3392_v55, %v3380_v37  ;;  %v7245_v23 = vld [vmem:[#allocation2 + $0xf14] sm:$0xf0]  ;;  %v7227_v40 = vld [vmem:[#allocation2 + $0xe84] sm:$0xf0]  ;;  %v6444_v41 = vld [vmem:[#allocation2 + $0xf00] sm:$0xf]  ;;  %v6317_v55 = vor.u32 %v7211_v35, %v6316_v33  ;;  %v4649_v4 = vor.u32 %v6792_v53, %v4646_v56 }
 0x100   :  { %3657 = vmatpush.bf16.msrb.mxu3 %v6557_v54  ;;  %v6533_v54 = vor.u32 %v7265_v44, %v6532_v42  ;;  %v3368_v62 = vpop.f32.mrf.mxu0  ;;  %v7243_v44 = vld [vmem:[#allocation2 + $0xf04] sm:$0xf0]  ;;  %v6790_v17 = vld [vmem:[#allocation2 + $0xe4] sm:$0xf]  ;;  %v660_v35 = vld [vmem:[#allocation1 + $0x3f] sm:$0xff] }
 0x101   :  { %3619 = vmatpush.bf16.msrb.mxu0 %v6357_v60  ;;  %v3405_v60 = vpop.f32.mrf.mxu3  ;;  %v658_v33 = vld [vmem:[#allocation1 + $0x2d] sm:$0xff] }
 0x102   :  { %3632 = vmatpush.bf16.msrb.mxu1 %v6421_v61  ;;  %v6524_v61 = vld [vmem:[#allocation2 + $0xfa0] sm:$0xf]  ;;  %v6770_v56 = vld [vmem:[#allocation2 + $0x44] sm:$0xf] }
 0x103   :  { %3645 = vmatpush.bf16.msrb.mxu2 %v6485_v43  ;;  %v7263_v43 = vld [vmem:[#allocation2 + $0xfa4] sm:$0xf0] }
 0x104   :  { %3658 = vmatpush.bf16.msrb.mxu3 %v6549_v6  ;;  %v7642_v6 = vadd.f32 %v3405_v60, %v3393_v59  ;;  %v6525_v20 = vor.u32 %v7263_v43, %v6524_v61  ;;  %v6381_v59 = vor.u32 %v7227_v40, %v6380_v39  ;;  %v6445_v60 = vor.u32 %v7243_v44, %v6444_v41  ;;  %v6824_v61 = vld [vmem:[#allocation2 + $0x1f4] sm:$0xf]  ;;  %v4774_v43 = vld [vmem:[#allocation2 + $0x1f8] sm:$0xf0] }
 0x105   :  { %3620 = vmatpush.bf16.msrb.mxu0 %v6349_v22  ;;  %v6452_v22 = vld [vmem:[#allocation2 + $0xf10] sm:$0xf]  ;;  %v6772_v40 = vld [vmem:[#allocation2 + $0x54] sm:$0xf]  ;;  %v4566_v41 = vld [vmem:[#allocation2 + $0x58] sm:$0xf0] }
 0x106   :  { %3633 = vmatpush.bf16.msrb.mxu1 %v6413_v24  ;;  %v6516_v24 = vld [vmem:[#allocation2 + $0xf90] sm:$0xf]  ;;  %v6453_v37 = vor.u32 %v7245_v23, %v6452_v22  ;;  %v4702_v22 = vld [vmem:[#allocation2 + $0x168] sm:$0xf0]  ;;  %v657_v23 = vld [vmem:[#allocation1 + $0x24] sm:$0xff]  ;;  %v4569_v53 = vor.u32 %v6772_v40, %v4566_v41 }
 0x107   :  { %3646 = vmatpush.bf16.msrb.mxu2 %v6477_v26  ;;  %v7261_v26 = vld [vmem:[#allocation2 + $0xf94] sm:$0xf0]  ;;  %v6766_v40 = vld [vmem:[#allocation2 + $0x24] sm:$0xf]  ;;  %v4542_v41 = vld [vmem:[#allocation2 + $0x28] sm:$0xf0] }
 0x108   :  { %3659 = vmatpush.bf16.msrb.mxu3 %v6541_v36  ;;  %v6389_v36 = vor.u32 %v7229_v21, %v6388_v19  ;;  %v6517_v42 = vor.u32 %v7261_v26, %v6516_v24  ;;  %v4777_v19 = vor.u32 %v6824_v61, %v4774_v43  ;;  %v6806_v21 = vld [vmem:[#allocation2 + $0x164] sm:$0xf]  ;;  %v4766_v26 = vld [vmem:[#allocation2 + $0x1e8] sm:$0xf0] }
 0x109   :  { %3621 = vmatpush.bf16.msrb.mxu0 %v6341_v45  ;;  %v6508_v45 = vld [vmem:[#allocation2 + $0xf80] sm:$0xf]  ;;  %v6822_v24 = vld [vmem:[#allocation2 + $0x1e4] sm:$0xf]  ;;  %v4705_v39 = vor.u32 %v6806_v21, %v4702_v22  ;;  %v4686_v43 = vld [vmem:[#allocation2 + $0x148] sm:$0xf0] }
 0x10a   :  { %3634 = vmatpush.bf16.msrb.mxu1 %v6405_v18  ;;  %v7259_v18 = vld [vmem:[#allocation2 + $0xf84] sm:$0xf0]  ;;  %v4769_v44 = vor.u32 %v6822_v24, %v4766_v26  ;;  %v6802_v61 = vld [vmem:[#allocation2 + $0x144] sm:$0xf]  ;;  %v4550_v21 = vld [vmem:[#allocation2 + $0x38] sm:$0xf0] }
 0x10b   :  { %3647 = vmatpush.bf16.msrb.mxu2 %v6469_v50  ;;  %v3394_v50 = vpop.f32.mrf.mxu2  ;;  %v6509_v62 = vor.u32 %v7259_v18, %v6508_v45  ;;  %v4630_v45 = vld [vmem:[#allocation2 + $0xd8] sm:$0xf0]  ;;  %v6804_v18 = vld [vmem:[#allocation2 + $0x154] sm:$0xf] }
 0x10c   :  { %3660 = vmatpush.bf16.msrb.mxu3 %v6533_v54  ;;  %v3407_v54 = vpop.f32.mrf.mxu3  ;;  %v4694_v50 = vld [vmem:[#allocation2 + $0x158] sm:$0xf0]  ;;  %v6784_v22 = vld [vmem:[#allocation2 + $0xb4] sm:$0xf] }
 0x10d   :  { %3622 = vmatpush.bf16.msrb.mxu0 %v6333_v63  ;;  %v4585_v63 = vor.u32 %v6776_v51, %v4582_v52  ;;  %v6820_v51 = vld [vmem:[#allocation2 + $0x1d4] sm:$0xf]  ;;  %v4758_v52 = vld [vmem:[#allocation2 + $0x1d8] sm:$0xf0] }
 0x10e   :  { %3635 = vmatpush.bf16.msrb.mxu1 %v6397_v7  ;;  %v4713_v7 = vor.u32 %v6808_v57, %v4710_v58  ;;  %v4558_v57 = vld [vmem:[#allocation2 + $0x48] sm:$0xf0]  ;;  %v6786_v58 = vld [vmem:[#allocation2 + $0xc4] sm:$0xf]  ;;  %v4614_v26 = vld [vmem:[#allocation2 + $0xb8] sm:$0xf0] }
 0x10f   :  { %3648 = vmatpush.bf16.msrb.mxu2 %v6461_v14  ;;  %v6774_v14 = vld [vmem:[#allocation2 + $0x64] sm:$0xf] }
 0x110   :  { %3661 = vmatpush.bf16.msrb.mxu3 %v6525_v20  ;;  %v4638_v20 = vld [vmem:[#allocation2 + $0xe8] sm:$0xf0] }
 0x111   :  { %3623 = vmatpush.bf16.msrb.mxu0 %v6325_v30  ;;  %v659_v30 = vld [vmem:[#allocation1 + $0x36] sm:$0xff] }
 0x112   :  { %3636 = vmatpush.bf16.msrb.mxu1 %v6389_v36  ;;  %v4577_v36 = vor.u32 %v6774_v14, %v4574_v16  ;;  %v4561_v14 = vor.u32 %v6770_v56, %v4558_v57  ;;  %v4545_v57 = vor.u32 %v6766_v40, %v4542_v41  ;;  %v6840_v40 = vld [vmem:[#allocation2 + $0x274] sm:$0xf]  ;;  %v4838_v41 = vld [vmem:[#allocation2 + $0x278] sm:$0xf0] }
 0x113   :  { %3649 = vmatpush.bf16.msrb.mxu2 %v6453_v37  ;;  %v4641_v37 = vor.u32 %v6790_v17, %v4638_v20  ;;  %v6768_v20 = vld [vmem:[#allocation2 + $0x34] sm:$0xf] }
 0x114   :  { %3662 = vmatpush.bf16.msrb.mxu3 %v6517_v42  ;;  %v6788_v42 = vld [vmem:[#allocation2 + $0xd4] sm:$0xf] }
 0x115   :  { %3624 = vmatpush.bf16.msrb.mxu0 %v6317_v55  ;;  %v4633_v54 = vor.u32 %v6788_v42, %v4630_v45  ;;  %v4697_v55 = vor.u32 %v6804_v18, %v4694_v50  ;;  %v6782_v42 = vld [vmem:[#allocation2 + $0xa4] sm:$0xf]  ;;  %v4606_v18 = vld [vmem:[#allocation2 + $0xa8] sm:$0xf0] }
 0x116   :  { %3637 = vmatpush.bf16.msrb.mxu1 %v6381_v59  ;;  %v4761_v59 = vor.u32 %v6820_v51, %v4758_v52  ;;  %v3431_v16 = vpop.f32.mrf.mxu1  ;;  %v6798_v50 = vld [vmem:[#allocation2 + $0x124] sm:$0xf]  ;;  %v4670_v51 = vld [vmem:[#allocation2 + $0x128] sm:$0xf0] }
 0x117   :  { %3650 = vmatpush.bf16.msrb.mxu2 %v6445_v60  ;;  %v4622_v60 = vld [vmem:[#allocation2 + $0xc8] sm:$0xf0] }
 0x118   :  { %3663 = vmatpush.bf16.msrb.mxu3 %v6509_v62  ;;  %3625 = vmatmul.bf16.vlgmr.msrb.gmra.mxu0 %v657_v23  ;;  %v3418_v62 = vpop.f32.mrf.mxu0  ;;  %v4625_v17 = vor.u32 %v6786_v58, %v4622_v60  ;;  %v4609_v60 = vor.u32 %v6782_v42, %v4606_v18  ;;  %v6856_v42 = vld [vmem:[#allocation2 + $0x2f4] sm:$0xf]  ;;  %v4902_v18 = vld [vmem:[#allocation2 + $0x2f8] sm:$0xf0] }
 0x119   :  { %3669 = vmatpush.bf16.msra.mxu0 %v4585_v63  ;;  %3638 = vmatmul.bf16.vlgmr.msrb.gmra.mxu1 %v658_v33  ;;  %v6818_v63 = vld [vmem:[#allocation2 + $0x1c4] sm:$0xf]  ;;  %v4678_v33 = vld [vmem:[#allocation2 + $0x138] sm:$0xf0] }
 0x11a   :  { %3682 = vmatpush.bf16.msra.mxu1 %v4649_v4  ;;  %3651 = vmatmul.bf16.vlgmr.msrb.gmra.mxu2 %v659_v30  ;;  %v4750_v4 = vld [vmem:[#allocation2 + $0x1c8] sm:$0xf0]  ;;  %v6800_v30 = vld [vmem:[#allocation2 + $0x134] sm:$0xf] }
 0x11b   :  { %3695 = vmatpush.bf16.msra.mxu2 %v4713_v7  ;;  %3664 = vmatmul.bf16.vlgmr.msrb.gmra.mxu3 %v660_v35  ;;  %v3419_v7 = vadd.f32 %v3418_v62, %v7642_v6  ;;  %v4753_v23 = vor.u32 %v6818_v63, %v4750_v4  ;;  %v6816_v35 = vld [vmem:[#allocation2 + $0x1b4] sm:$0xf]  ;;  %v4617_v6 = vor.u32 %v6784_v22, %v4614_v26  ;;  %v4534_v62 = vld [vmem:[#allocation2 + $0x18] sm:$0xf0]  ;;  %v4526_v22 = vld [vmem:[#allocation2 + $0x8] sm:$0xf0] }
 0x11c   :  { %3708 = vmatpush.bf16.msra.mxu3 %v4777_v19  ;;  %v4689_v19 = vor.u32 %v6802_v61, %v4686_v43  ;;  %v4673_v61 = vor.u32 %v6798_v50, %v4670_v51  ;;  %v6764_v43 = vld [vmem:[#allocation2 + $0x14] sm:$0xf]  ;;  %v6778_v26 = vld [vmem:[#allocation2 + $0x84] sm:$0xf]  ;;  %v4966_v51 = vld [vmem:[#allocation2 + $0x378] sm:$0xf0] }
 0x11d   :  { %3670 = vmatpush.bf16.msra.mxu0 %v4577_v36  ;;  %v3432_v24 = vadd.f32 %v3431_v16, %v3419_v7  ;;  %v4742_v36 = vld [vmem:[#allocation2 + $0x1b8] sm:$0xf0]  ;;  %v3444_v45 = vpop.f32.mrf.mxu2  ;;  %v6780_v63 = vld [vmem:[#allocation2 + $0x94] sm:$0xf] }
 0x11e   :  { %3683 = vmatpush.bf16.msra.mxu1 %v4641_v37  ;;  %v4553_v37 = vor.u32 %v6768_v20, %v4550_v21  ;;  %v3433_v58 = vpop.f32.mrf.mxu1  ;;  %v4598_v7 = vld [vmem:[#allocation2 + $0x98] sm:$0xf0]  ;;  %v4537_v20 = vor.u32 %v6764_v43, %v4534_v62  ;;  %v6762_v21 = vld [vmem:[#allocation2 + $0x4] sm:$0xf]  ;;  %v6872_v50 = vld [vmem:[#allocation2 + $0x374] sm:$0xf] }
 0x11f   :  { %3696 = vmatpush.bf16.msra.mxu2 %v4705_v39  ;;  %v4681_v39 = vor.u32 %v6800_v30, %v4678_v33  ;;  %v3445_v52 = vadd.f32 %v3444_v45, %v3432_v24  ;;  %v4662_v16 = vld [vmem:[#allocation2 + $0x118] sm:$0xf0]  ;;  %v4590_v30 = vld [vmem:[#allocation2 + $0x88] sm:$0xf0]  ;;  %v6794_v33 = vld [vmem:[#allocation2 + $0x104] sm:$0xf]  ;;  %v4529_v45 = vor.u32 %v6762_v21, %v4526_v22  ;;  %v4905_v58 = vor.u32 %v6856_v42, %v4902_v18 }
 0x120   :  { %3709 = vmatpush.bf16.msra.mxu3 %v4769_v44  ;;  %v4745_v44 = vor.u32 %v6816_v35, %v4742_v36  ;;  %v3420_v56 = vpop.f32.mrf.mxu0  ;;  %v4654_v36 = vld [vmem:[#allocation2 + $0x108] sm:$0xf0]  ;;  %v6854_v62 = vld [vmem:[#allocation2 + $0x2e4] sm:$0xf]  ;;  %v6836_v22 = vld [vmem:[#allocation2 + $0x254] sm:$0xf] }
 0x121   :  { %3671 = vmatpush.bf16.msra.mxu0 %v4569_v53  ;;  %v3457_v53 = vpop.f32.mrf.mxu3  ;;  %v4830_v43 = vld [vmem:[#allocation2 + $0x268] sm:$0xf0]  ;;  %v6866_v18 = vld [vmem:[#allocation2 + $0x344] sm:$0xf] }
 0x122   :  { %3684 = vmatpush.bf16.msra.mxu1 %v4633_v54  ;;  %v6814_v54 = vld [vmem:[#allocation2 + $0x1a4] sm:$0xf]  ;;  %v4814_v42 = vld [vmem:[#allocation2 + $0x248] sm:$0xf0] }
 0x123   :  { %3697 = vmatpush.bf16.msra.mxu2 %v4697_v55  ;;  %v4734_v55 = vld [vmem:[#allocation2 + $0x1a8] sm:$0xf0] }
 0x124   :  { %3710 = vmatpush.bf16.msra.mxu3 %v4761_v59  ;;  %v7645_v59 = vadd.f32 %v3457_v53, %v3445_v52  ;;  %v4737_v4 = vor.u32 %v6814_v54, %v4734_v55  ;;  %v4593_v52 = vor.u32 %v6778_v26, %v4590_v30  ;;  %v4657_v53 = vor.u32 %v6794_v33, %v4654_v36  ;;  %v6888_v54 = vld [vmem:[#allocation2 + $0x3f4] sm:$0xf]  ;;  %v5030_v55 = vld [vmem:[#allocation2 + $0x3f8] sm:$0xf0] }
 0x125   :  { %3672 = vmatpush.bf16.msra.mxu0 %v4561_v14  ;;  %v6796_v14 = vld [vmem:[#allocation2 + $0x114] sm:$0xf]  ;;  %v4886_v30 = vld [vmem:[#allocation2 + $0x2d8] sm:$0xf0] }
 0x126   :  { %3685 = vmatpush.bf16.msra.mxu1 %v4625_v17  ;;  %v6812_v17 = vld [vmem:[#allocation2 + $0x194] sm:$0xf]  ;;  %v4665_v24 = vor.u32 %v6796_v14, %v4662_v16  ;;  %v4958_v14 = vld [vmem:[#allocation2 + $0x368] sm:$0xf0]  ;;  %v6886_v16 = vld [vmem:[#allocation2 + $0x3e4] sm:$0xf] }
 0x127   :  { %3698 = vmatpush.bf16.msra.mxu2 %v4689_v19  ;;  %v4726_v19 = vld [vmem:[#allocation2 + $0x198] sm:$0xf0]  ;;  %v6868_v33 = vld [vmem:[#allocation2 + $0x354] sm:$0xf] }
 0x128   :  { %3711 = vmatpush.bf16.msra.mxu3 %v4753_v23  ;;  %v4601_v23 = vor.u32 %v6780_v63, %v4598_v7  ;;  %v4729_v35 = vor.u32 %v6812_v17, %v4726_v19  ;;  %v5033_v63 = vor.u32 %v6888_v54, %v5030_v55  ;;  %v6870_v7 = vld [vmem:[#allocation2 + $0x364] sm:$0xf]  ;;  %v5022_v17 = vld [vmem:[#allocation2 + $0x3e8] sm:$0xf0]  ;;  %v6884_v36 = vld [vmem:[#allocation2 + $0x3d4] sm:$0xf] }
 0x129   :  { %3673 = vmatpush.bf16.msra.mxu0 %v4553_v37  ;;  %v6810_v37 = vld [vmem:[#allocation2 + $0x184] sm:$0xf]  ;;  %v4961_v21 = vor.u32 %v6870_v7, %v4958_v14  ;;  %v5025_v26 = vor.u32 %v6886_v16, %v5022_v17  ;;  %v4998_v7 = vld [vmem:[#allocation2 + $0x3b8] sm:$0xf0] }
 0x12a   :  { %3686 = vmatpush.bf16.msra.mxu1 %v4617_v6  ;;  %v4718_v6 = vld [vmem:[#allocation2 + $0x188] sm:$0xf0]  ;;  %v6830_v17 = vld [vmem:[#allocation2 + $0x224] sm:$0xf] }
 0x12b   :  { %3699 = vmatpush.bf16.msra.mxu2 %v4681_v39  ;;  %v3446_v39 = vpop.f32.mrf.mxu2  ;;  %v4721_v56 = vor.u32 %v6810_v37, %v4718_v6  ;;  %v5014_v37 = vld [vmem:[#allocation2 + $0x3d8] sm:$0xf0] }
 0x12c   :  { %3712 = vmatpush.bf16.msra.mxu3 %v4745_v44  ;;  %v3459_v44 = vpop.f32.mrf.mxu3 }
 0x12d   :  { %3674 = vmatpush.bf16.msra.mxu0 %v4545_v57  ;;  %v4841_v57 = vor.u32 %v6840_v40, %v4838_v41  ;;  %v6834_v41 = vld [vmem:[#allocation2 + $0x244] sm:$0xf] }
 0x12e   :  { %3687 = vmatpush.bf16.msra.mxu1 %v4609_v60  ;;  %v4969_v60 = vor.u32 %v6872_v50, %v4966_v51  ;;  %v6850_v44 = vld [vmem:[#allocation2 + $0x2c4] sm:$0xf]  ;;  %v4942_v50 = vld [vmem:[#allocation2 + $0x348] sm:$0xf0] }
 0x12f   :  { %3700 = vmatpush.bf16.msra.mxu2 %v4673_v61  ;;  %v6838_v61 = vld [vmem:[#allocation2 + $0x264] sm:$0xf]  ;;  %v4945_v55 = vor.u32 %v6866_v18, %v4942_v50  ;;  %v4854_v50 = vld [vmem:[#allocation2 + $0x298] sm:$0xf0] }
 0x130   :  { %3713 = vmatpush.bf16.msra.mxu3 %v4737_v4  ;;  %v4894_v4 = vld [vmem:[#allocation2 + $0x2e8] sm:$0xf0]  ;;  %v4833_v19 = vor.u32 %v6838_v61, %v4830_v43  ;;  %v4870_v43 = vld [vmem:[#allocation2 + $0x2b8] sm:$0xf0] }
 0x131   :  { %3675 = vmatpush.bf16.msra.mxu0 %v4537_v20  ;;  %v4897_v20 = vor.u32 %v6854_v62, %v4894_v4  ;;  %v6864_v62 = vld [vmem:[#allocation2 + $0x334] sm:$0xf] }
 0x132   :  { %3688 = vmatpush.bf16.msra.mxu1 %v4601_v23  ;;  %v4822_v23 = vld [vmem:[#allocation2 + $0x258] sm:$0xf0]  ;;  %v6880_v4 = vld [vmem:[#allocation2 + $0x3b4] sm:$0xf] }
 0x133   :  { %3701 = vmatpush.bf16.msra.mxu2 %v4665_v24  ;;  %v6852_v24 = vld [vmem:[#allocation2 + $0x2d4] sm:$0xf]  ;;  %v4825_v6 = vor.u32 %v6836_v22, %v4822_v23  ;;  %v4862_v23 = vld [vmem:[#allocation2 + $0x2a8] sm:$0xf0] }
 0x134   :  { %3714 = vmatpush.bf16.msra.mxu3 %v4729_v35  ;;  %v4950_v35 = vld [vmem:[#allocation2 + $0x358] sm:$0xf0]  ;;  %v4889_v39 = vor.u32 %v6852_v24, %v4886_v30  ;;  %v6862_v24 = vld [vmem:[#allocation2 + $0x324] sm:$0xf] }
 0x135   :  { %3676 = vmatpush.bf16.msra.mxu0 %v4529_v45  ;;  %v4953_v40 = vor.u32 %v6868_v33, %v4950_v35  ;;  %v5017_v45 = vor.u32 %v6884_v36, %v5014_v37  ;;  %v3470_v51 = vpop.f32.mrf.mxu0  ;;  %v6878_v35 = vld [vmem:[#allocation2 + $0x3a4] sm:$0xf]  ;;  %v4990_v36 = vld [vmem:[#allocation2 + $0x3a8] sm:$0xf0] }
 0x136   :  { %3689 = vmatpush.bf16.msra.mxu1 %v4593_v52  ;;  %v5006_v52 = vld [vmem:[#allocation2 + $0x3c8] sm:$0xf0]  ;;  %v4993_v18 = vor.u32 %v6878_v35, %v4990_v36 }
 0x137   :  { %3702 = vmatpush.bf16.msra.mxu2 %v4657_v53  ;;  %v4817_v53 = vor.u32 %v6834_v41, %v4814_v42 }
 0x138   :  { %3715 = vmatpush.bf16.msra.mxu3 %v4721_v56  ;;  %3677 = vmatmul.bf16.vlgmr.msra.gmra.mxu0 %v7560_v28  ;;  %v6882_v28 = vld [vmem:[#allocation2 + $0x3c4] sm:$0xf]  ;;  %v6832_v56 = vld [vmem:[#allocation2 + $0x234] sm:$0xf] }
 0x139   :  { %3721 = vmatpush.bf16.msrb.mxu0 %v4841_v57  ;;  %3690 = vmatmul.bf16.vlgmr.msra.gmra.mxu1 %v7564_v34  ;;  %v3483_v34 = vpop.f32.mrf.mxu1  ;;  %v4806_v57 = vld [vmem:[#allocation2 + $0x238] sm:$0xf0] }
 0x13a   :  { %3734 = vmatpush.bf16.msrb.mxu1 %v4905_v58  ;;  %3703 = vmatmul.bf16.vlgmr.msra.gmra.mxu2 %v7558_v27  ;;  %v4878_v27 = vld [vmem:[#allocation2 + $0x2c8] sm:$0xf0]  ;;  %v6848_v58 = vld [vmem:[#allocation2 + $0x2b4] sm:$0xf]  ;;  %v4809_v14 = vor.u32 %v6832_v56, %v4806_v57  ;;  %v6842_v57 = vld [vmem:[#allocation2 + $0x284] sm:$0xf] }
 0x13b   :  { %3747 = vmatpush.bf16.msrb.mxu2 %v4969_v60  ;;  %3716 = vmatmul.bf16.vlgmr.msra.gmra.mxu3 %v7562_v29  ;;  %v3471_v29 = vadd.f32 %v3470_v51, %v7645_v59  ;;  %v4881_v54 = vor.u32 %v6850_v44, %v4878_v27  ;;  %v5009_v60 = vor.u32 %v6882_v28, %v5006_v52  ;;  %v6828_v44 = vld [vmem:[#allocation2 + $0x214] sm:$0xf]  ;;  %v4918_v28 = vld [vmem:[#allocation2 + $0x318] sm:$0xf0] }
 0x13c   :  { %3760 = vmatpush.bf16.msrb.mxu3 %v5033_v63  ;;  %v4934_v63 = vld [vmem:[#allocation2 + $0x338] sm:$0xf0]  ;;  %v4873_v59 = vor.u32 %v6848_v58, %v4870_v43  ;;  %v6844_v27 = vld [vmem:[#allocation2 + $0x294] sm:$0xf]  ;;  %v4846_v58 = vld [vmem:[#allocation2 + $0x288] sm:$0xf0] }
 0x13d   :  { %3722 = vmatpush.bf16.msrb.mxu0 %v4833_v19  ;;  %v3484_v61 = vadd.f32 %v3483_v34, %v3471_v29  ;;  %v4937_v16 = vor.u32 %v6864_v62, %v4934_v63  ;;  %v4798_v19 = vld [vmem:[#allocation2 + $0x228] sm:$0xf0]  ;;  %v3496_v22 = vpop.f32.mrf.mxu2  ;;  %v3472_v37 = vpop.f32.mrf.mxu0  ;;  %v6860_v51 = vld [vmem:[#allocation2 + $0x314] sm:$0xf]  ;;  %v4982_v29 = vld [vmem:[#allocation2 + $0x398] sm:$0xf0] }
 0x13e   :  { %3735 = vmatpush.bf16.msrb.mxu1 %v4897_v20  ;;  %v6846_v20 = vld [vmem:[#allocation2 + $0x2a4] sm:$0xf]  ;;  %v3509_v33 = vpop.f32.mrf.mxu3  ;;  %v6876_v52 = vld [vmem:[#allocation2 + $0x394] sm:$0xf]  ;;  %v4921_v56 = vor.u32 %v6860_v51, %v4918_v28  ;;  %v4910_v43 = vld [vmem:[#allocation2 + $0x308] sm:$0xf0] }
 0x13f   :  { %3748 = vmatpush.bf16.msrb.mxu2 %v4961_v21  ;;  %v5001_v21 = vor.u32 %v6880_v4, %v4998_v7  ;;  %v3497_v30 = vadd.f32 %v3496_v22, %v3484_v61  ;;  %v4865_v41 = vor.u32 %v6846_v20, %v4862_v23  ;;  %v6826_v34 = vld [vmem:[#allocation2 + $0x204] sm:$0xf]  ;;  %v4985_v61 = vor.u32 %v6876_v52, %v4982_v29  ;;  %v4974_v63 = vld [vmem:[#allocation2 + $0x388] sm:$0xf0]  ;;  %v6904_v7 = vld [vmem:[#allocation2 + $0x474] sm:$0xf] }
 0x140   :  { %3761 = vmatpush.bf16.msrb.mxu3 %v5025_v26  ;;  %v4926_v26 = vld [vmem:[#allocation2 + $0x328] sm:$0xf0]  ;;  %v6874_v62 = vld [vmem:[#allocation2 + $0x384] sm:$0xf]  ;;  %v6936_v20 = vld [vmem:[#allocation2 + $0x574] sm:$0xf]  ;;  %v4849_v22 = vor.u32 %v6842_v57, %v4846_v58 }
 0x141   :  { %3723 = vmatpush.bf16.msrb.mxu0 %v4825_v6  ;;  %v4801_v6 = vor.u32 %v6830_v17, %v4798_v19  ;;  %v4929_v42 = vor.u32 %v6862_v24, %v4926_v26  ;;  %v5158_v19 = vld [vmem:[#allocation2 + $0x4f8] sm:$0xf0]  ;;  %v6952_v24 = vld [vmem:[#allocation2 + $0x5f4] sm:$0xf]  ;;  %v6902_v37 = vld [vmem:[#allocation2 + $0x464] sm:$0xf] }
 0x142   :  { %3736 = vmatpush.bf16.msrb.mxu1 %v4889_v39  ;;  %v3485_v39 = vpop.f32.mrf.mxu1  ;;  %v5286_v26 = vld [vmem:[#allocation2 + $0x5f8] sm:$0xf0]  ;;  %v6900_v52 = vld [vmem:[#allocation2 + $0x454] sm:$0xf] }
 0x143   :  { %3749 = vmatpush.bf16.msrb.mxu2 %v4953_v40  ;;  %v7652_v40 = vadd.f32 %v3509_v33, %v3497_v30  ;;  %v4977_v30 = vor.u32 %v6874_v62, %v4974_v63  ;;  %v6918_v39 = vld [vmem:[#allocation2 + $0x4e4] sm:$0xf]  ;;  %v5078_v29 = vld [vmem:[#allocation2 + $0x458] sm:$0xf0]  ;;  %v6948_v57 = vld [vmem:[#allocation2 + $0x5d4] sm:$0xf] }
 0x144   :  { %3762 = vmatpush.bf16.msrb.mxu3 %v5017_v45  ;;  %v4790_v45 = vld [vmem:[#allocation2 + $0x218] sm:$0xf0]  ;;  %v6898_v62 = vld [vmem:[#allocation2 + $0x444] sm:$0xf]  ;;  %v5070_v63 = vld [vmem:[#allocation2 + $0x448] sm:$0xf0] }
 0x145   :  { %3724 = vmatpush.bf16.msrb.mxu0 %v4817_v53  ;;  %v4793_v53 = vor.u32 %v6828_v44, %v4790_v45  ;;  %v3498_v4 = vpop.f32.mrf.mxu2  ;;  %v6934_v44 = vld [vmem:[#allocation2 + $0x564] sm:$0xf]  ;;  %v5214_v45 = vld [vmem:[#allocation2 + $0x568] sm:$0xf0]  ;;  %v5270_v58 = vld [vmem:[#allocation2 + $0x5d8] sm:$0xf0] }
 0x146   :  { %3737 = vmatpush.bf16.msrb.mxu1 %v4881_v54  ;;  %v4782_v54 = vld [vmem:[#allocation2 + $0x208] sm:$0xf0]  ;;  %v5217_v28 = vor.u32 %v6934_v44, %v5214_v45  ;;  %v5273_v4 = vor.u32 %v6948_v57, %v5270_v58  ;;  %v6910_v45 = vld [vmem:[#allocation2 + $0x4a4] sm:$0xf] }
 0x147   :  { %3750 = vmatpush.bf16.msrb.mxu2 %v4945_v55  ;;  %v4857_v55 = vor.u32 %v6844_v27, %v4854_v50  ;;  %v4785_v17 = vor.u32 %v6826_v34, %v4782_v54  ;;  %v6950_v27 = vld [vmem:[#allocation2 + $0x5e4] sm:$0xf]  ;;  %v5142_v54 = vld [vmem:[#allocation2 + $0x4d8] sm:$0xf0]  ;;  %v5054_v44 = vld [vmem:[#allocation2 + $0x428] sm:$0xf0] }
 0x148   :  { %3763 = vmatpush.bf16.msrb.mxu3 %v5009_v60  ;;  %v6858_v60 = vld [vmem:[#allocation2 + $0x304] sm:$0xf] }
 0x149   :  { %3725 = vmatpush.bf16.msrb.mxu0 %v4809_v14  ;;  %v5094_v14 = vld [vmem:[#allocation2 + $0x478] sm:$0xf0]  ;;  %v4913_v23 = vor.u32 %v6858_v60, %v4910_v43  ;;  %v5081_v60 = vor.u32 %v6900_v52, %v5078_v29 }
 0x14a   :  { %3738 = vmatpush.bf16.msrb.mxu1 %v4873_v59  ;;  %v6920_v59 = vld [vmem:[#allocation2 + $0x4f4] sm:$0xf]  ;;  %v5097_v33 = vor.u32 %v6904_v7, %v5094_v14  ;;  %v5134_v7 = vld [vmem:[#allocation2 + $0x4c8] sm:$0xf0]  ;;  %v6930_v14 = vld [vmem:[#allocation2 + $0x544] sm:$0xf] }
 0x14b   :  { %3751 = vmatpush.bf16.msrb.mxu2 %v4937_v16  ;;  %v3511_v16 = vpop.f32.mrf.mxu3  ;;  %v5161_v35 = vor.u32 %v6920_v59, %v5158_v19  ;;  %v5198_v59 = vld [vmem:[#allocation2 + $0x548] sm:$0xf0]  ;;  %v5073_v19 = vor.u32 %v6898_v62, %v5070_v63  ;;  %v6908_v62 = vld [vmem:[#allocation2 + $0x494] sm:$0xf] }
 0x14c   :  { %3764 = vmatpush.bf16.msrb.mxu3 %v5001_v21  ;;  %v5222_v21 = vld [vmem:[#allocation2 + $0x578] sm:$0xf0] }
 0x14d   :  { %3726 = vmatpush.bf16.msrb.mxu0 %v4801_v6  ;;  %v5225_v36 = vor.u32 %v6936_v20, %v5222_v21  ;;  %v5086_v6 = vld [vmem:[#allocation2 + $0x468] sm:$0xf0]  ;;  %v5201_v21 = vor.u32 %v6930_v14, %v5198_v59  ;;  %v6940_v14 = vld [vmem:[#allocation2 + $0x594] sm:$0xf]  ;;  %v5238_v59 = vld [vmem:[#allocation2 + $0x598] sm:$0xf0] }
 0x14e   :  { %3739 = vmatpush.bf16.msrb.mxu1 %v4865_v41  ;;  %v5289_v41 = vor.u32 %v6952_v24, %v5286_v26  ;;  %v5089_v50 = vor.u32 %v6902_v37, %v5086_v6  ;;  %v6912_v24 = vld [vmem:[#allocation2 + $0x4b4] sm:$0xf]  ;;  %v5254_v6 = vld [vmem:[#allocation2 + $0x5b8] sm:$0xf0] }
 0x14f   :  { %3752 = vmatpush.bf16.msrb.mxu2 %v4929_v42  ;;  %v5150_v42 = vld [vmem:[#allocation2 + $0x4e8] sm:$0xf0]  ;;  %v6944_v37 = vld [vmem:[#allocation2 + $0x5b4] sm:$0xf] }
 0x150   :  { %3765 = vmatpush.bf16.msrb.mxu3 %v4993_v18  ;;  %v5278_v18 = vld [vmem:[#allocation2 + $0x5e8] sm:$0xf0]  ;;  %v5153_v51 = vor.u32 %v6918_v39, %v5150_v42  ;;  %v6894_v42 = vld [vmem:[#allocation2 + $0x424] sm:$0xf] }
 0x151   :  { %3727 = vmatpush.bf16.msrb.mxu0 %v4793_v53  ;;  %v6916_v53 = vld [vmem:[#allocation2 + $0x4d4] sm:$0xf]  ;;  %v5281_v34 = vor.u32 %v6950_v27, %v5278_v18  ;;  %v5257_v27 = vor.u32 %v6944_v37, %v5254_v6 }
 0x152   :  { %3740 = vmatpush.bf16.msrb.mxu1 %v4857_v55  ;;  %v6932_v55 = vld [vmem:[#allocation2 + $0x554] sm:$0xf] }
 0x153   :  { %3753 = vmatpush.bf16.msrb.mxu2 %v4921_v56  ;;  %v5206_v56 = vld [vmem:[#allocation2 + $0x558] sm:$0xf0] }
 0x154   :  { %3766 = vmatpush.bf16.msrb.mxu3 %v4985_v61  ;;  %v5145_v61 = vor.u32 %v6916_v53, %v5142_v54  ;;  %v5209_v43 = vor.u32 %v6932_v55, %v5206_v56  ;;  %v6942_v53 = vld [vmem:[#allocation2 + $0x5a4] sm:$0xf]  ;;  %v5057_v55 = vor.u32 %v6894_v42, %v5054_v44 }
 0x155   :  { %3728 = vmatpush.bf16.msrb.mxu0 %v4785_v17  ;;  %v3522_v16 = vpop.f32.mrf.mxu0  ;;  %v5262_v17 = vld [vmem:[#allocation2 + $0x5c8] sm:$0xf0] }
 0x156   :  { %3741 = vmatpush.bf16.msrb.mxu1 %v4849_v22  ;;  %v6896_v22 = vld [vmem:[#allocation2 + $0x434] sm:$0xf] }
 0x157   :  { %3754 = vmatpush.bf16.msrb.mxu2 %v4913_v23  ;;  %v5062_v23 = vld [vmem:[#allocation2 + $0x438] sm:$0xf0] }
 0x158   :  { %3767 = vmatpush.bf16.msrb.mxu3 %v4977_v30  ;;  %3729 = vmatmul.bf16.vlgmr.msrb.gmra.mxu0 %v7572_v31  ;;  %v6946_v31 = vld [vmem:[#allocation2 + $0x5c4] sm:$0xf]  ;;  %v5065_v39 = vor.u32 %v6896_v22, %v5062_v23  ;;  %v5241_v22 = vor.u32 %v6940_v14, %v5238_v59  ;;  %v5166_v23 = vld [vmem:[#allocation2 + $0x508] sm:$0xf0]  ;;  %v5398_v14 = vld [vmem:[#allocation2 + $0x6d8] sm:$0xf0] }
 0x159   :  { %3773 = vmatpush.bf16.msra.mxu0 %v5097_v33  ;;  %3742 = vmatmul.bf16.vlgmr.msrb.gmra.mxu1 %v7576_v38  ;;  %v3535_v38 = vpop.f32.mrf.mxu1  ;;  %v5265_v26 = vor.u32 %v6946_v31, %v5262_v17  ;;  %v5126_v33 = vld [vmem:[#allocation2 + $0x4b8] sm:$0xf0]  ;;  %v6890_v31 = vld [vmem:[#allocation2 + $0x404] sm:$0xf]  ;;  %v5038_v17 = vld [vmem:[#allocation2 + $0x408] sm:$0xf0] }
 0x15a   :  { %3786 = vmatpush.bf16.msra.mxu1 %v5161_v35  ;;  %3755 = vmatmul.bf16.vlgmr.msrb.gmra.mxu2 %v7570_v25  ;;  %v6914_v25 = vld [vmem:[#allocation2 + $0x4c4] sm:$0xf]  ;;  %v6928_v35 = vld [vmem:[#allocation2 + $0x534] sm:$0xf]  ;;  %v5041_v6 = vor.u32 %v6890_v31, %v5038_v17  ;;  %v5526_v17 = vld [vmem:[#allocation2 + $0x7d8] sm:$0xf0] }
 0x15b   :  { %3799 = vmatpush.bf16.msra.mxu2 %v5225_v36  ;;  %3768 = vmatmul.bf16.vlgmr.msrb.gmra.mxu3 %v7574_v32  ;;  %v3523_v32 = vadd.f32 %v3522_v16, %v7652_v40  ;;  %v5137_v20 = vor.u32 %v6914_v25, %v5134_v7  ;;  %v5190_v36 = vld [vmem:[#allocation2 + $0x538] sm:$0xf0]  ;;  %v5129_v40 = vor.u32 %v6912_v24, %v5126_v33  ;;  %v6938_v24 = vld [vmem:[#allocation2 + $0x584] sm:$0xf]  ;;  %v6968_v33 = vld [vmem:[#allocation2 + $0x674] sm:$0xf] }
 0x15c   :  { %3812 = vmatpush.bf16.msra.mxu3 %v5289_v41  ;;  %v5193_v41 = vor.u32 %v6928_v35, %v5190_v36  ;;  %v5110_v25 = vld [vmem:[#allocation2 + $0x498] sm:$0xf0]  ;;  %v6984_v36 = vld [vmem:[#allocation2 + $0x6f4] sm:$0xf] }
 0x15d   :  { %3774 = vmatpush.bf16.msra.mxu0 %v5089_v50  ;;  %v3536_v30 = vadd.f32 %v3535_v38, %v3523_v32  ;;  %v3548_v18 = vpop.f32.mrf.mxu2  ;;  %v5118_v50 = vld [vmem:[#allocation2 + $0x4a8] sm:$0xf0]  ;;  %v3524_v54 = vpop.f32.mrf.mxu0  ;;  %v5174_v7 = vld [vmem:[#allocation2 + $0x518] sm:$0xf0]  ;;  %v5113_v32 = vor.u32 %v6908_v62, %v5110_v25  ;;  %v6906_v38 = vld [vmem:[#allocation2 + $0x484] sm:$0xf] }
 0x15e   :  { %3787 = vmatpush.bf16.msra.mxu1 %v5153_v51  ;;  %v6926_v51 = vld [vmem:[#allocation2 + $0x524] sm:$0xf]  ;;  %v3561_v29 = vpop.f32.mrf.mxu3  ;;  %v5121_v58 = vor.u32 %v6910_v45, %v5118_v50  ;;  %v5350_v35 = vld [vmem:[#allocation2 + $0x678] sm:$0xf0]  ;;  %v7016_v45 = vld [vmem:[#allocation2 + $0x7f4] sm:$0xf] }
 0x15f   :  { %3800 = vmatpush.bf16.msra.mxu2 %v5217_v28  ;;  %v5182_v28 = vld [vmem:[#allocation2 + $0x528] sm:$0xf0]  ;;  %v3549_v52 = vadd.f32 %v3548_v18, %v3536_v30  ;;  %v5353_v50 = vor.u32 %v6968_v33, %v5350_v35  ;;  %v5334_v25 = vld [vmem:[#allocation2 + $0x658] sm:$0xf0]  ;;  %v6996_v59 = vld [vmem:[#allocation2 + $0x754] sm:$0xf] }
 0x160   :  { %3813 = vmatpush.bf16.msra.mxu3 %v5281_v34  ;;  %v5246_v34 = vld [vmem:[#allocation2 + $0x5a8] sm:$0xf0]  ;;  %v7012_v31 = vld [vmem:[#allocation2 + $0x7d4] sm:$0xf] }
 0x161   :  { %3775 = vmatpush.bf16.msra.mxu0 %v5081_v60  ;;  %v3537_v56 = vpop.f32.mrf.mxu1  ;;  %v7659_v57 = vadd.f32 %v3561_v29, %v3549_v52  ;;  %v5185_v60 = vor.u32 %v6926_v51, %v5182_v28  ;;  %v5249_v63 = vor.u32 %v6942_v53, %v5246_v34  ;;  %v6966_v52 = vld [vmem:[#allocation2 + $0x664] sm:$0xf]  ;;  %v5342_v29 = vld [vmem:[#allocation2 + $0x668] sm:$0xf0] }
 0x162   :  { %3788 = vmatpush.bf16.msra.mxu1 %v5145_v61  ;;  %v6892_v61 = vld [vmem:[#allocation2 + $0x414] sm:$0xf]  ;;  %v6982_v53 = vld [vmem:[#allocation2 + $0x6e4] sm:$0xf]  ;;  %v5406_v54 = vld [vmem:[#allocation2 + $0x6e8] sm:$0xf0] }
 0x163   :  { %3801 = vmatpush.bf16.msra.mxu2 %v5209_v43  ;;  %v5046_v43 = vld [vmem:[#allocation2 + $0x418] sm:$0xf0]  ;;  %v5470_v56 = vld [vmem:[#allocation2 + $0x768] sm:$0xf0] }
 0x164   :  { %3814 = vmatpush.bf16.msra.mxu3 %v5273_v4  ;;  %v6924_v4 = vld [vmem:[#allocation2 + $0x514] sm:$0xf]  ;;  %v5049_v16 = vor.u32 %v6892_v61, %v5046_v43  ;;  %v5345_v61 = vor.u32 %v6966_v52, %v5342_v29  ;;  %v5409_v43 = vor.u32 %v6982_v53, %v5406_v54  ;;  %v6958_v52 = vld [vmem:[#allocation2 + $0x624] sm:$0xf]  ;;  %v5310_v29 = vld [vmem:[#allocation2 + $0x628] sm:$0xf0] }
 0x165   :  { %3776 = vmatpush.bf16.msra.mxu0 %v5073_v19  ;;  %v5177_v19 = vor.u32 %v6924_v4, %v5174_v7  ;;  %v3550_v30 = vpop.f32.mrf.mxu2  ;;  %v6980_v4 = vld [vmem:[#allocation2 + $0x6d4] sm:$0xf]  ;;  %v6974_v53 = vld [vmem:[#allocation2 + $0x6a4] sm:$0xf] }
 0x166   :  { %3789 = vmatpush.bf16.msra.mxu1 %v5137_v20  ;;  %v5102_v20 = vld [vmem:[#allocation2 + $0x488] sm:$0xf0]  ;;  %v3563_v37 = vpop.f32.mrf.mxu3 }
 0x167   :  { %3802 = vmatpush.bf16.msra.mxu2 %v5201_v21  ;;  %v6922_v21 = vld [vmem:[#allocation2 + $0x504] sm:$0xf]  ;;  %v5105_v42 = vor.u32 %v6906_v38, %v5102_v20  ;;  %v5518_v30 = vld [vmem:[#allocation2 + $0x7c8] sm:$0xf0] }
 0x168   :  { %3815 = vmatpush.bf16.msra.mxu3 %v5265_v26  ;;  %v5230_v26 = vld [vmem:[#allocation2 + $0x588] sm:$0xf0]  ;;  %v5169_v44 = vor.u32 %v6922_v21, %v5166_v23  ;;  %v6962_v20 = vld [vmem:[#allocation2 + $0x644] sm:$0xf] }
 0x169   :  { %3777 = vmatpush.bf16.msra.mxu0 %v5065_v39  ;;  %v5414_v39 = vld [vmem:[#allocation2 + $0x6f8] sm:$0xf0]  ;;  %v5233_v18 = vor.u32 %v6938_v24, %v5230_v26  ;;  %v6978_v21 = vld [vmem:[#allocation2 + $0x6c4] sm:$0xf]  ;;  %v5390_v23 = vld [vmem:[#allocation2 + $0x6c8] sm:$0xf0] }
 0x16a   :  { %3790 = vmatpush.bf16.msra.mxu1 %v5129_v40  ;;  %v7000_v40 = vld [vmem:[#allocation2 + $0x774] sm:$0xf]  ;;  %v5417_v51 = vor.u32 %v6984_v36, %v5414_v39  ;;  %v6994_v24 = vld [vmem:[#allocation2 + $0x744] sm:$0xf]  ;;  %v5393_v36 = vor.u32 %v6978_v21, %v5390_v23  ;;  %v5318_v39 = vld [vmem:[#allocation2 + $0x638] sm:$0xf0] }
 0x16b   :  { %3803 = vmatpush.bf16.msra.mxu2 %v5193_v41  ;;  %v5478_v41 = vld [vmem:[#allocation2 + $0x778] sm:$0xf0]  ;;  %v6954_v23 = vld [vmem:[#allocation2 + $0x604] sm:$0xf] }
 0x16c   :  { %3816 = vmatpush.bf16.msra.mxu3 %v5257_v27  ;;  %v5542_v27 = vld [vmem:[#allocation2 + $0x7f8] sm:$0xf0]  ;;  %v5481_v28 = vor.u32 %v7000_v40, %v5478_v41  ;;  %v6976_v40 = vld [vmem:[#allocation2 + $0x6b4] sm:$0xf] }
 0x16d   :  { %3778 = vmatpush.bf16.msra.mxu0 %v5057_v55  ;;  %v5545_v34 = vor.u32 %v7016_v45, %v5542_v27  ;;  %v6998_v55 = vld [vmem:[#allocation2 + $0x764] sm:$0xf]  ;;  %v6992_v45 = vld [vmem:[#allocation2 + $0x734] sm:$0xf]  ;;  %v5446_v27 = vld [vmem:[#allocation2 + $0x738] sm:$0xf0] }
 0x16e   :  { %3791 = vmatpush.bf16.msra.mxu1 %v5121_v58  ;;  %v7014_v58 = vld [vmem:[#allocation2 + $0x7e4] sm:$0xf]  ;;  %v5473_v62 = vor.u32 %v6998_v55, %v5470_v56  ;;  %v5374_v55 = vld [vmem:[#allocation2 + $0x6a8] sm:$0xf0]  ;;  %v5494_v21 = vld [vmem:[#allocation2 + $0x798] sm:$0xf0] }
 0x16f   :  { %3804 = vmatpush.bf16.msra.mxu2 %v5185_v60  ;;  %v5534_v60 = vld [vmem:[#allocation2 + $0x7e8] sm:$0xf0]  ;;  %v6990_v56 = vld [vmem:[#allocation2 + $0x724] sm:$0xf] }
 0x170   :  { %3817 = vmatpush.bf16.msra.mxu3 %v5249_v63  ;;  %v6964_v63 = vld [vmem:[#allocation2 + $0x654] sm:$0xf]  ;;  %v5537_v7 = vor.u32 %v7014_v58, %v5534_v60  ;;  %v5438_v58 = vld [vmem:[#allocation2 + $0x728] sm:$0xf0] }
 0x171   :  { %3779 = vmatpush.bf16.msra.mxu0 %v5049_v16  ;;  %v5462_v16 = vld [vmem:[#allocation2 + $0x758] sm:$0xf0] }
 0x172   :  { %3792 = vmatpush.bf16.msra.mxu1 %v5113_v32  ;;  %v5337_v32 = vor.u32 %v6964_v63, %v5334_v25  ;;  %v5465_v38 = vor.u32 %v6996_v59, %v5462_v16  ;;  %v5313_v25 = vor.u32 %v6958_v52, %v5310_v29  ;;  %v5441_v59 = vor.u32 %v6990_v56, %v5438_v58  ;;  %v6956_v16 = vld [vmem:[#allocation2 + $0x614] sm:$0xf]  ;;  %v7046_v56 = vld [vmem:[#allocation2 + $0x8e4] sm:$0xf] }
 0x173   :  { %3805 = vmatpush.bf16.msra.mxu2 %v5177_v19  ;;  %v5401_v19 = vor.u32 %v6980_v4, %v5398_v14  ;;  %v5377_v14 = vor.u32 %v6974_v53, %v5374_v55  ;;  %v5598_v55 = vld [vmem:[#allocation2 + $0x868] sm:$0xf0] }
 0x174   :  { %3818 = vmatpush.bf16.msra.mxu3 %v5241_v22  ;;  %v5529_v22 = vor.u32 %v7012_v31, %v5526_v17  ;;  %v5302_v31 = vld [vmem:[#allocation2 + $0x618] sm:$0xf0]  ;;  %v6972_v17 = vld [vmem:[#allocation2 + $0x694] sm:$0xf] }
 0x175   :  { %3780 = vmatpush.bf16.msra.mxu0 %v5041_v6  ;;  %v3574_v26 = vpop.f32.mrf.mxu0  ;;  %v6960_v6 = vld [vmem:[#allocation2 + $0x634] sm:$0xf] }
 0x176   :  { %3793 = vmatpush.bf16.msra.mxu1 %v5105_v42  ;;  %v3587_v35 = vpop.f32.mrf.mxu1 }
 0x177   :  { %3806 = vmatpush.bf16.msra.mxu2 %v5169_v44  ;;  %v5382_v44 = vld [vmem:[#allocation2 + $0x6b8] sm:$0xf0] }
 0x178   :  { %3819 = vmatpush.bf16.msra.mxu3 %v5233_v18  ;;  %3781 = vmatmul.bf16.vlgmr.msra.gmra.mxu0 %v7585_v8  ;;  %v5326_v8 = vld [vmem:[#allocation2 + $0x648] sm:$0xf0]  ;;  %v7008_v18 = vld [vmem:[#allocation2 + $0x7b4] sm:$0xf] }
 0x179   :  { %3825 = vmatpush.bf16.msrb.mxu0 %v5353_v50  ;;  %3794 = vmatmul.bf16.vlgmr.msra.gmra.mxu1 %v7589_v12  ;;  %v7010_v12 = vld [vmem:[#allocation2 + $0x7c4] sm:$0xf]  ;;  %v5329_v33 = vor.u32 %v6962_v20, %v5326_v8  ;;  %v5510_v50 = vld [vmem:[#allocation2 + $0x7b8] sm:$0xf0]  ;;  %v7004_v8 = vld [vmem:[#allocation2 + $0x794] sm:$0xf] }
 0x17a   :  { %3838 = vmatpush.bf16.msrb.mxu1 %v5417_v51  ;;  %3807 = vmatmul.bf16.vlgmr.msra.gmra.mxu2 %v7587_v11  ;;  %v5454_v11 = vld [vmem:[#allocation2 + $0x748] sm:$0xf0]  ;;  %v5521_v41 = vor.u32 %v7010_v12, %v5518_v30  ;;  %v5321_v51 = vor.u32 %v6960_v6, %v5318_v39  ;;  %v5430_v20 = vld [vmem:[#allocation2 + $0x718] sm:$0xf0]  ;;  %v6970_v12 = vld [vmem:[#allocation2 + $0x684] sm:$0xf] }
 0x17b   :  { %3851 = vmatpush.bf16.msrb.mxu2 %v5481_v28  ;;  %3820 = vmatmul.bf16.vlgmr.msra.gmra.mxu3 %v7591_v15  ;;  %v3575_v15 = vadd.f32 %v3574_v26, %v7659_v57  ;;  %v5457_v37 = vor.u32 %v6994_v24, %v5454_v11  ;;  %v5385_v57 = vor.u32 %v6976_v40, %v5382_v44  ;;  %v5294_v24 = vld [vmem:[#allocation2 + $0x608] sm:$0xf0]  ;;  %v7032_v39 = vld [vmem:[#allocation2 + $0x874] sm:$0xf]  ;;  %v5606_v40 = vld [vmem:[#allocation2 + $0x878] sm:$0xf0] }
 0x17c   :  { %3864 = vmatpush.bf16.msrb.mxu3 %v5545_v34  ;;  %v5449_v28 = vor.u32 %v6992_v45, %v5446_v27  ;;  %v5513_v34 = vor.u32 %v7008_v18, %v5510_v50  ;;  %v5358_v30 = vld [vmem:[#allocation2 + $0x688] sm:$0xf0]  ;;  %v5297_v44 = vor.u32 %v6954_v23, %v5294_v24  ;;  %v5670_v45 = vld [vmem:[#allocation2 + $0x8f8] sm:$0xf0]  ;;  %v7064_v27 = vld [vmem:[#allocation2 + $0x974] sm:$0xf]  ;;  %v5609_v29 = vor.u32 %v7032_v39, %v5606_v40 }
 0x17d   :  { %3826 = vmatpush.bf16.msrb.mxu0 %v5345_v61  ;;  %v3588_v42 = vadd.f32 %v3587_v35, %v3575_v15  ;;  %v3600_v54 = vpop.f32.mrf.mxu2  ;;  %v3576_v63 = vpop.f32.mrf.mxu0  ;;  %v6986_v15 = vld [vmem:[#allocation2 + $0x704] sm:$0xf]  ;;  %v5422_v35 = vld [vmem:[#allocation2 + $0x708] sm:$0xf0]  ;;  %v5734_v18 = vld [vmem:[#allocation2 + $0x978] sm:$0xf0]  ;;  %v5361_v50 = vor.u32 %v6970_v12, %v5358_v30 }
 0x17e   :  { %3839 = vmatpush.bf16.msrb.mxu1 %v5409_v43  ;;  %v3613_v61 = vpop.f32.mrf.mxu3  ;;  %v7006_v43 = vld [vmem:[#allocation2 + $0x7a4] sm:$0xf]  ;;  %v3589_v4 = vpop.f32.mrf.mxu1  ;;  %v5790_v63 = vld [vmem:[#allocation2 + $0x9e8] sm:$0xf0]  ;;  %v7024_v39 = vld [vmem:[#allocation2 + $0x834] sm:$0xf] }
 0x17f   :  { %3852 = vmatpush.bf16.msrb.mxu2 %v5473_v62  ;;  %v3601_v60 = vadd.f32 %v3600_v54, %v3588_v42  ;;  %v5502_v62 = vld [vmem:[#allocation2 + $0x7a8] sm:$0xf0]  ;;  %v7030_v54 = vld [vmem:[#allocation2 + $0x864] sm:$0xf]  ;;  %v5574_v40 = vld [vmem:[#allocation2 + $0x838] sm:$0xf0] }
 0x180   :  { %3865 = vmatpush.bf16.msrb.mxu3 %v5537_v7  ;;  %v7026_v24 = vld [vmem:[#allocation2 + $0x844] sm:$0xf]  ;;  %v5646_v12 = vld [vmem:[#allocation2 + $0x8c8] sm:$0xf0] }
 0x181   :  { %3827 = vmatpush.bf16.msrb.mxu0 %v5337_v32  ;;  %v7666_v7 = vadd.f32 %v3613_v61, %v3601_v60  ;;  %v5505_v32 = vor.u32 %v7006_v43, %v5502_v62  ;;  %v5662_v60 = vld [vmem:[#allocation2 + $0x8e8] sm:$0xf0]  ;;  %v7062_v61 = vld [vmem:[#allocation2 + $0x964] sm:$0xf] }
 0x182   :  { %3840 = vmatpush.bf16.msrb.mxu1 %v5401_v19  ;;  %v5366_v19 = vld [vmem:[#allocation2 + $0x698] sm:$0xf0]  ;;  %v5726_v43 = vld [vmem:[#allocation2 + $0x968] sm:$0xf0]  ;;  %v7078_v62 = vld [vmem:[#allocation2 + $0x9e4] sm:$0xf]  ;;  %v5665_v4 = vor.u32 %v7046_v56, %v5662_v60 }
 0x183   :  { %3853 = vmatpush.bf16.msrb.mxu2 %v5465_v38  ;;  %v6988_v38 = vld [vmem:[#allocation2 + $0x714] sm:$0xf]  ;;  %v5369_v11 = vor.u32 %v6972_v17, %v5366_v19  ;;  %v5793_v17 = vor.u32 %v7078_v62, %v5790_v63  ;;  %v7058_v30 = vld [vmem:[#allocation2 + $0x944] sm:$0xf]  ;;  %v5758_v62 = vld [vmem:[#allocation2 + $0x9a8] sm:$0xf0] }
 0x184   :  { %3866 = vmatpush.bf16.msrb.mxu3 %v5529_v22  ;;  %v5305_v22 = vor.u32 %v6956_v16, %v5302_v31  ;;  %v5433_v26 = vor.u32 %v6988_v38, %v5430_v20  ;;  %v5590_v16 = vld [vmem:[#allocation2 + $0x858] sm:$0xf0]  ;;  %v7044_v31 = vld [vmem:[#allocation2 + $0x8d4] sm:$0xf]  ;;  %v7054_v56 = vld [vmem:[#allocation2 + $0x924] sm:$0xf] }
 0x185   :  { %3828 = vmatpush.bf16.msrb.mxu0 %v5329_v33  ;;  %v5497_v33 = vor.u32 %v7004_v8, %v5494_v21  ;;  %v3602_v6 = vpop.f32.mrf.mxu2  ;;  %v7060_v19 = vld [vmem:[#allocation2 + $0x954] sm:$0xf]  ;;  %v5718_v38 = vld [vmem:[#allocation2 + $0x958] sm:$0xf0] }
 0x186   :  { %3841 = vmatpush.bf16.msrb.mxu1 %v5393_v36  ;;  %v7002_v36 = vld [vmem:[#allocation2 + $0x784] sm:$0xf]  ;;  %v3615_v42 = vpop.f32.mrf.mxu3  ;;  %v7076_v20 = vld [vmem:[#allocation2 + $0x9d4] sm:$0xf]  ;;  %v5782_v8 = vld [vmem:[#allocation2 + $0x9d8] sm:$0xf0]  ;;  %v5721_v23 = vor.u32 %v7060_v19, %v5718_v38 }
 0x187   :  { %3854 = vmatpush.bf16.msrb.mxu2 %v5457_v37  ;;  %v5486_v37 = vld [vmem:[#allocation2 + $0x788] sm:$0xf0]  ;;  %v5622_v38 = vld [vmem:[#allocation2 + $0x898] sm:$0xf0] }
 0x188   :  { %3867 = vmatpush.bf16.msrb.mxu3 %v5521_v41  ;;  %v7048_v41 = vld [vmem:[#allocation2 + $0x8f4] sm:$0xf]  ;;  %v5489_v52 = vor.u32 %v7002_v36, %v5486_v37 }
 0x189   :  { %3829 = vmatpush.bf16.msrb.mxu0 %v5321_v51  ;;  %v5425_v51 = vor.u32 %v6986_v15, %v5422_v35  ;;  %v5673_v53 = vor.u32 %v7048_v41, %v5670_v45  ;;  %v7040_v41 = vld [vmem:[#allocation2 + $0x8b4] sm:$0xf]  ;;  %v5638_v45 = vld [vmem:[#allocation2 + $0x8b8] sm:$0xf0] }
 0x18a   :  { %3842 = vmatpush.bf16.msrb.mxu1 %v5385_v57  ;;  %v7080_v57 = vld [vmem:[#allocation2 + $0x9f4] sm:$0xf] }
 0x18b   :  { %3855 = vmatpush.bf16.msrb.mxu2 %v5449_v28  ;;  %v5798_v28 = vld [vmem:[#allocation2 + $0x9f8] sm:$0xf0] }
 0x18c   :  { %3868 = vmatpush.bf16.msrb.mxu3 %v5513_v34  ;;  %v5737_v34 = vor.u32 %v7064_v27, %v5734_v18  ;;  %v5801_v58 = vor.u32 %v7080_v57, %v5798_v28  ;;  %v7056_v27 = vld [vmem:[#allocation2 + $0x934] sm:$0xf]  ;;  %v5702_v18 = vld [vmem:[#allocation2 + $0x938] sm:$0xf0]  ;;  %v5577_v57 = vor.u32 %v7024_v39, %v5574_v40 }
 0x18d   :  { %3830 = vmatpush.bf16.msrb.mxu0 %v5313_v25  ;;  %v5601_v25 = vor.u32 %v7030_v54, %v5598_v55  ;;  %v5705_v28 = vor.u32 %v7056_v27, %v5702_v18  ;;  %v5630_v55 = vld [vmem:[#allocation2 + $0x8a8] sm:$0xf0]  ;;  %v7144_v18 = vld [vmem:[#allocation2 + $0xbf4] sm:$0xf] }
 0x18e   :  { %3843 = vmatpush.bf16.msrb.mxu1 %v5377_v14  ;;  %v5729_v14 = vor.u32 %v7062_v61, %v5726_v43  ;;  %v7070_v43 = vld [vmem:[#allocation2 + $0x9a4] sm:$0xf] }
 0x18f   :  { %3856 = vmatpush.bf16.msrb.mxu2 %v5441_v59  ;;  %v7028_v59 = vld [vmem:[#allocation2 + $0x854] sm:$0xf]  ;;  %v5761_v19 = vor.u32 %v7070_v43, %v5758_v62 }
 0x190   :  { %3869 = vmatpush.bf16.msrb.mxu3 %v5505_v32  ;;  %v5654_v32 = vld [vmem:[#allocation2 + $0x8d8] sm:$0xf0]  ;;  %v5593_v21 = vor.u32 %v7028_v59, %v5590_v16 }
 0x191   :  { %3831 = vmatpush.bf16.msrb.mxu0 %v5305_v22  ;;  %v5657_v22 = vor.u32 %v7044_v31, %v5654_v32  ;;  %v7020_v31 = vld [vmem:[#allocation2 + $0x814] sm:$0xf] }
 0x192   :  { %3844 = vmatpush.bf16.msrb.mxu1 %v5369_v11  ;;  %v7042_v11 = vld [vmem:[#allocation2 + $0x8c4] sm:$0xf]  ;;  %v7036_v32 = vld [vmem:[#allocation2 + $0x894] sm:$0xf] }
 0x193   :  { %3857 = vmatpush.bf16.msrb.mxu2 %v5433_v26  ;;  %v5785_v26 = vor.u32 %v7076_v20, %v5782_v8  ;;  %v5649_v37 = vor.u32 %v7042_v11, %v5646_v12  ;;  %v7052_v20 = vld [vmem:[#allocation2 + $0x914] sm:$0xf]  ;;  %v5686_v8 = vld [vmem:[#allocation2 + $0x918] sm:$0xf0]  ;;  %v5625_v11 = vor.u32 %v7036_v32, %v5622_v38  ;;  %v7034_v12 = vld [vmem:[#allocation2 + $0x884] sm:$0xf] }
 0x194   :  { %3870 = vmatpush.bf16.msrb.mxu3 %v5497_v33  ;;  %v5774_v33 = vld [vmem:[#allocation2 + $0x9c8] sm:$0xf0]  ;;  %v7140_v32 = vld [vmem:[#allocation2 + $0xbd4] sm:$0xf] }
 0x195   :  { %3832 = vmatpush.bf16.msrb.mxu0 %v5297_v44  ;;  %v3626_v15 = vpop.f32.mrf.mxu0 }
 0x196   :  { %3845 = vmatpush.bf16.msrb.mxu1 %v5361_v50  ;;  %v3639_v36 = vpop.f32.mrf.mxu1  ;;  %v7072_v50 = vld [vmem:[#allocation2 + $0x9b4] sm:$0xf] }
 0x197   :  { %3858 = vmatpush.bf16.msrb.mxu2 %v5425_v51  ;;  %v5766_v51 = vld [vmem:[#allocation2 + $0x9b8] sm:$0xf0] }
 0x198   :  { %3871 = vmatpush.bf16.msrb.mxu3 %v5489_v52  ;;  %3833 = vmatmul.bf16.vlgmr.msrb.gmra.mxu0 %v7597_v46  ;;  %v5582_v46 = vld [vmem:[#allocation2 + $0x848] sm:$0xf0]  ;;  %v7022_v52 = vld [vmem:[#allocation2 + $0x824] sm:$0xf] }
 0x199   :  { %3877 = vmatpush.bf16.msra.mxu0 %v5609_v29  ;;  %3846 = vmatmul.bf16.vlgmr.msrb.gmra.mxu1 %v7601_v48  ;;  %v7074_v48 = vld [vmem:[#allocation2 + $0x9c4] sm:$0xf]  ;;  %v5585_v35 = vor.u32 %v7026_v24, %v5582_v46  ;;  %v5566_v29 = vld [vmem:[#allocation2 + $0x828] sm:$0xf0] }
 0x19a   :  { %3890 = vmatpush.bf16.msra.mxu1 %v5673_v53  ;;  %3859 = vmatmul.bf16.vlgmr.msrb.gmra.mxu2 %v7599_v47  ;;  %v5710_v47 = vld [vmem:[#allocation2 + $0x948] sm:$0xf0]  ;;  %v5777_v42 = vor.u32 %v7074_v48, %v5774_v33  ;;  %v7038_v53 = vld [vmem:[#allocation2 + $0x8a4] sm:$0xf] }
 0x19b   :  { %3903 = vmatpush.bf16.msra.mxu2 %v5737_v34  ;;  %3872 = vmatmul.bf16.vlgmr.msrb.gmra.mxu3 %v7603_v49  ;;  %v3627_v49 = vadd.f32 %v3626_v15, %v7666_v7  ;;  %v5713_v6 = vor.u32 %v7058_v30, %v5710_v47  ;;  %v5641_v7 = vor.u32 %v7040_v41, %v5638_v45  ;;  %v7018_v24 = vld [vmem:[#allocation2 + $0x804] sm:$0xf]  ;;  %v5550_v46 = vld [vmem:[#allocation2 + $0x808] sm:$0xf0]  ;;  %v5926_v41 = vld [vmem:[#allocation2 + $0xaf8] sm:$0xf0] }
 0x19c   :  { %3916 = vmatpush.bf16.msra.mxu3 %v5801_v58  ;;  %v5769_v34 = vor.u32 %v7072_v50, %v5766_v51  ;;  %v5694_v58 = vld [vmem:[#allocation2 + $0x928] sm:$0xf0]  ;;  %v5633_v59 = vor.u32 %v7038_v53, %v5630_v55  ;;  %v7050_v47 = vld [vmem:[#allocation2 + $0x904] sm:$0xf]  ;;  %v5553_v40 = vor.u32 %v7018_v24, %v5550_v46  ;;  %v6054_v50 = vld [vmem:[#allocation2 + $0xbf8] sm:$0xf0] }
 0x19d   :  { %3878 = vmatpush.bf16.msra.mxu0 %v5601_v25  ;;  %v3640_v44 = vadd.f32 %v3639_v36, %v3627_v49  ;;  %v3652_v54 = vpop.f32.mrf.mxu2  ;;  %v3628_v63 = vpop.f32.mrf.mxu0  ;;  %v5569_v25 = vor.u32 %v7022_v52, %v5566_v29  ;;  %v5697_v16 = vor.u32 %v7054_v56, %v5694_v58  ;;  %v5614_v30 = vld [vmem:[#allocation2 + $0x888] sm:$0xf0]  ;;  %v7066_v33 = vld [vmem:[#allocation2 + $0x984] sm:$0xf]  ;;  %v7096_v36 = vld [vmem:[#allocation2 + $0xa74] sm:$0xf] }
 0x19e   :  { %3891 = vmatpush.bf16.msra.mxu1 %v5665_v4  ;;  %v3665_v61 = vpop.f32.mrf.mxu3  ;;  %v3641_v4 = vpop.f32.mrf.mxu1  ;;  %v5678_v48 = vld [vmem:[#allocation2 + $0x908] sm:$0xf0]  ;;  %v5617_v45 = vor.u32 %v7034_v12, %v5614_v30  ;;  %v7094_v52 = vld [vmem:[#allocation2 + $0xa64] sm:$0xf]  ;;  %v7092_v63 = vld [vmem:[#allocation2 + $0xa54] sm:$0xf] }
 0x19f   :  { %3904 = vmatpush.bf16.msra.mxu2 %v5729_v14  ;;  %v3653_v60 = vadd.f32 %v3652_v54, %v3640_v44  ;;  %v5742_v49 = vld [vmem:[#allocation2 + $0x988] sm:$0xf0]  ;;  %v5990_v44 = vld [vmem:[#allocation2 + $0xb78] sm:$0xf0]  ;;  %v5681_v27 = vor.u32 %v7050_v47, %v5678_v48  ;;  %v7110_v53 = vld [vmem:[#allocation2 + $0xae4] sm:$0xf] }
 0x1a0   :  { %3917 = vmatpush.bf16.msra.mxu3 %v5793_v17  ;;  %v5558_v17 = vld [vmem:[#allocation2 + $0x818] sm:$0xf0]  ;;  %v5745_v51 = vor.u32 %v7066_v33, %v5742_v49  ;;  %v5854_v29 = vld [vmem:[#allocation2 + $0xa68] sm:$0xf0]  ;;  %v7126_v55 = vld [vmem:[#allocation2 + $0xb64] sm:$0xf] }
 0x1a1   :  { %3879 = vmatpush.bf16.msra.mxu0 %v5593_v21  ;;  %v7673_v14 = vadd.f32 %v3665_v61, %v3653_v60  ;;  %v7068_v21 = vld [vmem:[#allocation2 + $0x994] sm:$0xf]  ;;  %v5918_v54 = vld [vmem:[#allocation2 + $0xae8] sm:$0xf0]  ;;  %v7142_v58 = vld [vmem:[#allocation2 + $0xbe4] sm:$0xf]  ;;  %v5857_v61 = vor.u32 %v7094_v52, %v5854_v29 }
 0x1a2   :  { %3892 = vmatpush.bf16.msra.mxu1 %v5657_v22  ;;  %v5750_v22 = vld [vmem:[#allocation2 + $0x998] sm:$0xf0]  ;;  %v5982_v56 = vld [vmem:[#allocation2 + $0xb68] sm:$0xf0]  ;;  %v5921_v43 = vor.u32 %v7110_v53, %v5918_v54  ;;  %v7108_v4 = vld [vmem:[#allocation2 + $0xad4] sm:$0xf] }
 0x1a3   :  { %3905 = vmatpush.bf16.msra.mxu2 %v5721_v23  ;;  %v5561_v23 = vor.u32 %v7020_v31, %v5558_v17  ;;  %v5753_v15 = vor.u32 %v7068_v21, %v5750_v22  ;;  %v6046_v60 = vld [vmem:[#allocation2 + $0xbe8] sm:$0xf0]  ;;  %v5985_v62 = vor.u32 %v7126_v55, %v5982_v56  ;;  %v7124_v31 = vld [vmem:[#allocation2 + $0xb54] sm:$0xf]  ;;  %v5974_v17 = vld [vmem:[#allocation2 + $0xb58] sm:$0xf0] }
 0x1a4   :  { %3918 = vmatpush.bf16.msra.mxu3 %v5785_v26  ;;  %v5689_v26 = vor.u32 %v7052_v20, %v5686_v8  ;;  %v7090_v20 = vld [vmem:[#allocation2 + $0xa44] sm:$0xf]  ;;  %v5977_v21 = vor.u32 %v7124_v31, %v5974_v17  ;;  %v6030_v12 = vld [vmem:[#allocation2 + $0xbc8] sm:$0xf0]  ;;  %v7088_v48 = vld [vmem:[#allocation2 + $0xa34] sm:$0xf] }
 0x1a5   :  { %3880 = vmatpush.bf16.msra.mxu0 %v5585_v35  ;;  %v3654_v35 = vpop.f32.mrf.mxu2  ;;  %v7106_v22 = vld [vmem:[#allocation2 + $0xac4] sm:$0xf]  ;;  %v5830_v33 = vld [vmem:[#allocation2 + $0xa38] sm:$0xf0]  ;;  %v7104_v49 = vld [vmem:[#allocation2 + $0xab4] sm:$0xf] }
 0x1a6   :  { %3893 = vmatpush.bf16.msra.mxu1 %v5649_v37  ;;  %v5862_v37 = vld [vmem:[#allocation2 + $0xa78] sm:$0xf0]  ;;  %v3667_v39 = vpop.f32.mrf.mxu3  ;;  %v5886_v52 = vld [vmem:[#allocation2 + $0xaa8] sm:$0xf0]  ;;  %v7118_v29 = vld [vmem:[#allocation2 + $0xb24] sm:$0xf] }
 0x1a7   :  { %3906 = vmatpush.bf16.msra.mxu2 %v5713_v6  ;;  %v7112_v6 = vld [vmem:[#allocation2 + $0xaf4] sm:$0xf]  ;;  %v5950_v53 = vld [vmem:[#allocation2 + $0xb28] sm:$0xf0]  ;;  %v7134_v55 = vld [vmem:[#allocation2 + $0xba4] sm:$0xf] }
 0x1a8   :  { %3919 = vmatpush.bf16.msra.mxu3 %v5777_v42  ;;  %v7128_v42 = vld [vmem:[#allocation2 + $0xb74] sm:$0xf]  ;;  %v6014_v56 = vld [vmem:[#allocation2 + $0xba8] sm:$0xf0]  ;;  %v5878_v31 = vld [vmem:[#allocation2 + $0xa98] sm:$0xf0] }
 0x1a9   :  { %3881 = vmatpush.bf16.msra.mxu0 %v5577_v57  ;;  %v5865_v57 = vor.u32 %v7096_v36, %v5862_v37  ;;  %v7120_v39 = vld [vmem:[#allocation2 + $0xb34] sm:$0xf] }
 0x1aa   :  { %3894 = vmatpush.bf16.msra.mxu1 %v5641_v7  ;;  %v5929_v7 = vor.u32 %v7112_v6, %v5926_v41  ;;  %v5894_v6 = vld [vmem:[#allocation2 + $0xab8] sm:$0xf0]  ;;  %v7136_v41 = vld [vmem:[#allocation2 + $0xbb4] sm:$0xf] }
 0x1ab   :  { %3907 = vmatpush.bf16.msra.mxu2 %v5705_v28  ;;  %v5993_v28 = vor.u32 %v7128_v42, %v5990_v44  ;;  %v6022_v42 = vld [vmem:[#allocation2 + $0xbb8] sm:$0xf0]  ;;  %v7116_v17 = vld [vmem:[#allocation2 + $0xb14] sm:$0xf] }
 0x1ac   :  { %3920 = vmatpush.bf16.msra.mxu3 %v5769_v34  ;;  %v6057_v34 = vor.u32 %v7144_v18, %v6054_v50  ;;  %v7086_v50 = vld [vmem:[#allocation2 + $0xa24] sm:$0xf] }
 0x1ad   :  { %3882 = vmatpush.bf16.msra.mxu0 %v5569_v25  ;;  %v5846_v25 = vld [vmem:[#allocation2 + $0xa58] sm:$0xf0] }
 0x1ae   :  { %3895 = vmatpush.bf16.msra.mxu1 %v5633_v59  ;;  %v6049_v59 = vor.u32 %v7142_v58, %v6046_v60  ;;  %v5849_v38 = vor.u32 %v7092_v63, %v5846_v25  ;;  %v7084_v63 = vld [vmem:[#allocation2 + $0xa14] sm:$0xf]  ;;  %v5814_v25 = vld [vmem:[#allocation2 + $0xa18] sm:$0xf0] }
 0x1af   :  { %3908 = vmatpush.bf16.msra.mxu2 %v5697_v16  ;;  %v5910_v16 = vld [vmem:[#allocation2 + $0xad8] sm:$0xf0] }
 0x1b0   :  { %3921 = vmatpush.bf16.msra.mxu3 %v5761_v19  ;;  %v6038_v19 = vld [vmem:[#allocation2 + $0xbd8] sm:$0xf0]  ;;  %v5913_v8 = vor.u32 %v7108_v4, %v5910_v16  ;;  %v7100_v4 = vld [vmem:[#allocation2 + $0xa94] sm:$0xf]  ;;  %v6017_v16 = vor.u32 %v7134_v55, %v6014_v56 }
 0x1b1   :  { %3883 = vmatpush.bf16.msra.mxu0 %v5561_v23  ;;  %v7331_v23 = vld [vmem:[#allocation5] sm:$0x3]  ;;  %v6041_v46 = vor.u32 %v7140_v32, %v6038_v19  ;;  %v5942_v32 = vld [vmem:[#allocation2 + $0xb18] sm:$0xf0]  ;;  %v7132_v19 = vld [vmem:[#allocation2 + $0xb94] sm:$0xf] }
 0x1b2   :  { %3896 = vmatpush.bf16.msra.mxu1 %v5625_v11  ;;  %v618_v24 = vperm.slane %v7331_v23, 1  ;;  %v7122_v11 = vld [vmem:[#allocation2 + $0xb44] sm:$0xf]  ;;  %v6102_v55 = vld [vmem:[#allocation2 + $0xc58] sm:$0xf0] }
 0x1b3   :  { %3909 = vmatpush.bf16.msra.mxu2 %v5689_v26  ;;  %v7138_v26 = vld [vmem:[#allocation2 + $0xbc4] sm:$0xf]  ;;  %v7172_v56 = vld [vmem:[#allocation2 + $0xcd4] sm:$0xf] }
 0x1b4   :  { %3922 = vmatpush.bf16.msra.mxu3 %v5753_v15  ;;  %v6033_v37 = vor.u32 %v7138_v26, %v6030_v12  ;;  %v7098_v23 = vld [vmem:[#allocation2 + $0xa84] sm:$0xf]  ;;  %v5998_v12 = vld [vmem:[#allocation2 + $0xb88] sm:$0xf0] }
 0x1b5   :  { %3884 = vmatpush.bf16.msra.mxu0 %v5553_v40  ;;  %v3678_v30 = vpop.f32.mrf.mxu0  ;;  %v5958_v40 = vld [vmem:[#allocation2 + $0xb38] sm:$0xf0]  ;;  %v7130_v26 = vld [vmem:[#allocation2 + $0xb84] sm:$0xf] }
 0x1b6   :  { %3897 = vmatpush.bf16.msra.mxu1 %v5617_v45  ;;  %v3679_v35 = vadd.f32 %v3678_v30, %v618_v24  ;;  %v3691_v36 = vpop.f32.mrf.mxu1  ;;  %v5833_v45 = vor.u32 %v7088_v48, %v5830_v33  ;;  %v5961_v18 = vor.u32 %v7120_v39, %v5958_v40  ;;  %v5870_v24 = vld [vmem:[#allocation2 + $0xa88] sm:$0xf0]  ;;  %v7160_v30 = vld [vmem:[#allocation2 + $0xc74] sm:$0xf]  ;;  %v6182_v33 = vld [vmem:[#allocation2 + $0xcf8] sm:$0xf0]  ;;  %v6001_v40 = vor.u32 %v7130_v26, %v5998_v12 }
 0x1b7   :  { %3910 = vmatpush.bf16.msra.mxu2 %v5681_v27  ;;  %v5897_v27 = vor.u32 %v7104_v49, %v5894_v6  ;;  %v7192_v49 = vld [vmem:[#allocation2 + $0xd74] sm:$0xf]  ;;  %v6310_v39 = vld [vmem:[#allocation2 + $0xdf8] sm:$0xf0] }
 0x1b8   :  { %3923 = vmatpush.bf16.msra.mxu3 %v5745_v51  ;;  %3885 = vmatmul.bf16.vlgmr.msra.gmra.mxu0 %v7612_v5  ;;  %v5838_v5 = vld [vmem:[#allocation2 + $0xa48] sm:$0xf0]  ;;  %v3692_v44 = vadd.f32 %v3691_v36, %v3679_v35  ;;  %v6246_v35 = vld [vmem:[#allocation2 + $0xd78] sm:$0xf0]  ;;  %v5873_v36 = vor.u32 %v7098_v23, %v5870_v24  ;;  %v7208_v6 = vld [vmem:[#allocation2 + $0xdf4] sm:$0xf] }
 0x1b9   :  { %3929 = vmatpush.bf16.msrb.mxu0 %v5865_v57  ;;  %3898 = vmatmul.bf16.vlgmr.msra.gmra.mxu1 %v7616_v10  ;;  %v5966_v10 = vld [vmem:[#allocation2 + $0xb48] sm:$0xf0]  ;;  %v7102_v57 = vld [vmem:[#allocation2 + $0xaa4] sm:$0xf]  ;;  %v6086_v23 = vld [vmem:[#allocation2 + $0xc38] sm:$0xf0] }
 0x1ba   :  { %3942 = vmatpush.bf16.msrb.mxu1 %v5929_v7  ;;  %3911 = vmatmul.bf16.vlgmr.msra.gmra.mxu2 %v7614_v9  ;;  %v5902_v9 = vld [vmem:[#allocation2 + $0xac8] sm:$0xf0]  ;;  %v5969_v15 = vor.u32 %v7122_v11, %v5966_v10  ;;  %v7168_v24 = vld [vmem:[#allocation2 + $0xcb4] sm:$0xf]  ;;  %v6214_v12 = vld [vmem:[#allocation2 + $0xd38] sm:$0xf0] }
 0x1bb   :  { %3955 = vmatpush.bf16.msrb.mxu2 %v5993_v28  ;;  %3924 = vmatmul.bf16.vlgmr.msra.gmra.mxu3 %v7618_v13  ;;  %v5841_v13 = vor.u32 %v7090_v20, %v5838_v5  ;;  %v5905_v47 = vor.u32 %v7106_v22, %v5902_v9  ;;  %v5822_v51 = vld [vmem:[#allocation2 + $0xa28] sm:$0xf0]  ;;  %v6025_v28 = vor.u32 %v7136_v41, %v6022_v42  ;;  %v7184_v26 = vld [vmem:[#allocation2 + $0xd34] sm:$0xf] }
 0x1bc   :  { %3968 = vmatpush.bf16.msrb.mxu3 %v6057_v34  ;;  %v5825_v58 = vor.u32 %v7086_v50, %v5822_v51  ;;  %v5817_v20 = vor.u32 %v7084_v63, %v5814_v25  ;;  %v5881_v5 = vor.u32 %v7100_v4, %v5878_v31  ;;  %v5945_v22 = vor.u32 %v7116_v17, %v5942_v32  ;;  %v5934_v10 = vld [vmem:[#allocation2 + $0xb08] sm:$0xf0]  ;;  %v7204_v63 = vld [vmem:[#allocation2 + $0xdd4] sm:$0xf]  ;;  %v6294_v25 = vld [vmem:[#allocation2 + $0xdd8] sm:$0xf0] }
 0x1bd   :  { %3930 = vmatpush.bf16.msrb.mxu0 %v5857_v61  ;;  %v3704_v7 = vpop.f32.mrf.mxu2  ;;  %v3680_v61 = vpop.f32.mrf.mxu0  ;;  %v6313_v50 = vor.u32 %v7208_v6, %v6310_v39  ;;  %v6174_v51 = vld [vmem:[#allocation2 + $0xce8] sm:$0xf0]  ;;  %v7154_v31 = vld [vmem:[#allocation2 + $0xc44] sm:$0xf]  ;;  %v6297_v32 = vor.u32 %v7204_v63, %v6294_v25 }
 0x1be   :  { %3943 = vmatpush.bf16.msrb.mxu1 %v5921_v43  ;;  %v3705_v34 = vadd.f32 %v3704_v7, %v3692_v44  ;;  %v3717_v54 = vpop.f32.mrf.mxu3  ;;  %v5889_v43 = vor.u32 %v7102_v57, %v5886_v52  ;;  %v6249_v44 = vor.u32 %v7192_v49, %v6246_v35  ;;  %v7190_v57 = vld [vmem:[#allocation2 + $0xd64] sm:$0xf]  ;;  %v6238_v7 = vld [vmem:[#allocation2 + $0xd68] sm:$0xf0]  ;;  %v6166_v61 = vld [vmem:[#allocation2 + $0xcd8] sm:$0xf0] }
 0x1bf   :  { %3956 = vmatpush.bf16.msrb.mxu2 %v5985_v62  ;;  %v5953_v62 = vor.u32 %v7118_v29, %v5950_v53  ;;  %v6302_v52 = vld [vmem:[#allocation2 + $0xde8] sm:$0xf0]  ;;  %v7170_v17 = vld [vmem:[#allocation2 + $0xcc4] sm:$0xf] }
 0x1c0   :  { %3969 = vmatpush.bf16.msrb.mxu3 %v6049_v59  ;;  %v7679_v60 = vadd.f32 %v3717_v54, %v3705_v34  ;;  %v3693_v59 = vpop.f32.mrf.mxu1  ;;  %v6241_v34 = vor.u32 %v7190_v57, %v6238_v7  ;;  %v7156_v54 = vld [vmem:[#allocation2 + $0xc54] sm:$0xf]  ;;  %v7150_v49 = vld [vmem:[#allocation2 + $0xc24] sm:$0xf]  ;;  %v6078_v35 = vld [vmem:[#allocation2 + $0xc28] sm:$0xf0] }
 0x1c1   :  { %3931 = vmatpush.bf16.msrb.mxu0 %v5849_v38  ;;  %v6006_v38 = vld [vmem:[#allocation2 + $0xb98] sm:$0xf0]  ;;  %v6105_v4 = vor.u32 %v7156_v54, %v6102_v55  ;;  %v6169_v59 = vor.u32 %v7172_v56, %v6166_v61  ;;  %v6142_v6 = vld [vmem:[#allocation2 + $0xca8] sm:$0xf0]  ;;  %v7182_v39 = vld [vmem:[#allocation2 + $0xd24] sm:$0xf] }
 0x1c2   :  { %3944 = vmatpush.bf16.msrb.mxu1 %v5913_v8  ;;  %v7082_v8 = vld [vmem:[#allocation2 + $0xa04] sm:$0xf]  ;;  %v6009_v11 = vor.u32 %v7132_v19, %v6006_v38  ;;  %v6158_v19 = vld [vmem:[#allocation2 + $0xcc8] sm:$0xf0]  ;;  %v7148_v7 = vld [vmem:[#allocation2 + $0xc14] sm:$0xf] }
 0x1c3   :  { %3957 = vmatpush.bf16.msrb.mxu2 %v5977_v21  ;;  %v5806_v21 = vld [vmem:[#allocation2 + $0xa08] sm:$0xf0]  ;;  %v7186_v38 = vld [vmem:[#allocation2 + $0xd44] sm:$0xf]  ;;  %v7180_v54 = vld [vmem:[#allocation2 + $0xd14] sm:$0xf] }
 0x1c4   :  { %3970 = vmatpush.bf16.msrb.mxu3 %v6041_v46  ;;  %v7114_v46 = vld [vmem:[#allocation2 + $0xb04] sm:$0xf]  ;;  %v5809_v48 = vor.u32 %v7082_v8, %v5806_v21  ;;  %v6198_v55 = vld [vmem:[#allocation2 + $0xd18] sm:$0xf0]  ;;  %v7196_v56 = vld [vmem:[#allocation2 + $0xd94] sm:$0xf] }
 0x1c5   :  { %3932 = vmatpush.bf16.msrb.mxu0 %v5841_v13  ;;  %v3706_v9 = vpop.f32.mrf.mxu2  ;;  %v6201_v25 = vor.u32 %v7180_v54, %v6198_v55  ;;  %v6350_v54 = vld [vmem:[#allocation2 + $0xe48] sm:$0xf0]  ;;  %v7234_v55 = vld [vmem:[#allocation2 + $0xec4] sm:$0xf] }
 0x1c6   :  { %3945 = vmatpush.bf16.msrb.mxu1 %v5905_v47  ;;  %v3719_v13 = vpop.f32.mrf.mxu3  ;;  %v6118_v47 = vld [vmem:[#allocation2 + $0xc78] sm:$0xf0] }
 0x1c7   :  { %3958 = vmatpush.bf16.msrb.mxu2 %v5969_v15  ;;  %v7176_v15 = vld [vmem:[#allocation2 + $0xcf4] sm:$0xf]  ;;  %v6121_v41 = vor.u32 %v7160_v30, %v6118_v47  ;;  %v6278_v30 = vld [vmem:[#allocation2 + $0xdb8] sm:$0xf0] }
 0x1c8   :  { %3971 = vmatpush.bf16.msrb.mxu3 %v6033_v37  ;;  %v5937_v37 = vor.u32 %v7114_v46, %v5934_v10  ;;  %v6185_v42 = vor.u32 %v7176_v15, %v6182_v33  ;;  %v6150_v10 = vld [vmem:[#allocation2 + $0xcb8] sm:$0xf0]  ;;  %v7200_v13 = vld [vmem:[#allocation2 + $0xdb4] sm:$0xf]  ;;  %v6217_v33 = vor.u32 %v7184_v26, %v6214_v12  ;;  %v7222_v12 = vld [vmem:[#allocation2 + $0xe64] sm:$0xf] }
 0x1c9   :  { %3933 = vmatpush.bf16.msrb.mxu0 %v5833_v45  ;;  %v7158_v45 = vld [vmem:[#allocation2 + $0xc64] sm:$0xf] }
 0x1ca   :  { %3946 = vmatpush.bf16.msrb.mxu1 %v5897_v27  ;;  %v6110_v27 = vld [vmem:[#allocation2 + $0xc68] sm:$0xf0] }
 0x1cb   :  { %3959 = vmatpush.bf16.msrb.mxu2 %v5961_v18  ;;  %v7174_v18 = vld [vmem:[#allocation2 + $0xce4] sm:$0xf]  ;;  %v6113_v29 = vor.u32 %v7158_v45, %v6110_v27  ;;  %v6270_v45 = vld [vmem:[#allocation2 + $0xda8] sm:$0xf0]  ;;  %v6081_v27 = vor.u32 %v7150_v49, %v6078_v35 }
 0x1cc   :  { %3972 = vmatpush.bf16.msrb.mxu3 %v6025_v28  ;;  %v7206_v28 = vld [vmem:[#allocation2 + $0xde4] sm:$0xf]  ;;  %v6177_v53 = vor.u32 %v7174_v18, %v6174_v51  ;;  %v6558_v35 = vld [vmem:[#allocation2 + $0xfe8] sm:$0xf0] }
 0x1cd   :  { %3934 = vmatpush.bf16.msrb.mxu0 %v5825_v58  ;;  %v6305_v58 = vor.u32 %v7206_v28, %v6302_v52  ;;  %v6070_v28 = vld [vmem:[#allocation2 + $0xc18] sm:$0xf0]  ;;  %v7164_v52 = vld [vmem:[#allocation2 + $0xc94] sm:$0xf]  ;;  %v7270_v49 = vld [vmem:[#allocation2 + $0xfe4] sm:$0xf] }
 0x1ce   :  { %3947 = vmatpush.bf16.msrb.mxu1 %v5889_v43  ;;  %v7188_v43 = vld [vmem:[#allocation2 + $0xd54] sm:$0xf]  ;;  %v6073_v61 = vor.u32 %v7148_v7, %v6070_v28  ;;  %v6550_v7 = vld [vmem:[#allocation2 + $0xfd8] sm:$0xf0] }
 0x1cf   :  { %3960 = vmatpush.bf16.msrb.mxu2 %v5953_v62  ;;  %v6230_v62 = vld [vmem:[#allocation2 + $0xd58] sm:$0xf0]  ;;  %v7335_v28 = vld [vmem:[#allocation1 + $0x1b] sm:$0xff] }
 0x1d0   :  { %3973 = vmatpush.bf16.msrb.mxu3 %v6017_v16  ;;  %v6233_v16 = vor.u32 %v7188_v43, %v6230_v62  ;;  %v7146_v43 = vld [vmem:[#allocation2 + $0xc04] sm:$0xf]  ;;  %v6062_v62 = vld [vmem:[#allocation2 + $0xc08] sm:$0xf0] }
 0x1d1   :  { %3935 = vmatpush.bf16.msrb.mxu0 %v5817_v20  ;;  %v7202_v20 = vld [vmem:[#allocation2 + $0xdc4] sm:$0xf] }
 0x1d2   :  { %3948 = vmatpush.bf16.msrb.mxu1 %v5881_v5 }
 0x1d3   :  { %3961 = vmatpush.bf16.msrb.mxu2 %v5945_v22  ;;  %v7152_v22 = vld [vmem:[#allocation2 + $0xc34] sm:$0xf] }
 0x1d4   :  { %3974 = vmatpush.bf16.msrb.mxu3 %v6009_v11  ;;  %v6089_v15 = vor.u32 %v7152_v22, %v6086_v23 }
 0x1d5   :  { %3936 = vmatpush.bf16.msrb.mxu0 %v5809_v48  ;;  %v3730_v21 = vpop.f32.mrf.mxu0  ;;  %v6153_v48 = vor.u32 %v7168_v24, %v6150_v10  ;;  %v7272_v24 = vld [vmem:[#allocation2 + $0xff4] sm:$0xf] }
 0x1d6   :  { %3949 = vmatpush.bf16.msrb.mxu1 %v5873_v36  ;;  %v3731_v46 = vadd.f32 %v3730_v21, %v7679_v60  ;;  %v3743_v9 = vpop.f32.mrf.mxu1  ;;  %v7166_v36 = vld [vmem:[#allocation2 + $0xca4] sm:$0xf]  ;;  %v6281_v60 = vor.u32 %v7200_v13, %v6278_v30  ;;  %v6438_v21 = vld [vmem:[#allocation2 + $0xef8] sm:$0xf0]  ;;  %v6366_v13 = vld [vmem:[#allocation2 + $0xe68] sm:$0xf0] }
 0x1d7   :  { %3962 = vmatpush.bf16.msrb.mxu2 %v5937_v37  ;;  %v6145_v51 = vor.u32 %v7166_v36, %v6142_v6  ;;  %v7238_v30 = vld [vmem:[#allocation2 + $0xee4] sm:$0xf]  ;;  %v6369_v36 = vor.u32 %v7222_v12, %v6366_v13  ;;  %v7220_v6 = vld [vmem:[#allocation2 + $0xe54] sm:$0xf]  ;;  %v6462_v12 = vld [vmem:[#allocation2 + $0xf28] sm:$0xf0] }
 0x1d8   :  { %3975 = vmatpush.bf16.msrb.mxu3 %v6001_v40  ;;  %3937 = vmatmul.bf16.vlgmr.msrb.gmra.mxu0 %v7624_v0  ;;  %v6094_v0 = vld [vmem:[#allocation2 + $0xc48] sm:$0xf0]  ;;  %v3744_v47 = vadd.f32 %v3743_v9, %v3731_v46  ;;  %v6566_v46 = vld [vmem:[#allocation2 + $0xff8] sm:$0xf0] }
 0x1d9   :  { %3981 = vmatpush.bf16.msra.mxu0 %v6121_v41  ;;  %3950 = vmatmul.bf16.vlgmr.msrb.gmra.mxu1 %v7628_v2  ;;  %v6286_v2 = vld [vmem:[#allocation2 + $0xdc8] sm:$0xf0]  ;;  %v6097_v8 = vor.u32 %v7154_v31, %v6094_v0 }
 0x1da   :  { %3994 = vmatpush.bf16.msra.mxu1 %v6185_v42  ;;  %3963 = vmatmul.bf16.vlgmr.msrb.gmra.mxu2 %v7626_v1  ;;  %v6222_v1 = vld [vmem:[#allocation2 + $0xd48] sm:$0xf0]  ;;  %v6289_v11 = vor.u32 %v7202_v20, %v6286_v2  ;;  %v6374_v20 = vld [vmem:[#allocation2 + $0xe78] sm:$0xf0]  ;;  %v7240_v2 = vld [vmem:[#allocation2 + $0xef4] sm:$0xf] }
 0x1db   :  { %4007 = vmatpush.bf16.msra.mxu2 %v6249_v44  ;;  %3976 = vmatmul.bf16.vlgmr.msrb.gmra.mxu3 %v7630_v3  ;;  %v6161_v3 = vor.u32 %v7170_v17, %v6158_v19  ;;  %v6225_v5 = vor.u32 %v7186_v38, %v6222_v1  ;;  %v6206_v40 = vld [vmem:[#allocation2 + $0xd28] sm:$0xf0]  ;;  %v7198_v44 = vld [vmem:[#allocation2 + $0xda4] sm:$0xf]  ;;  %v7224_v1 = vld [vmem:[#allocation2 + $0xe74] sm:$0xf]  ;;  %v6441_v10 = vor.u32 %v7240_v2, %v6438_v21 }
 0x1dc   :  { %4020 = vmatpush.bf16.msra.mxu3 %v6313_v50  ;;  %v6209_v57 = vor.u32 %v7182_v39, %v6206_v40  ;;  %v6190_v17 = vld [vmem:[#allocation2 + $0xd08] sm:$0xf0]  ;;  %v6358_v39 = vld [vmem:[#allocation2 + $0xe58] sm:$0xf0]  ;;  %v7236_v40 = vld [vmem:[#allocation2 + $0xed4] sm:$0xf] }
 0x1dd   :  { %3982 = vmatpush.bf16.msra.mxu0 %v6113_v29  ;;  %v3756_v37 = vpop.f32.mrf.mxu2  ;;  %v3732_v50 = vpop.f32.mrf.mxu0  ;;  %v6254_v19 = vld [vmem:[#allocation2 + $0xd88] sm:$0xf0]  ;;  %v7248_v2 = vld [vmem:[#allocation2 + $0xf34] sm:$0xf] }
 0x1de   :  { %3995 = vmatpush.bf16.msra.mxu1 %v6177_v53  ;;  %v3757_v41 = vadd.f32 %v3756_v37, %v3744_v47  ;;  %v3769_v42 = vpop.f32.mrf.mxu3  ;;  %v3745_v29 = vpop.f32.mrf.mxu1  ;;  %v6273_v53 = vor.u32 %v7198_v44, %v6270_v45  ;;  %v6569_v47 = vor.u32 %v7272_v24, %v6566_v46  ;;  %v6422_v44 = vld [vmem:[#allocation2 + $0xed8] sm:$0xf0]  ;;  %v7252_v45 = vld [vmem:[#allocation2 + $0xf54] sm:$0xf]  ;;  %v7333_v50 = vld [vmem:[#allocation1 + $0x12] sm:$0xff] }
 0x1df   :  { %4008 = vmatpush.bf16.msra.mxu2 %v6241_v34  ;;  %v6134_v34 = vld [vmem:[#allocation2 + $0xc98] sm:$0xf0]  ;;  %v6425_v29 = vor.u32 %v7236_v40, %v6422_v44  ;;  %v7264_v21 = vld [vmem:[#allocation2 + $0xfb4] sm:$0xf]  ;;  %v6334_v24 = vld [vmem:[#allocation2 + $0xe28] sm:$0xf0] }
 0x1e0   :  { %4021 = vmatpush.bf16.msra.mxu3 %v6305_v58  ;;  %v7686_v18 = vadd.f32 %v3769_v42, %v3757_v41  ;;  %v6262_v58 = vld [vmem:[#allocation2 + $0xd98] sm:$0xf0]  ;;  %v6137_v63 = vor.u32 %v7164_v52, %v6134_v34  ;;  %v6561_v42 = vor.u32 %v7270_v49, %v6558_v35  ;;  %v6361_v52 = vor.u32 %v7220_v6, %v6358_v39  ;;  %v7218_v34 = vld [vmem:[#allocation2 + $0xe44] sm:$0xf]  ;;  %v7228_v39 = vld [vmem:[#allocation2 + $0xe94] sm:$0xf] }
 0x1e1   :  { %3983 = vmatpush.bf16.msra.mxu0 %v6105_v4  ;;  %v7162_v4 = vld [vmem:[#allocation2 + $0xc84] sm:$0xf]  ;;  %v6265_v0 = vor.u32 %v7196_v56, %v6262_v58  ;;  %v7332_v41 = vld [vmem:[#allocation1] sm:$0xff]  ;;  %v6414_v58 = vld [vmem:[#allocation2 + $0xec8] sm:$0xf0] }
 0x1e2   :  { %3996 = vmatpush.bf16.msra.mxu1 %v6169_v59  ;;  %v6126_v59 = vld [vmem:[#allocation2 + $0xc88] sm:$0xf0]  ;;  %v7230_v46 = vld [vmem:[#allocation2 + $0xea4] sm:$0xf]  ;;  %v6326_v6 = vld [vmem:[#allocation2 + $0xe18] sm:$0xf0] }
 0x1e3   :  { %4009 = vmatpush.bf16.msra.mxu2 %v6233_v16  ;;  %v7178_v16 = vld [vmem:[#allocation2 + $0xd04] sm:$0xf]  ;;  %v6129_v22 = vor.u32 %v7162_v4, %v6126_v59  ;;  %v6353_v59 = vor.u32 %v7218_v34, %v6350_v54  ;;  %v6454_v44 = vld [vmem:[#allocation2 + $0xf18] sm:$0xf0]  ;;  %v6446_v54 = vld [vmem:[#allocation2 + $0xf08] sm:$0xf0] }
 0x1e4   :  { %4022 = vmatpush.bf16.msra.mxu3 %v6297_v32  ;;  %v7194_v32 = vld [vmem:[#allocation2 + $0xd84] sm:$0xf]  ;;  %v6193_v23 = vor.u32 %v7178_v16, %v6190_v17  ;;  %v7216_v17 = vld [vmem:[#allocation2 + $0xe34] sm:$0xf] }
 0x1e5   :  { %3984 = vmatpush.bf16.msra.mxu0 %v6097_v8  ;;  %v3758_v31 = vpop.f32.mrf.mxu2  ;;  %v6065_v8 = vor.u32 %v7146_v43, %v6062_v62  ;;  %v6257_v9 = vor.u32 %v7194_v32, %v6254_v19  ;;  %v6478_v43 = vld [vmem:[#allocation2 + $0xf48] sm:$0xf0]  ;;  %v6342_v32 = vld [vmem:[#allocation2 + $0xe38] sm:$0xf0]  ;;  %v7232_v19 = vld [vmem:[#allocation2 + $0xeb4] sm:$0xf] }
 0x1e6   :  { %3997 = vmatpush.bf16.msra.mxu1 %v6161_v3  ;;  %v3771_v38 = vpop.f32.mrf.mxu3  ;;  %v7256_v3 = vld [vmem:[#allocation2 + $0xf74] sm:$0xf]  ;;  %v6417_v31 = vor.u32 %v7234_v55, %v6414_v58  ;;  %v7242_v34 = vld [vmem:[#allocation2 + $0xf04] sm:$0xf]  ;;  %v6510_v58 = vld [vmem:[#allocation2 + $0xf88] sm:$0xf0] }
 0x1e7   :  { %4010 = vmatpush.bf16.msra.mxu2 %v6225_v5  ;;  %v6502_v5 = vld [vmem:[#allocation2 + $0xf78] sm:$0xf0]  ;;  %v7258_v55 = vld [vmem:[#allocation2 + $0xf84] sm:$0xf] }
 0x1e8   :  { %4023 = vmatpush.bf16.msra.mxu3 %v6289_v11  ;;  %v6377_v11 = vor.u32 %v7224_v1, %v6374_v20  ;;  %v6505_v26 = vor.u32 %v7256_v3, %v6502_v5  ;;  %v6406_v20 = vld [vmem:[#allocation2 + $0xeb8] sm:$0xf0]  ;;  %v6345_v5 = vor.u32 %v7216_v17, %v6342_v32  ;;  %v6620_v32 = vld [vmem:[#allocation7 + $0x60] sm:$0xf] }
 0x1e9   :  { %3985 = vmatpush.bf16.msra.mxu0 %v6089_v15  ;;  %v6430_v15 = vld [vmem:[#allocation2 + $0xee8] sm:$0xf0]  ;;  %v6534_v3 = vld [vmem:[#allocation2 + $0xfb8] sm:$0xf0] }
 0x1ea   :  { %3998 = vmatpush.bf16.msra.mxu1 %v6153_v48  ;;  %v7254_v48 = vld [vmem:[#allocation2 + $0xf64] sm:$0xf]  ;;  %v6433_v37 = vor.u32 %v7238_v30, %v6430_v15  ;;  %v6526_v15 = vld [vmem:[#allocation2 + $0xfa8] sm:$0xf0] }
 0x1eb   :  { %4011 = vmatpush.bf16.msra.mxu2 %v6217_v33  ;;  %v6494_v33 = vld [vmem:[#allocation2 + $0xf68] sm:$0xf0] }
 0x1ec   :  { %4024 = vmatpush.bf16.msra.mxu3 %v6281_v60  ;;  %v6497_v60 = vor.u32 %v7254_v48, %v6494_v33 }
 0x1ed   :  { %3986 = vmatpush.bf16.msra.mxu0 %v6081_v27  ;;  %v6486_v27 = vld [vmem:[#allocation2 + $0xf58] sm:$0xf0] }
 0x1ee   :  { %3999 = vmatpush.bf16.msra.mxu1 %v6145_v51  ;;  %v7334_v51 = vld [vmem:[#allocation1 + $0x9] sm:$0xff] }
 0x1ef   :  { %4012 = vmatpush.bf16.msra.mxu2 %v6209_v57  ;;  %v7268_v57 = vld [vmem:[#allocation2 + $0xfd4] sm:$0xf] }
 0x1f0   :  { %4025 = vmatpush.bf16.msra.mxu3 %v6273_v53  ;;  %v6489_v53 = vor.u32 %v7252_v45, %v6486_v27  ;;  %v6553_v56 = vor.u32 %v7268_v57, %v6550_v7  ;;  %v7260_v45 = vld [vmem:[#allocation2 + $0xf94] sm:$0xf]  ;;  %v6518_v27 = vld [vmem:[#allocation2 + $0xf98] sm:$0xf0] }
 0x1f1   :  { %3987 = vmatpush.bf16.msra.mxu0 %v6073_v61  ;;  %v7250_v61 = vld [vmem:[#allocation2 + $0xf44] sm:$0xf] }
 0x1f2   :  { %4000 = vmatpush.bf16.msra.mxu1 %v6137_v63  ;;  %v7266_v63 = vld [vmem:[#allocation2 + $0xfc4] sm:$0xf] }
 0x1f3   :  { %4013 = vmatpush.bf16.msra.mxu2 %v6201_v25  ;;  %v6542_v25 = vld [vmem:[#allocation2 + $0xfc8] sm:$0xf0] }
 0x1f4   :  { %4026 = vmatpush.bf16.msra.mxu3 %v6265_v0  ;;  %v6481_v0 = vor.u32 %v7250_v61, %v6478_v43  ;;  %v6545_v38 = vor.u32 %v7266_v63, %v6542_v25  ;;  %v6628_v61 = vld [vmem:[#allocation7 + $0x70] sm:$0xf]  ;;  %v7289_v43 = vld [vmem:[#allocation7 + $0x74] sm:$0xf0]  ;;  %v7288_v25 = vld [vmem:[#allocation7 + $0x74] sm:$0xf] }
 0x1f5   :  { %3988 = vmatpush.bf16.msra.mxu0 %v6065_v8  ;;  %v3782_v62 = vpop.f32.mrf.mxu0  ;;  %v6470_v8 = vld [vmem:[#allocation2 + $0xf38] sm:$0xf0] }
 0x1f6   :  { %4001 = vmatpush.bf16.msra.mxu1 %v6129_v22  ;;  %v3783_v4 = vadd.f32 %v3782_v62, %v7686_v18  ;;  %v3795_v16 = vpop.f32.mrf.mxu1  ;;  %v6409_v18 = vor.u32 %v7232_v19, %v6406_v20  ;;  %v6473_v22 = vor.u32 %v7248_v2, %v6470_v8  ;;  %v7287_v19 = vld [vmem:[#allocation7 + $0x64] sm:$0xf0]  ;;  %v7336_v2 = vld [vmem:[#allocation1 + $0x24] sm:$0xff] }
 0x1f7   :  { %4014 = vmatpush.bf16.msra.mxu2 %v6193_v23  ;;  %v7214_v23 = vld [vmem:[#allocation2 + $0xe24] sm:$0xf]  ;;  %v6621_v20 = vor.u32 %v7287_v19, %v6620_v32 }
 0x1f8   :  { %4027 = vmatpush.bf16.msra.mxu3 %v6257_v9  ;;  %3989 = vmatmul.bf16.vlgmr.msra.gmra.mxu0 %v7332_v41  ;;  %v3796_v1 = vadd.f32 %v3795_v16, %v3783_v4  ;;  %v6537_v9 = vor.u32 %v7264_v21, %v6534_v3  ;;  %v6337_v33 = vor.u32 %v7214_v23, %v6334_v24  ;;  %v6390_v41 = vld [vmem:[#allocation2 + $0xe98] sm:$0xf0]  ;;  %v6612_v21 = vld [vmem:[#allocation7 + $0x50] sm:$0xf] }
 0x1f9   :  { %4033 = vmatpush.bf16.msrb.mxu0 %v6377_v11  ;;  %4002 = vmatmul.bf16.vlgmr.msra.gmra.mxu1 %v7334_v51  ;;  %v7210_v51 = vld [vmem:[#allocation2 + $0xe04] sm:$0xf]  ;;  %v6393_v57 = vor.u32 %v7228_v39, %v6390_v41  ;;  %v6630_v4 = vld [vmem:[#allocation7 + $0x78] sm:$0xf0]  ;;  %v6449_v16 = vor.u32 %v7242_v34, %v6446_v54  ;;  %v7285_v3 = vld [vmem:[#allocation7 + $0x54] sm:$0xf0] }
 0x1fa   :  { %4046 = vmatpush.bf16.msrb.mxu1 %v6441_v10  ;;  %4015 = vmatmul.bf16.vlgmr.msra.gmra.mxu2 %v7333_v50  ;;  %v6398_v10 = vld [vmem:[#allocation2 + $0xea8] sm:$0xf0]  ;;  %v6633_v17 = vor.u32 %v7288_v25, %v6630_v4  ;;  %v6614_v23 = vld [vmem:[#allocation7 + $0x58] sm:$0xf0]  ;;  %v4085_v4 = vmax.f32 %v7673_v14, 0.0 }
 0x1fb   :  { %4059 = vmatpush.bf16.msrb.mxu2 %v6505_v26  ;;  %4028 = vmatmul.bf16.vlgmr.msra.gmra.mxu3 %v7335_v28  ;;  %v7246_v26 = vld [vmem:[#allocation2 + $0xf24] sm:$0xf]  ;;  %v6318_v28 = vld [vmem:[#allocation2 + $0xe08] sm:$0xf0]  ;;  %v7339_v24 = vld [vmem:[#allocation1 + $0x3f] sm:$0xff] }
 0x1fc   :  { %4072 = vmatpush.bf16.msrb.mxu3 %v6569_v47  ;;  %v7262_v47 = vld [vmem:[#allocation2 + $0xfa4] sm:$0xf]  ;;  %v6321_v63 = vor.u32 %v7210_v51, %v6318_v28  ;;  %v7279_v41 = vld [vmem:[#allocation7 + $0x24] sm:$0xf0]  ;;  %v6582_v34 = vld [vmem:[#allocation7 + $0x18] sm:$0xf0] }
 0x1fd   :  { %4034 = vmatpush.bf16.msrb.mxu0 %v6369_v36  ;;  %v3808_v11 = vpop.f32.mrf.mxu2  ;;  %v3784_v48 = vpop.f32.mrf.mxu0  ;;  %v6401_v36 = vor.u32 %v7230_v46, %v6398_v10  ;;  %v6529_v40 = vor.u32 %v7262_v47, %v6526_v15  ;;  %v6613_v46 = vor.u32 %v7285_v3, %v6612_v21  ;;  %v7283_v10 = vld [vmem:[#allocation7 + $0x44] sm:$0xf0] }
 0x1fe   :  { %4047 = vmatpush.bf16.msrb.mxu1 %v6433_v37  ;;  %v3809_v13 = vadd.f32 %v3808_v11, %v3796_v1  ;;  %v3821_v30 = vpop.f32.mrf.mxu3  ;;  %v3797_v49 = vpop.f32.mrf.mxu1  ;;  %v6465_v37 = vor.u32 %v7246_v26, %v6462_v12  ;;  %v6622_v1 = vld [vmem:[#allocation7 + $0x68] sm:$0xf0]  ;;  %v6604_v11 = vld [vmem:[#allocation7 + $0x40] sm:$0xf]  ;;  %v7282_v26 = vld [vmem:[#allocation7 + $0x44] sm:$0xf] }
 0x1ff   :  { %4060 = vmatpush.bf16.msrb.mxu2 %v6497_v60  ;;  %v7212_v60 = vld [vmem:[#allocation2 + $0xe14] sm:$0xf]  ;;  %v6606_v12 = vld [vmem:[#allocation7 + $0x48] sm:$0xf0]  ;;  %v6605_v47 = vor.u32 %v7283_v10, %v6604_v11  ;;  %v7281_v49 = vld [vmem:[#allocation7 + $0x34] sm:$0xf0] }
 0x200   :  { %4073 = vmatpush.bf16.msrb.mxu3 %v6561_v42  ;;  %v7689_v35 = vadd.f32 %v3821_v30, %v3809_v13  ;;  %v7244_v42 = vld [vmem:[#allocation2 + $0xf14] sm:$0xf]  ;;  %v6329_v50 = vor.u32 %v7212_v60, %v6326_v6  ;;  %v6609_v48 = vor.u32 %v7282_v26, %v6606_v12  ;;  %v6598_v60 = vld [vmem:[#allocation7 + $0x38] sm:$0xf0]  ;;  %v6684_v12 = vld [vmem:[#allocation7 + $0xe0] sm:$0xf] }
 0x201   :  { %4035 = vmatpush.bf16.msrb.mxu0 %v6361_v52  ;;  %v6457_v7 = vor.u32 %v7244_v42, %v6454_v44  ;;  %v7226_v52 = vld [vmem:[#allocation2 + $0xe84] sm:$0xf]  ;;  %v6694_v26 = vld [vmem:[#allocation7 + $0xf8] sm:$0xf0] }
 0x202   :  { %4048 = vmatpush.bf16.msrb.mxu1 %v6425_v29  ;;  %v6382_v29 = vld [vmem:[#allocation2 + $0xe88] sm:$0xf0]  ;;  %v7278_v44 = vld [vmem:[#allocation7 + $0x24] sm:$0xf] }
 0x203   :  { %4061 = vmatpush.bf16.msrb.mxu2 %v6489_v53  ;;  %v6521_v53 = vor.u32 %v7260_v45, %v6518_v27  ;;  %v6590_v45 = vld [vmem:[#allocation7 + $0x28] sm:$0xf0] }
 0x204   :  { %4074 = vmatpush.bf16.msrb.mxu3 %v6553_v56  ;;  %v6593_v28 = vor.u32 %v7278_v44, %v6590_v45  ;;  %v7299_v44 = vld [vmem:[#allocation7 + $0xc4] sm:$0xf0]  ;;  %v7298_v45 = vld [vmem:[#allocation7 + $0xc4] sm:$0xf] }
 0x205   :  { %4036 = vmatpush.bf16.msrb.mxu0 %v6353_v59  ;;  %v3810_v56 = vpop.f32.mrf.mxu2  ;;  %v6385_v59 = vor.u32 %v7226_v52, %v6382_v29  ;;  %v6580_v52 = vld [vmem:[#allocation7 + $0x10] sm:$0xf]  ;;  %v7277_v29 = vld [vmem:[#allocation7 + $0x14] sm:$0xf0] }
 0x206   :  { %4049 = vmatpush.bf16.msrb.mxu1 %v6417_v31  ;;  %v3823_v62 = vpop.f32.mrf.mxu3  ;;  %v6513_v31 = vor.u32 %v7258_v55, %v6510_v58  ;;  %v6581_v54 = vor.u32 %v7277_v29, %v6580_v52  ;;  %v6572_v56 = vld [vmem:[#allocation7] sm:$0xf]  ;;  %v7275_v58 = vld [vmem:[#allocation7 + $0x4] sm:$0xf0]  ;;  %v6662_v52 = vld [vmem:[#allocation7 + $0xb8] sm:$0xf0] }
 0x207   :  { %4062 = vmatpush.bf16.msrb.mxu2 %v6481_v0  ;;  %v6629_v0 = vor.u32 %v7289_v43, %v6628_v61  ;;  %v7274_v61 = vld [vmem:[#allocation7 + $0x4] sm:$0xf]  ;;  %v6574_v43 = vld [vmem:[#allocation7 + $0x8] sm:$0xf0]  ;;  %v6573_v25 = vor.u32 %v7275_v58, %v6572_v56 }
 0x208   :  { %4075 = vmatpush.bf16.msrb.mxu3 %v6545_v38  ;;  %v7286_v38 = vld [vmem:[#allocation7 + $0x64] sm:$0xf] }
 0x209   :  { %4037 = vmatpush.bf16.msrb.mxu0 %v6345_v5  ;;  %v6625_v8 = vor.u32 %v7286_v38, %v6622_v1  ;;  %v7337_v5 = vld [vmem:[#allocation1 + $0x2d] sm:$0xff] }
 0x20a   :  { %4050 = vmatpush.bf16.msrb.mxu1 %v6409_v18  ;;  %v7338_v18 = vld [vmem:[#allocation1 + $0x36] sm:$0xff] }
 0x20b   :  { %4063 = vmatpush.bf16.msrb.mxu2 %v6473_v22  ;;  %v7284_v22 = vld [vmem:[#allocation7 + $0x54] sm:$0xf] }
 0x20c   :  { %4076 = vmatpush.bf16.msrb.mxu3 %v6537_v9  ;;  %v6617_v9 = vor.u32 %v7284_v22, %v6614_v23 }
 0x20d   :  { %4038 = vmatpush.bf16.msrb.mxu0 %v6337_v33  ;;  %v6596_v33 = vld [vmem:[#allocation7 + $0x30] sm:$0xf] }
 0x20e   :  { %4051 = vmatpush.bf16.msrb.mxu1 %v6401_v36  ;;  %v6597_v6 = vor.u32 %v7281_v49, %v6596_v33  ;;  %v6676_v49 = vld [vmem:[#allocation7 + $0xd0] sm:$0xf] }
 0x20f   :  { %4064 = vmatpush.bf16.msrb.mxu2 %v6465_v37  ;;  %v7280_v37 = vld [vmem:[#allocation7 + $0x34] sm:$0xf] }
 0x210   :  { %4077 = vmatpush.bf16.msrb.mxu3 %v6529_v40  ;;  %v6601_v39 = vor.u32 %v7280_v37, %v6598_v60  ;;  %v6588_v40 = vld [vmem:[#allocation7 + $0x20] sm:$0xf]  ;;  %v7300_v37 = vld [vmem:[#allocation7 + $0xd4] sm:$0xf] }
 0x211   :  { %4039 = vmatpush.bf16.msrb.mxu0 %v6329_v50  ;;  %v6589_v51 = vor.u32 %v7279_v41, %v6588_v40 }
 0x212   :  { %4052 = vmatpush.bf16.msrb.mxu1 %v6393_v57 }
 0x213   :  { %4065 = vmatpush.bf16.msrb.mxu2 %v6457_v7 }
 0x214   :  { %4078 = vmatpush.bf16.msrb.mxu3 %v6521_v53  ;;  %v7276_v53 = vld [vmem:[#allocation7 + $0x14] sm:$0xf] }
 0x215   :  { %4040 = vmatpush.bf16.msrb.mxu0 %v6321_v63  ;;  %v3834_v13 = vpop.f32.mrf.mxu0  ;;  %v6585_v55 = vor.u32 %v7276_v53, %v6582_v34  ;;  %v6652_v34 = vld [vmem:[#allocation7 + $0xa0] sm:$0xf] }
 0x216   :  { %4053 = vmatpush.bf16.msrb.mxu1 %v6385_v59  ;;  %v3835_v30 = vadd.f32 %v3834_v13, %v7689_v35  ;;  %v3847_v15 = vpop.f32.mrf.mxu1  ;;  %v6577_v59 = vor.u32 %v7274_v61, %v6574_v43  ;;  %v7303_v13 = vld [vmem:[#allocation7 + $0xe4] sm:$0xf0]  ;;  %v6654_v61 = vld [vmem:[#allocation7 + $0xa8] sm:$0xf0] }
 0x217   :  { %4066 = vmatpush.bf16.msrb.mxu2 %v6449_v16  ;;  %v4087_v16 = vpack.c.bf16 %v4085_v4, %v4085_v4 }
 0x218   :  { %4079 = vmatpush.bf16.msrb.mxu3 %v6513_v31  ;;  %4041 = vmatmul.bf16.vlgmr.msrb.gmra.mxu0 %v7336_v2  ;;  %v3848_v36 = vadd.f32 %v3847_v15, %v3835_v30  ;;  %v6686_v15 = vld [vmem:[#allocation7 + $0xe8] sm:$0xf0] }
 0x219   :  { %4287 = vmatpush.bf16.msra.mxu0 %v6629_v0  ;;  %4054 = vmatmul.bf16.vlgmr.msrb.gmra.mxu1 %v7337_v5 }
 0x21a   :  { %4067 = vmatmul.bf16.vlgmr.msrb.gmra.mxu2 %v7338_v18 }
 0x21b   :  { %4313 = vmatpush.bf16.msra.mxu2 %v6633_v17  ;;  %4080 = vmatmul.bf16.vlgmr.msrb.gmra.mxu3 %v7339_v24  ;;  %v6692_v24 = vld [vmem:[#allocation7 + $0xf0] sm:$0xf] }
 0x21d   :  { %4288 = vmatpush.bf16.msra.mxu0 %v6621_v20  ;;  %v3860_v42 = vpop.f32.mrf.mxu2  ;;  %v3836_v50 = vpop.f32.mrf.mxu0 }
 0x21e   :  { %v3861_v27 = vadd.f32 %v3860_v42, %v3848_v36  ;;  %v3873_v35 = vpop.f32.mrf.mxu3  ;;  %v3849_v57 = vpop.f32.mrf.mxu1  ;;  %v7301_v36 = vld [vmem:[#allocation7 + $0xd4] sm:$0xf0]  ;;  %v6668_v42 = vld [vmem:[#allocation7 + $0xc0] sm:$0xf] }
 0x21f   :  { %4314 = vmatpush.bf16.msra.mxu2 %v6625_v8  ;;  %v7297_v57 = vld [vmem:[#allocation7 + $0xb4] sm:$0xf0] }
 0x220   :  { %v3874_v7 = vadd.f32 %v3873_v35, %v3861_v27  ;;  %v6670_v27 = vld [vmem:[#allocation7 + $0xc8] sm:$0xf0]  ;;  %v6669_v35 = vor.u32 %v7299_v44, %v6668_v42  ;;  %v7311_v42 = vld [vmem:[%s7764_s5 + $0x28] sm:$0xff] }
 0x221   :  { %4289 = vmatpush.bf16.msra.mxu0 %v6613_v46  ;;  %v7305_v46 = vld [vmem:[#allocation7 + $0xf4] sm:$0xf0]  ;;  %v6673_v50 = vor.u32 %v7298_v45, %v6670_v27  ;;  %v7319_v44 = vld [vmem:[%s7764_s5 + $0x68] sm:$0xff] }
 0x222   :  { %v6693_v10 = vor.u32 %v7305_v46, %v6692_v24  ;;  %v7310_v45 = vld [vmem:[%s7764_s5 + $0x20] sm:$0xff] }
 0x223   :  { %4315 = vmatpush.bf16.msra.mxu2 %v6617_v9  ;;  %v7304_v9 = vld [vmem:[#allocation7 + $0xf4] sm:$0xf] }
 0x224   :  { %v6697_v30 = vor.u32 %v7304_v9, %v6694_v26  ;;  %4300 = vmatpush.bf16.msra.mxu1 %v6693_v10  ;;  %v7318_v27 = vld [vmem:[%s7764_s5 + $0x60] sm:$0xff] }
 0x225   :  { %4290 = vmatpush.bf16.msra.mxu0 %v6605_v47  ;;  %v3862_v62 = vpop.f32.mrf.mxu2  ;;  %v7302_v47 = vld [vmem:[#allocation7 + $0xe4] sm:$0xf] }
 0x226   :  { %v3875_v63 = vpop.f32.mrf.mxu3  ;;  %4326 = vmatpush.bf16.msra.mxu3 %v6697_v30  ;;  %v6689_v33 = vor.u32 %v7302_v47, %v6686_v15  ;;  %v6644_v62 = vld [vmem:[#allocation7 + $0x90] sm:$0xf] }
 0x227   :  { %4316 = vmatpush.bf16.msra.mxu2 %v6609_v48  ;;  %v6685_v48 = vor.u32 %v7303_v13, %v6684_v12  ;;  %v7293_v63 = vld [vmem:[#allocation7 + $0x94] sm:$0xf0] }
 0x228   :  { %v6645_v4 = vor.u32 %v7293_v63, %v6644_v62 }
 0x229   :  { %4291 = vmatpush.bf16.msra.mxu0 %v6597_v6  ;;  %4301 = vmatpush.bf16.msra.mxu1 %v6685_v48  ;;  %v6677_v6 = vor.u32 %v7301_v36, %v6676_v49 }
 0x22a   :  { %4327 = vmatpush.bf16.msra.mxu3 %v6689_v33 }
 0x22b   :  { %4317 = vmatpush.bf16.msra.mxu2 %v6601_v39  ;;  %v6678_v39 = vld [vmem:[#allocation7 + $0xd8] sm:$0xf0] }
 0x22c   :  { %v6681_v41 = vor.u32 %v7300_v37, %v6678_v39  ;;  %v7312_v39 = vld [vmem:[%s7764_s5 + $0x30] sm:$0xff] }
 0x22d   :  { %4292 = vmatpush.bf16.msra.mxu0 %v6589_v51  ;;  %4302 = vmatpush.bf16.msra.mxu1 %v6677_v6  ;;  %v6660_v51 = vld [vmem:[#allocation7 + $0xb0] sm:$0xf] }
 0x22e   :  { %4328 = vmatpush.bf16.msra.mxu3 %v6681_v41 }
 0x22f   :  { %4318 = vmatpush.bf16.msra.mxu2 %v6593_v28  ;;  %v6661_v28 = vor.u32 %v7297_v57, %v6660_v51  ;;  %v7308_v57 = vld [vmem:[%s7764_s5 + $0x10] sm:$0xff] }
 0x231   :  { %4293 = vmatpush.bf16.msra.mxu0 %v6581_v54  ;;  %4303 = vmatpush.bf16.msra.mxu1 %v6669_v35  ;;  %v7295_v54 = vld [vmem:[#allocation7 + $0xa4] sm:$0xf0]  ;;  %v7309_v35 = vld [vmem:[%s7764_s5 + $0x18] sm:$0xff] }
 0x232   :  { %4329 = vmatpush.bf16.msra.mxu3 %v6673_v50  ;;  %v6653_v58 = vor.u32 %v7295_v54, %v6652_v34  ;;  %v7317_v50 = vld [vmem:[%s7764_s5 + $0x58] sm:$0xff]  ;;  %v7306_v34 = vld [vmem:[%s7764_s5] sm:$0xff]  ;;  %v7315_v54 = vld [vmem:[%s7764_s5 + $0x48] sm:$0xff] }
 0x233   :  { %4319 = vmatpush.bf16.msra.mxu2 %v6585_v55  ;;  %v7294_v55 = vld [vmem:[#allocation7 + $0xa4] sm:$0xf] }
 0x234   :  { %v6657_v43 = vor.u32 %v7294_v55, %v6654_v61  ;;  %v7314_v55 = vld [vmem:[%s7764_s5 + $0x40] sm:$0xff] }
 0x235   :  { %4294 = vmatpush.bf16.msra.mxu0 %v6573_v25  ;;  %v3886_v31 = vpop.f32.mrf.mxu0  ;;  %4304 = vmatpush.bf16.msra.mxu1 %v6661_v28  ;;  %v7292_v25 = vld [vmem:[#allocation7 + $0x94] sm:$0xf] }
 0x236   :  { %v3887_v0 = vadd.f32 %v3886_v31, %v3874_v7  ;;  %v3899_v17 = vpop.f32.mrf.mxu1  ;;  %v7296_v7 = vld [vmem:[#allocation7 + $0xb4] sm:$0xf] }
 0x237   :  { %4320 = vmatpush.bf16.msra.mxu2 %v6577_v59  ;;  %v6665_v29 = vor.u32 %v7296_v7, %v6662_v52  ;;  %v6646_v59 = vld [vmem:[#allocation7 + $0x98] sm:$0xf0] }
 0x238   :  { %4295 = vmatmul.bf16.vlgmr.msra.gmra.mxu0 %v4087_v16  ;;  %v3900_v32 = vadd.f32 %v3899_v17, %v3887_v0 }
 0x239   :  { %4330 = vmatpush.bf16.msra.mxu3 %v6665_v29  ;;  %4305 = vmatpush.bf16.msra.mxu1 %v6653_v58  ;;  %v7307_v29 = vld [vmem:[%s7764_s5 + $0x8] sm:$0xff] }
 0x23a   :  { %4321 = vmatmul.bf16.vlgmr.msra.gmra.mxu2 %v4087_v16  ;;  %v6649_v16 = vor.u32 %v7292_v25, %v6646_v59 }
 0x23d   :  { %v3912_v19 = vpop.f32.mrf.mxu2  ;;  %v3888_v20 = vpop.f32.mrf.mxu0  ;;  %4331 = vmatpush.bf16.msra.mxu3 %v6657_v43  ;;  %4306 = vmatpush.bf16.msra.mxu1 %v6645_v4 }
 0x23e   :  { %v3913_v38 = vadd.f32 %v3912_v19, %v3900_v32  ;;  %v3925_v1 = vpop.f32.mrf.mxu3  ;;  %v3901_v2 = vpop.f32.mrf.mxu1  ;;  %v6636_v19 = vld [vmem:[#allocation7 + $0x80] sm:$0xf] }
 0x240   :  { %v7693_v8 = vadd.f32 %v3925_v1, %v3913_v38  ;;  %v7291_v38 = vld [vmem:[#allocation7 + $0x84] sm:$0xf0]  ;;  %v7290_v1 = vld [vmem:[#allocation7 + $0x84] sm:$0xf] }
 0x241   :  { %4332 = vmatpush.bf16.msra.mxu3 %v6649_v16  ;;  %v6637_v2 = vor.u32 %v7291_v38, %v6636_v19 }
 0x243   :  { %4307 = vmatpush.bf16.msra.mxu1 %v6637_v2 }
 0x245   :  { %v3914_v21 = vpop.f32.mrf.mxu2 }
 0x246   :  { %v3927_v14 = vpop.f32.mrf.mxu3  ;;  %v6638_v21 = vld [vmem:[#allocation7 + $0x88] sm:$0xf0] }
 0x247   :  { %v6641_v14 = vor.u32 %v7290_v1, %v6638_v21  ;;  %v7330_v1 = vld [vmem:[#allocation10] ss:$0 sm:$0xff] }
 0x249   :  { %4333 = vmatpush.bf16.msra.mxu3 %v6641_v14 }
 0x255   :  { %v7695_v3 = vpop.f32.mrf.mxu0 }
 0x256   :  { %v7697_v5 = vpop.f32.mrf.mxu1  ;;  %v3939_v31 = vadd.f32 %v7695_v3, %v7693_v8 }
 0x25d   :  { %v7699_v18 = vpop.f32.mrf.mxu2  ;;  %v3940_v23 = vpop.f32.mrf.mxu0 }
 0x25e   :  { %v7701_v22 = vpop.f32.mrf.mxu3  ;;  %v3953_v11 = vpop.f32.mrf.mxu1  ;;  %v3952_v23 = vadd.f32 %v7697_v5, %v3939_v31 }
 0x260   :  { %v3965_v24 = vadd.f32 %v7699_v18, %v3952_v23  ;;  %v7313_v18 = vld [vmem:[%s7764_s5 + $0x38] sm:$0xff] }
 0x261   :  { %4475 = vmatpush.bf16.msrb.mxu0 %v7313_v18 }
 0x262   :  { %v3978_v3 = vadd.f32 %v7701_v22, %v3965_v24  ;;  %v7321_v22 = vld [vmem:[%s7764_s5 + $0x78] sm:$0xff] }
 0x263   :  { %4488 = vmatpush.bf16.msrb.mxu1 %v7321_v22 }
 0x265   :  { %v3966_v60 = vpop.f32.mrf.mxu2  ;;  %4476 = vmatpush.bf16.msrb.mxu0 %v7312_v39 }
 0x266   :  { %v3979_v40 = vpop.f32.mrf.mxu3 }
 0x267   :  { %v7320_v40 = vld [vmem:[%s7764_s5 + $0x70] sm:$0xff] }
 0x268   :  { %4489 = vmatpush.bf16.msrb.mxu1 %v7320_v40 }
 0x269   :  { %4477 = vmatpush.bf16.msrb.mxu0 %v7311_v42 }
 0x26c   :  { %4490 = vmatpush.bf16.msrb.mxu1 %v7319_v44 }
 0x26d   :  { %4478 = vmatpush.bf16.msrb.mxu0 %v7310_v45 }
 0x270   :  { %4491 = vmatpush.bf16.msrb.mxu1 %v7318_v27 }
 0x271   :  { %4479 = vmatpush.bf16.msrb.mxu0 %v7309_v35 }
 0x274   :  { %4492 = vmatpush.bf16.msrb.mxu1 %v7317_v50 }
 0x275   :  { %v3990_v53 = vpop.f32.mrf.mxu0  ;;  %4480 = vmatpush.bf16.msrb.mxu0 %v7308_v57 }
 0x276   :  { %v4003_v56 = vpop.f32.mrf.mxu1  ;;  %v3991_v9 = vadd.f32 %v3990_v53, %v3978_v3  ;;  %v7316_v53 = vld [vmem:[%s7764_s5 + $0x50] sm:$0xff]  ;;  %s7499_s5 = smov [#allocation11]  }
 0x277   :  { %s4508_s10 = sshll.u32 %s7499_s5, 4  ;;  %s4509_s10 = int_to_ptr.vmem [resolvable:$true] %s4508_s10 }
 0x278   :  { %v4004_v11 = vadd.f32 %v4003_v56, %v3991_v9  ;;  %4493 = vmatpush.bf16.msrb.mxu1 %v7316_v53  ;;  %v4121_v56 = vld [vmem:[#allocation8] sm:$0x3] }
 0x279   :  { %4481 = vmatpush.bf16.msrb.mxu0 %v7307_v29  ;;  %v4123_v58 = vperm.slane %v4121_v56, 0  ;;  %v4124_v62 = vperm.slane %v4121_v56, 1 }
 0x27c   :  { %4494 = vmatpush.bf16.msrb.mxu1 %v7315_v54 }
 0x27d   :  { %v4016_v0 = vpop.f32.mrf.mxu2  ;;  %v3992_v32 = vpop.f32.mrf.mxu0  ;;  %4482 = vmatpush.bf16.msrb.mxu0 %v7306_v34 }
 0x27e   :  { %v4029_v17 = vpop.f32.mrf.mxu3  ;;  %v4005_v20 = vpop.f32.mrf.mxu1  ;;  %v4017_v10 = vadd.f32 %v4016_v0, %v4004_v11 }
 0x280   :  { %v4030_v26 = vadd.f32 %v4029_v17, %v4017_v10  ;;  %4495 = vmatpush.bf16.msrb.mxu1 %v7314_v55 }
 0x285   :  { %v4018_v46 = vpop.f32.mrf.mxu2 }
 0x286   :  { %v4031_v8 = vpop.f32.mrf.mxu3 }
 0x295   :  { %v4042_v12 = vpop.f32.mrf.mxu0 }
 0x296   :  { %v4055_v13 = vpop.f32.mrf.mxu1  ;;  %v4043_v30 = vadd.f32 %v4042_v12, %v4030_v26 }
 0x298   :  { %v4056_v47 = vadd.f32 %v4055_v13, %v4043_v30 }
 0x29d   :  { %v4068_v15 = vpop.f32.mrf.mxu2  ;;  %v4044_v5 = vpop.f32.mrf.mxu0 }
 0x29e   :  { %v4069_v48 = vadd.f32 %v4068_v15, %v4056_v47  ;;  %v4081_v33 = vpop.f32.mrf.mxu3  ;;  %v4057_v49 = vpop.f32.mrf.mxu1 }
 0x2a0   :  { %v4082_v36 = vadd.f32 %v4081_v33, %v4069_v48 }
 0x2a2   :  { %v4086_v37 = vmax.f32 %v4082_v36, 0.0 }
 0x2a4   :  { %v4088_v60 = vpack.c.bf16 %v4086_v37, %v4086_v37 }
 0x2a5   :  { %v4070_v6 = vpop.f32.mrf.mxu2 }
 0x2a6   :  { %v4083_v41 = vpop.f32.mrf.mxu3  ;;  %4308 = vmatmul.bf16.vlgmr.msra.gmra.mxu1 %v4088_v60  ;;  %4334 = vmatmul.bf16.vlgmr.msra.gmra.mxu3 %v4088_v60 }
 0x2b5   :  { %v4296_v51 = vpop.f32.mrf.mxu0 }
 0x2b6   :  { %v4297_v61 = vadd.f32 %v4296_v51, %v4123_v58 }
 0x2bd   :  { %v4322_v7 = vpop.f32.mrf.mxu2  ;;  %v4298_v28 = vpop.f32.mrf.mxu0 }
 0x2be   :  { %v4323_v4 = vadd.f32 %v4322_v7, %v4124_v62 }
 0x2c5   :  { %v4324_v52 = vpop.f32.mrf.mxu2 }
 0x323   :  { %v4309_v43 = vpop.f32.mrf.mxu1 }
 0x324   :  { %v4310_v63 = vadd.f32 %v4309_v43, %v4297_v61 }
 0x326   :  { %v4339_v25 = vmax.f32 %v4310_v63, 0.0 }
 0x328   :  { %v4341_v59 = vpack.c.bf16 %v4339_v25, %v4339_v25 }
 0x329   :  { %v4335_v16 = vpop.f32.mrf.mxu3 }
 0x32a   :  { %v4336_v31 = vadd.f32 %v4335_v16, %v4323_v4  ;;  %4483 = vmatmul.bf16.vlgmr.msrb.gmra.mxu0 %v4341_v59 }
 0x32b   :  { %v4311_v0 = vpop.f32.mrf.mxu1 }
 0x32c   :  { %v4340_v17 = vmax.f32 %v4336_v31, 0.0 }
 0x32e   :  { %v4342_v32 = vpack.c.bf16 %v4340_v17, %v4340_v17 }
 0x330   :  { %4496 = vmatmul.bf16.vlgmr.msrb.gmra.mxu1 %v4342_v32 }
 0x331   :  { %v4337_v19 = vpop.f32.mrf.mxu3 }
 0x3a7   :  { %v4484_v38 = vpop.f32.mrf.mxu0 }
 0x3a8   :  { %v4485_v20 = vadd.f32 %v7330_v1, %v4484_v38 }
 0x3ad   :  { %v4497_v2 = vpop.f32.mrf.mxu1 }
 0x3ae   :  { %v4498_v21 = vadd.f32 %v4497_v2, %v4485_v20 }
 0x3af   :  { %v4486_v14 = vpop.f32.mrf.mxu0 }
 0x3b0   :  { %4502 = vst.msk [vmem:[#allocation11] sm:$0x3] %vm4501_vm0, %v4498_v21 }
 0x3b1   :  { %4513 = dma.vmem_to_hbm [thread:$0]  %s4509_s10, 32, %s4511_s13, [#allocation4]  }
 0x3b5   :  { %v4499_v23 = vpop.f32.mrf.mxu1 }
 0x3b6   :  { %7490 = dma.done.wait [#allocation4], 32  }
 0x3b7   :  { %7491 = vsyncadd [#allocation4], 4294967264 }
 0x3b8   :  { %4518 = vsyncpa [#allocation3], 1 }
 0x3b9   :  { %4519 = vsyncpa [#allocation6], 1 }
 0x3ba   :  { %4520 = vsyncpa [#allocation9], 1 }
 0x3bb   :  { %4521 = vsyncpa [#allocation4], 1 }

// kernel: conv_model_forward.2
= control target key start
LH: loop header
LB: loop body
LE: loop exit
PB: predicated region body
PF: predicated region fallthrough
CT: control target
= control target key end

     0   :  { %10 = vsyncpa [#allocation4], 0  ;;  %s10604_s0 = inlined_call_operand.vmem [shape: f32[2,18,18,3], index: 0, kind: input, shape index: {}]   ;;  %s10605_s1 = inlined_call_operand.hbm [shape: f32[3,3,3,64], index: 1, kind: input, shape index: {}]   ;;  %s10606_s2 = inlined_call_operand.hbm [shape: f32[1,64], index: 2, kind: input, shape index: {}]   ;;  %s10607_s3 = inlined_call_operand.hbm [shape: f32[3,3,64,64], index: 3, kind: input, shape index: {}]   ;;  %s10608_s4 = inlined_call_operand.hbm [shape: f32[1,64], index: 4, kind: input, shape index: {}]   ;;  %s10609_s5 = inlined_call_operand.vmem [shape: bf16[2,64,64], index: 5, kind: output, shape index: {}]  }
   0x1   :  { %11 = vsyncpa [#allocation6], 0 }
   0x2   :  { %12 = vsyncpa [#allocation9], 0  ;;  %s7343_s18 = smov 0  }
   0x3 LB: > { %s185_s21 = sshll.u32 %s10606_s2, 4  ;;  %s7352_s22 = sadd.s32 4294967295, %s7302_s18   ;;  %s7302_s18 = sphi %s7343_s18, %s18_s18   ;;  %s186_s21 = int_to_ptr.hbm [resolvable:$true] %s185_s21 }
   0x4   : > { %p6470_p0 = scmp.ge.s32.totalorder %s7302_s18, 1  ;;  %p159_p1 = scmp.lt.s32.totalorder %s7302_s18, 3 }
   0x5   : > { %p7104_p2 = scmp.eq.s32.totalorder %s7352_s22, 0  ;;  %s7304_s24 = smov [#allocation5]  }
   0x6   : > { %p7357_p3 = pnand %p6470_p0, %p159_p1  ;;  %s187_s25 = sshll.u32 %s7304_s24, 4  ;;  %s188_s25 = int_to_ptr.vmem [resolvable:$true] %s187_s25 }
   0x7   : > { %s170_s28 = sshll.u32 %s10605_s1, 4  ;;  %s7305_s30 = smov [#allocation3]   ;;  %s171_s28 = int_to_ptr.hbm [resolvable:$true] %s170_s28 }
   0x8   : > { %p7091_p4 = pneg %p7357_p3  ;;  %s172_s6 = sshll.u32 %s7305_s30, 4  ;;  %s173_s6 = int_to_ptr.vmem [resolvable:$true] %s172_s6 }
   0x9   : > { %s196_s9 = sshll.u32 %s10607_s3, 4  ;;  %s7306_s10 = smov 64   ;;  %s197_s9 = int_to_ptr.hbm [resolvable:$true] %s196_s9 }
   0xa   : > { %p7368_p5 = pnand %p7104_p2, %p7091_p4  ;;  %s7307_s11 = smov 4  }
   0xb   : > { %s7308_s12 = smov [#allocation7]   ;;  %s7309_s14 = smov 128  }
   0xc   : > { %7097 = dma.hbm_to_vmem [thread:$0]  (!%p7368_p5), %s186_s21, 16, %s188_s25, [#allocation6]  }
   0xd   : > { %7094 = dma.hbm_to_vmem [thread:$0]  (!%p7368_p5), %s171_s28, 576, %s173_s6, [#allocation4], %s7306_s10, %s7306_s10, %s7307_s11  }
   0xe   : > { %s198_s13 = sshll.u32 %s7308_s12, 4  ;;  %s7310_s15 = smov 8   ;;  %s199_s13 = int_to_ptr.vmem [resolvable:$true] %s198_s13 }
   0xf   : > { %7100 = dma.hbm_to_vmem [thread:$0]  (!%p7368_p5), %s197_s9, 9216, %s199_s13, [#allocation6], %s7309_s14, %s7309_s14, %s7310_s15  }
  0x10   : > { %s211_s19 = sshll.u32 %s10608_s4, 4  ;;  %s7311_s20 = smov [#allocation8]   ;;  %s212_s19 = int_to_ptr.hbm [resolvable:$true] %s211_s19 }
  0x11   : > { %s213_s21 = sshll.u32 %s7311_s20, 4  ;;  %234 = sbr.rel (%p7357_p3) target bundleno = 1595 (0x63b), region = 40  ;;  %s214_s21 = int_to_ptr.vmem [resolvable:$true] %s213_s21 }
  0x12   : > { %7103 = dma.hbm_to_vmem [thread:$0]  (!%p7368_p5), %s212_s19, 16, %s214_s21, [#allocation9]  }
  0x16   : > { %7289 = dma.done.wait (%p7104_p2), [#allocation4], 576  }
  0x17   : > { %7291 = vsyncadd (%p7104_p2), [#allocation4], 4294966720 }
  0x18   : > { %7293 = dma.done.wait (%p7104_p2), [#allocation6], 9232  }
  0x19   : > { %7295 = vsyncadd (%p7104_p2), [#allocation6], 4294958064 }
  0x1a   : > { %7297 = dma.done.wait (%p7104_p2), [#allocation9], 16  }
  0x1b   : > { %7299 = vsyncadd (%p7104_p2), [#allocation9], 4294967280  ;;  %p278_p6 = scmp.lt.s32.totalorder %s7352_s22, 1  ;;  %vm539_vm0 = vcmask 1042432   ;;  %vm474_vm1 = vcmask 23552   ;;  %vm391_vm2 = vcmask 1046528  }
  0x1c   : > { %v342_v0 = vld [vmem:[#allocation3] sm:$0x7]  ;;  %v473_v2 = vld [vmem:[#allocation3 + $0x4] sm:$0x7]  ;;  %v918_v10 = vld [vmem:[#allocation3 + $0x8] sm:$0x7] }
  0x1d   : > { %s10966_s22 = smov (!%p278_p6, %s7352_s22), 1  ;;  %7073 = vmatpush.msk.msra.mxu3 %vm539_vm0, %v342_v0  ;;  %6484 = vmatpush.msk.msra.mxu0 %vm539_vm0, %v473_v2  ;;  %v1132_v11 = vld [vmem:[#allocation3 + $0xc] sm:$0x7]  ;;  %v1294_v16 = vld [vmem:[#allocation3 + $0x10] sm:$0x7]  ;;  %vm836_vm3 = vcmask 1045504  }
  0x1e   : > { %s7074_s23 = smul.u32 432, %s10966_s22  ;;  %7072 = vmatpush.msk.msra.mxu2 %vm539_vm0, %v473_v2  ;;  %6517 = vmatpush.msk.msra.mxu1 %vm539_vm0, %v342_v0  ;;  %vm2149_vm4 = vcmask 523264   ;;  %vm2152_vm5 = vcmask 517120   ;;  %vm6284_vm6 = vcmask 1041409   ;;  %vm6286_vm7 = vcmask 1042434   ;;  %s7071_s27 = sshll.u32 %s10966_s22, 5 }
  0x1f   : > { %6583 = vmatpush.msk.msrb.mxu3 %vm539_vm0, %v1132_v11  ;;  %6616 = vmatpush.msk.msrb.mxu0 %vm539_vm0, %v1294_v16  ;;  %vm6288_vm8 = vcmask 1043459   ;;  %vm6290_vm9 = vcmask 1044484   ;;  %vm6292_vm10 = vcmask 1045509   ;;  %vm6294_vm11 = vcmask 1046534   ;;  %s9997_s30 = scalar_lea.vmem %s10609_s5, %s7071_s27 }
  0x20   : > { %s7408_s26 = scalar_lea.vmem %s10604_s0, %s7074_s23  ;;  %6550 = vmatpush.msk.msrb.mxu2 %vm539_vm0, %v918_v10  ;;  %vm6296_vm12 = vcmask 1047559   ;;  %vm6363_vm13 = vcmask 519168  }
  0x21   : > { %v7411_v1 = vld [vmem:[%s7408_s26 + $0xc0] sm:$0xff]  ;;  %v7419_v4 = vld [vmem:[%s7408_s26 + $0x8] sm:$0xff]  ;;  %v7433_v12 = vld [vmem:[%s7408_s26 + $0x10] sm:$0x3] }
  0x22   : > { %v7416_v3 = vld [vmem:[%s7408_s26] sm:$0xff]  ;;  %v7422_v5 = vld [vmem:[%s7408_s26 + $0xc8] sm:$0xff]  ;;  %v432_v6 = vrot.slane %v7411_v1, 1  ;;  %6534 = vmatmul.msk.f32.vlgmr.msra.gmra.mxu3 %vm474_vm1, %v7411_v1  ;;  %v393_v8 = vrot.slane %v7419_v4, 1  ;;  %v7436_v13 = vld [vmem:[%s7408_s26 + $0xd0] sm:$0x3] }
  0x23   : > { %v392_v7 = vrot.slane %v7416_v3, 1  ;;  %v433_v9 = vrot.slane %v7422_v5, 1  ;;  %6518 = vmatmul.msk.f32.vlgmr.msra.gmra.mxu1 %vm474_vm1, %v7416_v3  ;;  %v395_v17 = vrot.slane %v7433_v12, 1  ;;  %v435_v18 = vrot.slane %v7436_v13, 1  ;;  %v7459_v21 = vld [vmem:[%s7408_s26 + $0xd8] sm:$0xff]  ;;  %v7465_v23 = vld [vmem:[%s7408_s26 + $0x20] sm:$0xff] }
  0x24   : > { %v7462_v22 = vld [vmem:[%s7408_s26 + $0x18] sm:$0xff]  ;;  %v7468_v24 = vld [vmem:[%s7408_s26 + $0xe0] sm:$0xff]  ;;  %v398_v26 = vrot.slane %v7465_v23, 1  ;;  %v437_v27 = vrot.slane %v7459_v21, 1  ;;  %v7488_v31 = vld [vmem:[%s7408_s26 + $0x28] sm:$0x3] }
  0x25   : > { %v394_v14 = vsel %vm391_vm2, %v392_v7, %v393_v8  ;;  %v7441_v15 = vsel %vm391_vm2, %v432_v6, %v433_v9  ;;  %v396_v19 = vsel %vm391_vm2, %v393_v8, %v395_v17  ;;  %v7456_v20 = vsel %vm391_vm2, %v433_v9, %v435_v18  ;;  %v7491_v32 = vld [vmem:[%s7408_s26 + $0xe8] sm:$0x3]  ;;  %v7510_v37 = vld [vmem:[%s7408_s26 + $0xf0] sm:$0xff]  ;;  %v7516_v39 = vld [vmem:[%s7408_s26 + $0x38] sm:$0xff] }
  0x26   : > { %10697 = vst [vmem:[#allocation13_spill] sm:$0xff] %v7441_v15  ;;  %6485 = vmatmul.msk.f32.vlgmr.msra.gmra.mxu0 %vm474_vm1, %v394_v14  ;;  %6501 = vmatmul.msk.f32.vlgmr.msra.gmra.mxu2 %vm474_vm1, %v7441_v15  ;;  %v397_v25 = vrot.slane %v7462_v22, 1  ;;  %v438_v28 = vrot.slane %v7468_v24, 1  ;;  %v400_v33 = vrot.slane %v7488_v31, 1  ;;  %v440_v34 = vrot.slane %v7491_v32, 1  ;;  %v7513_v38 = vld [vmem:[%s7408_s26 + $0x30] sm:$0xff] }
  0x27   : > { %10698 = vst [vmem:[#allocation14_spill] sm:$0xff] %v7456_v20  ;;  %v7519_v40 = vld [vmem:[%s7408_s26 + $0xf8] sm:$0xff]  ;;  %v402_v41 = vrot.slane %v7513_v38, 1  ;;  %v403_v42 = vrot.slane %v7516_v39, 1  ;;  %v442_v43 = vrot.slane %v7510_v37, 1  ;;  %v7562_v53 = vld [vmem:[%s7408_s26 + $0x108] sm:$0xff] }
  0x28   : > { %v7482_v29 = vsel %vm391_vm2, %v397_v25, %v398_v26  ;;  %v7485_v30 = vsel %vm391_vm2, %v437_v27, %v438_v28  ;;  %v7504_v35 = vsel %vm391_vm2, %v398_v26, %v400_v33  ;;  %v7507_v36 = vsel %vm391_vm2, %v438_v28, %v440_v34  ;;  %v7540_v47 = vld [vmem:[%s7408_s26 + $0x40] sm:$0x3]  ;;  %10699 = vst [vmem:[#allocation15_spill] sm:$0xff] %v7562_v53  ;;  %v7565_v54 = vld [vmem:[%s7408_s26 + $0x48] sm:$0xff]  ;;  %v7568_v55 = vld [vmem:[%s7408_s26 + $0x50] sm:$0xff] }
  0x29   : > { %v443_v44 = vrot.slane %v7519_v40, 1  ;;  %v7534_v45 = vsel %vm391_vm2, %v402_v41, %v403_v42  ;;  %v7543_v48 = vld [vmem:[%s7408_s26 + $0x100] sm:$0x3]  ;;  %v405_v49 = vrot.slane %v7540_v47, 1  ;;  %v7571_v56 = vld [vmem:[%s7408_s26 + $0x110] sm:$0xff]  ;;  %v407_v57 = vrot.slane %v7565_v54, 1 }
  0x2a   : > { %6535 = vmatmul.msk.f32.gmra.mxu3 %vm474_vm1, %v7422_v5  ;;  %v445_v50 = vrot.slane %v7543_v48, 1  ;;  %10700 = vst [vmem:[#allocation16_spill] sm:$0xff] %v7571_v56  ;;  %v408_v58 = vrot.slane %v7568_v55, 1  ;;  %v447_v59 = vrot.slane %v7562_v53, 1  ;;  %v448_v60 = vrot.slane %v7571_v56, 1  ;;  %v7614_v9 = vld [vmem:[%s7408_s26 + $0x120] sm:$0xff] }
  0x2b   : > { %6519 = vmatmul.msk.f32.gmra.mxu1 %vm474_vm1, %v7419_v4  ;;  %v7537_v46 = vsel %vm391_vm2, %v442_v43, %v443_v44  ;;  %v7556_v51 = vsel %vm391_vm2, %v403_v42, %v405_v49  ;;  %v7592_v63 = vld [vmem:[%s7408_s26 + $0x58] sm:$0x3]  ;;  %10706 = vst [vmem:[#allocation22_spill] sm:$0xff] %v7614_v9  ;;  %v7617_v10 = vld [vmem:[%s7408_s26 + $0x60] sm:$0xff]  ;;  %v7620_v11 = vld [vmem:[%s7408_s26 + $0x68] sm:$0xff]  ;;  %v452_v18 = vrot.slane %v7614_v9, 1 }
  0x2c   : > { %v7559_v52 = vsel %vm391_vm2, %v443_v44, %v445_v50  ;;  %v7586_v61 = vsel %vm391_vm2, %v407_v57, %v408_v58  ;;  %v7589_v62 = vsel %vm391_vm2, %v447_v59, %v448_v60  ;;  %v7595_v0 = vld [vmem:[%s7408_s26 + $0x118] sm:$0x3]  ;;  %v410_v2 = vrot.slane %v7592_v63, 1  ;;  %v7623_v14 = vld [vmem:[%s7408_s26 + $0x128] sm:$0xff]  ;;  %v7644_v27 = vld [vmem:[%s7408_s26 + $0x70] sm:$0x3] }
  0x2d   : > { %10701 = vst [vmem:[#allocation17_spill] sm:$0xff] %v7586_v61  ;;  %v450_v6 = vrot.slane %v7595_v0, 1  ;;  %v412_v16 = vrot.slane %v7617_v10, 1  ;;  %v413_v17 = vrot.slane %v7620_v11, 1  ;;  %v7647_v28 = vld [vmem:[%s7408_s26 + $0x130] sm:$0x3] }
  0x2e   : > { %6486 = vmatmul.msk.f32.gmra.mxu0 %vm474_vm1, %v396_v19  ;;  %6502 = vmatmul.msk.f32.gmra.mxu2 %vm474_vm1, %v7456_v20  ;;  %10702 = vst [vmem:[#allocation18_spill] sm:$0xff] %v7589_v62  ;;  %v7608_v7 = vsel %vm391_vm2, %v408_v58, %v410_v2  ;;  %v453_v19 = vrot.slane %v7623_v14, 1  ;;  %v415_v33 = vrot.slane %v7644_v27, 1  ;;  %v455_v34 = vrot.slane %v7647_v28, 1  ;;  %v7666_v43 = vld [vmem:[%s7408_s26 + $0x138] sm:$0xff]  ;;  %v7672_v49 = vld [vmem:[%s7408_s26 + $0x80] sm:$0xff] }
  0x2f   : > { %10703 = vst [vmem:[#allocation19_spill] sm:$0xff] %v7595_v0  ;;  %v7611_v8 = vsel %vm391_vm2, %v448_v60, %v450_v6  ;;  %v7638_v25 = vsel %vm391_vm2, %v412_v16, %v413_v17  ;;  %v7669_v44 = vld [vmem:[%s7408_s26 + $0x78] sm:$0xff]  ;;  %v7675_v50 = vld [vmem:[%s7408_s26 + $0x140] sm:$0xff]  ;;  %v418_v58 = vrot.slane %v7672_v49, 1  ;;  %v457_v59 = vrot.slane %v7666_v43, 1 }
  0x30   : > { %10704 = vst [vmem:[#allocation20_spill] sm:$0xff] %v7608_v7  ;;  %v7641_v26 = vsel %vm391_vm2, %v452_v18, %v453_v19  ;;  %v7660_v41 = vsel %vm391_vm2, %v413_v17, %v415_v33  ;;  %v7663_v42 = vsel %vm391_vm2, %v453_v19, %v455_v34  ;;  %v417_v57 = vrot.slane %v7669_v44, 1  ;;  %v7696_v16 = vld [vmem:[%s7408_s26 + $0x88] sm:$0x3]  ;;  %v7807_v0 = vld [vmem:[%s7408_s26 + $0x178] sm:$0x3] }
  0x31   : > { %10705 = vst [vmem:[#allocation21_spill] sm:$0xff] %v7611_v8  ;;  %v458_v60 = vrot.slane %v7675_v50, 1  ;;  %v7699_v17 = vld [vmem:[%s7408_s26 + $0x148] sm:$0x3]  ;;  %v420_v18 = vrot.slane %v7696_v16, 1 }
  0x32   : > { %6536 = vmatmul.msk.f32.gmra.mxu3 %vm474_vm1, %v7459_v21  ;;  %10707 = vst [vmem:[#allocation23_spill] sm:$0xff] %v7623_v14  ;;  %v7690_v2 = vsel %vm391_vm2, %v417_v57, %v418_v58  ;;  %v460_v19 = vrot.slane %v7699_v17, 1  ;;  %v7718_v57 = vld [vmem:[%s7408_s26 + $0x150] sm:$0xff] }
  0x33   : > { %6520 = vmatmul.msk.f32.gmra.mxu1 %vm474_vm1, %v7462_v22  ;;  %10708 = vst [vmem:[#allocation24_spill] sm:$0xff] %v7638_v25  ;;  %v7693_v6 = vsel %vm391_vm2, %v457_v59, %v458_v60  ;;  %v7712_v33 = vsel %vm391_vm2, %v418_v58, %v420_v18  ;;  %v7721_v59 = vld [vmem:[%s7408_s26 + $0x90] sm:$0xff]  ;;  %v462_v18 = vrot.slane %v7718_v57, 1 }
  0x34   : > { %10709 = vst [vmem:[#allocation25_spill] sm:$0xff] %v7641_v26  ;;  %v7715_v34 = vsel %vm391_vm2, %v458_v60, %v460_v19  ;;  %v422_v58 = vrot.slane %v7721_v59, 1 }
  0x35   : > { %10710 = vst [vmem:[#allocation26_spill] sm:$0xff] %v7647_v28 }
  0x36   : > { %6487 = vmatmul.msk.f32.gmra.mxu0 %vm474_vm1, %v7482_v29  ;;  %6503 = vmatmul.msk.f32.gmra.mxu2 %vm474_vm1, %v7485_v30  ;;  %10711 = vst [vmem:[#allocation27_spill] sm:$0xff] %v7660_v41 }
  0x37   : > { %10712 = vst [vmem:[#allocation28_spill] sm:$0xff] %v7663_v42 }
  0x38   : > { %10713 = vst [vmem:[#allocation29_spill] sm:$0xff] %v7666_v43 }
  0x39   : > { %10714 = vst [vmem:[#allocation30_spill] sm:$0xff] %v7675_v50 }
  0x3a   : > { %6537 = vmatmul.msk.f32.gmra.mxu3 %vm474_vm1, %v7468_v24  ;;  %10715 = vst [vmem:[#allocation31_spill] sm:$0xff] %v7690_v2 }
  0x3b   : > { %6521 = vmatmul.msk.f32.gmra.mxu1 %vm474_vm1, %v7465_v23  ;;  %10716 = vst [vmem:[#allocation32_spill] sm:$0xff] %v7693_v6 }
  0x3c   : > { %10717 = vst [vmem:[#allocation33_spill] sm:$0xff] %v7699_v17 }
  0x3d   : > { %10718 = vst [vmem:[#allocation34_spill] sm:$0xff] %v7712_v33 }
  0x3e   : > { %6488 = vmatmul.msk.f32.gmra.mxu0 %vm474_vm1, %v7504_v35  ;;  %6504 = vmatmul.msk.f32.gmra.mxu2 %vm474_vm1, %v7507_v36  ;;  %10719 = vst [vmem:[#allocation35_spill] sm:$0xff] %v7715_v34 }
  0x3f   : > { %10720 = vst [vmem:[#allocation36_spill] sm:$0xff] %v7718_v57 }
  0x40   : > { %10731 = vst [vmem:[#allocation47_spill] sm:$0xff] %v7807_v0 }
  0x42   : > { %6538 = vmatmul.msk.f32.gmra.mxu3 %vm474_vm1, %v7510_v37 }
  0x43   : > { %6522 = vmatmul.msk.f32.gmra.mxu1 %vm474_vm1, %v7513_v38 }
  0x46   : > { %6489 = vmatmul.msk.f32.gmra.mxu0 %vm474_vm1, %v7534_v45  ;;  %6505 = vmatmul.msk.f32.gmra.mxu2 %vm474_vm1, %v7537_v46 }
  0x4a   : > { %6539 = vmatmul.msk.f32.gmra.mxu3 %vm474_vm1, %v7519_v40 }
  0x4b   : > { %6523 = vmatmul.msk.f32.gmra.mxu1 %vm474_vm1, %v7516_v39 }
  0x4e   : > { %6490 = vmatmul.msk.f32.gmra.mxu0 %vm474_vm1, %v7556_v51  ;;  %6506 = vmatmul.msk.f32.gmra.mxu2 %vm474_vm1, %v7559_v52 }
  0x52   : > { %6540 = vmatmul.msk.f32.gmra.mxu3 %vm474_vm1, %v7562_v53 }
  0x53   : > { %6524 = vmatmul.msk.f32.gmra.mxu1 %vm474_vm1, %v7565_v54 }
  0x56   : > { %6491 = vmatmul.msk.f32.gmra.mxu0 %vm474_vm1, %v7586_v61  ;;  %6507 = vmatmul.msk.f32.gmra.mxu2 %vm474_vm1, %v7589_v62  ;;  %v840_v62 = vrot.slane %v7433_v12, 2 }
  0x5a   : > { %6541 = vmatmul.msk.f32.gmra.mxu3 %vm474_vm1, %v7571_v56 }
  0x5b   : > { %6525 = vmatmul.msk.f32.gmra.mxu1 %vm474_vm1, %v7568_v55 }
  0x5e   : > { %6492 = vmatmul.msk.f32.gmra.mxu0 %vm474_vm1, %v7608_v7  ;;  %6508 = vmatmul.msk.f32.gmra.mxu2 %vm474_vm1, %v7611_v8  ;;  %v7775_v8 = vld [vmem:[%s7408_s26 + $0xa8] sm:$0xff] }
  0x62   : > { %6542 = vmatmul.msk.f32.gmra.mxu3 %vm474_vm1, %v7614_v9  ;;  %v1453_v9 = vld [vmem:[#allocation3 + $0x14] sm:$0x7] }
  0x63   : > { %6526 = vmatmul.msk.f32.gmra.mxu1 %vm474_vm1, %v7617_v10 }
  0x64   : > { %6649 = vmatpush.msk.msrb.mxu1 %vm539_vm0, %v1453_v9 }
  0x66   : > { %6493 = vmatmul.msk.f32.gmra.mxu0 %vm474_vm1, %v7638_v25  ;;  %6509 = vmatmul.msk.f32.gmra.mxu2 %vm474_vm1, %v7641_v26 }
  0x6a   : > { %6543 = vmatmul.msk.f32.gmra.mxu3 %vm474_vm1, %v7623_v14 }
  0x6b   : > { %6527 = vmatmul.msk.f32.gmra.mxu1 %vm474_vm1, %v7620_v11 }
  0x6e   : > { %6494 = vmatmul.msk.f32.gmra.mxu0 %vm474_vm1, %v7660_v41  ;;  %6510 = vmatmul.msk.f32.gmra.mxu2 %vm474_vm1, %v7663_v42  ;;  %v7748_v42 = vld [vmem:[%s7408_s26 + $0xa0] sm:$0x3] }
  0x72   : > { %6544 = vmatmul.msk.f32.gmra.mxu3 %vm474_vm1, %v7666_v43  ;;  %v7727_v43 = vld [vmem:[%s7408_s26 + $0x158] sm:$0xff] }
  0x73   : > { %6528 = vmatmul.msk.f32.gmra.mxu1 %vm474_vm1, %v7669_v44  ;;  %10721 = vst [vmem:[#allocation37_spill] sm:$0xff] %v7727_v43  ;;  %v463_v19 = vrot.slane %v7727_v43, 1 }
  0x76   : > { %6495 = vmatmul.msk.f32.gmra.mxu0 %vm474_vm1, %v7690_v2  ;;  %6511 = vmatmul.msk.f32.gmra.mxu2 %vm474_vm1, %v7693_v6  ;;  %v7724_v6 = vld [vmem:[%s7408_s26 + $0x98] sm:$0xff] }
  0x77   : > { %v423_v60 = vrot.slane %v7724_v6, 1 }
  0x79   : > { %v7742_v17 = vsel %vm391_vm2, %v422_v58, %v423_v60  ;;  %v1607_v58 = vld [vmem:[#allocation3 + $0x18] sm:$0x7] }
  0x7a   : > { %6545 = vmatmul.msk.f32.gmra.mxu3 %vm474_vm1, %v7675_v50  ;;  %10722 = vst [vmem:[#allocation38_spill] sm:$0xff] %v7742_v17  ;;  %v7745_v50 = vsel %vm391_vm2, %v462_v18, %v463_v19  ;;  %v425_v18 = vrot.slane %v7748_v42, 1  ;;  %6682 = vmatpush.msk.msra.mxu2 %vm539_vm0, %v1607_v58  ;;  %v7781_v58 = vld [vmem:[%s7408_s26 + $0x170] sm:$0xff] }
  0x7b   : > { %6529 = vmatmul.msk.f32.gmra.mxu1 %vm474_vm1, %v7672_v49  ;;  %10723 = vst [vmem:[#allocation39_spill] sm:$0xff] %v7745_v50 }
  0x7c   : > { %v7766_v26 = vsel %vm391_vm2, %v423_v60, %v425_v18  ;;  %10728 = vst [vmem:[#allocation44_spill] sm:$0xff] %v7781_v58  ;;  %v468_v18 = vrot.slane %v7781_v58, 1 }
  0x7d   : > { %10725 = vst [vmem:[#allocation41_spill] sm:$0xff] %v7766_v26 }
  0x7e   : > { %6496 = vmatmul.msk.f32.gmra.mxu0 %vm474_vm1, %v7712_v33  ;;  %6512 = vmatmul.msk.f32.gmra.mxu2 %vm474_vm1, %v7715_v34  ;;  %v7751_v34 = vld [vmem:[%s7408_s26 + $0x160] sm:$0x3] }
  0x7f   : > { %10724 = vst [vmem:[#allocation40_spill] sm:$0xff] %v7751_v34  ;;  %v465_v28 = vrot.slane %v7751_v34, 1  ;;  %v7778_v34 = vld [vmem:[%s7408_s26 + $0xb0] sm:$0xff] }
  0x80   : > { %v428_v60 = vrot.slane %v7778_v34, 1 }
  0x81   : > { %v7769_v14 = vsel %vm391_vm2, %v463_v19, %v465_v28  ;;  %v1928_v28 = vld [vmem:[#allocation3 + $0x20] sm:$0x7] }
  0x82   : > { %6546 = vmatmul.msk.f32.gmra.mxu3 %vm474_vm1, %v7718_v57  ;;  %v1769_v57 = vld [vmem:[#allocation3 + $0x1c] sm:$0x7]  ;;  %10726 = vst [vmem:[#allocation42_spill] sm:$0xff] %v7769_v14  ;;  %6748 = vmatpush.msk.msra.mxu0 %vm539_vm0, %v1928_v28 }
  0x83   : > { %6530 = vmatmul.msk.f32.gmra.mxu1 %vm474_vm1, %v7721_v59  ;;  %6715 = vmatpush.msk.msra.mxu3 %vm539_vm0, %v1769_v57  ;;  %v427_v57 = vrot.slane %v7775_v8, 1 }
  0x85   : > { %v7798_v9 = vsel %vm391_vm2, %v427_v57, %v428_v60  ;;  %v470_v57 = vrot.slane %v7807_v0, 1  ;;  %v842_v0 = vrot.slane %v7462_v22, 2 }
  0x86   : > { %6497 = vmatmul.msk.f32.gmra.mxu0 %vm474_vm1, %v7742_v17  ;;  %6513 = vmatmul.msk.f32.gmra.mxu2 %vm474_vm1, %v7745_v50  ;;  %v7772_v50 = vld [vmem:[%s7408_s26 + $0x168] sm:$0xff]  ;;  %10729 = vst [vmem:[#allocation45_spill] sm:$0xff] %v7798_v9 }
  0x87   : > { %10727 = vst [vmem:[#allocation43_spill] sm:$0xff] %v7772_v50  ;;  %v467_v19 = vrot.slane %v7772_v50, 1 }
  0x8a   : > { %6547 = vmatmul.msk.f32.gmra.mxu3 %vm474_vm1, %v7727_v43  ;;  %v7801_v43 = vsel %vm391_vm2, %v467_v19, %v468_v18 }
  0x8b   : > { %6531 = vmatmul.msk.f32.gmra.mxu1 %vm474_vm1, %v7724_v6  ;;  %10730 = vst [vmem:[#allocation46_spill] sm:$0xff] %v7801_v43 }
  0x8e   : > { %6498 = vmatmul.msk.f32.gmra.mxu0 %vm474_vm1, %v7766_v26  ;;  %6514 = vmatmul.msk.f32.gmra.mxu2 %vm474_vm1, %v7769_v14  ;;  %v7804_v14 = vld [vmem:[%s7408_s26 + $0xb8] sm:$0x3] }
  0x8f   : > { %v430_v28 = vrot.slane %v7804_v14, 1 }
  0x91   : > { %v7820_v19 = vsel %vm391_vm2, %v428_v60, %v430_v28  ;;  %v838_v60 = vrot.slane %v7419_v4, 2  ;;  %v845_v4 = vrot.slane %v7488_v31, 2  ;;  %v848_v31 = vrot.slane %v7516_v39, 2 }
  0x92   : > { %6548 = vmatmul.msk.f32.gmra.mxu3 %vm474_vm1, %v7772_v50  ;;  %10732 = vst [vmem:[#allocation48_spill] sm:$0xff] %v7820_v19  ;;  %v7823_v50 = vsel %vm391_vm2, %v468_v18, %v470_v57 }
  0x93   : > { %6532 = vmatmul.msk.f32.gmra.mxu1 %vm474_vm1, %v7775_v8  ;;  %10733 = vst [vmem:[#allocation49_spill] sm:$0xff] %v7823_v50 }
  0x96   : > { %6499 = vmatmul.msk.f32.gmra.mxu0 %vm474_vm1, %v7798_v9  ;;  %6515 = vmatmul.msk.f32.gmra.mxu2 %vm474_vm1, %v7801_v43  ;;  %v843_v43 = vrot.slane %v7465_v23, 2 }
  0x98   : > { %v844_v28 = vsel %vm836_vm3, %v842_v0, %v843_v43 }
  0x9a   : > { %6549 = vmatmul.msk.f32.gmra.mxu3 %vm474_vm1, %v7781_v58  ;;  %v837_v58 = vrot.slane %v7416_v3, 2 }
  0x9b   : > { %6533 = vmatmul.msk.f32.gmra.mxu1 %vm474_vm1, %v7778_v34 }
  0x9e   : > { %6500 = vmatmul.msk.f32.gmra.mxu0 %vm474_vm1, %v7820_v19  ;;  %6516 = vmatmul.msk.f32.gmra.mxu2 %vm474_vm1, %v7823_v50  ;;  %v839_v50 = vsel %vm836_vm3, %v837_v58, %v838_v60 }
  0xa0   : > { %v7835_v18 = vpop.f32.mrf.mxu1 }
  0xa2   : > { %6584 = vmatmul.msk.f32.vlgmr.msrb.gmra.mxu3 %vm474_vm1, %v7462_v22  ;;  %v846_v22 = vsel %vm836_vm3, %v843_v43, %v845_v4 }
  0xa3   : > { %v7838_v57 = vpop.f32.mrf.mxu0  ;;  %6650 = vmatmul.msk.f32.vlgmr.msrb.gmra.mxu1 %vm474_vm1, %v844_v28 }
  0xa5   : > { %v788_v3 = vpop.f32.mrf.mxu3 }
  0xa6   : > { %6551 = vmatmul.msk.f32.vlgmr.msrb.gmra.mxu2 %vm474_vm1, %v839_v50  ;;  %6617 = vmatmul.msk.f32.vlgmr.msrb.gmra.mxu0 %vm474_vm1, %v7482_v29  ;;  %v841_v50 = vsel %vm836_vm3, %v838_v60, %v840_v62  ;;  %v847_v29 = vrot.slane %v7513_v38, 2  ;;  %v850_v60 = vrot.slane %v7540_v47, 2 }
  0xa8   : > { %v7851_v53 = vpop.f32.mrf.mxu1 }
  0xa9   : > { %v608_v0 = vpop.f32.mrf.mxu2 }
  0xaa   : > { %v7849_v56 = vadd.f32 %v788_v3, %v608_v0  ;;  %6585 = vmatmul.msk.f32.gmra.mxu3 %vm474_vm1, %v7465_v23  ;;  %v7870_v23 = vsel %vm836_vm3, %v847_v29, %v848_v31  ;;  %v7887_v29 = vsel %vm836_vm3, %v848_v31, %v850_v60 }
  0xab   : > { %v7854_v58 = vpop.f32.mrf.mxu0  ;;  %6651 = vmatmul.msk.f32.gmra.mxu1 %vm474_vm1, %v846_v22 }
  0xad   : > { %v791_v12 = vpop.f32.mrf.mxu3 }
  0xae   : > { %6552 = vmatmul.msk.f32.gmra.mxu2 %vm474_vm1, %v841_v50  ;;  %6618 = vmatmul.msk.f32.gmra.mxu0 %vm474_vm1, %v7504_v35 }
  0xb0   : > { %v7867_v4 = vpop.f32.mrf.mxu1 }
  0xb1   : > { %v611_v43 = vpop.f32.mrf.mxu2 }
  0xb2   : > { %v7865_v3 = vadd.f32 %v791_v12, %v611_v43  ;;  %6586 = vmatmul.msk.f32.gmra.mxu3 %vm474_vm1, %v7513_v38  ;;  %v853_v43 = vrot.slane %v7568_v55, 2 }
  0xb3   : > { %v7872_v62 = vpop.f32.mrf.mxu0  ;;  %6652 = vmatmul.msk.f32.gmra.mxu1 %vm474_vm1, %v7870_v23 }
  0xb4   : > { %10734 = vst [vmem:[#allocation50_spill] sm:$0xff] %v7865_v3 }
  0xb5   : > { %v794_v35 = vpop.f32.mrf.mxu3 }
  0xb6   : > { %6553 = vmatmul.msk.f32.gmra.mxu2 %vm474_vm1, %v844_v28  ;;  %6619 = vmatmul.msk.f32.gmra.mxu0 %vm474_vm1, %v7534_v45  ;;  %v852_v28 = vrot.slane %v7565_v54, 2 }
  0xb8   : > { %v7884_v12 = vpop.f32.mrf.mxu1 }
  0xb9   : > { %v614_v0 = vpop.f32.mrf.mxu2 }
  0xba   : > { %v7882_v50 = vadd.f32 %v794_v35, %v614_v0  ;;  %6587 = vmatmul.msk.f32.gmra.mxu3 %vm474_vm1, %v7516_v39  ;;  %v7905_v39 = vsel %vm836_vm3, %v852_v28, %v853_v43 }
  0xbb   : > { %v7889_v38 = vpop.f32.mrf.mxu0  ;;  %6653 = vmatmul.msk.f32.gmra.mxu1 %vm474_vm1, %v7887_v29 }
  0xbc   : > { %10735 = vst [vmem:[#allocation51_spill] sm:$0xff] %v7882_v50 }
  0xbd   : > { %v797_v47 = vpop.f32.mrf.mxu3 }
  0xbe   : > { %6554 = vmatmul.msk.f32.gmra.mxu2 %vm474_vm1, %v846_v22  ;;  %6620 = vmatmul.msk.f32.gmra.mxu0 %vm474_vm1, %v7556_v51 }
  0xc0   : > { %v7902_v60 = vpop.f32.mrf.mxu1 }
  0xc1   : > { %v617_v31 = vpop.f32.mrf.mxu2 }
  0xc2   : > { %v7900_v35 = vadd.f32 %v797_v47, %v617_v31  ;;  %6588 = vmatmul.msk.f32.gmra.mxu3 %vm474_vm1, %v7565_v54  ;;  %v855_v47 = vrot.slane %v7592_v63, 2 }
  0xc3   : > { %v7907_v0 = vpop.f32.mrf.mxu0  ;;  %6654 = vmatmul.msk.f32.gmra.mxu1 %vm474_vm1, %v7905_v39 }
  0xc4   : > { %10736 = vst [vmem:[#allocation52_spill] sm:$0xff] %v7900_v35  ;;  %v7923_v50 = vsel %vm836_vm3, %v853_v43, %v855_v47  ;;  %v858_v43 = vrot.slane %v7620_v11, 2 }
  0xc5   : > { %v800_v22 = vpop.f32.mrf.mxu3  ;;  %10738 = vst [vmem:[#allocation54_spill] sm:$0xff] %v7923_v50 }
  0xc6   : > { %6555 = vmatmul.msk.f32.gmra.mxu2 %vm474_vm1, %v7870_v23  ;;  %6621 = vmatmul.msk.f32.gmra.mxu0 %vm474_vm1, %v7586_v61 }
  0xc8   : > { %v7920_v35 = vpop.f32.mrf.mxu1 }
  0xc9   : > { %v620_v31 = vpop.f32.mrf.mxu2 }
  0xca   : > { %v7918_v28 = vadd.f32 %v800_v22, %v620_v31  ;;  %6589 = vmatmul.msk.f32.gmra.mxu3 %vm474_vm1, %v7568_v55  ;;  %v857_v22 = vrot.slane %v7617_v10, 2 }
  0xcb   : > { %v7925_v54 = vpop.f32.mrf.mxu0  ;;  %6655 = vmatmul.msk.f32.gmra.mxu1 %vm474_vm1, %v7923_v50 }
  0xcc   : > { %10737 = vst [vmem:[#allocation53_spill] sm:$0xff] %v7918_v28  ;;  %v7942_v55 = vsel %vm836_vm3, %v857_v22, %v858_v43 }
  0xcd   : > { %v803_v63 = vpop.f32.mrf.mxu3 }
  0xce   : > { %6556 = vmatmul.msk.f32.gmra.mxu2 %vm474_vm1, %v7887_v29  ;;  %6622 = vmatmul.msk.f32.gmra.mxu0 %vm474_vm1, %v7608_v7 }
  0xd0   : > { %v7939_v28 = vpop.f32.mrf.mxu1 }
  0xd1   : > { %v623_v47 = vpop.f32.mrf.mxu2 }
  0xd2   : > { %v7937_v31 = vadd.f32 %v803_v63, %v623_v47  ;;  %6590 = vmatmul.msk.f32.gmra.mxu3 %vm474_vm1, %v7617_v10  ;;  %v860_v47 = vrot.slane %v7644_v27, 2 }
  0xd3   : > { %v7944_v61 = vpop.f32.mrf.mxu0  ;;  %6656 = vmatmul.msk.f32.gmra.mxu1 %vm474_vm1, %v7942_v55 }
  0xd4   : > { %10739 = vst [vmem:[#allocation55_spill] sm:$0xff] %v7937_v31  ;;  %v7960_v3 = vsel %vm836_vm3, %v858_v43, %v860_v47  ;;  %v863_v43 = vrot.slane %v7672_v49, 2 }
  0xd5   : > { %v806_v63 = vpop.f32.mrf.mxu3  ;;  %10741 = vst [vmem:[#allocation57_spill] sm:$0xff] %v7960_v3 }
  0xd6   : > { %6557 = vmatmul.msk.f32.gmra.mxu2 %vm474_vm1, %v7905_v39  ;;  %6623 = vmatmul.msk.f32.gmra.mxu0 %vm474_vm1, %v7638_v25 }
  0xd8   : > { %v7957_v7 = vpop.f32.mrf.mxu1 }
  0xd9   : > { %v626_v31 = vpop.f32.mrf.mxu2 }
  0xda   : > { %v7955_v22 = vadd.f32 %v806_v63, %v626_v31  ;;  %6591 = vmatmul.msk.f32.gmra.mxu3 %vm474_vm1, %v7620_v11  ;;  %v862_v31 = vrot.slane %v7669_v44, 2 }
  0xdb   : > { %v7962_v10 = vpop.f32.mrf.mxu0  ;;  %6657 = vmatmul.msk.f32.gmra.mxu1 %vm474_vm1, %v7960_v3 }
  0xdc   : > { %10740 = vst [vmem:[#allocation56_spill] sm:$0xff] %v7955_v22  ;;  %v7979_v11 = vsel %vm836_vm3, %v862_v31, %v863_v43 }
  0xdd   : > { %v809_v27 = vpop.f32.mrf.mxu3 }
  0xde   : > { %6558 = vmatmul.msk.f32.gmra.mxu2 %vm474_vm1, %v7923_v50  ;;  %6624 = vmatmul.msk.f32.gmra.mxu0 %vm474_vm1, %v7660_v41 }
  0xe0   : > { %v7976_v22 = vpop.f32.mrf.mxu1 }
  0xe1   : > { %v629_v63 = vpop.f32.mrf.mxu2 }
  0xe2   : > { %v7974_v47 = vadd.f32 %v809_v27, %v629_v63  ;;  %6592 = vmatmul.msk.f32.gmra.mxu3 %vm474_vm1, %v7669_v44  ;;  %v865_v63 = vrot.slane %v7696_v16, 2 }
  0xe3   : > { %v7981_v25 = vpop.f32.mrf.mxu0  ;;  %6658 = vmatmul.msk.f32.gmra.mxu1 %vm474_vm1, %v7979_v11 }
  0xe4   : > { %10742 = vst [vmem:[#allocation58_spill] sm:$0xff] %v7974_v47  ;;  %v7997_v50 = vsel %vm836_vm3, %v863_v43, %v865_v63  ;;  %v868_v43 = vrot.slane %v7724_v6, 2 }
  0xe5   : > { %v812_v27 = vpop.f32.mrf.mxu3  ;;  %10744 = vst [vmem:[#allocation60_spill] sm:$0xff] %v7997_v50 }
  0xe6   : > { %6559 = vmatmul.msk.f32.gmra.mxu2 %vm474_vm1, %v7942_v55  ;;  %6625 = vmatmul.msk.f32.gmra.mxu0 %vm474_vm1, %v7690_v2 }
  0xe8   : > { %v7994_v41 = vpop.f32.mrf.mxu1 }
  0xe9   : > { %v632_v47 = vpop.f32.mrf.mxu2 }
  0xea   : > { %v7992_v31 = vadd.f32 %v812_v27, %v632_v47  ;;  %6593 = vmatmul.msk.f32.gmra.mxu3 %vm474_vm1, %v7672_v49  ;;  %v867_v47 = vrot.slane %v7721_v59, 2 }
  0xeb   : > { %v7999_v44 = vpop.f32.mrf.mxu0  ;;  %6659 = vmatmul.msk.f32.gmra.mxu1 %vm474_vm1, %v7997_v50 }
  0xec   : > { %10743 = vst [vmem:[#allocation59_spill] sm:$0xff] %v7992_v31  ;;  %v8016_v49 = vsel %vm836_vm3, %v867_v47, %v868_v43 }
  0xed   : > { %v815_v16 = vpop.f32.mrf.mxu3  ;;  %10746 = vst [vmem:[#allocation62_spill] sm:$0xff] %v8016_v49 }
  0xee   : > { %6560 = vmatmul.msk.f32.gmra.mxu2 %vm474_vm1, %v7960_v3  ;;  %6626 = vmatmul.msk.f32.gmra.mxu0 %vm474_vm1, %v7712_v33 }
  0xf0   : > { %v8013_v31 = vpop.f32.mrf.mxu1 }
  0xf1   : > { %v635_v27 = vpop.f32.mrf.mxu2 }
  0xf2   : > { %v8011_v63 = vadd.f32 %v815_v16, %v635_v27  ;;  %6594 = vmatmul.msk.f32.gmra.mxu3 %vm474_vm1, %v7721_v59  ;;  %v870_v27 = vrot.slane %v7748_v42, 2 }
  0xf3   : > { %v8018_v2 = vpop.f32.mrf.mxu0  ;;  %6660 = vmatmul.msk.f32.gmra.mxu1 %vm474_vm1, %v8016_v49 }
  0xf4   : > { %10745 = vst [vmem:[#allocation61_spill] sm:$0xff] %v8011_v63  ;;  %v8034_v3 = vsel %vm836_vm3, %v868_v43, %v870_v27  ;;  %v873_v43 = vrot.slane %v7778_v34, 2 }
  0xf5   : > { %v818_v16 = vpop.f32.mrf.mxu3  ;;  %10748 = vst [vmem:[#allocation64_spill] sm:$0xff] %v8034_v3 }
  0xf6   : > { %6561 = vmatmul.msk.f32.gmra.mxu2 %vm474_vm1, %v7979_v11  ;;  %6627 = vmatmul.msk.f32.gmra.mxu0 %vm474_vm1, %v7742_v17 }
  0xf8   : > { %v8031_v33 = vpop.f32.mrf.mxu1 }
  0xf9   : > { %v638_v63 = vpop.f32.mrf.mxu2 }
  0xfa   : > { %v8029_v47 = vadd.f32 %v818_v16, %v638_v63  ;;  %6595 = vmatmul.msk.f32.gmra.mxu3 %vm474_vm1, %v7724_v6  ;;  %v872_v63 = vrot.slane %v7775_v8, 2 }
  0xfb   : > { %v8036_v59 = vpop.f32.mrf.mxu0  ;;  %6661 = vmatmul.msk.f32.gmra.mxu1 %vm474_vm1, %v8034_v3 }
  0xfc   : > { %10747 = vst [vmem:[#allocation63_spill] sm:$0xff] %v8029_v47  ;;  %v8053_v6 = vsel %vm836_vm3, %v872_v63, %v873_v43 }
  0xfd   : > { %v821_v42 = vpop.f32.mrf.mxu3  ;;  %10750 = vst [vmem:[#allocation66_spill] sm:$0xff] %v8053_v6 }
  0xfe   : > { %6562 = vmatmul.msk.f32.gmra.mxu2 %vm474_vm1, %v7997_v50  ;;  %6628 = vmatmul.msk.f32.gmra.mxu0 %vm474_vm1, %v7766_v26 }
 0x100   : > { %v8050_v47 = vpop.f32.mrf.mxu1 }
 0x101   : > { %v641_v16 = vpop.f32.mrf.mxu2 }
 0x102   : > { %v8048_v27 = vadd.f32 %v821_v42, %v641_v16  ;;  %6596 = vmatmul.msk.f32.gmra.mxu3 %vm474_vm1, %v7775_v8  ;;  %v875_v16 = vrot.slane %v7804_v14, 2 }
 0x103   : > { %v8055_v17 = vpop.f32.mrf.mxu0  ;;  %6662 = vmatmul.msk.f32.gmra.mxu1 %vm474_vm1, %v8053_v6 }
 0x104   : > { %10749 = vst [vmem:[#allocation65_spill] sm:$0xff] %v8048_v27  ;;  %v8071_v50 = vsel %vm836_vm3, %v873_v43, %v875_v16  ;;  %v878_v43 = vrot.slane %v7422_v5, 2 }
 0x105   : > { %v824_v42 = vpop.f32.mrf.mxu3  ;;  %10752 = vst [vmem:[#allocation68_spill] sm:$0xff] %v8071_v50 }
 0x106   : > { %6563 = vmatmul.msk.f32.gmra.mxu2 %vm474_vm1, %v8016_v49  ;;  %6629 = vmatmul.msk.f32.gmra.mxu0 %vm474_vm1, %v7798_v9  ;;  %v2318_v49 = vld [vmem:[#allocation7 + $0x78] sm:$0xff] }
 0x107   : > { %2423 = vmatpush.msra.mxu1 %v2318_v49 }
 0x108   : > { %v8068_v26 = vpop.f32.mrf.mxu1 }
 0x109   : > { %v644_v27 = vpop.f32.mrf.mxu2 }
 0x10a   : > { %v8066_v63 = vadd.f32 %v824_v42, %v644_v27  ;;  %6597 = vmatmul.msk.f32.gmra.mxu3 %vm474_vm1, %v7778_v34  ;;  %v877_v27 = vrot.slane %v7411_v1, 2 }
 0x10b   : > { %v8073_v8 = vpop.f32.mrf.mxu0  ;;  %6663 = vmatmul.msk.f32.gmra.mxu1 %vm474_vm1, %v8071_v50 }
 0x10c   : > { %10751 = vst [vmem:[#allocation67_spill] sm:$0xff] %v8066_v63  ;;  %v8090_v63 = vsel %vm836_vm3, %v877_v27, %v878_v43 }
 0x10d   : > { %v827_v14 = vpop.f32.mrf.mxu3  ;;  %10754 = vst [vmem:[#allocation70_spill] sm:$0xff] %v8090_v63 }
 0x10e   : > { %6564 = vmatmul.msk.f32.gmra.mxu2 %vm474_vm1, %v8034_v3  ;;  %6630 = vmatmul.msk.f32.gmra.mxu0 %vm474_vm1, %v7820_v19  ;;  %v2317_v3 = vld [vmem:[#allocation7 + $0x70] sm:$0xff] }
 0x10f   : > { %2424 = vmatpush.msra.mxu1 %v2317_v3  ;;  %v890_v3 = vrot.slane %v7543_v48, 2 }
 0x110   : > { %v8087_v34 = vpop.f32.mrf.mxu1 }
 0x111   : > { %v647_v42 = vpop.f32.mrf.mxu2 }
 0x112   : > { %v8085_v16 = vadd.f32 %v827_v14, %v647_v42  ;;  %6598 = vmatmul.msk.f32.gmra.mxu3 %vm474_vm1, %v7411_v1  ;;  %v880_v14 = vrot.slane %v7436_v13, 2 }
 0x113   : > { %v8092_v9 = vpop.f32.mrf.mxu0  ;;  %6664 = vmatmul.msk.f32.gmra.mxu1 %vm474_vm1, %v8090_v63 }
 0x114   : > { %10753 = vst [vmem:[#allocation69_spill] sm:$0xff] %v8085_v16  ;;  %v8108_v19 = vsel %vm836_vm3, %v878_v43, %v880_v14  ;;  %v883_v43 = vrot.slane %v7468_v24, 2 }
 0x115   : > { %v830_v49 = vpop.f32.mrf.mxu3 }
 0x116   : > { %6565 = vmatmul.msk.f32.gmra.mxu2 %vm474_vm1, %v8053_v6  ;;  %6631 = vmatmul.msk.f32.gmra.mxu0 %vm474_vm1, %v7441_v15 }
 0x118   : > { %v8105_v16 = vpop.f32.mrf.mxu1 }
 0x119   : > { %v650_v42 = vpop.f32.mrf.mxu2 }
 0x11a   : > { %v8103_v27 = vadd.f32 %v830_v49, %v650_v42  ;;  %6599 = vmatmul.msk.f32.gmra.mxu3 %vm474_vm1, %v7422_v5  ;;  %v882_v49 = vrot.slane %v7459_v21, 2 }
 0x11b   : > { %v8110_v1 = vpop.f32.mrf.mxu0  ;;  %6665 = vmatmul.msk.f32.gmra.mxu1 %vm474_vm1, %v8108_v19 }
 0x11c   : > { %10755 = vst [vmem:[#allocation71_spill] sm:$0xff] %v8103_v27  ;;  %v8125_v5 = vsel %vm836_vm3, %v882_v49, %v883_v43  ;;  %v741_v49 = vadd.f32 %v7835_v18, %v7838_v57  ;;  %v887_v57 = vrot.slane %v7510_v37, 2 }
 0x11d   : > { %v833_v13 = vpop.f32.mrf.mxu3 }
 0x11e   : > { %6566 = vmatmul.msk.f32.gmra.mxu2 %vm474_vm1, %v8071_v50  ;;  %6632 = vmatmul.msk.f32.gmra.mxu0 %vm474_vm1, %v7456_v20 }
 0x120   : > { %v1478_v27 = vpop.f32.mrf.mxu1 }
 0x121   : > { %v653_v14 = vpop.f32.mrf.mxu2 }
 0x122   : > { %v8122_v42 = vadd.f32 %v833_v13, %v653_v14  ;;  %6600 = vmatmul.msk.f32.gmra.mxu3 %vm474_vm1, %v7459_v21  ;;  %v885_v13 = vrot.slane %v7491_v32, 2 }
 0x123   : > { %v1319_v15 = vpop.f32.mrf.mxu0  ;;  %6666 = vmatmul.msk.f32.gmra.mxu1 %vm474_vm1, %v8125_v5 }
 0x124   : > { %10756 = vst [vmem:[#allocation72_spill] sm:$0xff] %v8122_v42  ;;  %v8139_v21 = vsel %vm836_vm3, %v883_v43, %v885_v13  ;;  %v888_v43 = vrot.slane %v7519_v40, 2 }
 0x125   : > { %v1159_v20 = vpop.f32.mrf.mxu3 }
 0x126   : > { %6567 = vmatmul.msk.f32.gmra.mxu2 %vm474_vm1, %v8090_v63  ;;  %6633 = vmatmul.msk.f32.gmra.mxu0 %vm474_vm1, %v7485_v30 }
 0x128   : > { %v1481_v50 = vpop.f32.mrf.mxu1 }
 0x129   : > { %v1003_v14 = vpop.f32.mrf.mxu2 }
 0x12a   : > { %v1099_v42 = vadd.f32 %v1003_v14, %v741_v49  ;;  %6601 = vmatmul.msk.f32.gmra.mxu3 %vm474_vm1, %v7468_v24  ;;  %v8156_v49 = vsel %vm836_vm3, %v887_v57, %v888_v43  ;;  %v8172_v57 = vsel %vm836_vm3, %v888_v43, %v890_v3 }
 0x12b   : > { %v1322_v6 = vpop.f32.mrf.mxu0  ;;  %6667 = vmatmul.msk.f32.gmra.mxu1 %vm474_vm1, %v8139_v21 }
 0x12c   : > { %v1255_v63 = vadd.f32 %v1159_v20, %v1099_v42  ;;  %v744_v20 = vadd.f32 %v7851_v53, %v7854_v58 }
 0x12d   : > { %v1162_v32 = vpop.f32.mrf.mxu3 }
 0x12e   : > { %6568 = vmatmul.msk.f32.gmra.mxu2 %vm474_vm1, %v8108_v19  ;;  %6634 = vmatmul.msk.f32.gmra.mxu0 %vm474_vm1, %v7507_v36  ;;  %v1415_v18 = vadd.f32 %v1319_v15, %v1255_v63 }
 0x130   : > { %v8153_v24 = vadd.f32 %v1478_v27, %v1415_v18  ;;  %v1484_v15 = vpop.f32.mrf.mxu1  ;;  %v747_v27 = vadd.f32 %v7867_v4, %v7872_v62  ;;  %v10757_v62 = vld [vmem:[#allocation15_spill] sm:$0xff] }
 0x131   : > { %v1006_v42 = vpop.f32.mrf.mxu2 }
 0x132   : > { %v1100_v13 = vadd.f32 %v1006_v42, %v744_v20  ;;  %6602 = vmatmul.msk.f32.gmra.mxu3 %vm474_vm1, %v7510_v37 }
 0x133   : > { %v1325_v14 = vpop.f32.mrf.mxu0  ;;  %6668 = vmatmul.msk.f32.gmra.mxu1 %vm474_vm1, %v8156_v49 }
 0x134   : > { %v1256_v63 = vadd.f32 %v1162_v32, %v1100_v13 }
 0x135   : > { %v1165_v53 = vpop.f32.mrf.mxu3 }
 0x136   : > { %6569 = vmatmul.msk.f32.gmra.mxu2 %vm474_vm1, %v8125_v5  ;;  %6635 = vmatmul.msk.f32.gmra.mxu0 %vm474_vm1, %v7537_v46  ;;  %v1416_v58 = vadd.f32 %v1322_v6, %v1256_v63  ;;  %v10758_v6 = vld [vmem:[#allocation16_spill] sm:$0xff] }
 0x137   : > { %v893_v43 = vrot.slane %v10758_v6, 2 }
 0x138   : > { %v8169_v18 = vadd.f32 %v1481_v50, %v1416_v58  ;;  %v1487_v13 = vpop.f32.mrf.mxu1  ;;  %v892_v50 = vrot.slane %v10757_v62, 2 }
 0x139   : > { %v1009_v37 = vpop.f32.mrf.mxu2 }
 0x13a   : > { %v1101_v32 = vadd.f32 %v1009_v37, %v747_v27  ;;  %6603 = vmatmul.msk.f32.gmra.mxu3 %vm474_vm1, %v7519_v40  ;;  %v750_v40 = vadd.f32 %v7884_v12, %v7889_v38  ;;  %v8189_v3 = vsel %vm836_vm3, %v892_v50, %v893_v43 }
 0x13b   : > { %v1328_v20 = vpop.f32.mrf.mxu0  ;;  %6669 = vmatmul.msk.f32.gmra.mxu1 %vm474_vm1, %v8172_v57 }
 0x13c   : > { %v1257_v42 = vadd.f32 %v1165_v53, %v1101_v32 }
 0x13d   : > { %v1168_v48 = vpop.f32.mrf.mxu3 }
 0x13e   : > { %6570 = vmatmul.msk.f32.gmra.mxu2 %vm474_vm1, %v8139_v21  ;;  %6636 = vmatmul.msk.f32.gmra.mxu0 %vm474_vm1, %v7559_v52  ;;  %v1417_v4 = vadd.f32 %v1325_v14, %v1257_v42  ;;  %v10760_v14 = vld [vmem:[#allocation18_spill] sm:$0xff] }
 0x140   : > { %v8186_v63 = vadd.f32 %v1484_v15, %v1417_v4  ;;  %v10761_v15 = vld [vmem:[#allocation19_spill] sm:$0xff]  ;;  %v1490_v42 = vpop.f32.mrf.mxu1  ;;  %v753_v4 = vadd.f32 %v7902_v60, %v7907_v0  ;;  %v10762_v60 = vld [vmem:[#allocation21_spill] sm:$0xff] }
 0x141   : > { %v1012_v53 = vpop.f32.mrf.mxu2  ;;  %v895_v32 = vrot.slane %v10761_v15, 2 }
 0x142   : > { %10759 = vst [vmem:[#allocation15_spill] sm:$0xff] %v8186_v63  ;;  %v1102_v58 = vadd.f32 %v1012_v53, %v750_v40  ;;  %6604 = vmatmul.msk.f32.gmra.mxu3 %vm474_vm1, %v10757_v62  ;;  %v2316_v63 = vld [vmem:[#allocation7 + $0x68] sm:$0xff] }
 0x143   : > { %v1331_v27 = vpop.f32.mrf.mxu0  ;;  %6670 = vmatmul.msk.f32.gmra.mxu1 %vm474_vm1, %v8189_v3  ;;  %v8205_v40 = vsel %vm836_vm3, %v893_v43, %v895_v32 }
 0x144   : > { %v1258_v37 = vadd.f32 %v1168_v48, %v1102_v58  ;;  %2425 = vmatpush.msra.mxu1 %v2316_v63 }
 0x145   : > { %v1171_v12 = vpop.f32.mrf.mxu3 }
 0x146   : > { %6571 = vmatmul.msk.f32.gmra.mxu2 %vm474_vm1, %v8156_v49  ;;  %6637 = vmatmul.msk.f32.gmra.mxu0 %vm474_vm1, %v10760_v14  ;;  %v1418_v38 = vadd.f32 %v1328_v20, %v1258_v37  ;;  %v10764_v37 = vld [vmem:[#allocation23_spill] sm:$0xff] }
 0x148   : > { %v8202_v50 = vadd.f32 %v1487_v13, %v1418_v38  ;;  %v10763_v13 = vld [vmem:[#allocation22_spill] sm:$0xff]  ;;  %v898_v38 = vrot.slane %v10764_v37, 2  ;;  %v1493_v32 = vpop.f32.mrf.mxu1 }
 0x149   : > { %v1015_v48 = vpop.f32.mrf.mxu2  ;;  %v897_v43 = vrot.slane %v10763_v13, 2 }
 0x14a   : > { %v1103_v62 = vadd.f32 %v1015_v48, %v753_v4  ;;  %6605 = vmatmul.msk.f32.gmra.mxu3 %vm474_vm1, %v10758_v6  ;;  %v756_v6 = vadd.f32 %v7920_v35, %v7925_v54  ;;  %v10766_v35 = vld [vmem:[#allocation25_spill] sm:$0xff] }
 0x14b   : > { %v1334_v53 = vpop.f32.mrf.mxu0  ;;  %6671 = vmatmul.msk.f32.gmra.mxu1 %vm474_vm1, %v8205_v40  ;;  %v8222_v48 = vsel %vm836_vm3, %v897_v43, %v898_v38 }
 0x14c   : > { %v1259_v58 = vadd.f32 %v1171_v12, %v1103_v62 }
 0x14d   : > { %v1174_v0 = vpop.f32.mrf.mxu3 }
 0x14e   : > { %6572 = vmatmul.msk.f32.gmra.mxu2 %vm474_vm1, %v8172_v57  ;;  %6638 = vmatmul.msk.f32.gmra.mxu0 %vm474_vm1, %v10762_v60  ;;  %v1419_v20 = vadd.f32 %v1331_v27, %v1259_v58 }
 0x150   : > { %v8219_v12 = vadd.f32 %v1490_v42, %v1419_v20  ;;  %v10767_v42 = vld [vmem:[#allocation26_spill] sm:$0xff]  ;;  %v759_v20 = vadd.f32 %v7939_v28, %v7944_v61  ;;  %v10768_v61 = vld [vmem:[#allocation28_spill] sm:$0xff] }
 0x151   : > { %v1018_v15 = vpop.f32.mrf.mxu2  ;;  %v900_v58 = vrot.slane %v10767_v42, 2 }
 0x152   : > { %10765 = vst [vmem:[#allocation16_spill] sm:$0xff] %v8219_v12  ;;  %v1104_v4 = vadd.f32 %v1018_v15, %v756_v6  ;;  %6606 = vmatmul.msk.f32.gmra.mxu3 %vm474_vm1, %v10763_v13 }
 0x153   : > { %v1337_v62 = vpop.f32.mrf.mxu0  ;;  %6672 = vmatmul.msk.f32.gmra.mxu1 %vm474_vm1, %v8222_v48  ;;  %v8238_v6 = vsel %vm836_vm3, %v898_v38, %v900_v58 }
 0x154   : > { %v1260_v27 = vadd.f32 %v1174_v0, %v1104_v4  ;;  %v1496_v4 = vpop.f32.mrf.mxu1 }
 0x155   : > { %v1177_v54 = vpop.f32.mrf.mxu3 }
 0x156   : > { %6573 = vmatmul.msk.f32.gmra.mxu2 %vm474_vm1, %v8189_v3  ;;  %6639 = vmatmul.msk.f32.gmra.mxu0 %vm474_vm1, %v10766_v35  ;;  %v1420_v63 = vadd.f32 %v1334_v53, %v1260_v27  ;;  %v10770_v27 = vld [vmem:[#allocation30_spill] sm:$0xff] }
 0x158   : > { %v8235_v43 = vadd.f32 %v1493_v32, %v1420_v63  ;;  %v10769_v32 = vld [vmem:[#allocation29_spill] sm:$0xff]  ;;  %v903_v63 = vrot.slane %v10770_v27, 2 }
 0x159   : > { %v1021_v13 = vpop.f32.mrf.mxu2  ;;  %v902_v38 = vrot.slane %v10769_v32, 2 }
 0x15a   : > { %v1105_v0 = vadd.f32 %v1021_v13, %v759_v20  ;;  %6607 = vmatmul.msk.f32.gmra.mxu3 %vm474_vm1, %v10764_v37  ;;  %v762_v37 = vadd.f32 %v7957_v7, %v7962_v10  ;;  %v10772_v7 = vld [vmem:[#allocation32_spill] sm:$0xff] }
 0x15b   : > { %v1340_v15 = vpop.f32.mrf.mxu0  ;;  %6673 = vmatmul.msk.f32.gmra.mxu1 %vm474_vm1, %v8238_v6  ;;  %v8255_v20 = vsel %vm836_vm3, %v902_v38, %v903_v63  ;;  %v765_v38 = vadd.f32 %v7976_v22, %v7981_v25  ;;  %v10774_v25 = vld [vmem:[#allocation35_spill] sm:$0xff] }
 0x15c   : > { %v1261_v12 = vadd.f32 %v1177_v54, %v1105_v0 }
 0x15d   : > { %v1180_v28 = vpop.f32.mrf.mxu3 }
 0x15e   : > { %6574 = vmatmul.msk.f32.gmra.mxu2 %vm474_vm1, %v8205_v40  ;;  %6640 = vmatmul.msk.f32.gmra.mxu0 %vm474_vm1, %v10768_v61  ;;  %v1421_v53 = vadd.f32 %v1337_v62, %v1261_v12  ;;  %v1499_v12 = vpop.f32.mrf.mxu1 }
 0x160   : > { %v8252_v42 = vadd.f32 %v1496_v4, %v1421_v53  ;;  %v10773_v4 = vld [vmem:[#allocation33_spill] sm:$0xff] }
 0x161   : > { %v1024_v54 = vpop.f32.mrf.mxu2  ;;  %v905_v53 = vrot.slane %v10773_v4, 2 }
 0x162   : > { %10771 = vst [vmem:[#allocation18_spill] sm:$0xff] %v8252_v42  ;;  %v1106_v58 = vadd.f32 %v1024_v54, %v762_v37  ;;  %6608 = vmatmul.msk.f32.gmra.mxu3 %vm474_vm1, %v10769_v32 }
 0x163   : > { %v1343_v13 = vpop.f32.mrf.mxu0  ;;  %6674 = vmatmul.msk.f32.gmra.mxu1 %vm474_vm1, %v8255_v20  ;;  %v8271_v54 = vsel %vm836_vm3, %v903_v63, %v905_v53  ;;  %v10775_v63 = vld [vmem:[#allocation36_spill] sm:$0xff] }
 0x164   : > { %v1262_v0 = vadd.f32 %v1180_v28, %v1106_v58 }
 0x165   : > { %v1183_v10 = vpop.f32.mrf.mxu3 }
 0x166   : > { %6575 = vmatmul.msk.f32.gmra.mxu2 %vm474_vm1, %v8222_v48  ;;  %6641 = vmatmul.msk.f32.gmra.mxu0 %vm474_vm1, %v10772_v7  ;;  %v1422_v62 = vadd.f32 %v1340_v15, %v1262_v0  ;;  %v2315_v7 = vld [vmem:[#allocation7 + $0x60] sm:$0xff]  ;;  %v907_v0 = vrot.slane %v10775_v63, 2 }
 0x167   : > { %2426 = vmatpush.msra.mxu1 %v2315_v7 }
 0x168   : > { %v8268_v37 = vadd.f32 %v1499_v12, %v1422_v62  ;;  %v10776_v12 = vld [vmem:[#allocation37_spill] sm:$0xff] }
 0x169   : > { %v1027_v28 = vpop.f32.mrf.mxu2  ;;  %v908_v62 = vrot.slane %v10776_v12, 2 }
 0x16a   : > { %v1107_v32 = vadd.f32 %v1027_v28, %v765_v38  ;;  %6609 = vmatmul.msk.f32.gmra.mxu3 %vm474_vm1, %v10770_v27  ;;  %v768_v27 = vadd.f32 %v7994_v41, %v7999_v44 }
 0x16b   : > { %v1346_v58 = vpop.f32.mrf.mxu0  ;;  %6675 = vmatmul.msk.f32.gmra.mxu1 %vm474_vm1, %v8271_v54  ;;  %v8288_v53 = vsel %vm836_vm3, %v907_v0, %v908_v62 }
 0x16c   : > { %v1263_v42 = vadd.f32 %v1183_v10, %v1107_v32  ;;  %v771_v32 = vadd.f32 %v8013_v31, %v8018_v2 }
 0x16d   : > { %v1186_v22 = vpop.f32.mrf.mxu3 }
 0x16e   : > { %6576 = vmatmul.msk.f32.gmra.mxu2 %vm474_vm1, %v8238_v6  ;;  %6642 = vmatmul.msk.f32.gmra.mxu0 %vm474_vm1, %v10774_v25  ;;  %v8281_v15 = vadd.f32 %v1343_v13, %v1263_v42  ;;  %v10777_v42 = vld [vmem:[#allocation39_spill] sm:$0xff]  ;;  %v10779_v13 = vld [vmem:[#allocation40_spill] sm:$0xff] }
 0x16f   : > { %v910_v7 = vrot.slane %v10779_v13, 2 }
 0x171   : > { %v1030_v10 = vpop.f32.mrf.mxu2 }
 0x172   : > { %v1108_v4 = vadd.f32 %v1030_v10, %v768_v27  ;;  %6610 = vmatmul.msk.f32.gmra.mxu3 %vm474_vm1, %v10775_v63 }
 0x173   : > { %v1349_v38 = vpop.f32.mrf.mxu0  ;;  %6676 = vmatmul.msk.f32.gmra.mxu1 %vm474_vm1, %v8288_v53 }
 0x174   : > { %v1264_v28 = vadd.f32 %v1186_v22, %v1108_v4  ;;  %v8304_v22 = vsel %vm836_vm3, %v908_v62, %v910_v7  ;;  %v10782_v4 = vld [vmem:[#allocation43_spill] sm:$0xff] }
 0x175   : > { %v1189_v41 = vpop.f32.mrf.mxu3  ;;  %v912_v62 = vrot.slane %v10782_v4, 2 }
 0x176   : > { %6577 = vmatmul.msk.f32.gmra.mxu2 %vm474_vm1, %v8255_v20  ;;  %6643 = vmatmul.msk.f32.gmra.mxu0 %vm474_vm1, %v10777_v42  ;;  %v8298_v44 = vadd.f32 %v1346_v58, %v1264_v28  ;;  %v10780_v58 = vld [vmem:[#allocation42_spill] sm:$0xff]  ;;  %v10783_v28 = vld [vmem:[#allocation44_spill] sm:$0xff] }
 0x177   : > { %v913_v13 = vrot.slane %v10783_v28, 2 }
 0x178   : > { %10778 = vst [vmem:[#allocation19_spill] sm:$0xff] %v8298_v44  ;;  %v8342_v44 = vld [vmem:[%s7408_s26 + $0x180] sm:$0xff] }
 0x179   : > { %v1033_v0 = vpop.f32.mrf.mxu2  ;;  %10787 = vst [vmem:[#allocation23_spill] sm:$0xff] %v8342_v44 }
 0x17a   : > { %v1109_v63 = vadd.f32 %v1033_v0, %v771_v32  ;;  %6611 = vmatmul.msk.f32.gmra.mxu3 %vm474_vm1, %v10776_v12  ;;  %v774_v12 = vadd.f32 %v8031_v33, %v8036_v59  ;;  %v8321_v32 = vsel %vm836_vm3, %v912_v62, %v913_v13 }
 0x17b   : > { %v1352_v27 = vpop.f32.mrf.mxu0  ;;  %6677 = vmatmul.msk.f32.gmra.mxu1 %vm474_vm1, %v8304_v22 }
 0x17c   : > { %v1265_v10 = vadd.f32 %v1189_v41, %v1109_v63  ;;  %v10784_v63 = vld [vmem:[#allocation46_spill] sm:$0xff] }
 0x17d   : > { %v1192_v2 = vpop.f32.mrf.mxu3 }
 0x17e   : > { %6578 = vmatmul.msk.f32.gmra.mxu2 %vm474_vm1, %v8271_v54  ;;  %6644 = vmatmul.msk.f32.gmra.mxu0 %vm474_vm1, %v10780_v58  ;;  %v8314_v31 = vadd.f32 %v1349_v38, %v1265_v10  ;;  %v10786_v10 = vld [vmem:[#allocation47_spill] sm:$0xff] }
 0x17f   : > { %v915_v62 = vrot.slane %v10786_v10, 2 }
 0x180   : > { %10781 = vst [vmem:[#allocation21_spill] sm:$0xff] %v8314_v31 }
 0x181   : > { %v1036_v41 = vpop.f32.mrf.mxu2 }
 0x182   : > { %v1110_v7 = vadd.f32 %v1036_v41, %v774_v12  ;;  %6612 = vmatmul.msk.f32.gmra.mxu3 %vm474_vm1, %v10782_v4  ;;  %v777_v12 = vadd.f32 %v8050_v47, %v8055_v17  ;;  %v10788_v17 = vld [vmem:[#allocation49_spill] sm:$0xff] }
 0x183   : > { %v1355_v0 = vpop.f32.mrf.mxu0  ;;  %6678 = vmatmul.msk.f32.gmra.mxu1 %vm474_vm1, %v8321_v32 }
 0x184   : > { %v1266_v38 = vadd.f32 %v1192_v2, %v1110_v7  ;;  %v8337_v2 = vsel %vm836_vm3, %v913_v13, %v915_v62  ;;  %v780_v62 = vadd.f32 %v8068_v26, %v8073_v8 }
 0x185   : > { %v1195_v33 = vpop.f32.mrf.mxu3 }
 0x186   : > { %6579 = vmatmul.msk.f32.gmra.mxu2 %vm474_vm1, %v8288_v53  ;;  %6645 = vmatmul.msk.f32.gmra.mxu0 %vm474_vm1, %v10784_v63  ;;  %v8331_v59 = vadd.f32 %v1352_v27, %v1266_v38  ;;  %v337_v63 = vld [vmem:[%s7408_s26 + $0x188] sm:$0xff] }
 0x187   : > { %v2314_v27 = vld [vmem:[#allocation7 + $0x58] sm:$0xff]  ;;  %v1448_v38 = vrot.slane %v337_v63, 2  ;;  %v1289_v10 = vrot.slane %v337_v63, 1 }
 0x188   : > { %10785 = vst [vmem:[#allocation22_spill] sm:$0xff] %v8331_v59  ;;  %2427 = vmatpush.msra.mxu1 %v2314_v27 }
 0x189   : > { %v1039_v4 = vpop.f32.mrf.mxu2 }
 0x18a   : > { %v1111_v41 = vadd.f32 %v1039_v4, %v777_v12  ;;  %6613 = vmatmul.msk.f32.gmra.mxu3 %vm474_vm1, %v10783_v28  ;;  %v1447_v28 = vrot.slane %v8342_v44, 2 }
 0x18b   : > { %v1358_v7 = vpop.f32.mrf.mxu0  ;;  %6679 = vmatmul.msk.f32.gmra.mxu1 %vm474_vm1, %v8337_v2 }
 0x18c   : > { %v1267_v31 = vadd.f32 %v1195_v33, %v1111_v41  ;;  %v1288_v33 = vrot.slane %v8342_v44, 1  ;;  %v8358_v41 = vsel %vm836_vm3, %v1447_v28, %v1448_v38 }
 0x18d   : > { %v1198_v47 = vpop.f32.mrf.mxu3  ;;  %10790 = vst [vmem:[#allocation26_spill] sm:$0xff] %v8358_v41 }
 0x18e   : > { %6580 = vmatmul.msk.f32.gmra.mxu2 %vm474_vm1, %v8304_v22  ;;  %6646 = vmatmul.msk.f32.gmra.mxu0 %vm474_vm1, %v10788_v17  ;;  %v8351_v13 = vadd.f32 %v1355_v0, %v1267_v31  ;;  %v8363_v31 = vsel %vm391_vm2, %v1288_v33, %v1289_v10  ;;  %v783_v33 = vadd.f32 %v8087_v34, %v8092_v9 }
 0x190   : > { %10789 = vst [vmem:[#allocation25_spill] sm:$0xff] %v8351_v13  ;;  %v338_v13 = vld [vmem:[%s7408_s26 + $0x190] sm:$0x3] }
 0x191   : > { %v1042_v12 = vpop.f32.mrf.mxu2  ;;  %v1450_v27 = vrot.slane %v338_v13, 2  ;;  %v1291_v28 = vrot.slane %v338_v13, 1 }
 0x192   : > { %v1112_v4 = vadd.f32 %v1042_v12, %v780_v62  ;;  %6614 = vmatmul.msk.f32.gmra.mxu3 %vm474_vm1, %v8342_v44 }
 0x193   : > { %v1361_v59 = vpop.f32.mrf.mxu0  ;;  %6680 = vmatmul.msk.f32.gmra.mxu1 %vm474_vm1, %v8358_v41  ;;  %v8377_v12 = vsel %vm836_vm3, %v1448_v38, %v1450_v27  ;;  %v8381_v41 = vsel %vm391_vm2, %v1289_v10, %v1291_v28  ;;  %v7132_v28 = vld [vmem:[%s7408_s26 + $0x38] sm:$0xff] }
 0x194   : > { %v1268_v0 = vadd.f32 %v1198_v47, %v1112_v4 }
 0x195   : > { %v1201_v26 = vpop.f32.mrf.mxu3 }
 0x196   : > { %6581 = vmatmul.msk.f32.gmra.mxu2 %vm474_vm1, %v8321_v32  ;;  %6647 = vmatmul.msk.f32.gmra.mxu0 %vm474_vm1, %v8363_v31  ;;  %v8372_v8 = vadd.f32 %v1358_v7, %v1268_v0  ;;  %v786_v7 = vadd.f32 %v8105_v16, %v8110_v1  ;;  %v7131_v0 = vld [vmem:[%s7408_s26 + $0x30] sm:$0xff] }
 0x199   : > { %v1045_v62 = vpop.f32.mrf.mxu2 }
 0x19a   : > { %v1113_v47 = vadd.f32 %v1045_v62, %v783_v33  ;;  %6615 = vmatmul.msk.f32.gmra.mxu3 %vm474_vm1, %v337_v63 }
 0x19b   : > { %v1364_v4 = vpop.f32.mrf.mxu0  ;;  %6681 = vmatmul.msk.f32.gmra.mxu1 %vm474_vm1, %v8377_v12 }
 0x19c   : > { %v1269_v44 = vadd.f32 %v1201_v26, %v1113_v47  ;;  %v10791_v47 = vld [vmem:[#allocation50_spill] sm:$0xff] }
 0x19d   : > { %v1204_v9 = vpop.f32.mrf.mxu3 }
 0x19e   : > { %6582 = vmatmul.msk.f32.gmra.mxu2 %vm474_vm1, %v8337_v2  ;;  %6648 = vmatmul.msk.f32.gmra.mxu0 %vm474_vm1, %v8381_v41  ;;  %v8389_v34 = vadd.f32 %v1361_v59, %v1269_v44 }
 0x1a1   : > { %v1048_v63 = vpop.f32.mrf.mxu2 }
 0x1a2   : > { %v1114_v13 = vadd.f32 %v1048_v63, %v786_v7  ;;  %6716 = vmatmul.msk.f32.vlgmr.msra.gmra.mxu3 %vm474_vm1, %v7534_v45  ;;  %v2313_v45 = vld [vmem:[#allocation7 + $0x50] sm:$0xff] }
 0x1a3   : > { %v1367_v38 = vpop.f32.mrf.mxu0  ;;  %2428 = vmatpush.msra.mxu1 %v2313_v45  ;;  %v7133_v7 = vld [vmem:[%s7408_s26 + $0x48] sm:$0xff]  ;;  %v10796_v45 = vld [vmem:[#allocation54_spill] sm:$0xff] }
 0x1a4   : > { %v1270_v10 = vadd.f32 %v1204_v9, %v1114_v13  ;;  %v10792_v9 = vld [vmem:[#allocation17_spill] sm:$0xff]  ;;  %v8419_v13 = vpop.f32.mrf.mxu1 }
 0x1a5   : > { %v1207_v26 = vpop.f32.mrf.mxu3 }
 0x1a6   : > { %6683 = vmatmul.msk.f32.vlgmr.msra.gmra.mxu2 %vm474_vm1, %v7131_v0  ;;  %6749 = vmatmul.msk.f32.vlgmr.msra.gmra.mxu0 %vm474_vm1, %v7870_v23  ;;  %v8399_v44 = vadd.f32 %v1364_v4, %v1270_v10  ;;  %v10794_v10 = vld [vmem:[#allocation51_spill] sm:$0xff] }
 0x1a9   : > { %v1051_v59 = vpop.f32.mrf.mxu2 }
 0x1aa   : > { %v1115_v16 = vadd.f32 %v1051_v59, %v7849_v56  ;;  %6717 = vmatmul.msk.f32.gmra.mxu3 %vm474_vm1, %v7556_v51  ;;  %v10795_v59 = vld [vmem:[#allocation20_spill] sm:$0xff] }
 0x1ab   : > { %v1370_v1 = vpop.f32.mrf.mxu0 }
 0x1ac   : > { %v1271_v27 = vadd.f32 %v1207_v26, %v1115_v16 }
 0x1ad   : > { %v1210_v23 = vpop.f32.mrf.mxu3 }
 0x1ae   : > { %6684 = vmatmul.msk.f32.gmra.mxu2 %vm474_vm1, %v7132_v28  ;;  %6750 = vmatmul.msk.f32.gmra.mxu0 %vm474_vm1, %v7887_v29  ;;  %v8408_v33 = vadd.f32 %v1367_v38, %v1271_v27  ;;  %v7134_v27 = vld [vmem:[%s7408_s26 + $0x50] sm:$0xff]  ;;  %v8430_v28 = vpop.f32.mrf.mxu1 }
 0x1b1   : > { %v1054_v62 = vpop.f32.mrf.mxu2 }
 0x1b2   : > { %v1116_v56 = vadd.f32 %v1054_v62, %v10791_v47  ;;  %6718 = vmatmul.msk.f32.gmra.mxu3 %vm474_vm1, %v10792_v9  ;;  %v10798_v62 = vld [vmem:[#allocation52_spill] sm:$0xff] }
 0x1b3   : > { %v1373_v4 = vpop.f32.mrf.mxu0  ;;  %v10799_v9 = vld [vmem:[#allocation24_spill] sm:$0xff] }
 0x1b4   : > { %v1272_v51 = vadd.f32 %v1210_v23, %v1116_v56 }
 0x1b5   : > { %v1213_v63 = vpop.f32.mrf.mxu3 }
 0x1b6   : > { %6685 = vmatmul.msk.f32.gmra.mxu2 %vm474_vm1, %v7133_v7  ;;  %6751 = vmatmul.msk.f32.gmra.mxu0 %vm474_vm1, %v7905_v39  ;;  %v8417_v29 = vadd.f32 %v1370_v1, %v1272_v51  ;;  %v7135_v7 = vld [vmem:[%s7408_s26 + $0x60] sm:$0xff] }
 0x1b8   : > { %10793 = vst [vmem:[#allocation28_spill] sm:$0xff] %v8417_v29 }
 0x1b9   : > { %v1057_v38 = vpop.f32.mrf.mxu2 }
 0x1ba   : > { %v1117_v0 = vadd.f32 %v1057_v38, %v10794_v10  ;;  %6719 = vmatmul.msk.f32.gmra.mxu3 %vm474_vm1, %v10795_v59  ;;  %v10801_v10 = vld [vmem:[#allocation53_spill] sm:$0xff]  ;;  %v8442_v59 = vpop.f32.mrf.mxu1 }
 0x1bb   : > { %v1376_v26 = vpop.f32.mrf.mxu0 }
 0x1bc   : > { %v1273_v16 = vadd.f32 %v1213_v63, %v1117_v0 }
 0x1bd   : > { %v1216_v39 = vpop.f32.mrf.mxu3 }
 0x1be   : > { %6686 = vmatmul.msk.f32.gmra.mxu2 %vm474_vm1, %v7134_v27  ;;  %6752 = vmatmul.msk.f32.gmra.mxu0 %vm474_vm1, %v10796_v45  ;;  %v8428_v1 = vadd.f32 %v1373_v4, %v1273_v16  ;;  %v10802_v27 = vld [vmem:[#allocation27_spill] sm:$0xff] }
 0x1c0   : > { %10797 = vst [vmem:[#allocation29_spill] sm:$0xff] %v8428_v1 }
 0x1c1   : > { %v1060_v23 = vpop.f32.mrf.mxu2 }
 0x1c2   : > { %v1118_v47 = vadd.f32 %v1060_v23, %v10798_v62  ;;  %6720 = vmatmul.msk.f32.gmra.mxu3 %vm474_vm1, %v10799_v9  ;;  %v7136_v23 = vld [vmem:[%s7408_s26 + $0x68] sm:$0xff] }
 0x1c3   : > { %v1379_v56 = vpop.f32.mrf.mxu0  ;;  %v10805_v9 = vld [vmem:[#allocation55_spill] sm:$0xff] }
 0x1c4   : > { %v1274_v51 = vadd.f32 %v1216_v39, %v1118_v47  ;;  %v2312_v39 = vld [vmem:[#allocation7 + $0x48] sm:$0xff] }
 0x1c5   : > { %v1219_v63 = vpop.f32.mrf.mxu3  ;;  %2429 = vmatpush.msra.mxu1 %v2312_v39  ;;  %v10808_v39 = vld [vmem:[#allocation56_spill] sm:$0xff] }
 0x1c6   : > { %6687 = vmatmul.msk.f32.gmra.mxu2 %vm474_vm1, %v7135_v7  ;;  %6753 = vmatmul.msk.f32.gmra.mxu0 %vm474_vm1, %v7942_v55  ;;  %v8439_v4 = vadd.f32 %v1376_v26, %v1274_v51  ;;  %v10803_v55 = vld [vmem:[#allocation57_spill] sm:$0xff] }
 0x1c8   : > { %10800 = vst [vmem:[#allocation30_spill] sm:$0xff] %v8439_v4 }
 0x1c9   : > { %v1063_v38 = vpop.f32.mrf.mxu2 }
 0x1ca   : > { %v1119_v0 = vadd.f32 %v1063_v38, %v10801_v10  ;;  %6721 = vmatmul.msk.f32.gmra.mxu3 %vm474_vm1, %v10802_v27  ;;  %v10806_v38 = vld [vmem:[#allocation31_spill] sm:$0xff]  ;;  %v8455_v10 = vpop.f32.mrf.mxu1 }
 0x1cb   : > { %v1382_v16 = vpop.f32.mrf.mxu0 }
 0x1cc   : > { %v1275_v45 = vadd.f32 %v1219_v63, %v1119_v0  ;;  %v7137_v0 = vld [vmem:[%s7408_s26 + $0x78] sm:$0xff] }
 0x1cd   : > { %v1222_v26 = vpop.f32.mrf.mxu3 }
 0x1ce   : > { %6688 = vmatmul.msk.f32.gmra.mxu2 %vm474_vm1, %v7136_v23  ;;  %6754 = vmatmul.msk.f32.gmra.mxu0 %vm474_vm1, %v10803_v55  ;;  %v8450_v62 = vadd.f32 %v1379_v56, %v1275_v45 }
 0x1d0   : > { %10804 = vst [vmem:[#allocation33_spill] sm:$0xff] %v8450_v62  ;;  %v10817_v62 = vld [vmem:[#allocation41_spill] sm:$0xff] }
 0x1d1   : > { %v1066_v47 = vpop.f32.mrf.mxu2 }
 0x1d2   : > { %v1120_v51 = vadd.f32 %v1066_v47, %v10805_v9  ;;  %6722 = vmatmul.msk.f32.gmra.mxu3 %vm474_vm1, %v10806_v38  ;;  %v10809_v47 = vld [vmem:[#allocation34_spill] sm:$0xff] }
 0x1d3   : > { %v1385_v7 = vpop.f32.mrf.mxu0  ;;  %v7138_v9 = vld [vmem:[%s7408_s26 + $0x80] sm:$0xff] }
 0x1d4   : > { %v1276_v63 = vadd.f32 %v1222_v26, %v1120_v51  ;;  %v10810_v51 = vld [vmem:[#allocation60_spill] sm:$0xff] }
 0x1d5   : > { %v1225_v27 = vpop.f32.mrf.mxu3 }
 0x1d6   : > { %6689 = vmatmul.msk.f32.gmra.mxu2 %vm474_vm1, %v7137_v0  ;;  %6755 = vmatmul.msk.f32.gmra.mxu0 %vm474_vm1, %v7979_v11  ;;  %v8461_v56 = vadd.f32 %v1382_v16, %v1276_v63  ;;  %v8472_v16 = vpop.f32.mrf.mxu1  ;;  %v10812_v0 = vld [vmem:[#allocation58_spill] sm:$0xff] }
 0x1d8   : > { %10807 = vst [vmem:[#allocation35_spill] sm:$0xff] %v8461_v56 }
 0x1d9   : > { %v1069_v45 = vpop.f32.mrf.mxu2 }
 0x1da   : > { %v1121_v23 = vadd.f32 %v1069_v45, %v10808_v39  ;;  %6723 = vmatmul.msk.f32.gmra.mxu3 %vm474_vm1, %v10809_v47  ;;  %v10813_v39 = vld [vmem:[#allocation38_spill] sm:$0xff] }
 0x1db   : > { %v1388_v55 = vpop.f32.mrf.mxu0  ;;  %v10814_v47 = vld [vmem:[#allocation62_spill] sm:$0xff] }
 0x1dc   : > { %v1277_v26 = vadd.f32 %v1225_v27, %v1121_v23  ;;  %v7139_v23 = vld [vmem:[%s7408_s26 + $0x90] sm:$0xff] }
 0x1dd   : > { %v1228_v38 = vpop.f32.mrf.mxu3 }
 0x1de   : > { %6690 = vmatmul.msk.f32.gmra.mxu2 %vm474_vm1, %v7138_v9  ;;  %6756 = vmatmul.msk.f32.gmra.mxu0 %vm474_vm1, %v10810_v51  ;;  %v8470_v11 = vadd.f32 %v1385_v7, %v1277_v26  ;;  %v8483_v26 = vpop.f32.mrf.mxu1 }
 0x1e0   : > { %10811 = vst [vmem:[#allocation36_spill] sm:$0xff] %v8470_v11  ;;  %v10816_v11 = vld [vmem:[#allocation59_spill] sm:$0xff] }
 0x1e1   : > { %v1072_v63 = vpop.f32.mrf.mxu2 }
 0x1e2   : > { %v1122_v56 = vadd.f32 %v1072_v63, %v10812_v0  ;;  %6724 = vmatmul.msk.f32.gmra.mxu3 %vm474_vm1, %v10813_v39  ;;  %v7140_v39 = vld [vmem:[%s7408_s26 + $0x98] sm:$0xff] }
 0x1e3   : > { %v1391_v45 = vpop.f32.mrf.mxu0 }
 0x1e4   : > { %v1278_v27 = vadd.f32 %v1228_v38, %v1122_v56  ;;  %v2311_v38 = vld [vmem:[#allocation7 + $0x40] sm:$0xff] }
 0x1e5   : > { %v1231_v9 = vpop.f32.mrf.mxu3  ;;  %2430 = vmatpush.msra.mxu1 %v2311_v38  ;;  %v10822_v38 = vld [vmem:[#allocation66_spill] sm:$0xff] }
 0x1e6   : > { %6691 = vmatmul.msk.f32.gmra.mxu2 %vm474_vm1, %v7139_v23  ;;  %6757 = vmatmul.msk.f32.gmra.mxu0 %vm474_vm1, %v10814_v47  ;;  %v8481_v7 = vadd.f32 %v1388_v55, %v1278_v27  ;;  %v10818_v23 = vld [vmem:[#allocation64_spill] sm:$0xff] }
 0x1e8   : > { %10815 = vst [vmem:[#allocation37_spill] sm:$0xff] %v8481_v7  ;;  %v10820_v7 = vld [vmem:[#allocation61_spill] sm:$0xff] }
 0x1e9   : > { %v1075_v51 = vpop.f32.mrf.mxu2 }
 0x1ea   : > { %v1123_v63 = vadd.f32 %v1075_v51, %v10816_v11  ;;  %6725 = vmatmul.msk.f32.gmra.mxu3 %vm474_vm1, %v10817_v62  ;;  %v8495_v51 = vpop.f32.mrf.mxu1  ;;  %v10821_v62 = vld [vmem:[#allocation45_spill] sm:$0xff] }
 0x1eb   : > { %v1394_v0 = vpop.f32.mrf.mxu0 }
 0x1ec   : > { %v1279_v56 = vadd.f32 %v1231_v9, %v1123_v63  ;;  %v7141_v63 = vld [vmem:[%s7408_s26 + $0xa8] sm:$0xff] }
 0x1ed   : > { %v1234_v55 = vpop.f32.mrf.mxu3 }
 0x1ee   : > { %6692 = vmatmul.msk.f32.gmra.mxu2 %vm474_vm1, %v7140_v39  ;;  %6758 = vmatmul.msk.f32.gmra.mxu0 %vm474_vm1, %v10818_v23  ;;  %v8492_v27 = vadd.f32 %v1391_v45, %v1279_v56  ;;  %v10823_v23 = vld [vmem:[#allocation63_spill] sm:$0xff] }
 0x1f0   : > { %10819 = vst [vmem:[#allocation39_spill] sm:$0xff] %v8492_v27  ;;  %v10824_v27 = vld [vmem:[#allocation48_spill] sm:$0xff] }
 0x1f1   : > { %v1078_v47 = vpop.f32.mrf.mxu2 }
 0x1f2   : > { %v1124_v11 = vadd.f32 %v1078_v47, %v10820_v7  ;;  %6726 = vmatmul.msk.f32.gmra.mxu3 %vm474_vm1, %v10821_v62  ;;  %v8508_v29 = vpop.f32.mrf.mxu1 }
 0x1f3   : > { %v1397_v4 = vpop.f32.mrf.mxu0 }
 0x1f4   : > { %v1280_v9 = vadd.f32 %v1234_v55, %v1124_v11  ;;  %v7142_v55 = vld [vmem:[%s7408_s26 + $0xb0] sm:$0xff] }
 0x1f5   : > { %v1237_v39 = vpop.f32.mrf.mxu3  ;;  %v10825_v11 = vld [vmem:[#allocation68_spill] sm:$0xff] }
 0x1f6   : > { %6693 = vmatmul.msk.f32.gmra.mxu2 %vm474_vm1, %v7141_v63  ;;  %6759 = vmatmul.msk.f32.gmra.mxu0 %vm474_vm1, %v10822_v38  ;;  %v8503_v45 = vadd.f32 %v1394_v0, %v1280_v9  ;;  %v2277_v9 = vld [vmem:[#allocation7 + $0x38] sm:$0xff]  ;;  %v10826_v38 = vld [vmem:[#allocation65_spill] sm:$0xff] }
 0x1f7   : > { %2632 = vmatpush.msrb.mxu2 %v2277_v9 }
 0x1f9   : > { %v1081_v56 = vpop.f32.mrf.mxu2 }
 0x1fa   : > { %v1125_v7 = vadd.f32 %v1081_v56, %v10823_v23  ;;  %6727 = vmatmul.msk.f32.gmra.mxu3 %vm474_vm1, %v10824_v27  ;;  %v10827_v27 = vld [vmem:[#allocation13_spill] sm:$0xff] }
 0x1fb   : > { %v1400_v47 = vpop.f32.mrf.mxu0 }
 0x1fc   : > { %v1281_v1 = vadd.f32 %v1237_v39, %v1125_v7  ;;  %v2777_v7 = vld [vmem:[#allocation7 + $0xb8] sm:$0xff] }
 0x1fd   : > { %v1240_v62 = vpop.f32.mrf.mxu3  ;;  %2882 = vmatpush.msrb.mxu3 %v2777_v7  ;;  %v7144_v7 = vld [vmem:[%s7408_s26 + $0xc8] sm:$0xff] }
 0x1fe   : > { %6694 = vmatmul.msk.f32.gmra.mxu2 %vm474_vm1, %v7142_v55  ;;  %6760 = vmatmul.msk.f32.gmra.mxu0 %vm474_vm1, %v10825_v11  ;;  %v8514_v0 = vadd.f32 %v1397_v4, %v1281_v1  ;;  %v7312_v55 = vmov 0.0   ;;  %v7143_v1 = vld [vmem:[%s7408_s26 + $0xc0] sm:$0xff] }
 0x1ff   : > { %2154 = vst.msk [vmem:[#allocation2 + $0x18] sm:$0xff] %vm2149_vm4, %v7312_v55  ;;  %v10828_v4 = vld [vmem:[#allocation70_spill] sm:$0xff] }
 0x200   : > { %2155 = vst.msk [vmem:[#allocation2 + $0x20] sm:$0xff] %vm2149_vm4, %v7312_v55 }
 0x201   : > { %v1084_v63 = vpop.f32.mrf.mxu2  ;;  %2150 = vst.msk [vmem:[#allocation2] sm:$0xff] %vm2149_vm4, %v7312_v55 }
 0x202   : > { %v1126_v56 = vadd.f32 %v1084_v63, %v10826_v38  ;;  %6728 = vmatmul.msk.f32.gmra.mxu3 %vm474_vm1, %v10827_v27  ;;  %2151 = vst.msk [vmem:[#allocation2 + $0x8] sm:$0xff] %vm2149_vm4, %v7312_v55  ;;  %v10829_v38 = vld [vmem:[#allocation67_spill] sm:$0xff]  ;;  %v10830_v27 = vld [vmem:[#allocation14_spill] sm:$0xff] }
 0x203   : > { %v1403_v23 = vpop.f32.mrf.mxu0  ;;  %2157 = vst.msk [vmem:[#allocation2 + $0x30] sm:$0xff] %vm2149_vm4, %v7312_v55 }
 0x204   : > { %v1282_v39 = vadd.f32 %v1240_v62, %v1126_v56  ;;  %v8531_v62 = vpop.f32.mrf.mxu1  ;;  %2158 = vst.msk [vmem:[#allocation2 + $0x38] sm:$0xff] %vm2149_vm4, %v7312_v55 }
 0x205   : > { %v1243_v11 = vpop.f32.mrf.mxu3  ;;  %2160 = vst.msk [vmem:[#allocation2 + $0x48] sm:$0xff] %vm2149_vm4, %v7312_v55 }
 0x206   : > { %6695 = vmatmul.msk.f32.gmra.mxu2 %vm474_vm1, %v7143_v1  ;;  %6761 = vmatmul.msk.f32.gmra.mxu0 %vm474_vm1, %v10828_v4  ;;  %v8527_v9 = vadd.f32 %v1400_v47, %v1282_v39  ;;  %2161 = vst.msk [vmem:[#allocation2 + $0x50] sm:$0xff] %vm2149_vm4, %v7312_v55 }
 0x207   : > { %2163 = vst.msk [vmem:[#allocation2 + $0x60] sm:$0xff] %vm2149_vm4, %v7312_v55 }
 0x208   : > { %2164 = vst.msk [vmem:[#allocation2 + $0x68] sm:$0xff] %vm2149_vm4, %v7312_v55 }
 0x209   : > { %v1087_v63 = vpop.f32.mrf.mxu2  ;;  %2166 = vst.msk [vmem:[#allocation2 + $0x78] sm:$0xff] %vm2149_vm4, %v7312_v55 }
 0x20a   : > { %v1127_v56 = vadd.f32 %v1087_v63, %v10829_v38  ;;  %6729 = vmatmul.msk.f32.gmra.mxu3 %vm474_vm1, %v10830_v27  ;;  %v2278_v63 = vld [vmem:[#allocation2 + $0x1] sm:$0xff]  ;;  %2167 = vst.msk [vmem:[#allocation2 + $0x80] sm:$0xff] %vm2149_vm4, %v7312_v55 }
 0x20b   : > { %v1406_v47 = vpop.f32.mrf.mxu0  ;;  %6781 = vmatmul.msk.f32.vlgmr.msra.gmra.mxu1 %vm2149_vm4, %v2278_v63  ;;  %2169 = vst.msk [vmem:[#allocation2 + $0x90] sm:$0xff] %vm2149_vm4, %v7312_v55  ;;  %v7145_v63 = vld [vmem:[%s7408_s26 + $0xd8] sm:$0xff] }
 0x20c   : > { %v1283_v39 = vadd.f32 %v1243_v11, %v1127_v56  ;;  %v8563_v11 = vpop.f32.mrf.mxu1  ;;  %2170 = vst.msk [vmem:[#allocation2 + $0x98] sm:$0xff] %vm2149_vm4, %v7312_v55 }
 0x20d   : > { %v1246_v1 = vpop.f32.mrf.mxu3  ;;  %2172 = vst.msk [vmem:[#allocation2 + $0xa8] sm:$0xff] %vm2149_vm4, %v7312_v55 }
 0x20e   : > { %6696 = vmatmul.msk.f32.gmra.mxu2 %vm474_vm1, %v7144_v7  ;;  %6762 = vmatmul.msk.f32.gmra.mxu0 %vm474_vm1, %v8108_v19  ;;  %v8554_v4 = vadd.f32 %v1403_v23, %v1283_v39  ;;  %v10831_v19 = vld [vmem:[#allocation69_spill] sm:$0xff]  ;;  %2173 = vst.msk [vmem:[#allocation2 + $0xb0] sm:$0xff] %vm2149_vm4, %v7312_v55  ;;  %v3059_v39 = vld [vmem:[#allocation7 + $0xf8] sm:$0xff] }
 0x20f   : > { %2175 = vst.msk [vmem:[#allocation2 + $0xc0] sm:$0xff] %vm2149_vm4, %v7312_v55  ;;  %v3341_v7 = vld [vmem:[#allocation7 + $0x138] sm:$0xff]  ;;  %3164 = vmatpush.msrb.mxu0 %v3059_v39  ;;  %v7146_v39 = vld [vmem:[%s7408_s26 + $0xe0] sm:$0xff] }
 0x210   : > { %2176 = vst.msk [vmem:[#allocation2 + $0xc8] sm:$0xff] %vm2149_vm4, %v7312_v55  ;;  %3446 = vmatpush.msrb.mxu1 %v3341_v7 }
 0x211   : > { %v1090_v38 = vpop.f32.mrf.mxu2  ;;  %2178 = vst.msk [vmem:[#allocation2 + $0xd8] sm:$0xff] %vm2149_vm4, %v7312_v55 }
 0x212   : > { %v1128_v23 = vadd.f32 %v1090_v38, %v10831_v19  ;;  %6730 = vmatmul.msk.f32.gmra.mxu3 %vm474_vm1, %v7485_v30  ;;  %2179 = vst.msk [vmem:[#allocation2 + $0xe0] sm:$0xff] %vm2149_vm4, %v7312_v55  ;;  %v10832_v19 = vld [vmem:[#allocation71_spill] sm:$0xff] }
 0x213   : > { %v1409_v56 = vpop.f32.mrf.mxu0  ;;  %2181 = vst.msk [vmem:[#allocation2 + $0xf0] sm:$0xff] %vm2149_vm4, %v7312_v55 }
 0x214   : > { %v1284_v27 = vadd.f32 %v1246_v1, %v1128_v23  ;;  %2182 = vst.msk [vmem:[#allocation2 + $0xf8] sm:$0xff] %vm2149_vm4, %v7312_v55 }
 0x215   : > { %v1249_v30 = vpop.f32.mrf.mxu3  ;;  %2184 = vst.msk [vmem:[#allocation2 + $0x108] sm:$0xff] %vm2149_vm4, %v7312_v55 }
 0x216   : > { %6697 = vmatmul.msk.f32.gmra.mxu2 %vm474_vm1, %v7145_v63  ;;  %6763 = vmatmul.msk.f32.gmra.mxu0 %vm474_vm1, %v8125_v5  ;;  %v8582_v38 = vadd.f32 %v1406_v47, %v1284_v27  ;;  %v8595_v5 = vpop.f32.mrf.mxu1  ;;  %2185 = vst.msk [vmem:[#allocation2 + $0x110] sm:$0xff] %vm2149_vm4, %v7312_v55 }
 0x217   : > { %2187 = vst.msk [vmem:[#allocation2 + $0x120] sm:$0xff] %vm2149_vm4, %v7312_v55 }
 0x218   : > { %2188 = vst.msk [vmem:[#allocation2 + $0x128] sm:$0xff] %vm2149_vm4, %v7312_v55 }
 0x219   : > { %v1093_v1 = vpop.f32.mrf.mxu2  ;;  %2190 = vst.msk [vmem:[#allocation2 + $0x138] sm:$0xff] %vm2149_vm4, %v7312_v55 }
 0x21a   : > { %v1129_v23 = vadd.f32 %v1093_v1, %v10832_v19  ;;  %6731 = vmatmul.msk.f32.gmra.mxu3 %vm474_vm1, %v7507_v36  ;;  %2191 = vst.msk [vmem:[#allocation2 + $0x140] sm:$0xff] %vm2149_vm4, %v7312_v55  ;;  %v2276_v19 = vld [vmem:[#allocation7 + $0x30] sm:$0xff] }
 0x21b   : > { %v1412_v47 = vpop.f32.mrf.mxu0  ;;  %2193 = vst.msk [vmem:[#allocation2 + $0x150] sm:$0xff] %vm2149_vm4, %v7312_v55  ;;  %2633 = vmatpush.msrb.mxu2 %v2276_v19 }
 0x21c   : > { %v1285_v27 = vadd.f32 %v1249_v30, %v1129_v23  ;;  %2194 = vst.msk [vmem:[#allocation2 + $0x158] sm:$0xff] %vm2149_vm4, %v7312_v55  ;;  %v10833_v30 = vld [vmem:[#allocation72_spill] sm:$0xff] }
 0x21d   : > { %v1252_v7 = vpop.f32.mrf.mxu3  ;;  %2196 = vst.msk [vmem:[#allocation2 + $0x168] sm:$0xff] %vm2149_vm4, %v7312_v55 }
 0x21e   : > { %6698 = vmatmul.msk.f32.gmra.mxu2 %vm474_vm1, %v7146_v39  ;;  %6764 = vmatmul.msk.f32.gmra.mxu0 %vm474_vm1, %v8139_v21  ;;  %v8609_v63 = vadd.f32 %v1409_v56, %v1285_v27  ;;  %2197 = vst.msk [vmem:[#allocation2 + $0x170] sm:$0xff] %vm2149_vm4, %v7312_v55  ;;  %v8628_v23 = vpop.f32.mrf.mxu1  ;;  %v7147_v27 = vld [vmem:[%s7408_s26 + $0xf0] sm:$0xff] }
 0x21f   : > { %2199 = vst.msk [vmem:[#allocation2 + $0x180] sm:$0xff] %vm2149_vm4, %v7312_v55 }
 0x220   : > { %2200 = vst.msk [vmem:[#allocation2 + $0x188] sm:$0xff] %vm2149_vm4, %v7312_v55 }
 0x221   : > { %v1096_v36 = vpop.f32.mrf.mxu2  ;;  %2202 = vst.msk [vmem:[#allocation2 + $0x198] sm:$0xff] %vm2149_vm4, %v7312_v55 }
 0x222   : > { %v1130_v1 = vadd.f32 %v1096_v36, %v10833_v30  ;;  %6732 = vmatmul.msk.f32.gmra.mxu3 %vm474_vm1, %v7537_v46  ;;  %2203 = vst.msk [vmem:[#allocation2 + $0x1a0] sm:$0xff] %vm2149_vm4, %v7312_v55  ;;  %v8653_v30 = vld [vmem:[#allocation5] ss:$0 sm:$0xff] }
 0x223   : > { %v1953_v21 = vpop.f32.mrf.mxu0  ;;  %2156 = vst.msk [vmem:[#allocation2 + $0x28] sm:$0x3] %vm2152_vm5, %v7312_v55 }
 0x224   : > { %v1286_v56 = vadd.f32 %v1252_v7, %v1130_v1  ;;  %2153 = vst.msk [vmem:[#allocation2 + $0x10] sm:$0x3] %vm2152_vm5, %v7312_v55  ;;  %v2776_v1 = vld [vmem:[#allocation7 + $0xb0] sm:$0xff] }
 0x225   : > { %v1794_v39 = vpop.f32.mrf.mxu3  ;;  %2159 = vst.msk [vmem:[#allocation2 + $0x40] sm:$0x3] %vm2152_vm5, %v7312_v55  ;;  %2883 = vmatpush.msrb.mxu3 %v2776_v1  ;;  %v3058_v1 = vld [vmem:[#allocation7 + $0xf0] sm:$0xff] }
 0x226   : > { %6699 = vmatmul.msk.f32.gmra.mxu2 %vm474_vm1, %v7147_v27  ;;  %6765 = vmatmul.msk.f32.gmra.mxu0 %vm474_vm1, %v8156_v49  ;;  %v8636_v46 = vadd.f32 %v1412_v47, %v1286_v56  ;;  %2162 = vst.msk [vmem:[#allocation2 + $0x58] sm:$0x3] %vm2152_vm5, %v7312_v55  ;;  %v7148_v56 = vld [vmem:[%s7408_s26 + $0xf8] sm:$0xff]  ;;  %v8665_v19 = vpop.f32.mrf.mxu1 }
 0x227   : > { %2165 = vst.msk [vmem:[#allocation2 + $0x70] sm:$0x3] %vm2152_vm5, %v7312_v55  ;;  %3165 = vmatpush.msrb.mxu0 %v3058_v1 }
 0x228   : > { %2168 = vst.msk [vmem:[#allocation2 + $0x88] sm:$0x3] %vm2152_vm5, %v7312_v55 }
 0x229   : > { %v1634_v7 = vpop.f32.mrf.mxu2  ;;  %2171 = vst.msk [vmem:[#allocation2 + $0xa0] sm:$0x3] %vm2152_vm5, %v7312_v55 }
 0x22a   : > { %v1730_v49 = vadd.f32 %v1634_v7, %v8153_v24  ;;  %6733 = vmatmul.msk.f32.gmra.mxu3 %vm474_vm1, %v7559_v52  ;;  %2174 = vst.msk [vmem:[#allocation2 + $0xb8] sm:$0x3] %vm2152_vm5, %v7312_v55 }
 0x22b   : > { %v1956_v47 = vpop.f32.mrf.mxu0  ;;  %2177 = vst.msk [vmem:[#allocation2 + $0xd0] sm:$0x3] %vm2152_vm5, %v7312_v55 }
 0x22c   : > { %v1890_v36 = vadd.f32 %v1794_v39, %v1730_v49  ;;  %2180 = vst.msk [vmem:[#allocation2 + $0xe8] sm:$0x3] %vm2152_vm5, %v7312_v55 }
 0x22d   : > { %v1797_v52 = vpop.f32.mrf.mxu3  ;;  %2183 = vst.msk [vmem:[#allocation2 + $0x100] sm:$0x3] %vm2152_vm5, %v7312_v55 }
 0x22e   : > { %v2049_v24 = vadd.f32 %v1953_v21, %v1890_v36  ;;  %6700 = vmatmul.msk.f32.gmra.mxu2 %vm474_vm1, %v7148_v56  ;;  %6766 = vmatmul.msk.f32.gmra.mxu0 %vm474_vm1, %v8172_v57  ;;  %v2279_v21 = vld [vmem:[#allocation2 + $0x9] sm:$0xff]  ;;  %2186 = vst.msk [vmem:[#allocation2 + $0x118] sm:$0x3] %vm2152_vm5, %v7312_v55 }
 0x22f   : > { %6782 = vmatmul.msk.f32.gmra.mxu1 %vm2149_vm4, %v2279_v21  ;;  %2189 = vst.msk [vmem:[#allocation2 + $0x130] sm:$0x3] %vm2152_vm5, %v7312_v55  ;;  %v7149_v56 = vld [vmem:[%s7408_s26 + $0x108] sm:$0xff] }
 0x230   : > { %v2085_v27 = vadd.f32 %v8653_v30, %v2049_v24  ;;  %v3340_v24 = vld [vmem:[#allocation7 + $0x130] sm:$0xff]  ;;  %2192 = vst.msk [vmem:[#allocation2 + $0x148] sm:$0x3] %vm2152_vm5, %v7312_v55 }
 0x231   : > { %v1637_v39 = vpop.f32.mrf.mxu2  ;;  %3447 = vmatpush.msrb.mxu1 %v3340_v24  ;;  %2195 = vst.msk [vmem:[#allocation2 + $0x160] sm:$0x3] %vm2152_vm5, %v7312_v55  ;;  %v7150_v24 = vld [vmem:[%s7408_s26 + $0x110] sm:$0xff] }
 0x232   : > { %v2117_v57 = vmax.f32 %v2085_v27, 0.0  ;;  %v1731_v7 = vadd.f32 %v1637_v39, %v8169_v18  ;;  %6734 = vmatmul.msk.f32.gmra.mxu3 %vm474_vm1, %v10760_v14  ;;  %2198 = vst.msk [vmem:[#allocation2 + $0x178] sm:$0x3] %vm2152_vm5, %v7312_v55 }
 0x233   : > { %v1959_v49 = vpop.f32.mrf.mxu0  ;;  %2201 = vst.msk [vmem:[#allocation2 + $0x190] sm:$0x3] %vm2152_vm5, %v7312_v55 }
 0x234   : > { %2206 = vst.msk [vmem:[#allocation2 + $0x19] sm:$0xff] %vm2149_vm4, %v2117_v57  ;;  %v1891_v36 = vadd.f32 %v1797_v52, %v1731_v7 }
 0x235   : > { %v1800_v14 = vpop.f32.mrf.mxu3  ;;  %2204 = vst.msk [vmem:[#allocation2 + $0x1a8] sm:$0x3] %vm2152_vm5, %v7312_v55 }
 0x236   : > { %v2050_v18 = vadd.f32 %v1956_v47, %v1891_v36  ;;  %6701 = vmatmul.msk.f32.gmra.mxu2 %vm474_vm1, %v7149_v56  ;;  %6767 = vmatmul.msk.f32.gmra.mxu0 %vm474_vm1, %v8189_v3  ;;  %v8696_v47 = vpop.f32.mrf.mxu1  ;;  %v10834_v3 = vld [vmem:[#allocation15_spill] sm:$0xff] }
 0x238   : > { %v2086_v52 = vadd.f32 %v8653_v30, %v2050_v18 }
 0x239   : > { %v1640_v27 = vpop.f32.mrf.mxu2 }
 0x23a   : > { %v2118_v21 = vmax.f32 %v2086_v52, 0.0  ;;  %v1732_v39 = vadd.f32 %v1640_v27, %v10834_v3  ;;  %6735 = vmatmul.msk.f32.gmra.mxu3 %vm474_vm1, %v10762_v60 }
 0x23b   : > { %v1962_v57 = vpop.f32.mrf.mxu0  ;;  %v2280_v7 = vld [vmem:[#allocation2 + $0x19] sm:$0xff] }
 0x23c   : > { %2207 = vst.msk [vmem:[#allocation2 + $0x21] sm:$0xff] %vm2149_vm4, %v2118_v21  ;;  %v1892_v36 = vadd.f32 %v1800_v14, %v1732_v39  ;;  %6783 = vmatmul.msk.f32.gmra.mxu1 %vm2149_vm4, %v2280_v7  ;;  %v7151_v39 = vld [vmem:[%s7408_s26 + $0x120] sm:$0xff] }
 0x23d   : > { %v1803_v55 = vpop.f32.mrf.mxu3 }
 0x23e   : > { %v2051_v1 = vadd.f32 %v1959_v49, %v1892_v36  ;;  %6702 = vmatmul.msk.f32.gmra.mxu2 %vm474_vm1, %v7150_v24  ;;  %6768 = vmatmul.msk.f32.gmra.mxu0 %vm474_vm1, %v8205_v40  ;;  %v8713_v27 = vpop.f32.mrf.mxu1  ;;  %v2275_v40 = vld [vmem:[#allocation7 + $0x28] sm:$0xff] }
 0x23f   : > { %2634 = vmatpush.msrb.mxu2 %v2275_v40 }
 0x240   : > { %v2087_v18 = vadd.f32 %v8653_v30, %v2051_v1  ;;  %v10835_v1 = vld [vmem:[#allocation16_spill] sm:$0xff] }
 0x241   : > { %v1643_v56 = vpop.f32.mrf.mxu2 }
 0x242   : > { %v2119_v52 = vmax.f32 %v2087_v18, 0.0  ;;  %v1733_v60 = vadd.f32 %v1643_v56, %v8202_v50  ;;  %6736 = vmatmul.msk.f32.gmra.mxu3 %vm474_vm1, %v10766_v35  ;;  %v2775_v56 = vld [vmem:[#allocation7 + $0xa8] sm:$0xff] }
 0x243   : > { %v1965_v14 = vpop.f32.mrf.mxu0  ;;  %v2281_v49 = vld [vmem:[#allocation2 + $0x21] sm:$0xff]  ;;  %2884 = vmatpush.msrb.mxu3 %v2775_v56 }
 0x244   : > { %2208 = vst.msk [vmem:[#allocation2 + $0x31] sm:$0xff] %vm2149_vm4, %v2119_v52  ;;  %v1893_v21 = vadd.f32 %v1803_v55, %v1733_v60  ;;  %6784 = vmatmul.msk.f32.gmra.mxu1 %vm2149_vm4, %v2281_v49  ;;  %v7152_v60 = vld [vmem:[%s7408_s26 + $0x128] sm:$0xff] }
 0x245   : > { %v1806_v50 = vpop.f32.mrf.mxu3 }
 0x246   : > { %v2052_v3 = vadd.f32 %v1962_v57, %v1893_v21  ;;  %6703 = vmatmul.msk.f32.gmra.mxu2 %vm474_vm1, %v7151_v39  ;;  %6769 = vmatmul.msk.f32.gmra.mxu0 %vm474_vm1, %v8222_v48  ;;  %v8729_v48 = vpop.f32.mrf.mxu1 }
 0x248   : > { %v2088_v7 = vadd.f32 %v8653_v30, %v2052_v3 }
 0x249   : > { %v1646_v35 = vpop.f32.mrf.mxu2 }
 0x24a   : > { %v2120_v36 = vmax.f32 %v2088_v7, 0.0  ;;  %v1734_v24 = vadd.f32 %v1646_v35, %v10835_v1  ;;  %6737 = vmatmul.msk.f32.gmra.mxu3 %vm474_vm1, %v10768_v61  ;;  %v3057_v35 = vld [vmem:[#allocation7 + $0xe8] sm:$0xff] }
 0x24b   : > { %v1968_v55 = vpop.f32.mrf.mxu0  ;;  %v2282_v18 = vld [vmem:[#allocation2 + $0x31] sm:$0xff]  ;;  %3166 = vmatpush.msrb.mxu0 %v3057_v35 }
 0x24c   : > { %2209 = vst.msk [vmem:[#allocation2 + $0x39] sm:$0xff] %vm2149_vm4, %v2120_v36  ;;  %v1894_v57 = vadd.f32 %v1806_v50, %v1734_v24  ;;  %6785 = vmatmul.msk.f32.gmra.mxu1 %vm2149_vm4, %v2282_v18  ;;  %v10836_v50 = vld [vmem:[#allocation32_spill] sm:$0xff]  ;;  %v7153_v1 = vld [vmem:[%s7408_s26 + $0x138] sm:$0xff] }
 0x24d   : > { %v1809_v49 = vpop.f32.mrf.mxu3 }
 0x24e   : > { %v2053_v52 = vadd.f32 %v1965_v14, %v1894_v57  ;;  %6704 = vmatmul.msk.f32.gmra.mxu2 %vm474_vm1, %v7152_v60  ;;  %6770 = vmatmul.msk.f32.gmra.mxu0 %vm474_vm1, %v8238_v6  ;;  %v3339_v6 = vld [vmem:[#allocation7 + $0x128] sm:$0xff]  ;;  %v8745_v24 = vpop.f32.mrf.mxu1 }
 0x24f   : > { %3448 = vmatpush.msrb.mxu1 %v3339_v6 }
 0x250   : > { %v2089_v61 = vadd.f32 %v8653_v30, %v2053_v52  ;;  %v10837_v52 = vld [vmem:[#allocation18_spill] sm:$0xff] }
 0x251   : > { %v1649_v21 = vpop.f32.mrf.mxu2 }
 0x252   : > { %v2121_v40 = vmax.f32 %v2089_v61, 0.0  ;;  %v1735_v3 = vadd.f32 %v1649_v21, %v8235_v43  ;;  %6738 = vmatmul.msk.f32.gmra.mxu3 %vm474_vm1, %v10836_v50  ;;  %v7154_v21 = vld [vmem:[%s7408_s26 + $0x140] sm:$0xff] }
 0x253   : > { %v1971_v39 = vpop.f32.mrf.mxu0  ;;  %v2283_v7 = vld [vmem:[#allocation2 + $0x39] sm:$0xff] }
 0x254   : > { %2210 = vst.msk [vmem:[#allocation2 + $0x49] sm:$0xff] %vm2149_vm4, %v2121_v40  ;;  %v1895_v14 = vadd.f32 %v1809_v49, %v1735_v3  ;;  %6786 = vmatmul.msk.f32.gmra.mxu1 %vm2149_vm4, %v2283_v7 }
 0x255   : > { %v1812_v43 = vpop.f32.mrf.mxu3 }
 0x256   : > { %v2054_v36 = vadd.f32 %v1968_v55, %v1895_v14  ;;  %6705 = vmatmul.msk.f32.gmra.mxu2 %vm474_vm1, %v7153_v1  ;;  %6771 = vmatmul.msk.f32.gmra.mxu0 %vm474_vm1, %v8255_v20  ;;  %v8758_v50 = vpop.f32.mrf.mxu1  ;;  %v7155_v1 = vld [vmem:[%s7408_s26 + $0x150] sm:$0xff] }
 0x258   : > { %v2090_v18 = vadd.f32 %v8653_v30, %v2054_v36 }
 0x259   : > { %v1652_v57 = vpop.f32.mrf.mxu2 }
 0x25a   : > { %v2122_v56 = vmax.f32 %v2090_v18, 0.0  ;;  %v1736_v60 = vadd.f32 %v1652_v57, %v10837_v52  ;;  %6739 = vmatmul.msk.f32.gmra.mxu3 %vm474_vm1, %v10774_v25 }
 0x25b   : > { %v1974_v49 = vpop.f32.mrf.mxu0  ;;  %v2284_v55 = vld [vmem:[#allocation2 + $0x49] sm:$0xff] }
 0x25c   : > { %2211 = vst.msk [vmem:[#allocation2 + $0x51] sm:$0xff] %vm2149_vm4, %v2122_v56  ;;  %v1896_v61 = vadd.f32 %v1812_v43, %v1736_v60  ;;  %6787 = vmatmul.msk.f32.gmra.mxu1 %vm2149_vm4, %v2284_v55  ;;  %v2774_v55 = vld [vmem:[#allocation7 + $0xa0] sm:$0xff] }
 0x25d   : > { %v1815_v40 = vpop.f32.mrf.mxu3  ;;  %2885 = vmatpush.msrb.mxu3 %v2774_v55 }
 0x25e   : > { %v2055_v20 = vadd.f32 %v1971_v39, %v1896_v61  ;;  %6706 = vmatmul.msk.f32.gmra.mxu2 %vm474_vm1, %v7154_v21  ;;  %6772 = vmatmul.msk.f32.gmra.mxu0 %vm474_vm1, %v8271_v54  ;;  %v2274_v54 = vld [vmem:[#allocation7 + $0x20] sm:$0xff]  ;;  %v8772_v52 = vpop.f32.mrf.mxu1 }
 0x25f   : > { %2635 = vmatpush.msrb.mxu2 %v2274_v54 }
 0x260   : > { %v2091_v3 = vadd.f32 %v8653_v30, %v2055_v20  ;;  %v10838_v20 = vld [vmem:[#allocation19_spill] sm:$0xff] }
 0x261   : > { %v1655_v25 = vpop.f32.mrf.mxu2  ;;  %v1583_v21 = vadd.f32 %v8430_v28, %v10838_v20  ;;  %v3055_v20 = vld [vmem:[#allocation7 + $0xd8] sm:$0xff] }
 0x262   : > { %v2123_v7 = vmax.f32 %v2091_v3, 0.0  ;;  %v1737_v14 = vadd.f32 %v1655_v25, %v8268_v37  ;;  %6740 = vmatmul.msk.f32.gmra.mxu3 %vm474_vm1, %v10777_v42  ;;  %v1582_v42 = vadd.f32 %v8419_v13, %v8281_v15  ;;  %v7156_v13 = vld [vmem:[%s7408_s26 + $0x158] sm:$0xff] }
 0x263   : > { %v1977_v35 = vpop.f32.mrf.mxu0  ;;  %v2285_v39 = vld [vmem:[#allocation2 + $0x51] sm:$0xff] }
 0x264   : > { %2212 = vst.msk [vmem:[#allocation2 + $0x61] sm:$0xff] %vm2149_vm4, %v2123_v7  ;;  %v1897_v6 = vadd.f32 %v1815_v40, %v1737_v14  ;;  %6788 = vmatmul.msk.f32.gmra.mxu1 %vm2149_vm4, %v2285_v39  ;;  %v10839_v14 = vld [vmem:[#allocation46_spill] sm:$0xff] }
 0x265   : > { %v1818_v37 = vpop.f32.mrf.mxu3 }
 0x266   : > { %v2056_v36 = vadd.f32 %v1974_v49, %v1897_v6  ;;  %6707 = vmatmul.msk.f32.gmra.mxu2 %vm474_vm1, %v7155_v1  ;;  %6773 = vmatmul.msk.f32.gmra.mxu0 %vm474_vm1, %v8288_v53  ;;  %v3338_v6 = vld [vmem:[#allocation7 + $0x120] sm:$0xff]  ;;  %v8789_v54 = vpop.f32.mrf.mxu1 }
 0x267   : > { %3449 = vmatpush.msrb.mxu1 %v3338_v6  ;;  %v3053_v6 = vld [vmem:[#allocation7 + $0xc8] sm:$0xff] }
 0x268   : > { %v2092_v43 = vadd.f32 %v8653_v30, %v2056_v36  ;;  %v7157_v36 = vld [vmem:[%s7408_s26 + $0x168] sm:$0xff] }
 0x269   : > { %v1658_v18 = vpop.f32.mrf.mxu2 }
 0x26a   : > { %v2124_v57 = vmax.f32 %v2092_v43, 0.0  ;;  %v1738_v56 = vadd.f32 %v1658_v18, %v1582_v42  ;;  %6741 = vmatmul.msk.f32.gmra.mxu3 %vm474_vm1, %v10780_v58 }
 0x26b   : > { %v1980_v60 = vpop.f32.mrf.mxu0  ;;  %v2286_v49 = vld [vmem:[#allocation2 + $0x61] sm:$0xff] }
 0x26c   : > { %2213 = vst.msk [vmem:[#allocation2 + $0x69] sm:$0xff] %vm2149_vm4, %v2124_v57  ;;  %v1898_v53 = vadd.f32 %v1818_v37, %v1738_v56  ;;  %6789 = vmatmul.msk.f32.gmra.mxu1 %vm2149_vm4, %v2286_v49  ;;  %v10840_v37 = vld [vmem:[#allocation21_spill] sm:$0xff] }
 0x26d   : > { %v1821_v61 = vpop.f32.mrf.mxu3  ;;  %v1584_v42 = vadd.f32 %v8442_v59, %v10840_v37  ;;  %v3052_v37 = vld [vmem:[#allocation7 + $0xc0] sm:$0xff] }
 0x26e   : > { %v2057_v15 = vadd.f32 %v1977_v35, %v1898_v53  ;;  %6708 = vmatmul.msk.f32.gmra.mxu2 %vm474_vm1, %v7156_v13  ;;  %6774 = vmatmul.msk.f32.gmra.mxu0 %vm474_vm1, %v8304_v22  ;;  %v3056_v22 = vld [vmem:[#allocation7 + $0xe0] sm:$0xff]  ;;  %v2273_v13 = vld [vmem:[#allocation7 + $0x18] sm:$0xff] }
 0x26f   : > { %3167 = vmatpush.msrb.mxu0 %v3056_v22  ;;  %2636 = vmatpush.msrb.mxu2 %v2273_v13  ;;  %v2770_v22 = vld [vmem:[#allocation7 + $0x80] sm:$0xff] }
 0x270   : > { %v2093_v58 = vadd.f32 %v8653_v30, %v2057_v15  ;;  %v7158_v15 = vld [vmem:[%s7408_s26 + $0x170] sm:$0xff] }
 0x271   : > { %v1661_v40 = vpop.f32.mrf.mxu2  ;;  %3168 = vmatpush.msrb.mxu0 %v3055_v20 }
 0x272   : > { %v2125_v3 = vmax.f32 %v2093_v58, 0.0  ;;  %v1739_v25 = vadd.f32 %v1661_v40, %v1583_v21  ;;  %6742 = vmatmul.msk.f32.gmra.mxu3 %vm474_vm1, %v10839_v14  ;;  %v10841_v21 = vld [vmem:[#allocation22_spill] sm:$0xff] }
 0x273   : > { %v1983_v7 = vpop.f32.mrf.mxu0  ;;  %v2287_v35 = vld [vmem:[#allocation2 + $0x69] sm:$0xff]  ;;  %v1585_v58 = vadd.f32 %v8455_v10, %v10841_v21 }
 0x274   : > { %2214 = vst.msk [vmem:[#allocation2 + $0x79] sm:$0xff] %vm2149_vm4, %v2125_v3  ;;  %v1899_v39 = vadd.f32 %v1821_v61, %v1739_v25  ;;  %6790 = vmatmul.msk.f32.gmra.mxu1 %vm2149_vm4, %v2287_v35  ;;  %v2772_v61 = vld [vmem:[#allocation7 + $0x90] sm:$0xff]  ;;  %v2771_v25 = vld [vmem:[#allocation7 + $0x88] sm:$0xff] }
 0x275   : > { %v1824_v1 = vpop.f32.mrf.mxu3  ;;  %v2272_v3 = vld [vmem:[#allocation7 + $0x10] sm:$0xff] }
 0x276   : > { %v2058_v28 = vadd.f32 %v1980_v60, %v1899_v39  ;;  %6709 = vmatmul.msk.f32.gmra.mxu2 %vm474_vm1, %v7157_v36  ;;  %6775 = vmatmul.msk.f32.gmra.mxu0 %vm474_vm1, %v8321_v32  ;;  %v2773_v32 = vld [vmem:[#allocation7 + $0x98] sm:$0xff]  ;;  %v2271_v39 = vld [vmem:[#allocation7 + $0x8] sm:$0xff] }
 0x277   : > { %2886 = vmatpush.msrb.mxu3 %v2773_v32  ;;  %2637 = vmatpush.msrb.mxu2 %v2272_v3 }
 0x278   : > { %v2094_v43 = vadd.f32 %v8653_v30, %v2058_v28 }
 0x279   : > { %v1664_v18 = vpop.f32.mrf.mxu2  ;;  %2887 = vmatpush.msrb.mxu3 %v2772_v61  ;;  %2638 = vmatpush.msrb.mxu2 %v2271_v39  ;;  %v341_v39 = vld [vmem:[%s7408_s26 + $0x1a8] sm:$0x3] }
 0x27a   : > { %v2126_v57 = vmax.f32 %v2094_v43, 0.0  ;;  %v1740_v56 = vadd.f32 %v1664_v18, %v1584_v42  ;;  %6743 = vmatmul.msk.f32.gmra.mxu3 %vm474_vm1, %v10788_v17  ;;  %v8806_v17 = vpop.f32.mrf.mxu1  ;;  %v10842_v43 = vld [vmem:[#allocation23_spill] sm:$0xff]  ;;  %v10843_v18 = vld [vmem:[#allocation26_spill] sm:$0xff] }
 0x27b   : > { %v1986_v49 = vpop.f32.mrf.mxu0  ;;  %v2288_v60 = vld [vmem:[#allocation2 + $0x79] sm:$0xff]  ;;  %2888 = vmatpush.msrb.mxu3 %v2771_v25 }
 0x27c   : > { %2215 = vst.msk [vmem:[#allocation2 + $0x81] sm:$0xff] %vm2149_vm4, %v2126_v57  ;;  %v1900_v53 = vadd.f32 %v1824_v1, %v1740_v56  ;;  %6791 = vmatmul.msk.f32.gmra.mxu1 %vm2149_vm4, %v2288_v60  ;;  %v2270_v1 = vld [vmem:[#allocation7] sm:$0xff] }
 0x27d   : > { %v1827_v59 = vpop.f32.mrf.mxu3  ;;  %2889 = vmatpush.msrb.mxu3 %v2770_v22  ;;  %2639 = vmatpush.msrb.mxu2 %v2270_v1  ;;  %v10844_v57 = vld [vmem:[#allocation25_spill] sm:$0xff] }
 0x27e   : > { %v2059_v55 = vadd.f32 %v1983_v7, %v1900_v53  ;;  %6710 = vmatmul.msk.f32.gmra.mxu2 %vm474_vm1, %v7158_v15  ;;  %6776 = vmatmul.msk.f32.gmra.mxu0 %vm474_vm1, %v8337_v2  ;;  %v3054_v7 = vld [vmem:[#allocation7 + $0xd0] sm:$0xff]  ;;  %v1586_v56 = vadd.f32 %v8472_v16, %v10844_v57 }
 0x27f   : > { %3169 = vmatpush.msrb.mxu0 %v3054_v7  ;;  %v340_v15 = vld [vmem:[%s7408_s26 + $0x1a0] sm:$0xff] }
 0x280   : > { %v2095_v40 = vadd.f32 %v8653_v30, %v2059_v55  ;;  %v339_v55 = vld [vmem:[%s7408_s26 + $0x198] sm:$0xff]  ;;  %v1764_v21 = vrot.slane %v340_v15, 1  ;;  %v1923_v7 = vrot.slane %v340_v15, 2 }
 0x281   : > { %v1667_v14 = vpop.f32.mrf.mxu2  ;;  %3170 = vmatpush.msrb.mxu0 %v3053_v6  ;;  %v1763_v16 = vrot.slane %v339_v55, 1  ;;  %v1922_v25 = vrot.slane %v339_v55, 2 }
 0x282   : > { %v2127_v2 = vmax.f32 %v2095_v40, 0.0  ;;  %v1741_v35 = vadd.f32 %v1667_v14, %v1585_v58  ;;  %6744 = vmatmul.msk.f32.gmra.mxu3 %vm474_vm1, %v8363_v31  ;;  %v8822_v53 = vpop.f32.mrf.mxu1  ;;  %v7159_v40 = vld [vmem:[%s7408_s26 + $0x188] sm:$0xff] }
 0x283   : > { %v1989_v28 = vpop.f32.mrf.mxu0  ;;  %v2289_v10 = vld [vmem:[#allocation2 + $0x81] sm:$0xff]  ;;  %3171 = vmatpush.msrb.mxu0 %v3052_v37 }
 0x284   : > { %2216 = vst.msk [vmem:[#allocation2 + $0x91] sm:$0xff] %vm2149_vm4, %v2127_v2  ;;  %v1901_v36 = vadd.f32 %v1827_v59, %v1741_v35  ;;  %6792 = vmatmul.msk.f32.gmra.mxu1 %vm2149_vm4, %v2289_v10  ;;  %v1765_v2 = vsel %vm391_vm2, %v1763_v16, %v1764_v21 }
 0x285   : > { %v1830_v31 = vpop.f32.mrf.mxu3 }
 0x286   : > { %v2060_v42 = vadd.f32 %v1986_v49, %v1901_v36  ;;  %6711 = vmatmul.msk.f32.gmra.mxu2 %vm474_vm1, %v10842_v43  ;;  %6777 = vmatmul.msk.f32.gmra.mxu0 %vm474_vm1, %v10843_v18  ;;  %v1924_v36 = vsel %vm836_vm3, %v1922_v25, %v1923_v7  ;;  %v1925_v43 = vrot.slane %v341_v39, 2  ;;  %v1588_v18 = vadd.f32 %v8495_v51, %v8389_v34 }
 0x288   : > { %v2096_v60 = vadd.f32 %v8653_v30, %v2060_v42 }
 0x289   : > { %v1670_v32 = vpop.f32.mrf.mxu2 }
 0x28a   : > { %v2128_v49 = vmax.f32 %v2096_v60, 0.0  ;;  %v1742_v59 = vadd.f32 %v1670_v32, %v1586_v56  ;;  %6745 = vmatmul.msk.f32.gmra.mxu3 %vm474_vm1, %v8381_v41  ;;  %v1587_v41 = vadd.f32 %v8483_v26, %v8372_v8  ;;  %v1766_v8 = vrot.slane %v341_v39, 1  ;;  %v3337_v26 = vld [vmem:[#allocation7 + $0x118] sm:$0xff] }
 0x28b   : > { %v1992_v13 = vpop.f32.mrf.mxu0  ;;  %v2290_v61 = vld [vmem:[#allocation2 + $0x91] sm:$0xff]  ;;  %3450 = vmatpush.msrb.mxu1 %v3337_v26 }
 0x28c   : > { %2217 = vst.msk [vmem:[#allocation2 + $0x99] sm:$0xff] %vm2149_vm4, %v2128_v49  ;;  %v1902_v20 = vadd.f32 %v1830_v31, %v1742_v59  ;;  %6793 = vmatmul.msk.f32.gmra.mxu1 %vm2149_vm4, %v2290_v61  ;;  %v1767_v57 = vsel %vm391_vm2, %v1764_v21, %v1766_v8  ;;  %v2737_v21 = vld [vmem:[#allocation2 + $0x2] sm:$0xff] }
 0x28d   : > { %v1833_v3 = vpop.f32.mrf.mxu3  ;;  %v2239_v8 = vld [vmem:[#allocation2 + $0x8] sm:$0xff] }
 0x28e   : > { %v2061_v58 = vadd.f32 %v1989_v28, %v1902_v20  ;;  %6712 = vmatmul.msk.f32.gmra.mxu2 %vm474_vm1, %v7159_v40  ;;  %6778 = vmatmul.msk.f32.gmra.mxu0 %vm474_vm1, %v8377_v12  ;;  %v8839_v28 = vpop.f32.mrf.mxu1  ;;  %v1589_v20 = vadd.f32 %v8508_v29, %v8399_v44 }
 0x290   : > { %v2097_v14 = vadd.f32 %v8653_v30, %v2061_v58 }
 0x291   : > { %v1673_v35 = vpop.f32.mrf.mxu2 }
 0x292   : > { %v2129_v22 = vmax.f32 %v2097_v14, 0.0  ;;  %v1743_v6 = vadd.f32 %v1673_v35, %v1587_v41  ;;  %6746 = vmatmul.msk.f32.gmra.mxu3 %vm474_vm1, %v1765_v2  ;;  %v2238_v41 = vld [vmem:[#allocation2] sm:$0xff]  ;;  %v3019_v14 = vld [vmem:[#allocation2 + $0x18] sm:$0xff]  ;;  %v1590_v35 = vadd.f32 %v8531_v62, %v8408_v33 }
 0x293   : > { %v1995_v10 = vpop.f32.mrf.mxu0  ;;  %v2291_v12 = vld [vmem:[#allocation2 + $0x99] sm:$0xff] }
 0x294   : > { %2218 = vst.msk [vmem:[#allocation2 + $0xa9] sm:$0xff] %vm2149_vm4, %v2129_v22  ;;  %v1903_v1 = vadd.f32 %v1833_v3, %v1743_v6  ;;  %6794 = vmatmul.msk.f32.gmra.mxu1 %vm2149_vm4, %v2291_v12  ;;  %v2738_v22 = vld [vmem:[#allocation2 + $0xa] sm:$0xff] }
 0x295   : > { %v1836_v42 = vpop.f32.mrf.mxu3 }
 0x296   : > { %v2062_v37 = vadd.f32 %v1992_v13, %v1903_v1  ;;  %6713 = vmatmul.msk.f32.gmra.mxu2 %vm474_vm1, %v339_v55  ;;  %6779 = vmatmul.msk.f32.gmra.mxu0 %vm474_vm1, %v1924_v36  ;;  %v1926_v55 = vsel %vm836_vm3, %v1923_v7, %v1925_v43  ;;  %v8855_v61 = vpop.f32.mrf.mxu1  ;;  %v10845_v43 = vld [vmem:[#allocation28_spill] sm:$0xff] }
 0x298   : > { %v2098_v31 = vadd.f32 %v8653_v30, %v2062_v37  ;;  %v3020_v37 = vld [vmem:[#allocation2 + $0x20] sm:$0xff] }
 0x299   : > { %v1676_v56 = vpop.f32.mrf.mxu2 }
 0x29a   : > { %v2130_v60 = vmax.f32 %v2098_v31, 0.0  ;;  %v1744_v32 = vadd.f32 %v1676_v56, %v1588_v18  ;;  %6747 = vmatmul.msk.f32.gmra.mxu3 %vm474_vm1, %v1767_v57  ;;  %v1591_v18 = vadd.f32 %v8563_v11, %v10845_v43  ;;  %v10848_v43 = vld [vmem:[#allocation33_spill] sm:$0xff] }
 0x29b   : > { %v1998_v49 = vpop.f32.mrf.mxu0  ;;  %v2292_v59 = vld [vmem:[#allocation2 + $0xa9] sm:$0xff] }
 0x29c   : > { %2219 = vst.msk [vmem:[#allocation2 + $0xb1] sm:$0xff] %vm2149_vm4, %v2130_v60  ;;  %v1904_v13 = vadd.f32 %v1836_v42, %v1744_v32  ;;  %6795 = vmatmul.msk.f32.gmra.mxu1 %vm2149_vm4, %v2292_v59  ;;  %v2739_v32 = vld [vmem:[#allocation2 + $0x1a] sm:$0xff] }
 0x29d   : > { %v1839_v51 = vpop.f32.mrf.mxu3 }
 0x29e   : > { %v2063_v34 = vadd.f32 %v1995_v10, %v1904_v13  ;;  %6714 = vmatmul.msk.f32.gmra.mxu2 %vm474_vm1, %v340_v15  ;;  %6780 = vmatmul.msk.f32.gmra.mxu0 %vm474_vm1, %v1926_v55  ;;  %v8865_v2 = vpop.f32.mrf.mxu1  ;;  %v3336_v13 = vld [vmem:[#allocation7 + $0x110] sm:$0xff] }
 0x29f   : > { %3451 = vmatpush.msrb.mxu1 %v3336_v13 }
 0x2a0   : > { %v2099_v16 = vadd.f32 %v8653_v30, %v2063_v34  ;;  %v3021_v34 = vld [vmem:[#allocation2 + $0x30] sm:$0xff] }
 0x2a1   : > { %v1679_v58 = vpop.f32.mrf.mxu2 }
 0x2a2   : > { %v2131_v40 = vmax.f32 %v2099_v16, 0.0  ;;  %v1745_v3 = vadd.f32 %v1679_v58, %v1589_v20  ;;  %6845 = vmatmul.msk.f32.vlgmr.msrb.gmra.mxu3 %vm2149_vm4, %v2737_v21  ;;  %v10846_v20 = vld [vmem:[#allocation29_spill] sm:$0xff] }
 0x2a3   : > { %v2001_v25 = vpop.f32.mrf.mxu0  ;;  %v2293_v7 = vld [vmem:[#allocation2 + $0xb1] sm:$0xff]  ;;  %v1592_v16 = vadd.f32 %v8595_v5, %v10846_v20 }
 0x2a4   : > { %2220 = vst.msk [vmem:[#allocation2 + $0xc1] sm:$0xff] %vm2149_vm4, %v2131_v40  ;;  %v1905_v15 = vadd.f32 %v1839_v51, %v1745_v3  ;;  %6796 = vmatmul.msk.f32.gmra.mxu1 %vm2149_vm4, %v2293_v7  ;;  %v2740_v7 = vld [vmem:[#allocation2 + $0x22] sm:$0xff] }
 0x2a5   : > { %v1842_v29 = vpop.f32.mrf.mxu3 }
 0x2a6   : > { %v2064_v44 = vadd.f32 %v1998_v49, %v1905_v15  ;;  %6813 = vmatmul.msk.f32.vlgmr.msrb.gmra.mxu2 %vm2149_vm4, %v2238_v41  ;;  %6877 = vmatmul.msk.f32.vlgmr.msrb.gmra.mxu0 %vm2149_vm4, %v3019_v14 }
 0x2a8   : > { %v2100_v39 = vadd.f32 %v8653_v30, %v2064_v44  ;;  %v3022_v44 = vld [vmem:[#allocation2 + $0x38] sm:$0xff] }
 0x2a9   : > { %v1682_v6 = vpop.f32.mrf.mxu2 }
 0x2aa   : > { %v2132_v10 = vmax.f32 %v2100_v39, 0.0  ;;  %v1746_v12 = vadd.f32 %v1682_v6, %v1590_v35  ;;  %6846 = vmatmul.msk.f32.gmra.mxu3 %vm2149_vm4, %v2738_v22  ;;  %v10847_v35 = vld [vmem:[#allocation30_spill] sm:$0xff] }
 0x2ab   : > { %v2004_v36 = vpop.f32.mrf.mxu0  ;;  %v2294_v1 = vld [vmem:[#allocation2 + $0xc1] sm:$0xff]  ;;  %v1593_v39 = vadd.f32 %v8628_v23, %v10847_v35  ;;  %v10850_v35 = vld [vmem:[#allocation36_spill] sm:$0xff] }
 0x2ac   : > { %2221 = vst.msk [vmem:[#allocation2 + $0xc9] sm:$0xff] %vm2149_vm4, %v2132_v10  ;;  %v1906_v26 = vadd.f32 %v1842_v29, %v1746_v12  ;;  %6797 = vmatmul.msk.f32.gmra.mxu1 %vm2149_vm4, %v2294_v1  ;;  %v8877_v62 = vpop.f32.mrf.mxu1  ;;  %v2741_v1 = vld [vmem:[#allocation2 + $0x32] sm:$0xff] }
 0x2ad   : > { %v1845_v33 = vpop.f32.mrf.mxu3 }
 0x2ae   : > { %v2065_v42 = vadd.f32 %v2001_v25, %v1906_v26  ;;  %6814 = vmatmul.msk.f32.gmra.mxu2 %vm2149_vm4, %v2239_v8  ;;  %6878 = vmatmul.msk.f32.gmra.mxu0 %vm2149_vm4, %v3020_v37 }
 0x2b0   : > { %v2101_v31 = vadd.f32 %v8653_v30, %v2065_v42  ;;  %v3023_v42 = vld [vmem:[#allocation2 + $0x48] sm:$0xff] }
 0x2b1   : > { %v1685_v57 = vpop.f32.mrf.mxu2 }
 0x2b2   : > { %v2133_v56 = vmax.f32 %v2101_v31, 0.0  ;;  %v1747_v60 = vadd.f32 %v1685_v57, %v1591_v18  ;;  %6847 = vmatmul.msk.f32.gmra.mxu3 %vm2149_vm4, %v2739_v32  ;;  %v1594_v18 = vadd.f32 %v8665_v19, %v10848_v43  ;;  %v10851_v43 = vld [vmem:[#allocation37_spill] sm:$0xff] }
 0x2b3   : > { %v2007_v49 = vpop.f32.mrf.mxu0  ;;  %v2295_v59 = vld [vmem:[#allocation2 + $0xc9] sm:$0xff] }
 0x2b4   : > { %2222 = vst.msk [vmem:[#allocation2 + $0xd9] sm:$0xff] %vm2149_vm4, %v2133_v56  ;;  %v1907_v55 = vadd.f32 %v1845_v33, %v1747_v60  ;;  %6798 = vmatmul.msk.f32.gmra.mxu1 %vm2149_vm4, %v2295_v59 }
 0x2b5   : > { %v1848_v11 = vpop.f32.mrf.mxu3 }
 0x2b6   : > { %v2066_v51 = vadd.f32 %v2004_v36, %v1907_v55  ;;  %6815 = vmatmul.msk.f32.gmra.mxu2 %vm2149_vm4, %v3019_v14  ;;  %6879 = vmatmul.msk.f32.gmra.mxu0 %vm2149_vm4, %v3021_v34 }
 0x2b8   : > { %v2102_v21 = vadd.f32 %v8653_v30, %v2066_v51 }
 0x2b9   : > { %v1688_v58 = vpop.f32.mrf.mxu2  ;;  %v8890_v40 = vpop.f32.mrf.mxu1 }
 0x2ba   : > { %v2134_v3 = vmax.f32 %v2102_v21, 0.0  ;;  %v1748_v25 = vadd.f32 %v1688_v58, %v1592_v16  ;;  %6848 = vmatmul.msk.f32.gmra.mxu3 %vm2149_vm4, %v2740_v7  ;;  %v2743_v7 = vld [vmem:[#allocation2 + $0x4a] sm:$0xff] }
 0x2bb   : > { %v2010_v41 = vpop.f32.mrf.mxu0  ;;  %v2296_v15 = vld [vmem:[#allocation2 + $0xd9] sm:$0xff] }
 0x2bc   : > { %2223 = vst.msk [vmem:[#allocation2 + $0xe1] sm:$0xff] %vm2149_vm4, %v2134_v3  ;;  %v1908_v14 = vadd.f32 %v1848_v11, %v1748_v25  ;;  %6799 = vmatmul.msk.f32.gmra.mxu1 %vm2149_vm4, %v2296_v15  ;;  %v10849_v11 = vld [vmem:[#allocation35_spill] sm:$0xff] }
 0x2bd   : > { %v1851_v5 = vpop.f32.mrf.mxu3  ;;  %v1595_v20 = vadd.f32 %v8696_v47, %v10849_v11  ;;  %v10852_v11 = vld [vmem:[#allocation39_spill] sm:$0xff] }
 0x2be   : > { %v2067_v29 = vadd.f32 %v2007_v49, %v1908_v14  ;;  %6816 = vmatmul.msk.f32.gmra.mxu2 %vm2149_vm4, %v3020_v37  ;;  %6880 = vmatmul.msk.f32.gmra.mxu0 %vm2149_vm4, %v3022_v44  ;;  %v2742_v49 = vld [vmem:[#allocation2 + $0x3a] sm:$0xff] }
 0x2c0   : > { %v2103_v22 = vadd.f32 %v8653_v30, %v2067_v29  ;;  %v3025_v29 = vld [vmem:[#allocation2 + $0x60] sm:$0xff] }
 0x2c1   : > { %v1691_v6 = vpop.f32.mrf.mxu2  ;;  %v8900_v10 = vpop.f32.mrf.mxu1 }
 0x2c2   : > { %v2135_v12 = vmax.f32 %v2103_v22, 0.0  ;;  %v1749_v36 = vadd.f32 %v1691_v6, %v1593_v39  ;;  %6849 = vmatmul.msk.f32.gmra.mxu3 %vm2149_vm4, %v2741_v1  ;;  %v1596_v39 = vadd.f32 %v8713_v27, %v10850_v35 }
 0x2c3   : > { %v2013_v8 = vpop.f32.mrf.mxu0  ;;  %v2297_v26 = vld [vmem:[#allocation2 + $0xe1] sm:$0xff] }
 0x2c4   : > { %2224 = vst.msk [vmem:[#allocation2 + $0xf1] sm:$0xff] %vm2149_vm4, %v2135_v12  ;;  %v1909_v37 = vadd.f32 %v1851_v5, %v1749_v36  ;;  %6800 = vmatmul.msk.f32.gmra.mxu1 %vm2149_vm4, %v2297_v26 }
 0x2c5   : > { %v1854_v23 = vpop.f32.mrf.mxu3 }
 0x2c6   : > { %v2068_v33 = vadd.f32 %v2010_v41, %v1909_v37  ;;  %6817 = vmatmul.msk.f32.gmra.mxu2 %vm2149_vm4, %v3021_v34  ;;  %6881 = vmatmul.msk.f32.gmra.mxu0 %vm2149_vm4, %v3023_v42  ;;  %v3024_v34 = vld [vmem:[#allocation2 + $0x50] sm:$0xff] }
 0x2c8   : > { %v2104_v31 = vadd.f32 %v8653_v30, %v2068_v33  ;;  %v3026_v33 = vld [vmem:[#allocation2 + $0x68] sm:$0xff] }
 0x2c9   : > { %v1694_v57 = vpop.f32.mrf.mxu2  ;;  %v8910_v56 = vpop.f32.mrf.mxu1 }
 0x2ca   : > { %v2136_v60 = vmax.f32 %v2104_v31, 0.0  ;;  %v1750_v32 = vadd.f32 %v1694_v57, %v1594_v18  ;;  %6850 = vmatmul.msk.f32.gmra.mxu3 %vm2149_vm4, %v2742_v49  ;;  %v1597_v18 = vadd.f32 %v8729_v48, %v10851_v43 }
 0x2cb   : > { %v2016_v59 = vpop.f32.mrf.mxu0  ;;  %v2298_v55 = vld [vmem:[#allocation2 + $0xf1] sm:$0xff] }
 0x2cc   : > { %2225 = vst.msk [vmem:[#allocation2 + $0xf9] sm:$0xff] %vm2149_vm4, %v2136_v60  ;;  %v1910_v13 = vadd.f32 %v1854_v23, %v1750_v32  ;;  %6801 = vmatmul.msk.f32.gmra.mxu1 %vm2149_vm4, %v2298_v55 }
 0x2cd   : > { %v1857_v19 = vpop.f32.mrf.mxu3 }
 0x2ce   : > { %v2069_v51 = vadd.f32 %v2013_v8, %v1910_v13  ;;  %6818 = vmatmul.msk.f32.gmra.mxu2 %vm2149_vm4, %v3022_v44  ;;  %6882 = vmatmul.msk.f32.gmra.mxu0 %vm2149_vm4, %v3024_v34  ;;  %v3335_v44 = vld [vmem:[#allocation7 + $0x108] sm:$0xff]  ;;  %v2744_v8 = vld [vmem:[#allocation2 + $0x52] sm:$0xff] }
 0x2cf   : > { %3452 = vmatpush.msrb.mxu1 %v3335_v44 }
 0x2d0   : > { %v2105_v16 = vadd.f32 %v8653_v30, %v2069_v51  ;;  %v3027_v51 = vld [vmem:[#allocation2 + $0x78] sm:$0xff] }
 0x2d1   : > { %v1697_v21 = vpop.f32.mrf.mxu2  ;;  %v8920_v58 = vpop.f32.mrf.mxu1 }
 0x2d2   : > { %v2137_v3 = vmax.f32 %v2105_v16, 0.0  ;;  %v1751_v25 = vadd.f32 %v1697_v21, %v1595_v20  ;;  %6851 = vmatmul.msk.f32.gmra.mxu3 %vm2149_vm4, %v2743_v7  ;;  %v1598_v20 = vadd.f32 %v8745_v24, %v10852_v11 }
 0x2d3   : > { %v2019_v41 = vpop.f32.mrf.mxu0  ;;  %v2299_v15 = vld [vmem:[#allocation2 + $0xf9] sm:$0xff] }
 0x2d4   : > { %2226 = vst.msk [vmem:[#allocation2 + $0x109] sm:$0xff] %vm2149_vm4, %v2137_v3  ;;  %v1911_v14 = vadd.f32 %v1857_v19, %v1751_v25  ;;  %6802 = vmatmul.msk.f32.gmra.mxu1 %vm2149_vm4, %v2299_v15 }
 0x2d5   : > { %v1860_v5 = vpop.f32.mrf.mxu3 }
 0x2d6   : > { %v2070_v47 = vadd.f32 %v2016_v59, %v1911_v14  ;;  %6819 = vmatmul.msk.f32.gmra.mxu2 %vm2149_vm4, %v3023_v42  ;;  %6883 = vmatmul.msk.f32.gmra.mxu0 %vm2149_vm4, %v3025_v29  ;;  %v2745_v59 = vld [vmem:[#allocation2 + $0x62] sm:$0xff] }
 0x2d8   : > { %v2106_v22 = vadd.f32 %v8653_v30, %v2070_v47 }
 0x2d9   : > { %v1700_v6 = vpop.f32.mrf.mxu2  ;;  %v8930_v12 = vpop.f32.mrf.mxu1 }
 0x2da   : > { %v2138_v36 = vmax.f32 %v2106_v22, 0.0  ;;  %v1752_v1 = vadd.f32 %v1700_v6, %v1596_v39  ;;  %6852 = vmatmul.msk.f32.gmra.mxu3 %vm2149_vm4, %v2744_v8 }
 0x2db   : > { %v2022_v26 = vpop.f32.mrf.mxu0  ;;  %v2300_v37 = vld [vmem:[#allocation2 + $0x109] sm:$0xff] }
 0x2dc   : > { %2227 = vst.msk [vmem:[#allocation2 + $0x111] sm:$0xff] %vm2149_vm4, %v2138_v36  ;;  %v1912_v42 = vadd.f32 %v1860_v5, %v1752_v1  ;;  %6803 = vmatmul.msk.f32.gmra.mxu1 %vm2149_vm4, %v2300_v37  ;;  %v1599_v5 = vadd.f32 %v8758_v50, %v8503_v45  ;;  %v2747_v1 = vld [vmem:[#allocation2 + $0x7a] sm:$0xff] }
 0x2dd   : > { %v1863_v27 = vpop.f32.mrf.mxu3 }
 0x2de   : > { %v2071_v23 = vadd.f32 %v2019_v41, %v1912_v42  ;;  %6820 = vmatmul.msk.f32.gmra.mxu2 %vm2149_vm4, %v3024_v34  ;;  %6884 = vmatmul.msk.f32.gmra.mxu0 %vm2149_vm4, %v3026_v33  ;;  %v2746_v41 = vld [vmem:[#allocation2 + $0x6a] sm:$0xff]  ;;  %v3334_v42 = vld [vmem:[#allocation7 + $0x100] sm:$0xff] }
 0x2df   : > { %3453 = vmatpush.msrb.mxu1 %v3334_v42  ;;  %v1603_v42 = vadd.f32 %v8822_v53, %v8582_v38 }
 0x2e0   : > { %v2107_v31 = vadd.f32 %v8653_v30, %v2071_v23  ;;  %v1600_v23 = vadd.f32 %v8772_v52, %v8514_v0  ;;  %v8979_v52 = vld [vmem:[#allocation5] ss:$0 sm:$0xff] }
 0x2e1   : > { %v1703_v57 = vpop.f32.mrf.mxu2  ;;  %v8940_v60 = vpop.f32.mrf.mxu1 }
 0x2e2   : > { %v2139_v32 = vmax.f32 %v2107_v31, 0.0  ;;  %v1753_v49 = vadd.f32 %v1703_v57, %v1597_v18  ;;  %6853 = vmatmul.msk.f32.gmra.mxu3 %vm2149_vm4, %v2745_v59 }
 0x2e3   : > { %v2025_v55 = vpop.f32.mrf.mxu0  ;;  %v2301_v13 = vld [vmem:[#allocation2 + $0x111] sm:$0xff] }
 0x2e4   : > { %2228 = vst.msk [vmem:[#allocation2 + $0x121] sm:$0xff] %vm2149_vm4, %v2139_v32  ;;  %v1913_v34 = vadd.f32 %v1863_v27, %v1753_v49  ;;  %6804 = vmatmul.msk.f32.gmra.mxu1 %vm2149_vm4, %v2301_v13  ;;  %v2748_v32 = vld [vmem:[#allocation2 + $0x82] sm:$0xff]  ;;  %v3030_v13 = vld [vmem:[#allocation2 + $0x98] sm:$0xff] }
 0x2e5   : > { %v1866_v48 = vpop.f32.mrf.mxu3 }
 0x2e6   : > { %v2072_v19 = vadd.f32 %v2022_v26, %v1913_v34  ;;  %6821 = vmatmul.msk.f32.gmra.mxu2 %vm2149_vm4, %v3025_v29  ;;  %6885 = vmatmul.msk.f32.gmra.mxu0 %vm2149_vm4, %v3027_v51  ;;  %v3028_v29 = vld [vmem:[#allocation2 + $0x80] sm:$0xff] }
 0x2e8   : > { %v2108_v16 = vadd.f32 %v8653_v30, %v2072_v19 }
 0x2e9   : > { %v1706_v21 = vpop.f32.mrf.mxu2  ;;  %v8950_v3 = vpop.f32.mrf.mxu1 }
 0x2ea   : > { %v2140_v25 = vmax.f32 %v2108_v16, 0.0  ;;  %v1754_v7 = vadd.f32 %v1706_v21, %v1598_v20  ;;  %6854 = vmatmul.msk.f32.gmra.mxu3 %vm2149_vm4, %v2746_v41  ;;  %v2749_v16 = vld [vmem:[#allocation2 + $0x92] sm:$0xff] }
 0x2eb   : > { %v2028_v15 = vpop.f32.mrf.mxu0  ;;  %v2302_v14 = vld [vmem:[#allocation2 + $0x121] sm:$0xff] }
 0x2ec   : > { %2229 = vst.msk [vmem:[#allocation2 + $0x129] sm:$0xff] %vm2149_vm4, %v2140_v25  ;;  %v1914_v44 = vadd.f32 %v1866_v48, %v1754_v7  ;;  %6805 = vmatmul.msk.f32.gmra.mxu1 %vm2149_vm4, %v2302_v14  ;;  %v1602_v14 = vadd.f32 %v8806_v17, %v8554_v4  ;;  %v4470_v4 = vld [vmem:[#allocation7 + $0x238] sm:$0xff] }
 0x2ed   : > { %v1869_v24 = vpop.f32.mrf.mxu3  ;;  %v8997_v17 = vld [vmem:[#allocation2 + $0xb0] sm:$0xff]  ;;  %4575 = vmatpush.msra.mxu1 %v4470_v4 }
 0x2ee   : > { %v2073_v47 = vadd.f32 %v2025_v55, %v1914_v44  ;;  %6822 = vmatmul.msk.f32.gmra.mxu2 %vm2149_vm4, %v3026_v33  ;;  %6886 = vmatmul.msk.f32.gmra.mxu0 %vm2149_vm4, %v3028_v29  ;;  %v3029_v33 = vld [vmem:[#allocation2 + $0x90] sm:$0xff] }
 0x2ef   : > { %v9056_v4 = vld [vmem:[#allocation2 + $0xca] sm:$0xff] }
 0x2f0   : > { %v2109_v35 = vadd.f32 %v8653_v30, %v2073_v47 }
 0x2f1   : > { %v1709_v39 = vpop.f32.mrf.mxu2  ;;  %v8960_v22 = vpop.f32.mrf.mxu1 }
 0x2f2   : > { %v2141_v6 = vmax.f32 %v2109_v35, 0.0  ;;  %v1755_v36 = vadd.f32 %v1709_v39, %v1599_v5  ;;  %6855 = vmatmul.msk.f32.gmra.mxu3 %vm2149_vm4, %v2747_v1  ;;  %v2750_v35 = vld [vmem:[#allocation2 + $0x9a] sm:$0xff]  ;;  %v3906_v1 = vld [vmem:[#allocation7 + $0x1b8] sm:$0xff] }
 0x2f3   : > { %v2031_v8 = vpop.f32.mrf.mxu0  ;;  %v2303_v26 = vld [vmem:[#allocation2 + $0x129] sm:$0xff]  ;;  %4011 = vmatpush.msra.mxu3 %v3906_v1 }
 0x2f4   : > { %2230 = vst.msk [vmem:[#allocation2 + $0x139] sm:$0xff] %vm2149_vm4, %v2141_v6  ;;  %v1915_v37 = vadd.f32 %v1869_v24, %v1755_v36  ;;  %6806 = vmatmul.msk.f32.gmra.mxu1 %vm2149_vm4, %v2303_v26 }
 0x2f5   : > { %v1872_v50 = vpop.f32.mrf.mxu3 }
 0x2f6   : > { %v2074_v45 = vadd.f32 %v2028_v15, %v1915_v37  ;;  %6823 = vmatmul.msk.f32.gmra.mxu2 %vm2149_vm4, %v3027_v51  ;;  %6887 = vmatmul.msk.f32.gmra.mxu0 %vm2149_vm4, %v3029_v33 }
 0x2f8   : > { %v2110_v27 = vadd.f32 %v8653_v30, %v2074_v45  ;;  %v1601_v30 = vadd.f32 %v8789_v54, %v8527_v9  ;;  %v3623_v9 = vld [vmem:[#allocation7 + $0x178] sm:$0xff] }
 0x2f9   : > { %v1712_v43 = vpop.f32.mrf.mxu2  ;;  %v8970_v18 = vpop.f32.mrf.mxu1  ;;  %v3031_v54 = vld [vmem:[#allocation2 + $0xa8] sm:$0xff]  ;;  %3728 = vmatpush.msra.mxu2 %v3623_v9 }
 0x2fa   : > { %v2142_v31 = vmax.f32 %v2110_v27, 0.0  ;;  %v1756_v57 = vadd.f32 %v1712_v43, %v1600_v23  ;;  %6856 = vmatmul.msk.f32.gmra.mxu3 %vm2149_vm4, %v2748_v32  ;;  %v2751_v43 = vld [vmem:[#allocation2 + $0xaa] sm:$0xff] }
 0x2fb   : > { %v2034_v49 = vpop.f32.mrf.mxu0  ;;  %v2304_v59 = vld [vmem:[#allocation2 + $0x139] sm:$0xff] }
 0x2fc   : > { %2231 = vst.msk [vmem:[#allocation2 + $0x141] sm:$0xff] %vm2149_vm4, %v2142_v31  ;;  %v1916_v55 = vadd.f32 %v1872_v50, %v1756_v57  ;;  %6807 = vmatmul.msk.f32.gmra.mxu1 %vm2149_vm4, %v2304_v59  ;;  %v1604_v59 = vadd.f32 %v8839_v28, %v8609_v63  ;;  %v9026_v63 = vld [vmem:[#allocation2 + $0xc8] sm:$0xff] }
 0x2fd   : > { %v1875_v0 = vpop.f32.mrf.mxu3 }
 0x2fe   : > { %v2075_v34 = vadd.f32 %v2031_v8, %v1916_v55  ;;  %6824 = vmatmul.msk.f32.gmra.mxu2 %vm2149_vm4, %v3028_v29  ;;  %6888 = vmatmul.msk.f32.gmra.mxu0 %vm2149_vm4, %v3030_v13  ;;  %v4188_v8 = vld [vmem:[#allocation7 + $0x1f8] sm:$0xff] }
 0x2ff   : > { %4293 = vmatpush.msra.mxu0 %v4188_v8 }
 0x300   : > { %v2111_v51 = vadd.f32 %v8979_v52, %v2075_v34 }
 0x301   : > { %v1715_v19 = vpop.f32.mrf.mxu2  ;;  %v8982_v48 = vpop.f32.mrf.mxu1 }
 0x302   : > { %v2143_v11 = vmax.f32 %v2111_v51, 0.0  ;;  %v1757_v20 = vadd.f32 %v1715_v19, %v1601_v30  ;;  %6857 = vmatmul.msk.f32.gmra.mxu3 %vm2149_vm4, %v2749_v16  ;;  %v2752_v51 = vld [vmem:[#allocation2 + $0xb2] sm:$0xff] }
 0x303   : > { %v2037_v21 = vpop.f32.mrf.mxu0  ;;  %v2305_v25 = vld [vmem:[#allocation2 + $0x141] sm:$0xff] }
 0x304   : > { %2232 = vst.msk [vmem:[#allocation2 + $0x151] sm:$0xff] %vm2149_vm4, %v2143_v11  ;;  %v1917_v7 = vadd.f32 %v1875_v0, %v1757_v20  ;;  %6808 = vmatmul.msk.f32.gmra.mxu1 %vm2149_vm4, %v2305_v25  ;;  %v1605_v25 = vadd.f32 %v8855_v61, %v8636_v46  ;;  %v3905_v46 = vld [vmem:[#allocation7 + $0x1b0] sm:$0xff]  ;;  %v9046_v61 = vld [vmem:[#allocation2 + $0xd8] sm:$0xff] }
 0x305   : > { %v1878_v15 = vpop.f32.mrf.mxu3  ;;  %4012 = vmatpush.msra.mxu3 %v3905_v46 }
 0x306   : > { %v2076_v41 = vadd.f32 %v2034_v49, %v1917_v7  ;;  %6825 = vmatmul.msk.f32.gmra.mxu2 %vm2149_vm4, %v3029_v33  ;;  %6889 = vmatmul.msk.f32.gmra.mxu0 %vm2149_vm4, %v3031_v54  ;;  %v9010_v49 = vld [vmem:[#allocation2 + $0xc0] sm:$0xff] }
 0x308   : > { %v2112_v44 = vadd.f32 %v8979_v52, %v2076_v41 }
 0x309   : > { %v1718_v29 = vpop.f32.mrf.mxu2  ;;  %v8992_v47 = vpop.f32.mrf.mxu1 }
 0x30a   : > { %v2144_v24 = vmax.f32 %v2112_v44, 0.0  ;;  %v1758_v5 = vadd.f32 %v1718_v29, %v1602_v14  ;;  %6858 = vmatmul.msk.f32.gmra.mxu3 %vm2149_vm4, %v2750_v35  ;;  %v9037_v14 = vld [vmem:[#allocation2 + $0xc2] sm:$0xff] }
 0x30b   : > { %v2040_v39 = vpop.f32.mrf.mxu0  ;;  %v2306_v6 = vld [vmem:[#allocation2 + $0x151] sm:$0xff] }
 0x30c   : > { %2233 = vst.msk [vmem:[#allocation2 + $0x159] sm:$0xff] %vm2149_vm4, %v2144_v24  ;;  %v1918_v36 = vadd.f32 %v1878_v15, %v1758_v5  ;;  %6809 = vmatmul.msk.f32.gmra.mxu1 %vm2149_vm4, %v2306_v6 }
 0x30d   : > { %v1881_v37 = vpop.f32.mrf.mxu3 }
 0x30e   : > { %v2077_v26 = vadd.f32 %v2037_v21, %v1918_v36  ;;  %6826 = vmatmul.msk.f32.gmra.mxu2 %vm2149_vm4, %v3030_v13  ;;  %6890 = vmatmul.msk.f32.gmra.mxu0 %vm2149_vm4, %v8997_v17  ;;  %v3622_v21 = vld [vmem:[#allocation7 + $0x170] sm:$0xff] }
 0x30f   : > { %3729 = vmatpush.msra.mxu2 %v3622_v21 }
 0x310   : > { %v2113_v33 = vadd.f32 %v8979_v52, %v2077_v26 }
 0x311   : > { %v1721_v45 = vpop.f32.mrf.mxu2  ;;  %v9005_v50 = vpop.f32.mrf.mxu1 }
 0x312   : > { %v2145_v23 = vmax.f32 %v2113_v33, 0.0  ;;  %v1759_v27 = vadd.f32 %v1721_v45, %v1603_v42  ;;  %6859 = vmatmul.msk.f32.gmra.mxu3 %vm2149_vm4, %v2751_v43  ;;  %v4187_v33 = vld [vmem:[#allocation7 + $0x1f0] sm:$0xff] }
 0x313   : > { %v2043_v31 = vpop.f32.mrf.mxu0  ;;  %v2307_v57 = vld [vmem:[#allocation2 + $0x159] sm:$0xff]  ;;  %4294 = vmatpush.msra.mxu0 %v4187_v33 }
 0x314   : > { %2234 = vst.msk [vmem:[#allocation2 + $0x169] sm:$0xff] %vm2149_vm4, %v2145_v23  ;;  %v1919_v32 = vadd.f32 %v1881_v37, %v1759_v27  ;;  %6810 = vmatmul.msk.f32.gmra.mxu1 %vm2149_vm4, %v2307_v57  ;;  %v3301_v37 = vld [vmem:[#allocation2 + $0x19] sm:$0xff] }
 0x315   : > { %v1884_v53 = vpop.f32.mrf.mxu3  ;;  %v9062_v45 = vld [vmem:[#allocation2 + $0xe0] sm:$0xff] }
 0x316   : > { %v2078_v38 = vadd.f32 %v2040_v39, %v1919_v32  ;;  %6827 = vmatmul.msk.f32.gmra.mxu2 %vm2149_vm4, %v3031_v54  ;;  %6891 = vmatmul.msk.f32.gmra.mxu0 %vm2149_vm4, %v9010_v49  ;;  %v9073_v57 = vld [vmem:[#allocation2 + $0xda] sm:$0xff] }
 0x318   : > { %v2114_v55 = vadd.f32 %v8979_v52, %v2078_v38  ;;  %v3302_v38 = vld [vmem:[#allocation2 + $0x21] sm:$0xff] }
 0x319   : > { %v1724_v13 = vpop.f32.mrf.mxu2  ;;  %v9018_v34 = vpop.f32.mrf.mxu1 }
 0x31a   : > { %v2146_v0 = vmax.f32 %v2114_v55, 0.0  ;;  %v1760_v30 = vadd.f32 %v1724_v13, %v1604_v59  ;;  %6860 = vmatmul.msk.f32.gmra.mxu3 %vm2149_vm4, %v2752_v51  ;;  %v9078_v59 = vld [vmem:[#allocation2 + $0xf0] sm:$0xff]  ;;  %v2756_v51 = vld [vmem:[#allocation2 + $0xe2] sm:$0xff] }
 0x31b   : > { %v2046_v19 = vpop.f32.mrf.mxu0  ;;  %v9020_v11 = vld [vmem:[#allocation2 + $0x169] sm:$0xff] }
 0x31c   : > { %2235 = vst.msk [vmem:[#allocation2 + $0x171] sm:$0xff] %vm2149_vm4, %v2146_v0  ;;  %v1920_v20 = vadd.f32 %v1884_v53, %v1760_v30  ;;  %6811 = vmatmul.msk.f32.gmra.mxu1 %vm2149_vm4, %v9020_v11 }
 0x31d   : > { %v1887_v16 = vpop.f32.mrf.mxu3 }
 0x31e   : > { %v2079_v28 = vadd.f32 %v2043_v31, %v1920_v20  ;;  %6828 = vmatmul.msk.f32.gmra.mxu2 %vm2149_vm4, %v8997_v17  ;;  %6892 = vmatmul.msk.f32.gmra.mxu0 %vm2149_vm4, %v9026_v63  ;;  %v9090_v20 = vld [vmem:[#allocation2 + $0x31] sm:$0xff] }
 0x320   : > { %v2115_v7 = vadd.f32 %v8979_v52, %v2079_v28 }
 0x321   : > { %v1727_v9 = vpop.f32.mrf.mxu2  ;;  %v9035_v54 = vpop.f32.mrf.mxu1 }
 0x322   : > { %v2147_v41 = vmax.f32 %v2115_v7, 0.0  ;;  %v1761_v15 = vadd.f32 %v1727_v9, %v1605_v25  ;;  %6861 = vmatmul.msk.f32.gmra.mxu3 %vm2149_vm4, %v9037_v14 }
 0x323   : > { %v3173_v44 = vpop.f32.mrf.mxu0  ;;  %v9039_v29 = vld [vmem:[#allocation2 + $0x171] sm:$0xff] }
 0x324   : > { %2236 = vst.msk [vmem:[#allocation2 + $0x181] sm:$0xff] %vm2149_vm4, %v2147_v41  ;;  %v1921_v24 = vadd.f32 %v1887_v16, %v1761_v15  ;;  %6812 = vmatmul.msk.f32.gmra.mxu1 %vm2149_vm4, %v9039_v29  ;;  %v9094_v16 = vld [vmem:[#allocation2 + $0xf8] sm:$0xff] }
 0x325   : > { %v2891_v35 = vpop.f32.mrf.mxu3  ;;  %v9105_v15 = vld [vmem:[#allocation2 + $0xf2] sm:$0xff] }
 0x326   : > { %v2080_v5 = vadd.f32 %v2046_v19, %v1921_v24  ;;  %6829 = vmatmul.msk.f32.gmra.mxu2 %vm2149_vm4, %v9010_v49  ;;  %6893 = vmatmul.msk.f32.gmra.mxu0 %vm2149_vm4, %v9046_v61  ;;  %v9109_v24 = vld [vmem:[#allocation2 + $0x39] sm:$0xff] }
 0x328   : > { %v2116_v39 = vadd.f32 %v8979_v52, %v2080_v5  ;;  %v4469_v52 = vld [vmem:[#allocation7 + $0x230] sm:$0xff]  ;;  %v3904_v5 = vld [vmem:[#allocation7 + $0x1a8] sm:$0xff] }
 0x329   : > { %v9053_v6 = vpop.f32.mrf.mxu1  ;;  %v2641_v36 = vpop.f32.mrf.mxu2  ;;  %4576 = vmatpush.msra.mxu1 %v4469_v52  ;;  %4013 = vmatpush.msra.mxu3 %v3904_v5  ;;  %v4186_v52 = vld [vmem:[#allocation7 + $0x1e8] sm:$0xff] }
 0x32a   : > { %v2148_v1 = vmax.f32 %v2116_v39, 0.0  ;;  %v2642_v8 = vadd.f32 %v2641_v36, %v8865_v2  ;;  %6862 = vmatmul.msk.f32.gmra.mxu3 %vm2149_vm4, %v9056_v4  ;;  %4295 = vmatpush.msra.mxu0 %v4186_v52 }
 0x32b   : > { %v3176_v26 = vpop.f32.mrf.mxu0 }
 0x32c   : > { %2237 = vst.msk [vmem:[#allocation2 + $0x189] sm:$0xff] %vm2149_vm4, %v2148_v1  ;;  %v2987_v42 = vadd.f32 %v2891_v35, %v2642_v8  ;;  %6909 = vmatmul.msk.f32.vlgmr.msrb.gmra.mxu1 %vm2149_vm4, %v3301_v37  ;;  %v9113_v35 = vld [vmem:[#allocation2 + $0x108] sm:$0xff] }
 0x32d   : > { %v2894_v2 = vpop.f32.mrf.mxu3 }
 0x32e   : > { %6830 = vmatmul.msk.f32.gmra.mxu2 %vm2149_vm4, %v9026_v63  ;;  %6894 = vmatmul.msk.f32.gmra.mxu0 %vm2149_vm4, %v9062_v45  ;;  %v9068_v23 = vadd.f32 %v3173_v44, %v2987_v42  ;;  %v9128_v42 = vld [vmem:[#allocation2 + $0x49] sm:$0xff] }
 0x331   : > { %v9070_v27 = vpop.f32.mrf.mxu1  ;;  %v2644_v43 = vpop.f32.mrf.mxu2 }
 0x332   : > { %v2645_v31 = vadd.f32 %v2644_v43, %v8877_v62  ;;  %6863 = vmatmul.msk.f32.gmra.mxu3 %vm2149_vm4, %v9073_v57  ;;  %v9132_v43 = vld [vmem:[#allocation2 + $0x110] sm:$0xff] }
 0x333   : > { %v3179_v32 = vpop.f32.mrf.mxu0 }
 0x334   : > { %v2988_v53 = vadd.f32 %v2894_v2, %v2645_v31  ;;  %6910 = vmatmul.msk.f32.gmra.mxu1 %vm2149_vm4, %v3302_v38  ;;  %v4468_v2 = vld [vmem:[#allocation7 + $0x228] sm:$0xff] }
 0x335   : > { %v2897_v55 = vpop.f32.mrf.mxu3  ;;  %4577 = vmatpush.msra.mxu1 %v4468_v2  ;;  %v9178_v2 = vld [vmem:[#allocation2 + $0x122] sm:$0xff] }
 0x336   : > { %6831 = vmatmul.msk.f32.gmra.mxu2 %vm2149_vm4, %v9046_v61  ;;  %6895 = vmatmul.msk.f32.gmra.mxu0 %vm2149_vm4, %v9078_v59  ;;  %v9084_v62 = vadd.f32 %v3176_v26, %v2988_v53  ;;  %v9124_v26 = vld [vmem:[#allocation2 + $0xfa] sm:$0xff]  ;;  %10860 = vst [vmem:[#allocation17_spill] sm:$0xff] %v9178_v2 }
 0x339   : > { %v9086_v13 = vpop.f32.mrf.mxu1  ;;  %v2647_v0 = vpop.f32.mrf.mxu2 }
 0x33a   : > { %v2648_v30 = vadd.f32 %v2647_v0, %v8890_v40  ;;  %6864 = vmatmul.msk.f32.gmra.mxu3 %vm2149_vm4, %v2756_v51  ;;  %v3621_v40 = vld [vmem:[#allocation7 + $0x168] sm:$0xff] }
 0x33b   : > { %v3182_v19 = vpop.f32.mrf.mxu0  ;;  %3730 = vmatpush.msra.mxu2 %v3621_v40 }
 0x33c   : > { %v2989_v28 = vadd.f32 %v2897_v55, %v2648_v30  ;;  %6911 = vmatmul.msk.f32.gmra.mxu1 %vm2149_vm4, %v9090_v20  ;;  %v9143_v55 = vld [vmem:[#allocation2 + $0x10a] sm:$0xff] }
 0x33d   : > { %v2900_v21 = vpop.f32.mrf.mxu3  ;;  %10855 = vst [vmem:[#allocation43_spill] sm:$0xff] %v9143_v55  ;;  %v9147_v30 = vld [vmem:[#allocation2 + $0x51] sm:$0xff] }
 0x33e   : > { %6832 = vmatmul.msk.f32.gmra.mxu2 %vm2149_vm4, %v9062_v45  ;;  %6896 = vmatmul.msk.f32.gmra.mxu0 %vm2149_vm4, %v9094_v16  ;;  %v9100_v25 = vadd.f32 %v3179_v32, %v2989_v28 }
 0x341   : > { %v9102_v7 = vpop.f32.mrf.mxu1  ;;  %v2650_v9 = vpop.f32.mrf.mxu2 }
 0x342   : > { %v2651_v41 = vadd.f32 %v2650_v9, %v8900_v10  ;;  %6865 = vmatmul.msk.f32.gmra.mxu3 %vm2149_vm4, %v9105_v15 }
 0x343   : > { %v3185_v44 = vpop.f32.mrf.mxu0 }
 0x344   : > { %v2990_v46 = vadd.f32 %v2900_v21, %v2651_v41  ;;  %6912 = vmatmul.msk.f32.gmra.mxu1 %vm2149_vm4, %v9109_v24  ;;  %v2760_v41 = vld [vmem:[#allocation2 + $0x112] sm:$0xff] }
 0x345   : > { %v2903_v10 = vpop.f32.mrf.mxu3 }
 0x346   : > { %6833 = vmatmul.msk.f32.gmra.mxu2 %vm2149_vm4, %v9078_v59  ;;  %6897 = vmatmul.msk.f32.gmra.mxu0 %vm2149_vm4, %v9113_v35  ;;  %v9119_v39 = vadd.f32 %v3182_v19, %v2990_v46  ;;  %v9151_v19 = vld [vmem:[#allocation2 + $0x120] sm:$0xff] }
 0x347   : > { %10856 = vst [vmem:[#allocation44_spill] sm:$0xff] %v9151_v19  ;;  %v9163_v46 = vld [vmem:[#allocation2 + $0x61] sm:$0xff] }
 0x348   : > { %10853 = vst [vmem:[#allocation40_spill] sm:$0xff] %v9119_v39  ;;  %v9387_v39 = vld [vmem:[#allocation2 + $0x4a] sm:$0xff] }
 0x349   : > { %v9121_v36 = vpop.f32.mrf.mxu1  ;;  %v2653_v1 = vpop.f32.mrf.mxu2 }
 0x34a   : > { %v2654_v8 = vadd.f32 %v2653_v1, %v8910_v56  ;;  %6866 = vmatmul.msk.f32.gmra.mxu3 %vm2149_vm4, %v9124_v26 }
 0x34b   : > { %v3188_v37 = vpop.f32.mrf.mxu0 }
 0x34c   : > { %v2991_v33 = vadd.f32 %v2903_v10, %v2654_v8  ;;  %6913 = vmatmul.msk.f32.gmra.mxu1 %vm2149_vm4, %v9128_v42  ;;  %v9167_v10 = vld [vmem:[#allocation2 + $0x128] sm:$0xff] }
 0x34d   : > { %v2906_v56 = vpop.f32.mrf.mxu3  ;;  %10858 = vst [vmem:[#allocation49_spill] sm:$0xff] %v9167_v10 }
 0x34e   : > { %6834 = vmatmul.msk.f32.gmra.mxu2 %vm2149_vm4, %v9094_v16  ;;  %6898 = vmatmul.msk.f32.gmra.mxu0 %vm2149_vm4, %v9132_v43  ;;  %v9138_v31 = vadd.f32 %v3185_v44, %v2991_v33 }
 0x350   : > { %10854 = vst [vmem:[#allocation42_spill] sm:$0xff] %v9138_v31  ;;  %v4183_v31 = vld [vmem:[#allocation7 + $0x1d0] sm:$0xff] }
 0x351   : > { %v9140_v32 = vpop.f32.mrf.mxu1  ;;  %v2656_v38 = vpop.f32.mrf.mxu2 }
 0x352   : > { %v2657_v53 = vadd.f32 %v2656_v38, %v8920_v58  ;;  %6867 = vmatmul.msk.f32.gmra.mxu3 %vm2149_vm4, %v9143_v55  ;;  %v9182_v38 = vld [vmem:[#allocation2 + $0x69] sm:$0xff] }
 0x353   : > { %v3191_v0 = vpop.f32.mrf.mxu0 }
 0x354   : > { %v2992_v51 = vadd.f32 %v2906_v56, %v2657_v53  ;;  %6914 = vmatmul.msk.f32.gmra.mxu1 %vm2149_vm4, %v9147_v30 }
 0x355   : > { %v2909_v58 = vpop.f32.mrf.mxu3 }
 0x356   : > { %6835 = vmatmul.msk.f32.gmra.mxu2 %vm2149_vm4, %v9113_v35  ;;  %6899 = vmatmul.msk.f32.gmra.mxu0 %vm2149_vm4, %v9151_v19  ;;  %v9157_v28 = vadd.f32 %v3188_v37, %v2992_v51  ;;  %v9186_v51 = vld [vmem:[#allocation2 + $0x138] sm:$0xff] }
 0x357   : > { %10861 = vst [vmem:[#allocation51_spill] sm:$0xff] %v9186_v51 }
 0x358   : > { %10857 = vst [vmem:[#allocation47_spill] sm:$0xff] %v9157_v28  ;;  %v9240_v28 = vld [vmem:[#allocation2 + $0x158] sm:$0xff] }
 0x359   : > { %v9159_v21 = vpop.f32.mrf.mxu1  ;;  %v2659_v40 = vpop.f32.mrf.mxu2  ;;  %10869 = vst [vmem:[#allocation55_spill] sm:$0xff] %v9240_v28 }
 0x35a   : > { %v2660_v9 = vadd.f32 %v2659_v40, %v8930_v12  ;;  %6868 = vmatmul.msk.f32.gmra.mxu3 %vm2149_vm4, %v2760_v41  ;;  %v3620_v12 = vld [vmem:[#allocation7 + $0x160] sm:$0xff] }
 0x35b   : > { %v3194_v44 = vpop.f32.mrf.mxu0  ;;  %3731 = vmatpush.msra.mxu2 %v3620_v12  ;;  %v9201_v12 = vld [vmem:[#allocation2 + $0x79] sm:$0xff] }
 0x35c   : > { %v2993_v5 = vadd.f32 %v2909_v58, %v2660_v9  ;;  %6915 = vmatmul.msk.f32.gmra.mxu1 %vm2149_vm4, %v9163_v46 }
 0x35d   : > { %v2912_v1 = vpop.f32.mrf.mxu3 }
 0x35e   : > { %6836 = vmatmul.msk.f32.gmra.mxu2 %vm2149_vm4, %v9132_v43  ;;  %6900 = vmatmul.msk.f32.gmra.mxu0 %vm2149_vm4, %v9167_v10  ;;  %v9173_v8 = vadd.f32 %v3191_v0, %v2993_v5  ;;  %v3903_v0 = vld [vmem:[#allocation7 + $0x1a0] sm:$0xff]  ;;  %v9197_v5 = vld [vmem:[#allocation2 + $0x12a] sm:$0xff] }
 0x35f   : > { %4014 = vmatpush.msra.mxu3 %v3903_v0  ;;  %10863 = vst [vmem:[#allocation54_spill] sm:$0xff] %v9197_v5 }
 0x360   : > { %10859 = vst [vmem:[#allocation50_spill] sm:$0xff] %v9173_v8  ;;  %v9224_v8 = vld [vmem:[#allocation2 + $0x150] sm:$0xff] }
 0x361   : > { %v9175_v37 = vpop.f32.mrf.mxu1  ;;  %v2662_v33 = vpop.f32.mrf.mxu2  ;;  %10867 = vst [vmem:[#allocation27_spill] sm:$0xff] %v9224_v8 }
 0x362   : > { %v2663_v52 = vadd.f32 %v2662_v33, %v8940_v60  ;;  %6869 = vmatmul.msk.f32.gmra.mxu3 %vm2149_vm4, %v9178_v2 }
 0x363   : > { %v3197_v56 = vpop.f32.mrf.mxu0 }
 0x364   : > { %v2994_v53 = vadd.f32 %v2912_v1, %v2663_v52  ;;  %6916 = vmatmul.msk.f32.gmra.mxu1 %vm2149_vm4, %v9182_v38  ;;  %v4185_v52 = vld [vmem:[#allocation7 + $0x1e0] sm:$0xff] }
 0x365   : > { %v2915_v60 = vpop.f32.mrf.mxu3  ;;  %4296 = vmatpush.msra.mxu0 %v4185_v52  ;;  %v9220_v52 = vld [vmem:[#allocation2 + $0x81] sm:$0xff] }
 0x366   : > { %6837 = vmatmul.msk.f32.gmra.mxu2 %vm2149_vm4, %v9151_v19  ;;  %6901 = vmatmul.msk.f32.gmra.mxu0 %vm2149_vm4, %v9186_v51  ;;  %v9192_v58 = vadd.f32 %v3194_v44, %v2994_v53  ;;  %v4467_v44 = vld [vmem:[#allocation7 + $0x220] sm:$0xff]  ;;  %v9205_v53 = vld [vmem:[#allocation2 + $0x140] sm:$0xff] }
 0x367   : > { %10864 = vst [vmem:[#allocation52_spill] sm:$0xff] %v9205_v53  ;;  %4578 = vmatpush.msra.mxu1 %v4467_v44  ;;  %v9255_v19 = vld [vmem:[#allocation2 + $0x99] sm:$0xff] }
 0x368   : > { %10862 = vst [vmem:[#allocation20_spill] sm:$0xff] %v9192_v58  ;;  %v9216_v58 = vld [vmem:[#allocation2 + $0x13a] sm:$0xff] }
 0x369   : > { %v9194_v40 = vpop.f32.mrf.mxu1  ;;  %v2665_v9 = vpop.f32.mrf.mxu2  ;;  %10866 = vst [vmem:[#allocation53_spill] sm:$0xff] %v9216_v58 }
 0x36a   : > { %v2666_v41 = vadd.f32 %v2665_v9, %v8950_v3  ;;  %6870 = vmatmul.msk.f32.gmra.mxu3 %vm2149_vm4, %v9197_v5 }
 0x36b   : > { %v3200_v1 = vpop.f32.mrf.mxu0 }
 0x36c   : > { %v2995_v33 = vadd.f32 %v2915_v60, %v2666_v41  ;;  %6917 = vmatmul.msk.f32.gmra.mxu1 %vm2149_vm4, %v9201_v12 }
 0x36d   : > { %v2918_v3 = vpop.f32.mrf.mxu3 }
 0x36e   : > { %6838 = vmatmul.msk.f32.gmra.mxu2 %vm2149_vm4, %v9167_v10  ;;  %6902 = vmatmul.msk.f32.gmra.mxu0 %vm2149_vm4, %v9205_v53  ;;  %v9211_v0 = vadd.f32 %v3197_v56, %v2995_v33  ;;  %v3900_v10 = vld [vmem:[#allocation7 + $0x188] sm:$0xff] }
 0x370   : > { %10865 = vst [vmem:[#allocation24_spill] sm:$0xff] %v9211_v0 }
 0x371   : > { %v9213_v9 = vpop.f32.mrf.mxu1  ;;  %v2668_v60 = vpop.f32.mrf.mxu2 }
 0x372   : > { %v2669_v41 = vadd.f32 %v2668_v60, %v8960_v22  ;;  %6871 = vmatmul.msk.f32.gmra.mxu3 %vm2149_vm4, %v9216_v58  ;;  %v9236_v58 = vld [vmem:[#allocation2 + $0x91] sm:$0xff] }
 0x373   : > { %v3203_v5 = vpop.f32.mrf.mxu0 }
 0x374   : > { %v2996_v44 = vadd.f32 %v2918_v3, %v2669_v41  ;;  %6918 = vmatmul.msk.f32.gmra.mxu1 %vm2149_vm4, %v9220_v52  ;;  %v2764_v3 = vld [vmem:[#allocation2 + $0x142] sm:$0xff] }
 0x375   : > { %v2921_v22 = vpop.f32.mrf.mxu3 }
 0x376   : > { %6839 = vmatmul.msk.f32.gmra.mxu2 %vm2149_vm4, %v9186_v51  ;;  %6903 = vmatmul.msk.f32.gmra.mxu0 %vm2149_vm4, %v9224_v8  ;;  %v9230_v56 = vadd.f32 %v3200_v1, %v2996_v44  ;;  %v3902_v51 = vld [vmem:[#allocation7 + $0x198] sm:$0xff]  ;;  %v3901_v44 = vld [vmem:[#allocation7 + $0x190] sm:$0xff] }
 0x377   : > { %4015 = vmatpush.msra.mxu3 %v3902_v51  ;;  %v3619_v1 = vld [vmem:[#allocation7 + $0x158] sm:$0xff] }
 0x378   : > { %10868 = vst [vmem:[#allocation57_spill] sm:$0xff] %v9230_v56  ;;  %3732 = vmatpush.msra.mxu2 %v3619_v1  ;;  %v9250_v56 = vld [vmem:[#allocation2 + $0x152] sm:$0xff] }
 0x379   : > { %v9232_v33 = vpop.f32.mrf.mxu1  ;;  %v2671_v60 = vpop.f32.mrf.mxu2  ;;  %4016 = vmatpush.msra.mxu3 %v3901_v44  ;;  %10871 = vst [vmem:[#allocation56_spill] sm:$0xff] %v9250_v56  ;;  %v3899_v1 = vld [vmem:[#allocation7 + $0x180] sm:$0xff]  ;;  %v4182_v44 = vld [vmem:[#allocation7 + $0x1c8] sm:$0xff] }
 0x37a   : > { %v2672_v0 = vadd.f32 %v2671_v60, %v8970_v18  ;;  %6872 = vmatmul.msk.f32.gmra.mxu3 %vm2149_vm4, %v2764_v3  ;;  %v4184_v60 = vld [vmem:[#allocation7 + $0x1d8] sm:$0xff] }
 0x37b   : > { %v3206_v41 = vpop.f32.mrf.mxu0  ;;  %4297 = vmatpush.msra.mxu0 %v4184_v60  ;;  %4017 = vmatpush.msra.mxu3 %v3900_v10  ;;  %v9259_v60 = vld [vmem:[#allocation2 + $0x168] sm:$0xff] }
 0x37c   : > { %v2997_v2 = vadd.f32 %v2921_v22, %v2672_v0  ;;  %6919 = vmatmul.msk.f32.gmra.mxu1 %vm2149_vm4, %v9236_v58  ;;  %10872 = vst [vmem:[#allocation34_spill] sm:$0xff] %v9259_v60 }
 0x37d   : > { %v2924_v18 = vpop.f32.mrf.mxu3  ;;  %4298 = vmatpush.msra.mxu0 %v4183_v31  ;;  %4018 = vmatpush.msra.mxu3 %v3899_v1 }
 0x37e   : > { %6840 = vmatmul.msk.f32.gmra.mxu2 %vm2149_vm4, %v9205_v53  ;;  %6904 = vmatmul.msk.f32.gmra.mxu0 %vm2149_vm4, %v9240_v28  ;;  %v9246_v3 = vadd.f32 %v3203_v5, %v2997_v2  ;;  %v3618_v53 = vld [vmem:[#allocation7 + $0x150] sm:$0xff]  ;;  %v3617_v5 = vld [vmem:[#allocation7 + $0x148] sm:$0xff] }
 0x37f   : > { %3733 = vmatpush.msra.mxu2 %v3618_v53  ;;  %4299 = vmatpush.msra.mxu0 %v4182_v44 }
 0x380   : > { %10870 = vst [vmem:[#allocation31_spill] sm:$0xff] %v9246_v3 }
 0x381   : > { %v9248_v0 = vpop.f32.mrf.mxu1  ;;  %v2674_v22 = vpop.f32.mrf.mxu2  ;;  %3734 = vmatpush.msra.mxu2 %v3617_v5  ;;  %v9270_v5 = vld [vmem:[#allocation2 + $0x15a] sm:$0xff] }
 0x382   : > { %v2675_v51 = vadd.f32 %v2674_v22, %v8982_v48  ;;  %6873 = vmatmul.msk.f32.gmra.mxu3 %vm2149_vm4, %v9250_v56  ;;  %v3616_v48 = vld [vmem:[#allocation7 + $0x140] sm:$0xff]  ;;  %10874 = vst [vmem:[#allocation58_spill] sm:$0xff] %v9270_v5  ;;  %v9274_v56 = vld [vmem:[#allocation2 + $0xa9] sm:$0xff] }
 0x383   : > { %v3209_v55 = vpop.f32.mrf.mxu0  ;;  %3735 = vmatpush.msra.mxu2 %v3616_v48 }
 0x384   : > { %v2998_v2 = vadd.f32 %v2924_v18, %v2675_v51  ;;  %6920 = vmatmul.msk.f32.gmra.mxu1 %vm2149_vm4, %v9255_v19  ;;  %v4181_v18 = vld [vmem:[#allocation7 + $0x1c0] sm:$0xff] }
 0x385   : > { %v2927_v53 = vpop.f32.mrf.mxu3  ;;  %4300 = vmatpush.msra.mxu0 %v4181_v18  ;;  %v9289_v18 = vld [vmem:[#allocation2 + $0x16a] sm:$0xff] }
 0x386   : > { %6841 = vmatmul.msk.f32.gmra.mxu2 %vm2149_vm4, %v9224_v8  ;;  %6905 = vmatmul.msk.f32.gmra.mxu0 %vm2149_vm4, %v9259_v60  ;;  %v9265_v22 = vadd.f32 %v3206_v41, %v2998_v2  ;;  %v4466_v41 = vld [vmem:[#allocation7 + $0x218] sm:$0xff]  ;;  %10877 = vst [vmem:[#allocation59_spill] sm:$0xff] %v9289_v18 }
 0x387   : > { %v9278_v2 = vld [vmem:[#allocation2 + $0x170] sm:$0xff]  ;;  %4579 = vmatpush.msra.mxu1 %v4466_v41 }
 0x388   : > { %10873 = vst [vmem:[#allocation60_spill] sm:$0xff] %v9265_v22  ;;  %v9297_v22 = vld [vmem:[#allocation2 + $0x180] sm:$0xff] }
 0x389   : > { %v9267_v10 = vpop.f32.mrf.mxu1  ;;  %v2677_v51 = vpop.f32.mrf.mxu2  ;;  %10875 = vst [vmem:[#allocation38_spill] sm:$0xff] %v9278_v2 }
 0x38a   : > { %v2678_v31 = vadd.f32 %v2677_v51, %v8992_v47  ;;  %6874 = vmatmul.msk.f32.gmra.mxu3 %vm2149_vm4, %v9270_v5  ;;  %10878 = vst [vmem:[#allocation41_spill] sm:$0xff] %v9297_v22 }
 0x38b   : > { %v3212_v3 = vpop.f32.mrf.mxu0 }
 0x38c   : > { %v2999_v8 = vadd.f32 %v2927_v53, %v2678_v31  ;;  %6921 = vmatmul.msk.f32.gmra.mxu1 %vm2149_vm4, %v9274_v56  ;;  %v9293_v31 = vld [vmem:[#allocation2 + $0xb1] sm:$0xff] }
 0x38d   : > { %v2930_v47 = vpop.f32.mrf.mxu3 }
 0x38e   : > { %6842 = vmatmul.msk.f32.gmra.mxu2 %vm2149_vm4, %v9240_v28  ;;  %6906 = vmatmul.msk.f32.gmra.mxu0 %vm2149_vm4, %v9278_v2  ;;  %v9284_v1 = vadd.f32 %v3209_v55, %v2999_v8  ;;  %v9371_v28 = vld [vmem:[#allocation2 + $0x3a] sm:$0xff] }
 0x390   : > { %10876 = vst [vmem:[#allocation62_spill] sm:$0xff] %v9284_v1 }
 0x391   : > { %v9286_v44 = vpop.f32.mrf.mxu1  ;;  %v2680_v48 = vpop.f32.mrf.mxu2 }
 0x392   : > { %v2681_v53 = vadd.f32 %v2680_v48, %v9005_v50  ;;  %6875 = vmatmul.msk.f32.gmra.mxu3 %vm2149_vm4, %v9289_v18  ;;  %v9309_v18 = vld [vmem:[#allocation2 + $0xc1] sm:$0xff] }
 0x393   : > { %v3215_v51 = vpop.f32.mrf.mxu0 }
 0x394   : > { %v3000_v41 = vadd.f32 %v2930_v47, %v2681_v53  ;;  %6922 = vmatmul.msk.f32.gmra.mxu1 %vm2149_vm4, %v9293_v31  ;;  %v2768_v47 = vld [vmem:[#allocation2 + $0x172] sm:$0xff] }
 0x395   : > { %v2933_v50 = vpop.f32.mrf.mxu3 }
 0x396   : > { %6843 = vmatmul.msk.f32.gmra.mxu2 %vm2149_vm4, %v9259_v60  ;;  %6907 = vmatmul.msk.f32.gmra.mxu0 %vm2149_vm4, %v9297_v22  ;;  %v9303_v55 = vadd.f32 %v3212_v3, %v3000_v41  ;;  %v9313_v60 = vld [vmem:[#allocation2 + $0x188] sm:$0xff] }
 0x397   : > { %10880 = vst [vmem:[#allocation61_spill] sm:$0xff] %v9313_v60 }
 0x398   : > { %10879 = vst [vmem:[#allocation64_spill] sm:$0xff] %v9303_v55  ;;  %v9324_v55 = vld [vmem:[#allocation2 + $0xc9] sm:$0xff] }
 0x399   : > { %v9305_v8 = vpop.f32.mrf.mxu1  ;;  %v2683_v48 = vpop.f32.mrf.mxu2 }
 0x39a   : > { %v2684_v1 = vadd.f32 %v2683_v48, %v9018_v34  ;;  %6876 = vmatmul.msk.f32.gmra.mxu3 %vm2149_vm4, %v2768_v47 }
 0x39b   : > { %v3218_v53 = vpop.f32.mrf.mxu0 }
 0x39c   : > { %v3001_v5 = vadd.f32 %v2933_v50, %v2684_v1  ;;  %6923 = vmatmul.msk.f32.gmra.mxu1 %vm2149_vm4, %v9309_v18  ;;  %v3866_v1 = vld [vmem:[#allocation2 + $0x30] sm:$0xff] }
 0x39d   : > { %v2936_v3 = vpop.f32.mrf.mxu3 }
 0x39e   : > { %6844 = vmatmul.msk.f32.gmra.mxu2 %vm2149_vm4, %v9278_v2  ;;  %6908 = vmatmul.msk.f32.gmra.mxu0 %vm2149_vm4, %v9313_v60  ;;  %v9319_v34 = vadd.f32 %v3215_v51, %v3001_v5  ;;  %v3583_v2 = vld [vmem:[#allocation2 + $0x1a] sm:$0xff] }
 0x39f   : > { %v3867_v60 = vld [vmem:[#allocation2 + $0x38] sm:$0xff] }
 0x3a0   : > { %10881 = vst [vmem:[#allocation45_spill] sm:$0xff] %v9319_v34 }
 0x3a1   : > { %v9321_v41 = vpop.f32.mrf.mxu1  ;;  %v2686_v48 = vpop.f32.mrf.mxu2 }
 0x3a2   : > { %v2687_v47 = vadd.f32 %v2686_v48, %v9035_v54  ;;  %6973 = vmatmul.msk.f32.vlgmr.msra.gmra.mxu3 %vm2149_vm4, %v3866_v1 }
 0x3a3   : > { %v3221_v50 = vpop.f32.mrf.mxu0 }
 0x3a4   : > { %v3002_v22 = vadd.f32 %v2936_v3, %v2687_v47  ;;  %6924 = vmatmul.msk.f32.gmra.mxu1 %vm2149_vm4, %v9324_v55  ;;  %v9337_v3 = vld [vmem:[#allocation2 + $0xd9] sm:$0xff] }
 0x3a5   : > { %v2939_v5 = vpop.f32.mrf.mxu3 }
 0x3a6   : > { %6941 = vmatmul.msk.f32.vlgmr.msra.gmra.mxu2 %vm2149_vm4, %v3583_v2  ;;  %7005 = vmatmul.msk.f32.vlgmr.msra.gmra.mxu0 %vm2149_vm4, %v9090_v20  ;;  %v9332_v51 = vadd.f32 %v3218_v53, %v3002_v22  ;;  %v4465_v2 = vld [vmem:[#allocation7 + $0x210] sm:$0xff] }
 0x3a7   : > { %v3584_v20 = vld [vmem:[#allocation2 + $0x22] sm:$0xff]  ;;  %4580 = vmatpush.msra.mxu1 %v4465_v2 }
 0x3a8   : > { %10882 = vst [vmem:[#allocation66_spill] sm:$0xff] %v9332_v51  ;;  %v9350_v51 = vld [vmem:[#allocation2 + $0xe1] sm:$0xff] }
 0x3a9   : > { %v2689_v54 = vpop.f32.mrf.mxu2  ;;  %v9334_v48 = vpop.f32.mrf.mxu1 }
 0x3aa   : > { %v2690_v34 = vadd.f32 %v2689_v54, %v9053_v6  ;;  %6974 = vmatmul.msk.f32.gmra.mxu3 %vm2149_vm4, %v3867_v60 }
 0x3ab   : > { %v3224_v1 = vpop.f32.mrf.mxu0 }
 0x3ac   : > { %v3003_v47 = vadd.f32 %v2939_v5, %v2690_v34  ;;  %6925 = vmatmul.msk.f32.gmra.mxu1 %vm2149_vm4, %v9337_v3  ;;  %v3868_v34 = vld [vmem:[#allocation2 + $0x48] sm:$0xff] }
 0x3ad   : > { %v2942_v22 = vpop.f32.mrf.mxu3 }
 0x3ae   : > { %6942 = vmatmul.msk.f32.gmra.mxu2 %vm2149_vm4, %v3584_v20  ;;  %7006 = vmatmul.msk.f32.gmra.mxu0 %vm2149_vm4, %v9109_v24  ;;  %v9345_v6 = vadd.f32 %v3221_v50, %v3003_v47  ;;  %v9355_v20 = vld [vmem:[#allocation2 + $0x32] sm:$0xff] }
 0x3b0   : > { %10883 = vst [vmem:[#allocation63_spill] sm:$0xff] %v9345_v6 }
 0x3b1   : > { %v2692_v53 = vpop.f32.mrf.mxu2  ;;  %v9347_v54 = vpop.f32.mrf.mxu1 }
 0x3b2   : > { %v2693_v60 = vadd.f32 %v2692_v53, %v9070_v27  ;;  %6975 = vmatmul.msk.f32.gmra.mxu3 %vm2149_vm4, %v3868_v34  ;;  %v9366_v34 = vld [vmem:[#allocation2 + $0xf1] sm:$0xff] }
 0x3b3   : > { %v3227_v5 = vpop.f32.mrf.mxu0 }
 0x3b4   : > { %v3004_v2 = vadd.f32 %v2942_v22, %v2693_v60  ;;  %6926 = vmatmul.msk.f32.gmra.mxu1 %vm2149_vm4, %v9350_v51  ;;  %v3869_v22 = vld [vmem:[#allocation2 + $0x50] sm:$0xff] }
 0x3b5   : > { %v2945_v24 = vpop.f32.mrf.mxu3 }
 0x3b6   : > { %6943 = vmatmul.msk.f32.gmra.mxu2 %vm2149_vm4, %v9355_v20  ;;  %7007 = vmatmul.msk.f32.gmra.mxu0 %vm2149_vm4, %v9128_v42  ;;  %v9361_v27 = vadd.f32 %v3224_v1, %v3004_v2 }
 0x3b8   : > { %10884 = vst [vmem:[#allocation48_spill] sm:$0xff] %v9361_v27 }
 0x3b9   : > { %v2695_v50 = vpop.f32.mrf.mxu2  ;;  %v9363_v47 = vpop.f32.mrf.mxu1 }
 0x3ba   : > { %v2696_v53 = vadd.f32 %v2695_v50, %v9086_v13  ;;  %6976 = vmatmul.msk.f32.gmra.mxu3 %vm2149_vm4, %v3869_v22  ;;  %v9382_v22 = vld [vmem:[#allocation2 + $0xf9] sm:$0xff] }
 0x3bb   : > { %v3230_v60 = vpop.f32.mrf.mxu0 }
 0x3bc   : > { %v3005_v6 = vadd.f32 %v2945_v24, %v2696_v53  ;;  %6927 = vmatmul.msk.f32.gmra.mxu1 %vm2149_vm4, %v9366_v34  ;;  %v3870_v24 = vld [vmem:[#allocation2 + $0x60] sm:$0xff] }
 0x3bd   : > { %v2948_v42 = vpop.f32.mrf.mxu3 }
 0x3be   : > { %6944 = vmatmul.msk.f32.gmra.mxu2 %vm2149_vm4, %v9371_v28  ;;  %7008 = vmatmul.msk.f32.gmra.mxu0 %vm2149_vm4, %v9147_v30  ;;  %v9377_v13 = vadd.f32 %v3227_v5, %v3005_v6 }
 0x3c0   : > { %10885 = vst [vmem:[#allocation68_spill] sm:$0xff] %v9377_v13 }
 0x3c1   : > { %v2698_v1 = vpop.f32.mrf.mxu2  ;;  %v9379_v2 = vpop.f32.mrf.mxu1 }
 0x3c2   : > { %10886 = vst [vmem:[#allocation65_spill] sm:$0xff] %v9379_v2  ;;  %v2699_v50 = vadd.f32 %v2698_v1, %v9102_v7  ;;  %6977 = vmatmul.msk.f32.gmra.mxu3 %vm2149_vm4, %v3870_v24  ;;  %v9398_v24 = vld [vmem:[#allocation2 + $0x109] sm:$0xff]  ;;  %v4464_v2 = vld [vmem:[#allocation7 + $0x208] sm:$0xff] }
 0x3c3   : > { %v3233_v53 = vpop.f32.mrf.mxu0  ;;  %4581 = vmatpush.msra.mxu1 %v4464_v2 }
 0x3c4   : > { %v3006_v27 = vadd.f32 %v2948_v42, %v2699_v50  ;;  %6928 = vmatmul.msk.f32.gmra.mxu1 %vm2149_vm4, %v9382_v22  ;;  %v3871_v42 = vld [vmem:[#allocation2 + $0x68] sm:$0xff] }
 0x3c5   : > { %v2951_v30 = vpop.f32.mrf.mxu3 }
 0x3c6   : > { %6945 = vmatmul.msk.f32.gmra.mxu2 %vm2149_vm4, %v9387_v39  ;;  %7009 = vmatmul.msk.f32.gmra.mxu0 %vm2149_vm4, %v9163_v46  ;;  %v9393_v7 = vadd.f32 %v3230_v60, %v3006_v27  ;;  %v9403_v46 = vld [vmem:[#allocation2 + $0x52] sm:$0xff] }
 0x3c8   : > { %10887 = vst [vmem:[#allocation13_spill] sm:$0xff] %v9393_v7  ;;  %v9414_v7 = vld [vmem:[#allocation2 + $0x111] sm:$0xff] }
 0x3c9   : > { %v2701_v6 = vpop.f32.mrf.mxu2  ;;  %v9395_v5 = vpop.f32.mrf.mxu1 }
 0x3ca   : > { %10888 = vst [vmem:[#allocation70_spill] sm:$0xff] %v9395_v5  ;;  %v2702_v1 = vadd.f32 %v2701_v6, %v9121_v36  ;;  %6978 = vmatmul.msk.f32.gmra.mxu3 %vm2149_vm4, %v3871_v42  ;;  %v9419_v5 = vld [vmem:[#allocation2 + $0x62] sm:$0xff] }
 0x3cb   : > { %v3236_v50 = vpop.f32.mrf.mxu0 }
 0x3cc   : > { %v3007_v13 = vadd.f32 %v2951_v30, %v2702_v1  ;;  %6929 = vmatmul.msk.f32.gmra.mxu1 %vm2149_vm4, %v9398_v24  ;;  %v3872_v1 = vld [vmem:[#allocation2 + $0x78] sm:$0xff] }
 0x3cd   : > { %v2954_v36 = vpop.f32.mrf.mxu3 }
 0x3ce   : > { %6946 = vmatmul.msk.f32.gmra.mxu2 %vm2149_vm4, %v9403_v46  ;;  %7010 = vmatmul.msk.f32.gmra.mxu0 %vm2149_vm4, %v9182_v38  ;;  %v9409_v27 = vadd.f32 %v3233_v53, %v3007_v13 }
 0x3d0   : > { %10889 = vst [vmem:[#allocation67_spill] sm:$0xff] %v9409_v27 }
 0x3d1   : > { %v2704_v60 = vpop.f32.mrf.mxu2  ;;  %v9411_v6 = vpop.f32.mrf.mxu1 }
 0x3d2   : > { %10890 = vst [vmem:[#allocation14_spill] sm:$0xff] %v9411_v6  ;;  %v2705_v30 = vadd.f32 %v2704_v60, %v9140_v32  ;;  %6979 = vmatmul.msk.f32.gmra.mxu3 %vm2149_vm4, %v3872_v1  ;;  %v9430_v1 = vld [vmem:[#allocation2 + $0x121] sm:$0xff]  ;;  %v9435_v6 = vld [vmem:[#allocation2 + $0x6a] sm:$0xff] }
 0x3d3   : > { %v3239_v42 = vpop.f32.mrf.mxu0 }
 0x3d4   : > { %v3008_v2 = vadd.f32 %v2954_v36, %v2705_v30  ;;  %6930 = vmatmul.msk.f32.gmra.mxu1 %vm2149_vm4, %v9414_v7  ;;  %v3873_v36 = vld [vmem:[#allocation2 + $0x80] sm:$0xff] }
 0x3d5   : > { %v2957_v38 = vpop.f32.mrf.mxu3 }
 0x3d6   : > { %6947 = vmatmul.msk.f32.gmra.mxu2 %vm2149_vm4, %v9419_v5  ;;  %7011 = vmatmul.msk.f32.gmra.mxu0 %vm2149_vm4, %v9201_v12  ;;  %v9425_v32 = vadd.f32 %v3236_v50, %v3008_v2 }
 0x3d8   : > { %10891 = vst [vmem:[#allocation69_spill] sm:$0xff] %v9425_v32 }
 0x3d9   : > { %v2707_v13 = vpop.f32.mrf.mxu2  ;;  %v9427_v53 = vpop.f32.mrf.mxu1 }
 0x3da   : > { %10892 = vst [vmem:[#allocation71_spill] sm:$0xff] %v9427_v53  ;;  %v2708_v60 = vadd.f32 %v2707_v13, %v9159_v21  ;;  %6980 = vmatmul.msk.f32.gmra.mxu3 %vm2149_vm4, %v3873_v36  ;;  %v9446_v36 = vld [vmem:[#allocation2 + $0x129] sm:$0xff]  ;;  %v9451_v53 = vld [vmem:[#allocation2 + $0x7a] sm:$0xff] }
 0x3db   : > { %v3242_v30 = vpop.f32.mrf.mxu0 }
 0x3dc   : > { %v3009_v27 = vadd.f32 %v2957_v38, %v2708_v60  ;;  %6931 = vmatmul.msk.f32.gmra.mxu1 %vm2149_vm4, %v9430_v1  ;;  %v3874_v38 = vld [vmem:[#allocation2 + $0x90] sm:$0xff] }
 0x3dd   : > { %v2960_v12 = vpop.f32.mrf.mxu3 }
 0x3de   : > { %6948 = vmatmul.msk.f32.gmra.mxu2 %vm2149_vm4, %v9435_v6  ;;  %7012 = vmatmul.msk.f32.gmra.mxu0 %vm2149_vm4, %v9220_v52  ;;  %v9441_v21 = vadd.f32 %v3239_v42, %v3009_v27 }
 0x3e0   : > { %10893 = vst [vmem:[#allocation72_spill] sm:$0xff] %v9441_v21 }
 0x3e1   : > { %v2710_v50 = vpop.f32.mrf.mxu2  ;;  %v9443_v2 = vpop.f32.mrf.mxu1 }
 0x3e2   : > { %10894 = vst [vmem:[#allocation15_spill] sm:$0xff] %v9443_v2  ;;  %v2711_v13 = vadd.f32 %v2710_v50, %v9175_v37  ;;  %6981 = vmatmul.msk.f32.gmra.mxu3 %vm2149_vm4, %v3874_v38  ;;  %v9462_v38 = vld [vmem:[#allocation2 + $0x139] sm:$0xff] }
 0x3e3   : > { %v3245_v60 = vpop.f32.mrf.mxu0  ;;  %v4463_v2 = vld [vmem:[#allocation7 + $0x200] sm:$0xff] }
 0x3e4   : > { %v3010_v32 = vadd.f32 %v2960_v12, %v2711_v13  ;;  %6932 = vmatmul.msk.f32.gmra.mxu1 %vm2149_vm4, %v9446_v36  ;;  %v3875_v12 = vld [vmem:[#allocation2 + $0x98] sm:$0xff] }
 0x3e5   : > { %v2963_v52 = vpop.f32.mrf.mxu3  ;;  %4582 = vmatpush.msra.mxu1 %v4463_v2 }
 0x3e6   : > { %6949 = vmatmul.msk.f32.gmra.mxu2 %vm2149_vm4, %v9451_v53  ;;  %7013 = vmatmul.msk.f32.gmra.mxu0 %vm2149_vm4, %v9236_v58  ;;  %v9457_v37 = vadd.f32 %v3242_v30, %v3010_v32  ;;  %v9467_v58 = vld [vmem:[#allocation2 + $0x82] sm:$0xff] }
 0x3e8   : > { %10895 = vst [vmem:[#allocation16_spill] sm:$0xff] %v9457_v37  ;;  %v9478_v37 = vld [vmem:[#allocation2 + $0x141] sm:$0xff] }
 0x3e9   : > { %v2713_v27 = vpop.f32.mrf.mxu2  ;;  %v9459_v42 = vpop.f32.mrf.mxu1 }
 0x3ea   : > { %10896 = vst [vmem:[#allocation32_spill] sm:$0xff] %v9459_v42  ;;  %v2714_v50 = vadd.f32 %v2713_v27, %v9194_v40  ;;  %6982 = vmatmul.msk.f32.gmra.mxu3 %vm2149_vm4, %v3875_v12  ;;  %v9483_v42 = vld [vmem:[#allocation2 + $0x92] sm:$0xff] }
 0x3eb   : > { %v3248_v13 = vpop.f32.mrf.mxu0 }
 0x3ec   : > { %v3011_v21 = vadd.f32 %v2963_v52, %v2714_v50  ;;  %6933 = vmatmul.msk.f32.gmra.mxu1 %vm2149_vm4, %v9462_v38  ;;  %v3876_v50 = vld [vmem:[#allocation2 + $0xa8] sm:$0xff] }
 0x3ed   : > { %v2966_v40 = vpop.f32.mrf.mxu3 }
 0x3ee   : > { %6950 = vmatmul.msk.f32.gmra.mxu2 %vm2149_vm4, %v9467_v58  ;;  %7014 = vmatmul.msk.f32.gmra.mxu0 %vm2149_vm4, %v9255_v19  ;;  %v9473_v32 = vadd.f32 %v3245_v60, %v3011_v21 }
 0x3f0   : > { %10897 = vst [vmem:[#allocation18_spill] sm:$0xff] %v9473_v32  ;;  %v9500_v32 = vld [vmem:[#allocation2 + $0x9a] sm:$0xff] }
 0x3f1   : > { %v2716_v30 = vpop.f32.mrf.mxu2  ;;  %v9475_v27 = vpop.f32.mrf.mxu1 }
 0x3f2   : > { %v2717_v52 = vadd.f32 %v2716_v30, %v9213_v9  ;;  %6983 = vmatmul.msk.f32.gmra.mxu3 %vm2149_vm4, %v3876_v50 }
 0x3f3   : > { %v3251_v12 = vpop.f32.mrf.mxu0 }
 0x3f4   : > { %v3012_v2 = vadd.f32 %v2966_v40, %v2717_v52  ;;  %6934 = vmatmul.msk.f32.gmra.mxu1 %vm2149_vm4, %v9478_v37  ;;  %v9494_v52 = vld [vmem:[#allocation2 + $0x151] sm:$0xff] }
 0x3f5   : > { %v2969_v19 = vpop.f32.mrf.mxu3 }
 0x3f6   : > { %6951 = vmatmul.msk.f32.gmra.mxu2 %vm2149_vm4, %v9483_v42  ;;  %7015 = vmatmul.msk.f32.gmra.mxu0 %vm2149_vm4, %v9274_v56  ;;  %v9489_v9 = vadd.f32 %v3248_v13, %v3012_v2 }
 0x3f8   : > { %10898 = vst [vmem:[#allocation19_spill] sm:$0xff] %v9489_v9  ;;  %v9517_v9 = vld [vmem:[#allocation2 + $0xaa] sm:$0xff] }
 0x3f9   : > { %v2719_v21 = vpop.f32.mrf.mxu2  ;;  %v9491_v60 = vpop.f32.mrf.mxu1 }
 0x3fa   : > { %v2720_v30 = vadd.f32 %v2719_v21, %v9232_v33  ;;  %6984 = vmatmul.msk.f32.gmra.mxu3 %vm2149_vm4, %v8997_v17  ;;  %v9511_v21 = vld [vmem:[#allocation2 + $0x159] sm:$0xff] }
 0x3fb   : > { %v3254_v40 = vpop.f32.mrf.mxu0 }
 0x3fc   : > { %v3013_v50 = vadd.f32 %v2969_v19, %v2720_v30  ;;  %6935 = vmatmul.msk.f32.gmra.mxu1 %vm2149_vm4, %v9494_v52 }
 0x3fd   : > { %v2972_v56 = vpop.f32.mrf.mxu3 }
 0x3fe   : > { %6952 = vmatmul.msk.f32.gmra.mxu2 %vm2149_vm4, %v9500_v32  ;;  %7016 = vmatmul.msk.f32.gmra.mxu0 %vm2149_vm4, %v9293_v31  ;;  %v9506_v33 = vadd.f32 %v3251_v12, %v3013_v50 }
 0x401   : > { %v2722_v13 = vpop.f32.mrf.mxu2  ;;  %v9508_v2 = vpop.f32.mrf.mxu1 }
 0x402   : > { %v2723_v17 = vadd.f32 %v2722_v13, %v9248_v0  ;;  %6985 = vmatmul.msk.f32.gmra.mxu3 %vm2149_vm4, %v9010_v49 }
 0x403   : > { %v3257_v19 = vpop.f32.mrf.mxu0 }
 0x404   : > { %v3014_v30 = vadd.f32 %v2972_v56, %v2723_v17  ;;  %6936 = vmatmul.msk.f32.gmra.mxu1 %vm2149_vm4, %v9511_v21  ;;  %v9532_v17 = vld [vmem:[#allocation2 + $0xb2] sm:$0xff] }
 0x405   : > { %v2975_v31 = vpop.f32.mrf.mxu3 }
 0x406   : > { %6953 = vmatmul.msk.f32.gmra.mxu2 %vm2149_vm4, %v9517_v9  ;;  %7017 = vmatmul.msk.f32.gmra.mxu0 %vm2149_vm4, %v9309_v18  ;;  %v9523_v0 = vadd.f32 %v3254_v40, %v3014_v30 }
 0x409   : > { %v2725_v12 = vpop.f32.mrf.mxu2  ;;  %v9525_v50 = vpop.f32.mrf.mxu1 }
 0x40a   : > { %v2726_v49 = vadd.f32 %v2725_v12, %v9267_v10  ;;  %6986 = vmatmul.msk.f32.gmra.mxu3 %vm2149_vm4, %v9026_v63 }
 0x40b   : > { %v3260_v56 = vpop.f32.mrf.mxu0 }
 0x40c   : > { %v3015_v13 = vadd.f32 %v2975_v31, %v2726_v49  ;;  %6937 = vmatmul.msk.f32.gmra.mxu1 %vm2149_vm4, %v9020_v11 }
 0x40d   : > { %v2978_v18 = vpop.f32.mrf.mxu3 }
 0x40e   : > { %6954 = vmatmul.msk.f32.gmra.mxu2 %vm2149_vm4, %v9532_v17  ;;  %7018 = vmatmul.msk.f32.gmra.mxu0 %vm2149_vm4, %v9324_v55  ;;  %v9538_v40 = vadd.f32 %v3257_v19, %v3015_v13 }
 0x411   : > { %v2728_v10 = vpop.f32.mrf.mxu2  ;;  %v9540_v30 = vpop.f32.mrf.mxu1 }
 0x412   : > { %v2729_v63 = vadd.f32 %v2728_v10, %v9286_v44  ;;  %6987 = vmatmul.msk.f32.gmra.mxu3 %vm2149_vm4, %v9046_v61  ;;  %v9556_v61 = vld [vmem:[#allocation2 + $0x181] sm:$0xff] }
 0x413   : > { %v3263_v31 = vpop.f32.mrf.mxu0 }
 0x414   : > { %v3016_v11 = vadd.f32 %v2978_v18, %v2729_v63  ;;  %6938 = vmatmul.msk.f32.gmra.mxu1 %vm2149_vm4, %v9039_v29 }
 0x415   : > { %v2981_v55 = vpop.f32.mrf.mxu3 }
 0x416   : > { %6955 = vmatmul.msk.f32.gmra.mxu2 %vm2149_vm4, %v9037_v14  ;;  %7019 = vmatmul.msk.f32.gmra.mxu0 %vm2149_vm4, %v9337_v3  ;;  %v9551_v19 = vadd.f32 %v3260_v56, %v3016_v11 }
 0x419   : > { %v2731_v12 = vpop.f32.mrf.mxu2  ;;  %v9553_v49 = vpop.f32.mrf.mxu1 }
 0x41a   : > { %v2732_v44 = vadd.f32 %v2731_v12, %v9305_v8  ;;  %6988 = vmatmul.msk.f32.gmra.mxu3 %vm2149_vm4, %v9062_v45  ;;  %v9571_v45 = vld [vmem:[#allocation2 + $0x189] sm:$0xff] }
 0x41b   : > { %v3266_v13 = vpop.f32.mrf.mxu0 }
 0x41c   : > { %v3017_v29 = vadd.f32 %v2981_v55, %v2732_v44  ;;  %6939 = vmatmul.msk.f32.gmra.mxu1 %vm2149_vm4, %v9556_v61 }
 0x41d   : > { %v2984_v14 = vpop.f32.mrf.mxu3 }
 0x41e   : > { %6956 = vmatmul.msk.f32.gmra.mxu2 %vm2149_vm4, %v9056_v4  ;;  %7020 = vmatmul.msk.f32.gmra.mxu0 %vm2149_vm4, %v9350_v51  ;;  %v9566_v3 = vadd.f32 %v3263_v31, %v3017_v29 }
 0x421   : > { %v2734_v8 = vpop.f32.mrf.mxu2  ;;  %v9568_v56 = vpop.f32.mrf.mxu1 }
 0x422   : > { %v2735_v18 = vadd.f32 %v2734_v8, %v9321_v41  ;;  %6989 = vmatmul.msk.f32.gmra.mxu3 %vm2149_vm4, %v9078_v59  ;;  %v3551_v41 = vadd.f32 %v9334_v48, %v9068_v23 }
 0x423   : > { %v4302_v10 = vpop.f32.mrf.mxu0 }
 0x424   : > { %v3018_v63 = vadd.f32 %v2984_v14, %v2735_v18  ;;  %6940 = vmatmul.msk.f32.gmra.mxu1 %vm2149_vm4, %v9571_v45 }
 0x425   : > { %v4020_v4 = vpop.f32.mrf.mxu3 }
 0x426   : > { %6957 = vmatmul.msk.f32.gmra.mxu2 %vm2149_vm4, %v9073_v57  ;;  %7021 = vmatmul.msk.f32.gmra.mxu0 %vm2149_vm4, %v9366_v34  ;;  %v9581_v51 = vadd.f32 %v3266_v13, %v3018_v63  ;;  %v9591_v57 = vld [vmem:[#allocation2 + $0xe2] sm:$0xff]  ;;  %v3552_v34 = vadd.f32 %v9347_v54, %v9084_v62  ;;  %v3553_v54 = vadd.f32 %v9363_v47, %v9100_v25  ;;  %v10899_v47 = vld [vmem:[#allocation40_spill] sm:$0xff] }
 0x429   : > { %v9585_v31 = vpop.f32.mrf.mxu1  ;;  %v3737_v11 = vpop.f32.mrf.mxu2 }
 0x42a   : > { %v3833_v59 = vadd.f32 %v3737_v11, %v3551_v41  ;;  %6990 = vmatmul.msk.f32.gmra.mxu3 %vm2149_vm4, %v9094_v16  ;;  %v10901_v41 = vld [vmem:[#allocation44_spill] sm:$0xff]  ;;  %v10902_v11 = vld [vmem:[#allocation43_spill] sm:$0xff] }
 0x42b   : > { %v4305_v55 = vpop.f32.mrf.mxu0 }
 0x42c   : > { %v4116_v12 = vadd.f32 %v4020_v4, %v3833_v59  ;;  %7037 = vmatmul.msk.f32.vlgmr.msra.gmra.mxu1 %vm2149_vm4, %v9355_v20 }
 0x42d   : > { %v4023_v23 = vpop.f32.mrf.mxu3 }
 0x42e   : > { %6958 = vmatmul.msk.f32.gmra.mxu2 %vm2149_vm4, %v9591_v57  ;;  %7022 = vmatmul.msk.f32.gmra.mxu0 %vm2149_vm4, %v9382_v22  ;;  %v9597_v48 = vadd.f32 %v4302_v10, %v4116_v12  ;;  %v10905_v12 = vld [vmem:[#allocation70_spill] sm:$0xff] }
 0x431   : > { %v9601_v44 = vpop.f32.mrf.mxu1  ;;  %v3740_v16 = vpop.f32.mrf.mxu2 }
 0x432   : > { %v3834_v13 = vadd.f32 %v3740_v16, %v3552_v34  ;;  %6991 = vmatmul.msk.f32.gmra.mxu3 %vm2149_vm4, %v9113_v35 }
 0x433   : > { %v4308_v29 = vpop.f32.mrf.mxu0 }
 0x434   : > { %v4117_v20 = vadd.f32 %v4023_v23, %v3834_v13  ;;  %7038 = vmatmul.msk.f32.gmra.mxu1 %vm2149_vm4, %v9371_v28 }
 0x435   : > { %v4026_v22 = vpop.f32.mrf.mxu3 }
 0x436   : > { %6959 = vmatmul.msk.f32.gmra.mxu2 %vm2149_vm4, %v9105_v15  ;;  %7023 = vmatmul.msk.f32.gmra.mxu0 %vm2149_vm4, %v9398_v24  ;;  %v9611_v62 = vadd.f32 %v4305_v55, %v4117_v20  ;;  %v10900_v24 = vld [vmem:[#allocation65_spill] sm:$0xff]  ;;  %v10904_v55 = vld [vmem:[#allocation42_spill] sm:$0xff] }
 0x437   : > { %v3554_v10 = vadd.f32 %v10900_v24, %v10899_v47  ;;  %v3555_v23 = vadd.f32 %v10905_v12, %v10904_v55  ;;  %v9649_v20 = vld [vmem:[#allocation2 + $0x112] sm:$0xff] }
 0x438   : > { %10907 = vst [vmem:[#allocation21_spill] sm:$0xff] %v9649_v20  ;;  %v10916_v12 = vld [vmem:[#allocation52_spill] sm:$0xff] }
 0x439   : > { %v9615_v14 = vpop.f32.mrf.mxu1  ;;  %v3743_v8 = vpop.f32.mrf.mxu2 }
 0x43a   : > { %v3835_v35 = vadd.f32 %v3743_v8, %v3553_v54  ;;  %6992 = vmatmul.msk.f32.gmra.mxu3 %vm2149_vm4, %v9132_v43  ;;  %v10909_v54 = vld [vmem:[#allocation47_spill] sm:$0xff]  ;;  %v10910_v8 = vld [vmem:[#allocation14_spill] sm:$0xff] }
 0x43b   : > { %v4311_v18 = vpop.f32.mrf.mxu0 }
 0x43c   : > { %v4118_v28 = vadd.f32 %v4026_v22, %v3835_v35  ;;  %7039 = vmatmul.msk.f32.gmra.mxu1 %vm2149_vm4, %v9387_v39  ;;  %v3556_v35 = vadd.f32 %v10910_v8, %v10909_v54 }
 0x43d   : > { %v4029_v15 = vpop.f32.mrf.mxu3 }
 0x43e   : > { %6960 = vmatmul.msk.f32.gmra.mxu2 %vm2149_vm4, %v9124_v26  ;;  %7024 = vmatmul.msk.f32.gmra.mxu0 %vm2149_vm4, %v9414_v7  ;;  %v9625_v25 = vadd.f32 %v4308_v29, %v4118_v28  ;;  %v10906_v29 = vld [vmem:[#allocation49_spill] sm:$0xff] }
 0x441   : > { %v9629_v63 = vpop.f32.mrf.mxu1  ;;  %v3746_v43 = vpop.f32.mrf.mxu2 }
 0x442   : > { %v3836_v4 = vadd.f32 %v3746_v43, %v3554_v10  ;;  %6993 = vmatmul.msk.f32.gmra.mxu3 %vm2149_vm4, %v10901_v41  ;;  %v10912_v10 = vld [vmem:[#allocation17_spill] sm:$0xff]  ;;  %v10914_v43 = vld [vmem:[#allocation50_spill] sm:$0xff] }
 0x443   : > { %v4314_v26 = vpop.f32.mrf.mxu0 }
 0x444   : > { %v4119_v39 = vadd.f32 %v4029_v15, %v3836_v4  ;;  %7040 = vmatmul.msk.f32.gmra.mxu1 %vm2149_vm4, %v9403_v46  ;;  %v10915_v4 = vld [vmem:[#allocation71_spill] sm:$0xff] }
 0x445   : > { %v4032_v7 = vpop.f32.mrf.mxu3  ;;  %v3557_v41 = vadd.f32 %v10915_v4, %v10914_v43  ;;  %v10926_v4 = vld [vmem:[#allocation56_spill] sm:$0xff] }
 0x446   : > { %6961 = vmatmul.msk.f32.gmra.mxu2 %vm2149_vm4, %v10902_v11  ;;  %7025 = vmatmul.msk.f32.gmra.mxu0 %vm2149_vm4, %v9430_v1  ;;  %v9639_v59 = vadd.f32 %v4311_v18, %v4119_v39 }
 0x448   : > { %10903 = vst [vmem:[#allocation46_spill] sm:$0xff] %v9639_v59  ;;  %v10939_v59 = vld [vmem:[#allocation45_spill] sm:$0xff] }
 0x449   : > { %v9643_v34 = vpop.f32.mrf.mxu1  ;;  %v3749_v16 = vpop.f32.mrf.mxu2 }
 0x44a   : > { %v3837_v13 = vadd.f32 %v3749_v16, %v3555_v23  ;;  %6994 = vmatmul.msk.f32.gmra.mxu3 %vm2149_vm4, %v10906_v29  ;;  %v10917_v23 = vld [vmem:[#allocation54_spill] sm:$0xff]  ;;  %v10919_v16 = vld [vmem:[#allocation20_spill] sm:$0xff] }
 0x44b   : > { %v4317_v28 = vpop.f32.mrf.mxu0 }
 0x44c   : > { %v4120_v46 = vadd.f32 %v4032_v7, %v3837_v13  ;;  %7041 = vmatmul.msk.f32.gmra.mxu1 %vm2149_vm4, %v9419_v5  ;;  %v10911_v5 = vld [vmem:[#allocation51_spill] sm:$0xff] }
 0x44d   : > { %v4035_v1 = vpop.f32.mrf.mxu3  ;;  %v10920_v13 = vld [vmem:[#allocation15_spill] sm:$0xff] }
 0x44e   : > { %6962 = vmatmul.msk.f32.gmra.mxu2 %vm2149_vm4, %v9649_v20  ;;  %7026 = vmatmul.msk.f32.gmra.mxu0 %vm2149_vm4, %v9446_v36  ;;  %v9655_v22 = vadd.f32 %v4314_v26, %v4120_v46  ;;  %v3558_v29 = vadd.f32 %v10920_v13, %v10919_v16  ;;  %v10931_v16 = vld [vmem:[#allocation61_spill] sm:$0xff]  ;;  %v4442_v13 = vld [vmem:[#allocation2 + $0xc2] sm:$0xff] }
 0x450   : > { %10908 = vst [vmem:[#allocation22_spill] sm:$0xff] %v9655_v22  ;;  %v10938_v22 = vld [vmem:[#allocation64_spill] sm:$0xff] }
 0x451   : > { %v9659_v18 = vpop.f32.mrf.mxu1  ;;  %v3752_v15 = vpop.f32.mrf.mxu2  ;;  %v3564_v20 = vadd.f32 %v9540_v30, %v10938_v22  ;;  %v10943_v30 = vld [vmem:[#allocation68_spill] sm:$0xff] }
 0x452   : > { %v3838_v47 = vadd.f32 %v3752_v15, %v3556_v35  ;;  %6995 = vmatmul.msk.f32.gmra.mxu3 %vm2149_vm4, %v10911_v5  ;;  %v10921_v35 = vld [vmem:[#allocation27_spill] sm:$0xff]  ;;  %v10922_v15 = vld [vmem:[#allocation53_spill] sm:$0xff] }
 0x453   : > { %v4320_v55 = vpop.f32.mrf.mxu0  ;;  %v10924_v5 = vld [vmem:[#allocation55_spill] sm:$0xff] }
 0x454   : > { %v4121_v24 = vadd.f32 %v4035_v1, %v3838_v47  ;;  %7042 = vmatmul.msk.f32.gmra.mxu1 %vm2149_vm4, %v9435_v6 }
 0x455   : > { %v4038_v39 = vpop.f32.mrf.mxu3 }
 0x456   : > { %6963 = vmatmul.msk.f32.gmra.mxu2 %vm2149_vm4, %v10912_v10  ;;  %7027 = vmatmul.msk.f32.gmra.mxu0 %vm2149_vm4, %v9462_v38  ;;  %v9669_v36 = vadd.f32 %v4317_v28, %v4121_v24  ;;  %v3608_v24 = vld [vmem:[#allocation2 + $0x142] sm:$0xff] }
 0x457   : > { %v10925_v10 = vld [vmem:[#allocation34_spill] sm:$0xff] }
 0x458   : > { %10913 = vst [vmem:[#allocation23_spill] sm:$0xff] %v9669_v36  ;;  %v4446_v36 = vld [vmem:[#allocation2 + $0xf2] sm:$0xff] }
 0x459   : > { %v9673_v26 = vpop.f32.mrf.mxu1  ;;  %v3755_v11 = vpop.f32.mrf.mxu2 }
 0x45a   : > { %v3839_v7 = vadd.f32 %v3755_v11, %v3557_v41  ;;  %6996 = vmatmul.msk.f32.gmra.mxu3 %vm2149_vm4, %v10916_v12  ;;  %v10927_v41 = vld [vmem:[#allocation38_spill] sm:$0xff]  ;;  %v10930_v12 = vld [vmem:[#allocation59_spill] sm:$0xff] }
 0x45b   : > { %v4323_v28 = vpop.f32.mrf.mxu0 }
 0x45c   : > { %v4122_v6 = vadd.f32 %v4038_v39, %v3839_v7  ;;  %7043 = vmatmul.msk.f32.gmra.mxu1 %vm2149_vm4, %v9451_v53 }
 0x45d   : > { %v4041_v8 = vpop.f32.mrf.mxu3 }
 0x45e   : > { %6964 = vmatmul.msk.f32.gmra.mxu2 %vm2149_vm4, %v10917_v23  ;;  %7028 = vmatmul.msk.f32.gmra.mxu0 %vm2149_vm4, %v9478_v37  ;;  %v9683_v38 = vadd.f32 %v4320_v55, %v4122_v6  ;;  %v10929_v55 = vld [vmem:[#allocation41_spill] sm:$0xff] }
 0x460   : > { %10918 = vst [vmem:[#allocation26_spill] sm:$0xff] %v9683_v38 }
 0x461   : > { %v9687_v46 = vpop.f32.mrf.mxu1  ;;  %v3758_v1 = vpop.f32.mrf.mxu2 }
 0x462   : > { %v3840_v54 = vadd.f32 %v3758_v1, %v3558_v29  ;;  %6997 = vmatmul.msk.f32.gmra.mxu3 %vm2149_vm4, %v10921_v35  ;;  %v3612_v29 = vld [vmem:[#allocation2 + $0x172] sm:$0xff] }
 0x463   : > { %v4178_v35 = vld [vmem:[#allocation2 + $0x199] sm:$0xff] }
 0x464   : > { %v4123_v53 = vadd.f32 %v4041_v8, %v3840_v54  ;;  %7044 = vmatmul.msk.f32.gmra.mxu1 %vm2149_vm4, %v9467_v58  ;;  %v4443_v8 = vld [vmem:[#allocation2 + $0xca] sm:$0xff] }
 0x465   : > { %v9725_v39 = vpop.f32.mrf.mxu3 }
 0x466   : > { %6965 = vmatmul.msk.f32.gmra.mxu2 %vm2149_vm4, %v10922_v15  ;;  %7029 = vmatmul.msk.f32.gmra.mxu0 %vm2149_vm4, %v9494_v52  ;;  %v9697_v37 = vadd.f32 %v4323_v28, %v4123_v53  ;;  %v4174_v52 = vld [vmem:[#allocation2 + $0x169] sm:$0xff] }
 0x467   : > { %v3613_v28 = vld [vmem:[#allocation2 + $0x182] sm:$0xff] }
 0x468   : > { %10923 = vst [vmem:[#allocation25_spill] sm:$0xff] %v9697_v37  ;;  %v10937_v37 = vld [vmem:[#allocation62_spill] sm:$0xff] }
 0x469   : > { %v9699_v47 = vpop.f32.mrf.mxu1  ;;  %v9714_v43 = vpop.f32.mrf.mxu2  ;;  %v3563_v38 = vadd.f32 %v9525_v50, %v10937_v37  ;;  %v10942_v50 = vld [vmem:[#allocation48_spill] sm:$0xff] }
 0x46a   : > { %6998 = vmatmul.msk.f32.gmra.mxu3 %vm2149_vm4, %v10924_v5  ;;  %v4444_v5 = vld [vmem:[#allocation2 + $0xda] sm:$0xff]  ;;  %v9809_v37 = vadd.f32 %v9601_v44, %v10942_v50 }
 0x46c   : > { %7045 = vmatmul.msk.f32.gmra.mxu1 %vm2149_vm4, %v9483_v42 }
 0x46e   : > { %6966 = vmatmul.msk.f32.gmra.mxu2 %vm2149_vm4, %v3608_v24  ;;  %7030 = vmatmul.msk.f32.gmra.mxu0 %vm2149_vm4, %v9511_v21  ;;  %v4175_v21 = vld [vmem:[#allocation2 + $0x171] sm:$0xff]  ;;  %v4179_v24 = vld [vmem:[#allocation2 + $0x1a1] sm:$0xff] }
 0x471   : > { %v9708_v58 = vpop.f32.mrf.mxu1  ;;  %v9730_v11 = vpop.f32.mrf.mxu2 }
 0x472   : > { %6999 = vmatmul.msk.f32.gmra.mxu3 %vm2149_vm4, %v10925_v10 }
 0x474   : > { %7046 = vmatmul.msk.f32.gmra.mxu1 %vm2149_vm4, %v9500_v32  ;;  %v10928_v32 = vld [vmem:[#allocation58_spill] sm:$0xff] }
 0x476   : > { %6967 = vmatmul.msk.f32.gmra.mxu2 %vm2149_vm4, %v10926_v4  ;;  %7031 = vmatmul.msk.f32.gmra.mxu0 %vm2149_vm4, %v4174_v52  ;;  %v3614_v4 = vld [vmem:[#allocation2 + $0x18a] sm:$0xff] }
 0x479   : > { %v9719_v42 = vpop.f32.mrf.mxu1  ;;  %v3767_v23 = vpop.f32.mrf.mxu2 }
 0x47a   : > { %7000 = vmatmul.msk.f32.gmra.mxu3 %vm2149_vm4, %v10927_v41 }
 0x47c   : > { %7047 = vmatmul.msk.f32.gmra.mxu1 %vm2149_vm4, %v9517_v9  ;;  %v9742_v9 = vpop.f32.mrf.mxu3 }
 0x47e   : > { %6968 = vmatmul.msk.f32.gmra.mxu2 %vm2149_vm4, %v10928_v32  ;;  %7032 = vmatmul.msk.f32.gmra.mxu0 %vm2149_vm4, %v4175_v21 }
 0x481   : > { %v9732_v7 = vpop.f32.mrf.mxu1  ;;  %v3770_v53 = vpop.f32.mrf.mxu2 }
 0x482   : > { %7001 = vmatmul.msk.f32.gmra.mxu3 %vm2149_vm4, %v10929_v55 }
 0x484   : > { %7048 = vmatmul.msk.f32.gmra.mxu1 %vm2149_vm4, %v9532_v17  ;;  %v3896_v17 = vld [vmem:[#allocation2 + $0x198] sm:$0xff]  ;;  %v9756_v54 = vpop.f32.mrf.mxu3 }
 0x486   : > { %6969 = vmatmul.msk.f32.gmra.mxu2 %vm2149_vm4, %v10930_v12  ;;  %7033 = vmatmul.msk.f32.gmra.mxu0 %vm2149_vm4, %v9556_v61  ;;  %v9754_v61 = vpop.f32.mrf.mxu0 }
 0x489   : > { %v9744_v6 = vpop.f32.mrf.mxu1  ;;  %v3773_v41 = vpop.f32.mrf.mxu2 }
 0x48a   : > { %7002 = vmatmul.msk.f32.gmra.mxu3 %vm2149_vm4, %v10931_v16  ;;  %v9778_v16 = vld [vmem:[#allocation8] ss:$0 sm:$0xff] }
 0x48c   : > { %7049 = vmatmul.msk.f32.gmra.mxu1 %vm2149_vm4, %v4442_v13  ;;  %v4053_v52 = vpop.f32.mrf.mxu3 }
 0x48e   : > { %6970 = vmatmul.msk.f32.gmra.mxu2 %vm2149_vm4, %v3612_v29  ;;  %7034 = vmatmul.msk.f32.gmra.mxu0 %vm2149_vm4, %v9571_v45  ;;  %v3897_v45 = vld [vmem:[#allocation2 + $0x1a0] sm:$0xff]  ;;  %v9765_v10 = vpop.f32.mrf.mxu0  ;;  %v10932_v29 = vld [vmem:[#allocation24_spill] sm:$0xff] }
 0x491   : > { %v9752_v1 = vpop.f32.mrf.mxu1  ;;  %v3776_v12 = vpop.f32.mrf.mxu2 }
 0x492   : > { %7003 = vmatmul.msk.f32.gmra.mxu3 %vm2149_vm4, %v3896_v17  ;;  %v10933_v17 = vld [vmem:[#allocation32_spill] sm:$0xff] }
 0x494   : > { %7050 = vmatmul.msk.f32.gmra.mxu1 %vm2149_vm4, %v4443_v8  ;;  %v9776_v55 = vpop.f32.mrf.mxu3  ;;  %v3559_v8 = vadd.f32 %v10933_v17, %v10932_v29  ;;  %v9795_v29 = vadd.f32 %v9553_v49, %v10939_v59  ;;  %v9813_v49 = vadd.f32 %v9615_v14, %v10943_v30  ;;  %v10945_v17 = vld [vmem:[#allocation67_spill] sm:$0xff]  ;;  %v10948_v30 = vld [vmem:[#allocation16_spill] sm:$0xff] }
 0x496   : > { %6971 = vmatmul.msk.f32.gmra.mxu2 %vm2149_vm4, %v3613_v28  ;;  %7035 = vmatmul.msk.f32.gmra.mxu0 %vm2149_vm4, %v4178_v35  ;;  %v9774_v32 = vpop.f32.mrf.mxu0  ;;  %v10934_v28 = vld [vmem:[#allocation57_spill] sm:$0xff]  ;;  %v3841_v59 = vadd.f32 %v9714_v43, %v3559_v8 }
 0x499   : > { %v9762_v15 = vpop.f32.mrf.mxu1 }
 0x49a   : > { %7004 = vmatmul.msk.f32.gmra.mxu3 %vm2149_vm4, %v3897_v45  ;;  %v3560_v45 = vadd.f32 %v9475_v27, %v10934_v28  ;;  %v10946_v28 = vld [vmem:[#allocation69_spill] sm:$0xff] }
 0x49b   : > { %v9827_v44 = vadd.f32 %v9659_v18, %v10946_v28 }
 0x49c   : > { %7051 = vmatmul.msk.f32.gmra.mxu1 %vm2149_vm4, %v4444_v5  ;;  %v10935_v5 = vld [vmem:[#allocation31_spill] sm:$0xff] }
 0x49e   : > { %6972 = vmatmul.msk.f32.gmra.mxu2 %vm2149_vm4, %v3614_v4  ;;  %7036 = vmatmul.msk.f32.gmra.mxu0 %vm2149_vm4, %v4179_v24  ;;  %v3561_v24 = vadd.f32 %v9491_v60, %v10935_v5  ;;  %v10947_v5 = vld [vmem:[#allocation72_spill] sm:$0xff] }
 0x49f   : > { %v9831_v14 = vadd.f32 %v9673_v26, %v10947_v5  ;;  %v4124_v26 = vadd.f32 %v9725_v39, %v3841_v59  ;;  %v3845_v39 = vadd.f32 %v3773_v41, %v3563_v38 }
 0x4a0   : > { %v3843_v43 = vadd.f32 %v3767_v23, %v3561_v24  ;;  %v3779_v24 = vpop.f32.mrf.mxu2 }
 0x4a1   : > { %v9770_v21 = vpop.f32.mrf.mxu1  ;;  %v9860_v38 = vadd.f32 %v9754_v61, %v4124_v26 }
 0x4a4   : > { %7052 = vmatmul.msk.f32.gmra.mxu1 %vm2149_vm4, %v9591_v57  ;;  %v10936_v57 = vld [vmem:[#allocation60_spill] sm:$0xff] }
 0x4a5   : > { %v3562_v4 = vadd.f32 %v9508_v2, %v10936_v57  ;;  %v10941_v2 = vld [vmem:[#allocation63_spill] sm:$0xff]  ;;  %v4335_v57 = vpop.f32.mrf.mxu0 }
 0x4a7   : > { %v3844_v8 = vadd.f32 %v3770_v53, %v3562_v4 }
 0x4a9   : > { %v4584_v13 = vpop.f32.mrf.mxu1 }
 0x4aa   : > { %v4680_v35 = vadd.f32 %v4584_v13, %v9597_v48  ;;  %v10940_v48 = vld [vmem:[#allocation66_spill] sm:$0xff]  ;;  %v9805_v13 = vadd.f32 %v9585_v31, %v10941_v2  ;;  %v3842_v31 = vadd.f32 %v9730_v11, %v3560_v45  ;;  %v9836_v11 = vadd.f32 %v9687_v46, %v10948_v30 }
 0x4ab   : > { %v9799_v27 = vadd.f32 %v9568_v56, %v10940_v48  ;;  %v10944_v56 = vld [vmem:[#allocation13_spill] sm:$0xff]  ;;  %v10949_v45 = vld [vmem:[#allocation18_spill] sm:$0xff] }
 0x4ac   : > { %v4716_v60 = vadd.f32 %v9778_v16, %v4680_v35  ;;  %7053 = vmatmul.msk.f32.gmra.mxu1 %vm2149_vm4, %v4446_v36  ;;  %v9818_v22 = vadd.f32 %v9629_v63, %v10944_v56  ;;  %v9822_v36 = vadd.f32 %v9643_v34, %v10945_v17  ;;  %v4059_v63 = vpop.f32.mrf.mxu3  ;;  %v9840_v18 = vadd.f32 %v9699_v47, %v10949_v45  ;;  %v4447_v30 = vld [vmem:[#allocation2 + $0xfa] sm:$0xff] }
 0x4ad   : > { %v4125_v53 = vadd.f32 %v9742_v9, %v3842_v31  ;;  %v4126_v47 = vadd.f32 %v9756_v54, %v3843_v43  ;;  %v4127_v45 = vadd.f32 %v4053_v52, %v3844_v8  ;;  %v3846_v52 = vadd.f32 %v3776_v12, %v3564_v20  ;;  %v4338_v20 = vpop.f32.mrf.mxu0 }
 0x4ae   : > { %v4748_v35 = vmax.f32 %v4716_v60, 0.0  ;;  %10950 = vst [vmem:[#allocation28_spill] sm:$0xff] %v9840_v18 }
 0x4af   : > { %v9867_v43 = vadd.f32 %v9765_v10, %v4125_v53  ;;  %v9875_v8 = vadd.f32 %v9774_v32, %v4126_v47  ;;  %v3847_v32 = vadd.f32 %v3779_v24, %v9795_v29 }
 0x4b0   : > { %v4812_v48 = vrot.slane %v4748_v35, 2  ;;  %v4813_v2 = vrot.slane %v4748_v35, 4  ;;  %v4814_v50 = vrot.slane %v4748_v35, 6  ;;  %v5004_v34 = vsel %vm2152_vm5, %v4748_v35, -inf }
 0x4b1   : > { %v5005_v60 = vrot.slane %v5004_v34, 4  ;;  %v4587_v23 = vpop.f32.mrf.mxu1 }
 0x4b2   : > { %v5011_v4 = vsel %vm2152_vm5, %v4812_v48, -inf  ;;  %v5018_v56 = vsel %vm2152_vm5, %v4813_v2, -inf  ;;  %v5025_v17 = vsel %vm2152_vm5, %v4814_v50, -inf  ;;  %v4681_v59 = vadd.f32 %v4587_v23, %v9611_v62  ;;  %v10951_v2 = vld [vmem:[#allocation19_spill] sm:$0xff] }
 0x4b3   : > { %v5006_v35 = vmax.f32 %v5004_v34, %v5005_v60  ;;  %v5012_v46 = vrot.slane %v5011_v4, 4  ;;  %v5019_v28 = vrot.slane %v5018_v56, 4  ;;  %v5026_v5 = vrot.slane %v5025_v17, 4 }
 0x4b4   : > { %7054 = vmatmul.msk.f32.gmra.mxu1 %vm2149_vm4, %v4447_v30  ;;  %v9852_v50 = vadd.f32 %v9708_v58, %v10951_v2  ;;  %v9856_v34 = vadd.f32 %v9719_v42, %v9506_v33  ;;  %v4717_v54 = vadd.f32 %v9778_v16, %v4681_v59  ;;  %v9864_v62 = vadd.f32 %v9732_v7, %v9523_v0  ;;  %v4062_v12 = vpop.f32.mrf.mxu3 }
 0x4b5   : > { %v5007_v9 = vrot.slane %v5006_v35, 2  ;;  %v5013_v31 = vmax.f32 %v5011_v4, %v5012_v46  ;;  %v5020_v48 = vmax.f32 %v5018_v56, %v5019_v28  ;;  %v5027_v18 = vmax.f32 %v5025_v17, %v5026_v5  ;;  %v4448_v56 = vld [vmem:[#allocation2 + $0x10a] sm:$0xff]  ;;  %v3782_v17 = vpop.f32.mrf.mxu2 }
 0x4b6   : > { %v9871_v58 = vadd.f32 %v9744_v6, %v9538_v40  ;;  %v4128_v33 = vadd.f32 %v9776_v55, %v3845_v39  ;;  %v4749_v42 = vmax.f32 %v4717_v54, 0.0  ;;  %v9877_v7 = vadd.f32 %v4335_v57, %v4127_v45 }
 0x4b7   : > { %v5014_v41 = vrot.slane %v5013_v31, 2  ;;  %v5008_v61 = vmax.f32 %v5006_v35, %v5007_v9  ;;  %v5021_v26 = vrot.slane %v5020_v48, 2  ;;  %v5028_v60 = vrot.slane %v5027_v18, 2 }
 0x4b8   : > { %v4815_v10 = vrot.slane %v4749_v42, 2  ;;  %v4816_v23 = vrot.slane %v4749_v42, 4  ;;  %v4817_v53 = vrot.slane %v4749_v42, 6  ;;  %v5032_v40 = vsel %vm2152_vm5, %v4749_v42, -inf }
 0x4b9   : > { %v4590_v0 = vpop.f32.mrf.mxu1  ;;  %v9882_v6 = vadd.f32 %v9752_v1, %v9551_v19  ;;  %v4129_v55 = vadd.f32 %v4059_v63, %v3846_v52  ;;  %v5015_v4 = vmax.f32 %v5013_v31, %v5014_v41  ;;  %v5033_v35 = vrot.slane %v5032_v40, 4 }
 0x4ba   : > { %v5039_v57 = vsel %vm2152_vm5, %v4815_v10, -inf  ;;  %v5046_v46 = vsel %vm2152_vm5, %v4816_v23, -inf  ;;  %v5053_v28 = vsel %vm2152_vm5, %v4817_v53, -inf  ;;  %v9891_v5 = vadd.f32 %v9762_v15, %v9566_v3  ;;  %v10955_v10 = vld [vmem:[#allocation46_spill] sm:$0xff]  ;;  %v4341_v53 = vpop.f32.mrf.mxu0 }
 0x4bb   : > { %10952 = vst [vmem:[#allocation29_spill] sm:$0xff] %v9882_v6  ;;  %v5009_v19 = vrot.slane %v5008_v61, 1  ;;  %v5022_v1 = vmax.f32 %v5020_v48, %v5021_v26  ;;  %v5029_v63 = vmax.f32 %v5027_v18, %v5028_v60  ;;  %v5034_v29 = vmax.f32 %v5032_v40, %v5033_v35 }
 0x4bc   : > { %7055 = vmatmul.msk.f32.gmra.mxu1 %vm2149_vm4, %v4448_v56  ;;  %10953 = vst [vmem:[#allocation30_spill] sm:$0xff] %v9891_v5  ;;  %v5040_v24 = vrot.slane %v5039_v57, 4  ;;  %v5047_v30 = vrot.slane %v5046_v46, 4  ;;  %v5054_v47 = vrot.slane %v5053_v28, 4  ;;  %v9893_v45 = vadd.f32 %v4062_v12, %v3847_v32 }
 0x4bd   : > { %v3848_v39 = vadd.f32 %v3782_v17, %v9799_v27  ;;  %v5016_v59 = vrot.slane %v5015_v4, 1  ;;  %v9896_v9 = vadd.f32 %v4338_v20, %v4128_v33  ;;  %v5035_v31 = vrot.slane %v5034_v29, 2 }
 0x4be   : > { %v5041_v2 = vmax.f32 %v5039_v57, %v5040_v24  ;;  %v5048_v54 = vmax.f32 %v5046_v46, %v5047_v30  ;;  %v5055_v52 = vmax.f32 %v5053_v28, %v5054_v47  ;;  %v5010_v3 = vmax.f32 %v5008_v61, %v5009_v19  ;;  %v4065_v61 = vpop.f32.mrf.mxu3 }
 0x4bf   : > { %v5023_v15 = vrot.slane %v5022_v1, 1  ;;  %v5030_v41 = vrot.slane %v5029_v63, 1  ;;  %v4682_v18 = vadd.f32 %v4590_v0, %v9625_v25  ;;  %v5036_v42 = vmax.f32 %v5034_v29, %v5035_v31  ;;  %v10956_v0 = vld [vmem:[#allocation21_spill] sm:$0xff] }
 0x4c0   : > { %v5042_v26 = vrot.slane %v5041_v2, 2  ;;  %v5049_v60 = vrot.slane %v5048_v54, 2  ;;  %v5056_v12 = vrot.slane %v5055_v52, 2  ;;  %v9901_v27 = vadd.f32 %v9770_v21, %v9581_v51 }
 0x4c1   : > { %v4593_v48 = vpop.f32.mrf.mxu1  ;;  %v5017_v33 = vmax.f32 %v5015_v4, %v5016_v59  ;;  %v4718_v20 = vadd.f32 %v9778_v16, %v4682_v18  ;;  %v5037_v40 = vrot.slane %v5036_v42, 1  ;;  %v9907_v17 = vadd.f32 %v4065_v61, %v3848_v39 }
 0x4c2   : > { %10954 = vst [vmem:[#allocation33_spill] sm:$0xff] %v9901_v27  ;;  %v4683_v23 = vadd.f32 %v4593_v48, %v10955_v10  ;;  %v5043_v32 = vmax.f32 %v5041_v2, %v5042_v26  ;;  %v5050_v56 = vmax.f32 %v5048_v54, %v5049_v60  ;;  %v5057_v25 = vmax.f32 %v5055_v52, %v5056_v12  ;;  %v4450_v26 = vld [vmem:[#allocation2 + $0x122] sm:$0xff] }
 0x4c3   : > { %v5024_v35 = vmax.f32 %v5022_v1, %v5023_v15  ;;  %v4750_v57 = vmax.f32 %v4718_v20, 0.0  ;;  %v9909_v51 = vadd.f32 %v4341_v53, %v4129_v55  ;;  %v5031_v21 = vmax.f32 %v5029_v63, %v5030_v41 }
 0x4c4   : > { %7056 = vmatmul.msk.f32.gmra.mxu1 %vm2149_vm4, %v10956_v0  ;;  %v9912_v4 = vsel %vm2149_vm4, %v5010_v3, -inf  ;;  %v5044_v46 = vrot.slane %v5043_v32, 1  ;;  %v4719_v28 = vadd.f32 %v9778_v16, %v4683_v23  ;;  %v9917_v47 = vsel %vm2149_vm4, %v5017_v33, -inf }
 0x4c5   : > { %v4818_v19 = vrot.slane %v4750_v57, 2  ;;  %v4819_v29 = vrot.slane %v4750_v57, 4  ;;  %v4820_v24 = vrot.slane %v4750_v57, 6  ;;  %v5060_v30 = vsel %vm2152_vm5, %v4750_v57, -inf }
 0x4c6   : > { %v5038_v39 = vmax.f32 %v5036_v42, %v5037_v40  ;;  %v5051_v1 = vrot.slane %v5050_v56, 1  ;;  %v5058_v59 = vrot.slane %v5057_v25, 1  ;;  %v5061_v55 = vrot.slane %v5060_v30, 4 }
 0x4c7   : > { %v5067_v63 = vsel %vm2152_vm5, %v4818_v19, -inf  ;;  %v5074_v31 = vsel %vm2152_vm5, %v4819_v29, -inf  ;;  %v5081_v2 = vsel %vm2152_vm5, %v4820_v24, -inf  ;;  %v9923_v54 = vsel %vm2149_vm4, %v5024_v35, -inf }
 0x4c8   : > { %v9926_v52 = vsel %vm2149_vm4, %v5031_v21, -inf  ;;  %v9928_v3 = vmax.f32 %v5043_v32, %v5044_v46  ;;  %v5068_v15 = vrot.slane %v5067_v63, 4  ;;  %v5062_v41 = vmax.f32 %v5060_v30, %v5061_v55 }
 0x4c9   : > { %v5075_v18 = vrot.slane %v5074_v31, 4  ;;  %v5082_v48 = vrot.slane %v5081_v2, 4  ;;  %v4751_v42 = vmax.f32 %v4719_v28, 0.0  ;;  %v9930_v60 = vmax.f32 %v5050_v56, %v5051_v1  ;;  %v9939_v57 = vpop.f32.mrf.mxu1  ;;  %v9941_v28 = vpop.f32.mrf.mxu2 }
 0x4ca   : > { %v9932_v12 = vmax.f32 %v5057_v25, %v5058_v59  ;;  %v9935_v33 = vsel %vm2149_vm4, %v5038_v39, -inf  ;;  %v5069_v20 = vmax.f32 %v5067_v63, %v5068_v15  ;;  %v5063_v10 = vrot.slane %v5062_v41, 2 }
 0x4cb   : > { %v5076_v23 = vmax.f32 %v5074_v31, %v5075_v18  ;;  %v5083_v53 = vmax.f32 %v5081_v2, %v5082_v48  ;;  %v4821_v61 = vrot.slane %v4751_v42, 2  ;;  %v4822_v32 = vrot.slane %v4751_v42, 4 }
 0x4cc   : > { %7057 = vmatmul.msk.f32.gmra.mxu1 %vm2149_vm4, %v4450_v26  ;;  %v5070_v40 = vrot.slane %v5069_v20, 2  ;;  %v4823_v0 = vrot.slane %v4751_v42, 6  ;;  %v5088_v35 = vsel %vm2152_vm5, %v4751_v42, -inf  ;;  %v5064_v56 = vmax.f32 %v5062_v41, %v5063_v10  ;;  %v4451_v26 = vld [vmem:[#allocation2 + $0x12a] sm:$0xff] }
 0x4cd   : > { %v5077_v25 = vrot.slane %v5076_v23, 2  ;;  %v5084_v21 = vrot.slane %v5083_v53, 2  ;;  %v5089_v46 = vrot.slane %v5088_v35, 4  ;;  %v5095_v29 = vsel %vm2152_vm5, %v4821_v61, -inf }
 0x4ce   : > { %v5071_v19 = vmax.f32 %v5069_v20, %v5070_v40  ;;  %v5102_v24 = vsel %vm2152_vm5, %v4822_v32, -inf  ;;  %v5109_v30 = vsel %vm2152_vm5, %v4823_v0, -inf  ;;  %v5065_v39 = vrot.slane %v5064_v56, 1 }
 0x4cf   : > { %v5078_v1 = vmax.f32 %v5076_v23, %v5077_v25  ;;  %v5085_v59 = vmax.f32 %v5083_v53, %v5084_v21  ;;  %v5090_v55 = vmax.f32 %v5088_v35, %v5089_v46  ;;  %v5096_v31 = vrot.slane %v5095_v29, 4 }
 0x4d0   : > { %v5072_v63 = vrot.slane %v5071_v19, 1  ;;  %v5103_v2 = vrot.slane %v5102_v24, 4  ;;  %v5110_v15 = vrot.slane %v5109_v30, 4  ;;  %v5066_v41 = vmax.f32 %v5064_v56, %v5065_v39 }
 0x4d1   : > { %v5079_v18 = vrot.slane %v5078_v1, 1  ;;  %v5086_v48 = vrot.slane %v5085_v59, 1  ;;  %v5091_v42 = vrot.slane %v5090_v55, 2  ;;  %v5097_v10 = vmax.f32 %v5095_v29, %v5096_v31 }
 0x4d2   : > { %v5073_v20 = vmax.f32 %v5071_v19, %v5072_v63  ;;  %v5104_v61 = vmax.f32 %v5102_v24, %v5103_v2  ;;  %v5111_v40 = vmax.f32 %v5109_v30, %v5110_v15  ;;  %v5901_v32 = vsel %vm2149_vm4, %v5066_v41, -inf  ;;  %v3788_v15 = vpop.f32.mrf.mxu2 }
 0x4d3   : > { %v5080_v23 = vmax.f32 %v5078_v1, %v5079_v18  ;;  %v5087_v53 = vmax.f32 %v5085_v59, %v5086_v48  ;;  %v5092_v0 = vmax.f32 %v5090_v55, %v5091_v42  ;;  %v5902_v35 = vmax.f32 %v9912_v4, %v5901_v32  ;;  %v4599_v55 = vpop.f32.mrf.mxu1 }
 0x4d4   : > { %7058 = vmatmul.msk.f32.gmra.mxu1 %vm2149_vm4, %v4451_v26  ;;  %v5904_v56 = vsel %vm2149_vm4, %v5073_v20, -inf  ;;  %v5098_v25 = vrot.slane %v5097_v10, 2  ;;  %v5105_v21 = vrot.slane %v5104_v61, 2  ;;  %v5112_v2 = vrot.slane %v5111_v40, 2 }
 0x4d5   : > { %v5905_v46 = vmax.f32 %v9917_v47, %v5904_v56  ;;  %v5907_v19 = vsel %vm2149_vm4, %v5080_v23, -inf  ;;  %v5910_v29 = vsel %vm2149_vm4, %v5087_v53, -inf  ;;  %v5093_v24 = vrot.slane %v5092_v0, 1 }
 0x4d6   : > { %v5908_v30 = vmax.f32 %v9923_v54, %v5907_v19  ;;  %v5911_v39 = vmax.f32 %v9926_v52, %v5910_v29  ;;  %v6092_v1 = vpack.c.bf16 %v5902_v35, %v5902_v35  ;;  %v5099_v59 = vmax.f32 %v5097_v10, %v5098_v25  ;;  %v4452_v54 = vld [vmem:[#allocation2 + $0x13a] sm:$0xff] }
 0x4d7   : > { %v6093_v4 = vpack.c.bf16 %v5905_v46, %v5905_v46  ;;  %v5094_v63 = vmax.f32 %v5092_v0, %v5093_v24  ;;  %v5106_v31 = vmax.f32 %v5104_v61, %v5105_v21  ;;  %v5113_v20 = vmax.f32 %v5111_v40, %v5112_v2 }
 0x4d8   : > { %v6094_v41 = vpack.c.bf16 %v5908_v30, %v5908_v30  ;;  %v6095_v47 = vpack.c.bf16 %v5911_v39, %v5911_v39  ;;  %v6220_v18 = vunpack.c.l.b16 %v6092_v1  ;;  %v5100_v48 = vrot.slane %v5099_v59, 1 }
 0x4d9   : > { %v6221_v42 = vunpack.c.l.b16 %v6093_v4  ;;  %v5107_v26 = vrot.slane %v5106_v31, 1  ;;  %v5913_v23 = vsel %vm2149_vm4, %v5094_v63, -inf  ;;  %v5915_v52 = vsel %vm2149_vm4, %v9928_v3, -inf  ;;  %v9965_v3 = vpop.f32.mrf.mxu3 }
 0x4da   : > { %v6222_v10 = vunpack.c.l.b16 %v6094_v41  ;;  %v5101_v53 = vmax.f32 %v5099_v59, %v5100_v48  ;;  %v5914_v32 = vmax.f32 %v9935_v33, %v5913_v23  ;;  %v6223_v61 = vunpack.c.l.b16 %v6095_v47  ;;  %v10957_v59 = vld [vmem:[#allocation22_spill] sm:$0xff]  ;;  %v9987_v23 = vpop.f32.mrf.mxu2 }
 0x4db   : > { %v6285_v0 = vsel %vm6284_vm6, %v6221_v42, %v6220_v18  ;;  %v5108_v35 = vmax.f32 %v5106_v31, %v5107_v26  ;;  %v5114_v56 = vrot.slane %v5113_v20, 1  ;;  %v5918_v40 = vsel %vm2149_vm4, %v9930_v60, -inf  ;;  %v10958_v31 = vld [vmem:[#allocation23_spill] sm:$0xff]  ;;  %v9977_v42 = vpop.f32.mrf.mxu1 }
 0x4dc   : > { %7059 = vmatmul.msk.f32.gmra.mxu1 %vm2149_vm4, %v4452_v54  ;;  %v6287_v25 = vsel %vm6286_vm7, %v6222_v10, %v6285_v0  ;;  %v5916_v21 = vsel %vm2149_vm4, %v5101_v53, -inf  ;;  %v6096_v46 = vpack.c.bf16 %v5914_v32, %v5914_v32  ;;  %v5921_v30 = vsel %vm2149_vm4, %v9932_v12, -inf }
 0x4dd   : > { %v6289_v19 = vsel %vm6288_vm8, %v6223_v61, %v6287_v25  ;;  %v5115_v33 = vmax.f32 %v5113_v20, %v5114_v56  ;;  %v5917_v29 = vmax.f32 %v5915_v52, %v5916_v21  ;;  %v5919_v24 = vsel %vm2149_vm4, %v5108_v35, -inf  ;;  %v4453_v20 = vld [vmem:[#allocation2 + $0x142] sm:$0xff] }
 0x4de   : > { %v5920_v39 = vmax.f32 %v5918_v40, %v5919_v24  ;;  %v6224_v1 = vunpack.c.l.b16 %v6096_v46  ;;  %v4684_v60 = vadd.f32 %v9939_v57, %v10957_v59  ;;  %v4685_v2 = vadd.f32 %v4599_v55, %v10958_v31 }
 0x4df   : > { %v5922_v4 = vsel %vm2149_vm4, %v5115_v33, -inf  ;;  %v6097_v63 = vpack.c.bf16 %v5917_v29, %v5917_v29  ;;  %v9981_v12 = vadd.f32 %v9941_v28, %v9805_v13  ;;  %v9985_v55 = vadd.f32 %v3788_v15, %v9809_v37 }
 0x4e0   : > { %v5923_v41 = vmax.f32 %v5921_v30, %v5922_v4  ;;  %v6098_v47 = vpack.c.bf16 %v5920_v39, %v5920_v39  ;;  %v6291_v18 = vsel %vm6290_vm9, %v6224_v1, %v6289_v19  ;;  %v4720_v48 = vadd.f32 %v9778_v16, %v4684_v60 }
 0x4e1   : > { %v6225_v57 = vunpack.c.l.b16 %v6097_v63  ;;  %v4721_v26 = vadd.f32 %v9778_v16, %v4685_v2  ;;  %v4071_v19 = vpop.f32.mrf.mxu3 }
 0x4e2   : > { %v6099_v54 = vpack.c.bf16 %v5923_v41, %v5923_v41  ;;  %v6226_v52 = vunpack.c.l.b16 %v6098_v47  ;;  %v4752_v10 = vmax.f32 %v4720_v48, 0.0  ;;  %v4454_v41 = vld [vmem:[#allocation2 + $0x152] sm:$0xff] }
 0x4e3   : > { %v6293_v53 = vsel %vm6292_vm10, %v6225_v57, %v6291_v18  ;;  %v4753_v13 = vmax.f32 %v4721_v26, 0.0  ;;  %v4605_v26 = vpop.f32.mrf.mxu1 }
 0x4e4   : > { %7060 = vmatmul.msk.f32.gmra.mxu1 %vm2149_vm4, %v4453_v20  ;;  %v6227_v28 = vunpack.c.l.b16 %v6099_v54  ;;  %v6295_v32 = vsel %vm6294_vm11, %v6226_v52, %v6293_v53  ;;  %v4824_v61 = vrot.slane %v4752_v10, 2  ;;  %v4825_v0 = vrot.slane %v4752_v10, 4  ;;  %v3794_v53 = vpop.f32.mrf.mxu2 }
 0x4e5   : > { %v4826_v37 = vrot.slane %v4752_v10, 6  ;;  %v5116_v15 = vsel %vm2152_vm5, %v4752_v10, -inf  ;;  %v4827_v35 = vrot.slane %v4753_v13, 2  ;;  %v4828_v56 = vrot.slane %v4753_v13, 4 }
 0x4e6   : > { %v6297_v40 = vsel %vm6296_vm12, %v6227_v28, %v6295_v32  ;;  %v5117_v25 = vrot.slane %v5116_v15, 4  ;;  %v5123_v21 = vsel %vm2152_vm5, %v4824_v61, -inf  ;;  %v5130_v46 = vsel %vm2152_vm5, %v4825_v0, -inf }
 0x4e7   : > { %v6347_v33 = vpack.c.b16 %v6297_v40, %v6297_v40  ;;  %v5124_v29 = vrot.slane %v5123_v21, 4  ;;  %v5131_v24 = vrot.slane %v5130_v46, 4  ;;  %v5137_v30 = vsel %vm2152_vm5, %v4826_v37, -inf }
 0x4e8   : > { %v5118_v39 = vmax.f32 %v5116_v15, %v5117_v25  ;;  %v5138_v1 = vrot.slane %v5137_v30, 4  ;;  %v4829_v59 = vrot.slane %v4753_v13, 6  ;;  %v5144_v60 = vsel %vm2152_vm5, %v4753_v13, -inf }
 0x4e9   : > { %6364 = vst.msk [vmem:[%s9997_s30] sm:$0xf] %vm6363_vm13, %v6347_v33  ;;  %v5125_v4 = vmax.f32 %v5123_v21, %v5124_v29  ;;  %v5132_v63 = vmax.f32 %v5130_v46, %v5131_v24  ;;  %v5145_v31 = vrot.slane %v5144_v60, 4  ;;  %v5151_v2 = vsel %vm2152_vm5, %v4827_v35, -inf }
 0x4ea   : > { %v5119_v47 = vrot.slane %v5118_v39, 2  ;;  %v5139_v18 = vmax.f32 %v5137_v30, %v5138_v1  ;;  %v5152_v48 = vrot.slane %v5151_v2, 4  ;;  %v5158_v57 = vsel %vm2152_vm5, %v4828_v56, -inf }
 0x4eb   : > { %v5126_v20 = vrot.slane %v5125_v4, 2  ;;  %v5133_v54 = vrot.slane %v5132_v63, 2  ;;  %v5146_v52 = vmax.f32 %v5144_v60, %v5145_v31  ;;  %v5159_v10 = vrot.slane %v5158_v57, 4 }
 0x4ec   : > { %7061 = vmatmul.msk.f32.gmra.mxu1 %vm2149_vm4, %v4454_v41  ;;  %v5120_v13 = vmax.f32 %v5118_v39, %v5119_v47  ;;  %v5140_v28 = vrot.slane %v5139_v18, 2  ;;  %v5153_v32 = vmax.f32 %v5151_v2, %v5152_v48  ;;  %v5165_v61 = vsel %vm2152_vm5, %v4829_v59, -inf  ;;  %v10959_v39 = vld [vmem:[#allocation26_spill] sm:$0xff] }
 0x4ed   : > { %v5127_v0 = vmax.f32 %v5125_v4, %v5126_v20  ;;  %v5134_v37 = vmax.f32 %v5132_v63, %v5133_v54  ;;  %v5147_v15 = vrot.slane %v5146_v52, 2  ;;  %v5160_v35 = vmax.f32 %v5158_v57, %v5159_v10  ;;  %v10016_v4 = vpop.f32.mrf.mxu3  ;;  %v4455_v47 = vld [vmem:[#allocation2 + $0x15a] sm:$0xff] }
 0x4ee   : > { %v5121_v40 = vrot.slane %v5120_v13, 1  ;;  %v5141_v25 = vmax.f32 %v5139_v18, %v5140_v28  ;;  %v5154_v56 = vrot.slane %v5153_v32, 2  ;;  %v5166_v21 = vrot.slane %v5165_v61, 4 }
 0x4ef   : > { %v5128_v46 = vrot.slane %v5127_v0, 1  ;;  %v5135_v33 = vrot.slane %v5134_v37, 1  ;;  %v5148_v29 = vmax.f32 %v5146_v52, %v5147_v15  ;;  %v5161_v24 = vrot.slane %v5160_v35, 2  ;;  %v10034_v15 = vpop.f32.mrf.mxu2 }
 0x4f0   : > { %v5142_v30 = vrot.slane %v5141_v25, 1  ;;  %v5155_v1 = vmax.f32 %v5153_v32, %v5154_v56  ;;  %v5167_v60 = vmax.f32 %v5165_v61, %v5166_v21  ;;  %v4686_v31 = vadd.f32 %v9977_v42, %v10959_v39  ;;  %v4608_v32 = vpop.f32.mrf.mxu1 }
 0x4f1   : > { %v10014_v59 = vadd.f32 %v9965_v3, %v9981_v12  ;;  %v5122_v63 = vmax.f32 %v5120_v13, %v5121_v40  ;;  %v5149_v2 = vrot.slane %v5148_v29, 1  ;;  %v5162_v41 = vmax.f32 %v5160_v35, %v5161_v24 }
 0x4f2   : > { %v5129_v18 = vmax.f32 %v5127_v0, %v5128_v46  ;;  %v5136_v48 = vmax.f32 %v5134_v37, %v5135_v33  ;;  %v5156_v57 = vrot.slane %v5155_v1, 1  ;;  %v5168_v20 = vrot.slane %v5167_v60, 2 }
 0x4f3   : > { %v10020_v54 = vadd.f32 %v4071_v19, %v9985_v55  ;;  %v5143_v42 = vmax.f32 %v5141_v25, %v5142_v30  ;;  %v5150_v52 = vmax.f32 %v5148_v29, %v5149_v2  ;;  %v5163_v10 = vrot.slane %v5162_v41, 1  ;;  %v10960_v19 = vld [vmem:[#allocation25_spill] sm:$0xff] }
 0x4f4   : > { %7062 = vmatmul.msk.f32.gmra.mxu1 %vm2149_vm4, %v4455_v47  ;;  %v10024_v3 = vadd.f32 %v9987_v23, %v9813_v49  ;;  %v5157_v12 = vmax.f32 %v5155_v1, %v5156_v57  ;;  %v5169_v13 = vmax.f32 %v5167_v60, %v5168_v20  ;;  %v4722_v28 = vadd.f32 %v9778_v16, %v4686_v31  ;;  %v4456_v60 = vld [vmem:[#allocation2 + $0x16a] sm:$0xff] }
 0x4f5   : > { %v10028_v61 = vadd.f32 %v3794_v53, %v9818_v22  ;;  %v10031_v0 = vsel %vm2149_vm4, %v5122_v63, -inf  ;;  %v5164_v55 = vmax.f32 %v5162_v41, %v5163_v10  ;;  %v4687_v37 = vadd.f32 %v4605_v26, %v10960_v19  ;;  %v10065_v2 = vpop.f32.mrf.mxu3 }
 0x4f6   : > { %v10037_v35 = vsel %vm2149_vm4, %v5129_v18, -inf  ;;  %v10040_v49 = vsel %vm2149_vm4, %v5136_v48, -inf  ;;  %v5170_v23 = vrot.slane %v5169_v13, 1  ;;  %v4754_v40 = vmax.f32 %v4722_v28, 0.0 }
 0x4f7   : > { %v10043_v25 = vsel %vm2149_vm4, %v5143_v42, -inf  ;;  %v10046_v22 = vsel %vm2149_vm4, %v5150_v52, -inf  ;;  %v4723_v53 = vadd.f32 %v9778_v16, %v4687_v37  ;;  %v4688_v26 = vadd.f32 %v4608_v32, %v9860_v38 }
 0x4f8   : > { %v10051_v56 = vsel %vm2149_vm4, %v5157_v12, -inf  ;;  %v4830_v21 = vrot.slane %v4754_v40, 2  ;;  %v4831_v46 = vrot.slane %v4754_v40, 4  ;;  %v4832_v33 = vrot.slane %v4754_v40, 6 }
 0x4f9   : > { %v10053_v29 = vmax.f32 %v5169_v13, %v5170_v23  ;;  %v10056_v24 = vsel %vm2149_vm4, %v5164_v55, -inf  ;;  %v5172_v30 = vsel %vm2152_vm5, %v4754_v40, -inf  ;;  %v4755_v1 = vmax.f32 %v4723_v53, 0.0 }
 0x4fa   : > { %v5173_v39 = vrot.slane %v5172_v30, 4  ;;  %v5179_v31 = vsel %vm2152_vm5, %v4830_v21, -inf  ;;  %v5186_v38 = vsel %vm2152_vm5, %v4831_v46, -inf  ;;  %v10062_v63 = vadd.f32 %v9778_v16, %v4688_v26  ;;  %v10072_v21 = vpop.f32.mrf.mxu2 }
 0x4fb   : > { %v5180_v41 = vrot.slane %v5179_v31, 4  ;;  %v5187_v47 = vrot.slane %v5186_v38, 4  ;;  %v5193_v18 = vsel %vm2152_vm5, %v4832_v33, -inf  ;;  %v4833_v48 = vrot.slane %v4755_v1, 2 }
 0x4fc   : > { %7063 = vmatmul.msk.f32.gmra.mxu1 %vm2149_vm4, %v4456_v60  ;;  %v5174_v57 = vmax.f32 %v5172_v30, %v5173_v39  ;;  %v5194_v20 = vrot.slane %v5193_v18, 4  ;;  %v4834_v42 = vrot.slane %v4755_v1, 4  ;;  %v4835_v52 = vrot.slane %v4755_v1, 6 }
 0x4fd   : > { %v5181_v10 = vmax.f32 %v5179_v31, %v5180_v41  ;;  %v5188_v12 = vmax.f32 %v5186_v38, %v5187_v47  ;;  %v5200_v13 = vsel %vm2152_vm5, %v4755_v1, -inf  ;;  %v5207_v28 = vsel %vm2152_vm5, %v4833_v48, -inf  ;;  %v4457_v41 = vld [vmem:[#allocation2 + $0x172] sm:$0xff] }
 0x4fe   : > { %v5175_v32 = vrot.slane %v5174_v57, 2  ;;  %v5195_v55 = vmax.f32 %v5193_v18, %v5194_v20  ;;  %v5201_v19 = vrot.slane %v5200_v13, 4  ;;  %v5208_v37 = vrot.slane %v5207_v28, 4 }
 0x4ff   : > { %v5182_v23 = vrot.slane %v5181_v10, 2  ;;  %v5189_v40 = vrot.slane %v5188_v12, 2  ;;  %v5214_v53 = vsel %vm2152_vm5, %v4834_v42, -inf  ;;  %v5221_v26 = vsel %vm2152_vm5, %v4835_v52, -inf }
 0x500   : > { %v5176_v46 = vmax.f32 %v5174_v57, %v5175_v32  ;;  %v5196_v33 = vrot.slane %v5195_v55, 2  ;;  %v5202_v30 = vmax.f32 %v5200_v13, %v5201_v19  ;;  %v5209_v60 = vmax.f32 %v5207_v28, %v5208_v37  ;;  %v10075_v28 = vpop.f32.mrf.mxu3 }
 0x501   : > { %v5183_v39 = vmax.f32 %v5181_v10, %v5182_v23  ;;  %v5190_v1 = vmax.f32 %v5188_v12, %v5189_v40  ;;  %v5215_v31 = vrot.slane %v5214_v53, 4  ;;  %v5222_v38 = vrot.slane %v5221_v26, 4 }
 0x502   : > { %v5177_v47 = vrot.slane %v5176_v46, 1  ;;  %v5197_v18 = vmax.f32 %v5195_v55, %v5196_v33  ;;  %v5203_v48 = vrot.slane %v5202_v30, 2  ;;  %v5210_v20 = vrot.slane %v5209_v60, 2 }
 0x503   : > { %v5184_v42 = vrot.slane %v5183_v39, 1  ;;  %v5191_v27 = vrot.slane %v5190_v1, 1  ;;  %v5216_v52 = vmax.f32 %v5214_v53, %v5215_v31  ;;  %v5223_v5 = vmax.f32 %v5221_v26, %v5222_v38 }
 0x504   : > { %7064 = vmatmul.msk.f32.gmra.mxu1 %vm2149_vm4, %v4457_v41  ;;  %v5178_v6 = vmax.f32 %v5176_v46, %v5177_v47  ;;  %v5198_v57 = vrot.slane %v5197_v18, 1  ;;  %v5204_v32 = vmax.f32 %v5202_v30, %v5203_v48  ;;  %v5211_v13 = vmax.f32 %v5209_v60, %v5210_v20  ;;  %v4458_v47 = vld [vmem:[#allocation2 + $0x182] sm:$0xff] }
 0x505   : > { %v5185_v10 = vmax.f32 %v5183_v39, %v5184_v42  ;;  %v5192_v12 = vmax.f32 %v5190_v1, %v5191_v27  ;;  %v5217_v19 = vrot.slane %v5216_v52, 2  ;;  %v5224_v37 = vrot.slane %v5223_v5, 2 }
 0x506   : > { %v5199_v23 = vmax.f32 %v5197_v18, %v5198_v57  ;;  %v5925_v55 = vsel %vm2149_vm4, %v5178_v6, -inf  ;;  %v5205_v40 = vrot.slane %v5204_v32, 1  ;;  %v5212_v33 = vrot.slane %v5211_v13, 1  ;;  %v10085_v18 = vpop.f32.mrf.mxu2 }
 0x507   : > { %v5926_v41 = vmax.f32 %v10031_v0, %v5925_v55  ;;  %v5928_v53 = vsel %vm2149_vm4, %v5185_v10, -inf  ;;  %v5931_v26 = vsel %vm2149_vm4, %v5192_v12, -inf  ;;  %v5218_v46 = vmax.f32 %v5216_v52, %v5217_v19 }
 0x508   : > { %v5929_v30 = vmax.f32 %v10037_v35, %v5928_v53  ;;  %v5932_v60 = vmax.f32 %v10040_v49, %v5931_v26  ;;  %v5934_v27 = vsel %vm2149_vm4, %v5199_v23, -inf  ;;  %v5206_v39 = vmax.f32 %v5204_v32, %v5205_v40  ;;  %v4611_v32 = vpop.f32.mrf.mxu1 }
 0x509   : > { %v5935_v1 = vmax.f32 %v10043_v25, %v5934_v27  ;;  %v6100_v31 = vpack.c.bf16 %v5926_v41, %v5926_v41  ;;  %v5213_v6 = vmax.f32 %v5211_v13, %v5212_v33  ;;  %v5219_v38 = vrot.slane %v5218_v46, 1 }
 0x50a   : > { %v6101_v0 = vpack.c.bf16 %v5929_v30, %v5929_v30  ;;  %v6102_v48 = vpack.c.bf16 %v5932_v60, %v5932_v60  ;;  %v5225_v20 = vmax.f32 %v5223_v5, %v5224_v37  ;;  %v5937_v42 = vsel %vm2149_vm4, %v5206_v39, -inf }
 0x50b   : > { %v6103_v35 = vpack.c.bf16 %v5935_v1, %v5935_v1  ;;  %v6228_v49 = vunpack.c.l.b16 %v6100_v31  ;;  %v5220_v52 = vmax.f32 %v5218_v46, %v5219_v38  ;;  %v5938_v57 = vmax.f32 %v10046_v22, %v5937_v42  ;;  %v10096_v22 = vpop.f32.mrf.mxu3 }
 0x50c   : > { %7065 = vmatmul.msk.f32.gmra.mxu1 %vm2149_vm4, %v4458_v47  ;;  %v6229_v25 = vunpack.c.l.b16 %v6101_v0  ;;  %v6230_v10 = vunpack.c.l.b16 %v6102_v48  ;;  %v5226_v13 = vrot.slane %v5225_v20, 1  ;;  %v5940_v12 = vsel %vm2149_vm4, %v5213_v6, -inf  ;;  %v4459_v6 = vld [vmem:[#allocation2 + $0x18a] sm:$0xff] }
 0x50d   : > { %v6231_v19 = vunpack.c.l.b16 %v6103_v35  ;;  %v5941_v23 = vmax.f32 %v10051_v56, %v5940_v12  ;;  %v5943_v5 = vsel %vm2149_vm4, %v5220_v52, -inf  ;;  %v6104_v37 = vpack.c.bf16 %v5938_v57, %v5938_v57 }
 0x50e   : > { %v6298_v55 = vsel %vm6284_vm6, %v6229_v25, %v6228_v49  ;;  %v5227_v40 = vmax.f32 %v5225_v20, %v5226_v13  ;;  %v5944_v33 = vmax.f32 %v10056_v24, %v5943_v5  ;;  %v4756_v41 = vmax.f32 %v10062_v63, 0.0  ;;  %v3806_v49 = vpop.f32.mrf.mxu2  ;;  %v4344_v13 = vpop.f32.mrf.mxu0 }
 0x50f   : > { %v5945_v53 = vsel %vm2149_vm4, %v10053_v29, -inf  ;;  %v6299_v26 = vsel %vm6286_vm7, %v6230_v10, %v6298_v55  ;;  %v6105_v46 = vpack.c.bf16 %v5941_v23, %v5941_v23  ;;  %v6232_v30 = vunpack.c.l.b16 %v6104_v37 }
 0x510   : > { %v6300_v56 = vsel %vm6288_vm8, %v6231_v19, %v6299_v26  ;;  %v5946_v60 = vsel %vm2149_vm4, %v5227_v40, -inf  ;;  %v6106_v27 = vpack.c.bf16 %v5944_v33, %v5944_v33  ;;  %v4836_v39 = vrot.slane %v4756_v41, 2  ;;  %v4614_v37 = vpop.f32.mrf.mxu1 }
 0x511   : > { %v5947_v1 = vmax.f32 %v5945_v53, %v5946_v60  ;;  %v6233_v31 = vunpack.c.l.b16 %v6105_v46  ;;  %v6301_v24 = vsel %vm6290_vm9, %v6232_v30, %v6300_v56  ;;  %v4837_v63 = vrot.slane %v4756_v41, 4 }
 0x512   : > { %v6234_v38 = vunpack.c.l.b16 %v6106_v27  ;;  %v4838_v47 = vrot.slane %v4756_v41, 6  ;;  %v5228_v29 = vsel %vm2152_vm5, %v4756_v41, -inf  ;;  %v5235_v0 = vsel %vm2152_vm5, %v4836_v39, -inf }
 0x513   : > { %v6107_v48 = vpack.c.bf16 %v5947_v1, %v5947_v1  ;;  %v6302_v20 = vsel %vm6292_vm10, %v6233_v31, %v6301_v24  ;;  %v5229_v42 = vrot.slane %v5228_v29, 4  ;;  %v5236_v35 = vrot.slane %v5235_v0, 4 }
 0x514   : > { %7066 = vmatmul.msk.f32.gmra.mxu1 %vm2149_vm4, %v4459_v6  ;;  %v6303_v52 = vsel %vm6294_vm11, %v6234_v38, %v6302_v20  ;;  %v5242_v57 = vsel %vm2152_vm5, %v4837_v63, -inf  ;;  %v5249_v25 = vsel %vm2152_vm5, %v4838_v47, -inf  ;;  %v4689_v10 = vadd.f32 %v4611_v32, %v9867_v43 }
 0x515   : > { %v6235_v12 = vunpack.c.l.b16 %v6107_v48  ;;  %v5230_v19 = vmax.f32 %v5228_v29, %v5229_v42  ;;  %v5237_v23 = vmax.f32 %v5235_v0, %v5236_v35  ;;  %v5243_v5 = vrot.slane %v5242_v57, 4  ;;  %v10143_v29 = vld [vmem:[#allocation8] ss:$0 sm:$0xff] }
 0x516   : > { %v10114_v55 = vadd.f32 %v10016_v4, %v10024_v3  ;;  %v5250_v40 = vrot.slane %v5249_v25, 4  ;;  %v4725_v33 = vadd.f32 %v9778_v16, %v4689_v10  ;;  %v10118_v41 = vadd.f32 %v4344_v13, %v9893_v45  ;;  %v4086_v45 = vpop.f32.mrf.mxu3  ;;  %v3809_v0 = vpop.f32.mrf.mxu2 }
 0x517   : > { %v3853_v43 = vadd.f32 %v10034_v15, %v9822_v36  ;;  %v6304_v32 = vsel %vm6296_vm12, %v6235_v12, %v6303_v52  ;;  %v5231_v53 = vrot.slane %v5230_v19, 2  ;;  %v5244_v26 = vmax.f32 %v5242_v57, %v5243_v5 }
 0x518   : > { %v6348_v46 = vpack.c.b16 %v6304_v32, %v6304_v32  ;;  %v5238_v30 = vrot.slane %v5237_v23, 2  ;;  %v5251_v56 = vmax.f32 %v5249_v25, %v5250_v40  ;;  %v4757_v60 = vmax.f32 %v4725_v33, 0.0  ;;  %v4617_v57 = vpop.f32.mrf.mxu1 }
 0x519   : > { %v10125_v4 = vadd.f32 %v10065_v2, %v10028_v61  ;;  %v3854_v16 = vadd.f32 %v10072_v21, %v9827_v44  ;;  %v5245_v3 = vrot.slane %v5244_v26, 2  ;;  %v4690_v27 = vadd.f32 %v4614_v37, %v9875_v8 }
 0x51a   : > { %6365 = vst.msk [vmem:[%s9997_s30 + $0x4] sm:$0xf] %vm6363_vm13, %v6348_v46  ;;  %v5252_v36 = vrot.slane %v5251_v56, 2  ;;  %v4839_v15 = vrot.slane %v4757_v60, 2  ;;  %v4840_v39 = vrot.slane %v4757_v60, 4  ;;  %v4841_v1 = vrot.slane %v4757_v60, 6 }
 0x51b   : > { %v10133_v31 = vadd.f32 %v10075_v28, %v3853_v43  ;;  %v3855_v61 = vadd.f32 %v10085_v18, %v9831_v14  ;;  %v5232_v2 = vmax.f32 %v5230_v19, %v5231_v53  ;;  %v5256_v24 = vsel %vm2152_vm5, %v4757_v60, -inf  ;;  %v10961_v19 = vld [vmem:[#allocation28_spill] sm:$0xff] }
 0x51c   : > { %v5239_v44 = vmax.f32 %v5237_v23, %v5238_v30  ;;  %v5257_v21 = vrot.slane %v5256_v24, 4  ;;  %v5263_v63 = vsel %vm2152_vm5, %v4839_v15, -inf  ;;  %v5270_v8 = vsel %vm2152_vm5, %v4840_v39, -inf }
 0x51d   : > { %v10141_v6 = vadd.f32 %v10096_v22, %v3854_v16  ;;  %v5246_v38 = vmax.f32 %v5244_v26, %v5245_v3  ;;  %v5264_v47 = vrot.slane %v5263_v63, 4  ;;  %v4726_v28 = vadd.f32 %v10143_v29, %v4690_v27 }
 0x51e   : > { %v5253_v14 = vmax.f32 %v5251_v56, %v5252_v36  ;;  %v5258_v18 = vmax.f32 %v5256_v24, %v5257_v21  ;;  %v5271_v48 = vrot.slane %v5270_v8, 4  ;;  %v5277_v20 = vsel %vm2152_vm5, %v4841_v1, -inf  ;;  %v10155_v26 = vpop.f32.mrf.mxu3 }
 0x51f   : > { %v10147_v42 = vadd.f32 %v4086_v45, %v3855_v61  ;;  %v10150_v35 = vadd.f32 %v3806_v49, %v9836_v11  ;;  %v5233_v52 = vrot.slane %v5232_v2, 1  ;;  %v5265_v22 = vmax.f32 %v5263_v63, %v5264_v47 }
 0x520   : > { %v5240_v25 = vrot.slane %v5239_v44, 1  ;;  %v5259_v10 = vrot.slane %v5258_v18, 2  ;;  %v5272_v13 = vmax.f32 %v5270_v8, %v5271_v48  ;;  %v5278_v12 = vrot.slane %v5277_v20, 4 }
 0x521   : > { %v10153_v23 = vadd.f32 %v3809_v0, %v10961_v19  ;;  %v5247_v5 = vrot.slane %v5246_v38, 1  ;;  %v5266_v37 = vrot.slane %v5265_v22, 2  ;;  %v4758_v40 = vmax.f32 %v4726_v28, 0.0 }
 0x522   : > { %v5254_v33 = vrot.slane %v5253_v14, 1  ;;  %v5260_v43 = vmax.f32 %v5258_v18, %v5259_v10  ;;  %v5273_v32 = vrot.slane %v5272_v13, 2  ;;  %v5279_v53 = vmax.f32 %v5277_v20, %v5278_v12 }
 0x523   : > { %v5234_v11 = vmax.f32 %v5232_v2, %v5233_v52  ;;  %v4842_v49 = vrot.slane %v4758_v40, 2  ;;  %v4843_v46 = vrot.slane %v4758_v40, 4  ;;  %v4844_v30 = vrot.slane %v4758_v40, 6 }
 0x524   : > { %v5241_v56 = vmax.f32 %v5239_v44, %v5240_v25  ;;  %v5267_v60 = vmax.f32 %v5265_v22, %v5266_v37  ;;  %v5280_v16 = vrot.slane %v5279_v53, 2  ;;  %v5284_v45 = vsel %vm2152_vm5, %v4758_v40, -inf }
 0x525   : > { %v5248_v3 = vmax.f32 %v5246_v38, %v5247_v5  ;;  %v5285_v27 = vrot.slane %v5284_v45, 4  ;;  %v5291_v36 = vsel %vm2152_vm5, %v4842_v49, -inf  ;;  %v5298_v15 = vsel %vm2152_vm5, %v4843_v46, -inf }
 0x526   : > { %v5255_v39 = vmax.f32 %v5253_v14, %v5254_v33  ;;  %v5261_v1 = vrot.slane %v5260_v43, 1  ;;  %v5274_v61 = vmax.f32 %v5272_v13, %v5273_v32  ;;  %v5292_v24 = vrot.slane %v5291_v36, 4  ;;  %v4620_v14 = vpop.f32.mrf.mxu1 }
 0x527   : > { %v5948_v2 = vsel %vm2149_vm4, %v5234_v11, -inf  ;;  %v5286_v21 = vmax.f32 %v5284_v45, %v5285_v27  ;;  %v5299_v63 = vrot.slane %v5298_v15, 4  ;;  %v5305_v44 = vsel %vm2152_vm5, %v4844_v30, -inf  ;;  %v10169_v11 = vpop.f32.mrf.mxu2 }
 0x528   : > { %v5951_v8 = vsel %vm2149_vm4, %v5241_v56, -inf  ;;  %v5268_v47 = vrot.slane %v5267_v60, 1  ;;  %v5281_v28 = vmax.f32 %v5279_v53, %v5280_v16  ;;  %v5293_v38 = vmax.f32 %v5291_v36, %v5292_v24  ;;  %v10167_v53 = vpop.f32.mrf.mxu3 }
 0x529   : > { %v5954_v0 = vsel %vm2149_vm4, %v5248_v3, -inf  ;;  %v5287_v18 = vrot.slane %v5286_v21, 2  ;;  %v5300_v48 = vmax.f32 %v5298_v15, %v5299_v63  ;;  %v5306_v20 = vrot.slane %v5305_v44, 4  ;;  %v4460_v63 = vld [vmem:[#allocation2 + $0x19a] sm:$0xff] }
 0x52a   : > { %v5957_v52 = vsel %vm2149_vm4, %v5255_v39, -inf  ;;  %v5262_v22 = vmax.f32 %v5260_v43, %v5261_v1  ;;  %v5275_v25 = vrot.slane %v5274_v61, 1  ;;  %v5294_v10 = vrot.slane %v5293_v38, 2  ;;  %7067 = vmatmul.msk.f32.gmra.mxu1 %vm2149_vm4, %v4460_v63 }
 0x52b   : > { %v5288_v13 = vmax.f32 %v5286_v21, %v5287_v18  ;;  %v5301_v12 = vrot.slane %v5300_v48, 2  ;;  %v5307_v19 = vmax.f32 %v5305_v44, %v5306_v20  ;;  %v4691_v5 = vadd.f32 %v4617_v57, %v9877_v7 }
 0x52c   : > { %v5269_v37 = vmax.f32 %v5267_v60, %v5268_v47  ;;  %v5282_v40 = vrot.slane %v5281_v28, 1  ;;  %v5295_v33 = vmax.f32 %v5293_v38, %v5294_v10  ;;  %v4692_v32 = vadd.f32 %v4620_v14, %v9896_v9 }
 0x52d   : > { %v5289_v49 = vrot.slane %v5288_v13, 1  ;;  %v5302_v46 = vmax.f32 %v5300_v48, %v5301_v12  ;;  %v5308_v30 = vrot.slane %v5307_v19, 2  ;;  %v4727_v43 = vadd.f32 %v10143_v29, %v4691_v5 }
 0x52e   : > { %v10172_v56 = vmax.f32 %v5274_v61, %v5275_v25  ;;  %v10175_v16 = vsel %vm2149_vm4, %v5262_v22, -inf  ;;  %v5296_v7 = vrot.slane %v5295_v33, 1  ;;  %v4728_v57 = vadd.f32 %v10143_v29, %v4692_v32 }
 0x52f   : > { %v5290_v60 = vmax.f32 %v5288_v13, %v5289_v49  ;;  %v5303_v45 = vrot.slane %v5302_v46, 1  ;;  %v5309_v9 = vmax.f32 %v5307_v19, %v5308_v30  ;;  %v4759_v3 = vmax.f32 %v4727_v43, 0.0  ;;  %v10195_v49 = vpop.f32.mrf.mxu2 }
 0x530   : > { %v10178_v27 = vmax.f32 %v5281_v28, %v5282_v40  ;;  %v10181_v36 = vsel %vm2149_vm4, %v5269_v37, -inf  ;;  %v5297_v15 = vmax.f32 %v5295_v33, %v5296_v7  ;;  %v10183_v39 = vmax.f32 %v4728_v57, 0.0 }
 0x531   : > { %v5304_v1 = vmax.f32 %v5302_v46, %v5303_v45  ;;  %v5310_v61 = vrot.slane %v5309_v9, 1  ;;  %v5949_v24 = vsel %vm2149_vm4, %v5290_v60, -inf  ;;  %v4845_v21 = vrot.slane %v4759_v3, 2 }
 0x532   : > { %v5950_v44 = vmax.f32 %v5948_v2, %v5949_v24  ;;  %v5952_v47 = vsel %vm2149_vm4, %v5297_v15, -inf  ;;  %v4846_v38 = vrot.slane %v4759_v3, 4  ;;  %v4847_v18 = vrot.slane %v4759_v3, 6 }
 0x533   : > { %v5311_v28 = vmax.f32 %v5309_v9, %v5310_v61  ;;  %v5953_v48 = vmax.f32 %v5951_v8, %v5952_v47  ;;  %v5955_v20 = vsel %vm2149_vm4, %v5304_v1, -inf  ;;  %v5312_v14 = vsel %vm2152_vm5, %v4759_v3, -inf  ;;  %v10193_v8 = vpop.f32.mrf.mxu3 }
 0x534   : > { %v5956_v22 = vmax.f32 %v5954_v0, %v5955_v20  ;;  %v6108_v25 = vpack.c.bf16 %v5950_v44, %v5950_v44  ;;  %v5313_v10 = vrot.slane %v5312_v14, 4  ;;  %v5319_v13 = vsel %vm2152_vm5, %v4845_v21, -inf }
 0x535   : > { %v5958_v12 = vsel %vm2149_vm4, %v5311_v28, -inf  ;;  %v6109_v2 = vpack.c.bf16 %v5953_v48, %v5953_v48  ;;  %v5320_v19 = vrot.slane %v5319_v13, 4  ;;  %v5326_v5 = vsel %vm2152_vm5, %v4846_v38, -inf }
 0x536   : > { %v5959_v37 = vmax.f32 %v5957_v52, %v5958_v12  ;;  %v6110_v40 = vpack.c.bf16 %v5956_v22, %v5956_v22  ;;  %v6236_v33 = vunpack.c.l.b16 %v6108_v25  ;;  %v5314_v32 = vmax.f32 %v5312_v14, %v5313_v10 }
 0x537   : > { %v6237_v46 = vunpack.c.l.b16 %v6109_v2  ;;  %v5321_v0 = vmax.f32 %v5319_v13, %v5320_v19  ;;  %v5327_v30 = vrot.slane %v5326_v5, 4  ;;  %v5333_v43 = vsel %vm2152_vm5, %v4847_v18, -inf }
 0x538   : > { %v6111_v7 = vpack.c.bf16 %v5959_v37, %v5959_v37  ;;  %v6238_v57 = vunpack.c.l.b16 %v6110_v40  ;;  %v5315_v60 = vrot.slane %v5314_v32, 2  ;;  %v5334_v45 = vrot.slane %v5333_v43, 4 }
 0x539   : > { %v6305_v9 = vsel %vm6284_vm6, %v6237_v46, %v6236_v33  ;;  %v5322_v3 = vrot.slane %v5321_v0, 2  ;;  %v5328_v52 = vmax.f32 %v5326_v5, %v5327_v30  ;;  %v4848_v15 = vrot.slane %v10183_v39, 2  ;;  %v4623_v5 = vpop.f32.mrf.mxu1  ;;  %v10208_v46 = vpop.f32.mrf.mxu0 }
 0x53a   : > { %v6239_v1 = vunpack.c.l.b16 %v6111_v7  ;;  %v6306_v61 = vsel %vm6286_vm7, %v6238_v57, %v6305_v9  ;;  %v5316_v24 = vmax.f32 %v5314_v32, %v5315_v60  ;;  %v5335_v21 = vmax.f32 %v5333_v43, %v5334_v45  ;;  %v3818_v60 = vpop.f32.mrf.mxu2 }
 0x53b   : > { %v5323_v63 = vmax.f32 %v5321_v0, %v5322_v3  ;;  %v5329_v44 = vrot.slane %v5328_v52, 2  ;;  %v4849_v47 = vrot.slane %v10183_v39, 4  ;;  %v4850_v38 = vrot.slane %v10183_v39, 6  ;;  %v4098_v57 = vpop.f32.mrf.mxu3 }
 0x53c   : > { %v6307_v18 = vsel %vm6288_vm8, %v6239_v1, %v6306_v61  ;;  %v5317_v28 = vrot.slane %v5316_v24, 1  ;;  %v5336_v48 = vrot.slane %v5335_v21, 2  ;;  %v5340_v20 = vsel %vm2152_vm5, %v10183_v39, -inf }
 0x53d   : > { %v5324_v14 = vrot.slane %v5323_v63, 1  ;;  %v5330_v22 = vmax.f32 %v5328_v52, %v5329_v44  ;;  %v5341_v25 = vrot.slane %v5340_v20, 4  ;;  %v5347_v10 = vsel %vm2152_vm5, %v4848_v15, -inf }
 0x53e   : > { %v5318_v13 = vmax.f32 %v5316_v24, %v5317_v28  ;;  %v5337_v12 = vmax.f32 %v5335_v21, %v5336_v48  ;;  %v5348_v2 = vrot.slane %v5347_v10, 4  ;;  %v5354_v19 = vsel %vm2152_vm5, %v4849_v47, -inf }
 0x53f   : > { %v5325_v37 = vmax.f32 %v5323_v63, %v5324_v14  ;;  %v5331_v40 = vrot.slane %v5330_v22, 1  ;;  %v5342_v33 = vmax.f32 %v5340_v20, %v5341_v25  ;;  %v5355_v32 = vrot.slane %v5354_v19, 4 }
 0x540   : > { %v5338_v0 = vrot.slane %v5337_v12, 1  ;;  %v5961_v39 = vsel %vm2149_vm4, %v5318_v13, -inf  ;;  %v5349_v30 = vmax.f32 %v5347_v10, %v5348_v2  ;;  %v5361_v43 = vsel %vm2152_vm5, %v4850_v38, -inf }
 0x541   : > { %v5966_v7 = vsel %vm2149_vm4, %v10172_v56, -inf  ;;  %v5332_v45 = vmax.f32 %v5330_v22, %v5331_v40  ;;  %v5962_v9 = vmax.f32 %v10175_v16, %v5961_v39  ;;  %v5964_v3 = vsel %vm2149_vm4, %v5325_v37, -inf }
 0x542   : > { %v5969_v52 = vsel %vm2149_vm4, %v10178_v27, -inf  ;;  %v5339_v15 = vmax.f32 %v5337_v12, %v5338_v0  ;;  %v5965_v1 = vmax.f32 %v10181_v36, %v5964_v3  ;;  %v5356_v61 = vmax.f32 %v5354_v19, %v5355_v32 }
 0x543   : > { %v5967_v24 = vsel %vm2149_vm4, %v5332_v45, -inf  ;;  %v6112_v21 = vpack.c.bf16 %v5962_v9, %v5962_v9  ;;  %v5343_v63 = vrot.slane %v5342_v33, 2  ;;  %v5362_v44 = vrot.slane %v5361_v43, 4 }
 0x544   : > { %v5968_v56 = vmax.f32 %v5966_v7, %v5967_v24  ;;  %v5970_v47 = vsel %vm2149_vm4, %v5339_v15, -inf  ;;  %v6113_v38 = vpack.c.bf16 %v5965_v1, %v5965_v1  ;;  %v5350_v28 = vrot.slane %v5349_v30, 2 }
 0x545   : > { %v5971_v16 = vmax.f32 %v5969_v52, %v5970_v47  ;;  %v6240_v48 = vunpack.c.l.b16 %v6112_v21  ;;  %v5357_v20 = vrot.slane %v5356_v61, 2  ;;  %v4693_v14 = vadd.f32 %v4623_v5, %v9909_v51  ;;  %v4626_v51 = vpop.f32.mrf.mxu1 }
 0x546   : > { %v3858_v27 = vadd.f32 %v10169_v11, %v9852_v50  ;;  %v6114_v36 = vpack.c.bf16 %v5968_v56, %v5968_v56  ;;  %v6241_v22 = vunpack.c.l.b16 %v6113_v38  ;;  %v5363_v25 = vmax.f32 %v5361_v43, %v5362_v44 }
 0x547   : > { %v3859_v10 = vadd.f32 %v10195_v49, %v9856_v34  ;;  %v3860_v13 = vadd.f32 %v3818_v60, %v9864_v62  ;;  %v6115_v12 = vpack.c.bf16 %v5971_v16, %v5971_v16  ;;  %v6308_v2 = vsel %vm6290_vm9, %v6240_v48, %v6307_v18  ;;  %v10234_v34 = vpop.f32.mrf.mxu0 }
 0x548   : > { %v6242_v19 = vunpack.c.l.b16 %v6114_v36  ;;  %v6309_v37 = vsel %vm6292_vm10, %v6241_v22, %v6308_v2  ;;  %v5344_v40 = vmax.f32 %v5342_v33, %v5343_v63  ;;  %v5351_v32 = vmax.f32 %v5349_v30, %v5350_v28  ;;  %v3821_v30 = vpop.f32.mrf.mxu2 }
 0x549   : > { %v10231_v50 = vadd.f32 %v10155_v26, %v10150_v35  ;;  %v6243_v11 = vunpack.c.l.b16 %v6115_v12  ;;  %v5358_v5 = vmax.f32 %v5356_v61, %v5357_v20  ;;  %v4729_v0 = vadd.f32 %v10143_v29, %v4693_v14  ;;  %v4101_v35 = vpop.f32.mrf.mxu3 }
 0x54a   : > { %v10238_v62 = vadd.f32 %v10167_v53, %v10153_v23  ;;  %v10241_v49 = vadd.f32 %v10193_v8, %v3858_v27  ;;  %v6310_v18 = vsel %vm6294_vm11, %v6242_v19, %v6309_v37  ;;  %v5364_v33 = vrot.slane %v5363_v25, 2 }
 0x54b   : > { %v10244_v39 = vadd.f32 %v4098_v57, %v3859_v10  ;;  %v6311_v26 = vsel %vm6296_vm12, %v6243_v11, %v6310_v18  ;;  %v4761_v43 = vmax.f32 %v4729_v0, 0.0  ;;  %v4694_v7 = vadd.f32 %v4626_v51, %v10118_v41 }
 0x54c   : > { %v10248_v60 = vadd.f32 %v4101_v35, %v3860_v13  ;;  %v6349_v23 = vpack.c.b16 %v6311_v26, %v6311_v26  ;;  %v5345_v53 = vrot.slane %v5344_v40, 1  ;;  %v5352_v45 = vrot.slane %v5351_v32, 1 }
 0x54d   : > { %v5359_v8 = vrot.slane %v5358_v5, 1  ;;  %v4851_v9 = vrot.slane %v4761_v43, 2  ;;  %v4852_v3 = vrot.slane %v4761_v43, 4  ;;  %v4853_v52 = vrot.slane %v4761_v43, 6  ;;  %v4629_v26 = vpop.f32.mrf.mxu1 }
 0x54e   : > { %6366 = vst.msk [vmem:[%s9997_s30 + $0x8] sm:$0xf] %vm6363_vm13, %v6349_v23  ;;  %v10253_v57 = vadd.f32 %v3821_v30, %v9871_v58  ;;  %v5365_v15 = vmax.f32 %v5363_v25, %v5364_v33  ;;  %v5368_v1 = vsel %vm2152_vm5, %v4761_v43, -inf  ;;  %v4730_v61 = vadd.f32 %v10143_v29, %v4694_v7 }
 0x54f   : > { %v5369_v41 = vrot.slane %v5368_v1, 4  ;;  %v5375_v24 = vsel %vm2152_vm5, %v4851_v9, -inf  ;;  %v5382_v21 = vsel %vm2152_vm5, %v4852_v3, -inf  ;;  %v5389_v63 = vsel %vm2152_vm5, %v4853_v52, -inf }
 0x550   : > { %v5346_v44 = vmax.f32 %v5344_v40, %v5345_v53  ;;  %v5376_v56 = vrot.slane %v5375_v24, 4  ;;  %v5383_v47 = vrot.slane %v5382_v21, 4  ;;  %v5390_v38 = vrot.slane %v5389_v63, 4  ;;  %v4353_v40 = vpop.f32.mrf.mxu0 }
 0x551   : > { %v5353_v28 = vmax.f32 %v5351_v32, %v5352_v45  ;;  %v5360_v16 = vmax.f32 %v5358_v5, %v5359_v8  ;;  %v5370_v58 = vmax.f32 %v5368_v1, %v5369_v41  ;;  %v4762_v48 = vmax.f32 %v4730_v61, 0.0 }
 0x552   : > { %v5366_v20 = vrot.slane %v5365_v15, 1  ;;  %v5377_v14 = vmax.f32 %v5375_v24, %v5376_v56  ;;  %v5384_v27 = vmax.f32 %v5382_v21, %v5383_v47  ;;  %v5391_v36 = vmax.f32 %v5389_v63, %v5390_v38 }
 0x553   : > { %v5371_v22 = vrot.slane %v5370_v58, 2  ;;  %v4854_v25 = vrot.slane %v4762_v48, 2  ;;  %v4855_v10 = vrot.slane %v4762_v48, 4  ;;  %v4856_v13 = vrot.slane %v4762_v48, 6 }
 0x554   : > { %v5378_v12 = vrot.slane %v5377_v14, 2  ;;  %v5385_v2 = vrot.slane %v5384_v27, 2  ;;  %v5392_v19 = vrot.slane %v5391_v36, 2  ;;  %v5396_v37 = vsel %vm2152_vm5, %v4762_v48, -inf }
 0x555   : > { %v5372_v51 = vmax.f32 %v5370_v58, %v5371_v22  ;;  %v5397_v11 = vrot.slane %v5396_v37, 4  ;;  %v5403_v32 = vsel %vm2152_vm5, %v4854_v25, -inf  ;;  %v5410_v5 = vsel %vm2152_vm5, %v4855_v10, -inf }
 0x556   : > { %v5367_v0 = vmax.f32 %v5365_v15, %v5366_v20  ;;  %v5379_v18 = vmax.f32 %v5377_v14, %v5378_v12  ;;  %v5386_v33 = vmax.f32 %v5384_v27, %v5385_v2  ;;  %v5404_v35 = vrot.slane %v5403_v32, 4 }
 0x557   : > { %v5972_v30 = vsel %vm2149_vm4, %v5346_v44, -inf  ;;  %v5398_v43 = vmax.f32 %v5396_v37, %v5397_v11  ;;  %v5411_v7 = vrot.slane %v5410_v5, 4  ;;  %v5417_v23 = vsel %vm2152_vm5, %v4856_v13, -inf }
 0x558   : > { %v5373_v53 = vrot.slane %v5372_v51, 1  ;;  %v5380_v45 = vrot.slane %v5379_v18, 1  ;;  %v5393_v8 = vmax.f32 %v5391_v36, %v5392_v19  ;;  %v5405_v9 = vmax.f32 %v5403_v32, %v5404_v35  ;;  %v10273_v13 = vpop.f32.mrf.mxu0  ;;  %v4461_v19 = vld [vmem:[#allocation2 + $0x1a2] sm:$0xff] }
 0x559   : > { %v5975_v3 = vsel %vm2149_vm4, %v5353_v28, -inf  ;;  %v5399_v52 = vrot.slane %v5398_v43, 2  ;;  %v5412_v1 = vmax.f32 %v5410_v5, %v5411_v7  ;;  %v5418_v61 = vrot.slane %v5417_v23, 4  ;;  %7068 = vmatmul.msk.f32.gmra.mxu1 %vm2149_vm4, %v4461_v19 }
 0x55a   : > { %v5978_v15 = vsel %vm2149_vm4, %v5360_v16, -inf  ;;  %v5981_v41 = vsel %vm2149_vm4, %v5367_v0, -inf  ;;  %v5387_v24 = vrot.slane %v5386_v33, 1  ;;  %v5406_v21 = vrot.slane %v5405_v9, 2 }
 0x55b   : > { %v5400_v63 = vmax.f32 %v5398_v43, %v5399_v52  ;;  %v5413_v44 = vrot.slane %v5412_v1, 2  ;;  %v5419_v56 = vmax.f32 %v5417_v23, %v5418_v61  ;;  %v4413_v47 = vadd.f32 %v10208_v46, %v9907_v17 }
 0x55c   : > { %v5374_v38 = vmax.f32 %v5372_v51, %v5373_v53  ;;  %v5381_v58 = vmax.f32 %v5379_v18, %v5380_v45  ;;  %v5394_v48 = vrot.slane %v5393_v8, 1  ;;  %v5407_v20 = vmax.f32 %v5405_v9, %v5406_v21 }
 0x55d   : > { %v5401_v28 = vrot.slane %v5400_v63, 1  ;;  %v5414_v14 = vmax.f32 %v5412_v1, %v5413_v44  ;;  %v5420_v27 = vrot.slane %v5419_v56, 2  ;;  %v4695_v36 = vadd.f32 %v4629_v26, %v4413_v47 }
 0x55e   : > { %v5388_v22 = vmax.f32 %v5386_v33, %v5387_v24  ;;  %v5408_v16 = vrot.slane %v5407_v20, 1  ;;  %v4414_v25 = vadd.f32 %v10234_v34, %v10014_v59  ;;  %v4415_v10 = vadd.f32 %v4353_v40, %v10020_v54  ;;  %v4632_v59 = vpop.f32.mrf.mxu1 }
 0x55f   : > { %v5402_v12 = vmax.f32 %v5400_v63, %v5401_v28  ;;  %v5415_v2 = vrot.slane %v5414_v14, 1  ;;  %v5421_v17 = vmax.f32 %v5419_v56, %v5420_v27  ;;  %v4731_v46 = vadd.f32 %v10143_v29, %v4695_v36 }
 0x560   : > { %v5395_v37 = vmax.f32 %v5393_v8, %v5394_v48  ;;  %v10277_v51 = vsel %vm2149_vm4, %v5374_v38, -inf  ;;  %v10280_v11 = vsel %vm2149_vm4, %v5381_v58, -inf  ;;  %v5409_v32 = vmax.f32 %v5407_v20, %v5408_v16  ;;  %v10294_v28 = vpop.f32.mrf.mxu0 }
 0x561   : > { %v5416_v54 = vmax.f32 %v5414_v14, %v5415_v2  ;;  %v5422_v34 = vrot.slane %v5421_v17, 1  ;;  %v5973_v40 = vsel %vm2149_vm4, %v5402_v12, -inf  ;;  %v4763_v5 = vmax.f32 %v4731_v46, 0.0 }
 0x562   : > { %v10285_v0 = vsel %vm2149_vm4, %v5388_v22, -inf  ;;  %v5974_v18 = vmax.f32 %v5972_v30, %v5973_v40  ;;  %v5976_v33 = vsel %vm2149_vm4, %v5409_v32, -inf  ;;  %v4696_v35 = vadd.f32 %v4632_v59, %v4414_v25 }
 0x563   : > { %v5423_v26 = vmax.f32 %v5421_v17, %v5422_v34  ;;  %v5977_v43 = vmax.f32 %v5975_v3, %v5976_v33  ;;  %v5979_v7 = vsel %vm2149_vm4, %v5416_v54, -inf  ;;  %v4857_v23 = vrot.slane %v4763_v5, 2 }
 0x564   : > { %v5980_v53 = vmax.f32 %v5978_v15, %v5979_v7  ;;  %v6116_v45 = vpack.c.bf16 %v5974_v18, %v5974_v18  ;;  %v4858_v8 = vrot.slane %v4763_v5, 4  ;;  %v4859_v9 = vrot.slane %v4763_v5, 6 }
 0x565   : > { %v5982_v52 = vsel %vm2149_vm4, %v5423_v26, -inf  ;;  %v6117_v1 = vpack.c.bf16 %v5977_v43, %v5977_v43  ;;  %v5424_v61 = vsel %vm2152_vm5, %v4763_v5, -inf  ;;  %v5431_v24 = vsel %vm2152_vm5, %v4857_v23, -inf }
 0x566   : > { %v5983_v30 = vmax.f32 %v5981_v41, %v5982_v52  ;;  %v6118_v21 = vpack.c.bf16 %v5980_v53, %v5980_v53  ;;  %v6244_v63 = vunpack.c.l.b16 %v6116_v45  ;;  %v5425_v44 = vrot.slane %v5424_v61, 4  ;;  %v4635_v22 = vpop.f32.mrf.mxu1 }
 0x567   : > { %v6245_v56 = vunpack.c.l.b16 %v6117_v1  ;;  %v5432_v3 = vrot.slane %v5431_v24, 4  ;;  %v5438_v47 = vsel %vm2152_vm5, %v4858_v8, -inf  ;;  %v5445_v15 = vsel %vm2152_vm5, %v4859_v9, -inf }
 0x568   : > { %v6119_v38 = vpack.c.bf16 %v5983_v30, %v5983_v30  ;;  %v6246_v58 = vunpack.c.l.b16 %v6118_v21  ;;  %v5426_v48 = vmax.f32 %v5424_v61, %v5425_v44  ;;  %v5439_v20 = vrot.slane %v5438_v47, 4 }
 0x569   : > { %v6312_v14 = vsel %vm6284_vm6, %v6245_v56, %v6244_v63  ;;  %v5433_v27 = vmax.f32 %v5431_v24, %v5432_v3  ;;  %v5446_v36 = vrot.slane %v5445_v15, 4  ;;  %v4732_v41 = vadd.f32 %v10143_v29, %v4696_v35 }
 0x56a   : > { %v6247_v16 = vunpack.c.l.b16 %v6119_v38  ;;  %v6313_v25 = vsel %vm6286_vm7, %v6246_v58, %v6312_v14  ;;  %v5427_v12 = vrot.slane %v5426_v48, 2  ;;  %v5440_v2 = vmax.f32 %v5438_v47, %v5439_v20  ;;  %v4362_v47 = vpop.f32.mrf.mxu0 }
 0x56b   : > { %v5993_v17 = vsel %vm2149_vm4, %v5395_v37, -inf  ;;  %v5434_v46 = vrot.slane %v5433_v27, 2  ;;  %v5447_v19 = vmax.f32 %v5445_v15, %v5446_v36  ;;  %v4764_v32 = vmax.f32 %v4732_v41, 0.0 }
 0x56c   : > { %v6314_v59 = vsel %vm6288_vm8, %v6247_v16, %v6313_v25  ;;  %v5428_v54 = vmax.f32 %v5426_v48, %v5427_v12  ;;  %v5441_v34 = vrot.slane %v5440_v2, 2  ;;  %v4697_v40 = vadd.f32 %v4635_v22, %v4415_v10 }
 0x56d   : > { %v5435_v5 = vmax.f32 %v5433_v27, %v5434_v46  ;;  %v5448_v18 = vrot.slane %v5447_v19, 2  ;;  %v4860_v33 = vrot.slane %v4764_v32, 2  ;;  %v4861_v35 = vrot.slane %v4764_v32, 4 }
 0x56e   : > { %v5429_v26 = vrot.slane %v5428_v54, 1  ;;  %v5442_v43 = vmax.f32 %v5440_v2, %v5441_v34  ;;  %v4862_v7 = vrot.slane %v4764_v32, 6  ;;  %v5452_v23 = vsel %vm2152_vm5, %v4764_v32, -inf  ;;  %v4638_v20 = vpop.f32.mrf.mxu1 }
 0x56f   : > { %v5436_v53 = vrot.slane %v5435_v5, 1  ;;  %v5449_v45 = vmax.f32 %v5447_v19, %v5448_v18  ;;  %v5453_v37 = vrot.slane %v5452_v23, 4  ;;  %v5459_v8 = vsel %vm2152_vm5, %v4860_v33, -inf }
 0x570   : > { %v5430_v9 = vmax.f32 %v5428_v54, %v5429_v26  ;;  %v5443_v52 = vrot.slane %v5442_v43, 1  ;;  %v5460_v1 = vrot.slane %v5459_v8, 4  ;;  %v5466_v61 = vsel %vm2152_vm5, %v4861_v35, -inf }
 0x571   : > { %v5437_v10 = vmax.f32 %v5435_v5, %v5436_v53  ;;  %v5450_v24 = vrot.slane %v5449_v45, 1  ;;  %v5454_v30 = vmax.f32 %v5452_v23, %v5453_v37  ;;  %v5467_v21 = vrot.slane %v5466_v61, 4 }
 0x572   : > { %v5444_v63 = vmax.f32 %v5442_v43, %v5443_v52  ;;  %v5985_v44 = vsel %vm2149_vm4, %v5430_v9, -inf  ;;  %v5461_v56 = vmax.f32 %v5459_v8, %v5460_v1  ;;  %v5473_v3 = vsel %vm2152_vm5, %v4862_v7, -inf }
 0x573   : > { %v5451_v15 = vmax.f32 %v5449_v45, %v5450_v24  ;;  %v5986_v38 = vmax.f32 %v10277_v51, %v5985_v44  ;;  %v5988_v58 = vsel %vm2149_vm4, %v5437_v10, -inf  ;;  %v5455_v48 = vrot.slane %v5454_v30, 2 }
 0x574   : > { %v5989_v14 = vmax.f32 %v10280_v11, %v5988_v58  ;;  %v5991_v27 = vsel %vm2149_vm4, %v5444_v63, -inf  ;;  %v5462_v36 = vrot.slane %v5461_v56, 2  ;;  %v5468_v41 = vmax.f32 %v5466_v61, %v5467_v21 }
 0x575   : > { %v5992_v22 = vmax.f32 %v10285_v0, %v5991_v27  ;;  %v5994_v16 = vsel %vm2149_vm4, %v5451_v15, -inf  ;;  %v6120_v25 = vpack.c.bf16 %v5986_v38, %v5986_v38  ;;  %v5456_v12 = vmax.f32 %v5454_v30, %v5455_v48 }
 0x576   : > { %v5995_v2 = vmax.f32 %v5993_v17, %v5994_v16  ;;  %v6121_v46 = vpack.c.bf16 %v5989_v14, %v5989_v14  ;;  %v5463_v19 = vmax.f32 %v5461_v56, %v5462_v36  ;;  %v5469_v51 = vrot.slane %v5468_v41, 2  ;;  %v4641_v21 = vpop.f32.mrf.mxu1 }
 0x577   : > { %v6122_v32 = vpack.c.bf16 %v5992_v22, %v5992_v22  ;;  %v6248_v54 = vunpack.c.l.b16 %v6120_v25  ;;  %v5457_v34 = vrot.slane %v5456_v12, 1  ;;  %v5474_v5 = vrot.slane %v5473_v3, 4 }
 0x578   : > { %v6123_v18 = vpack.c.bf16 %v5995_v2, %v5995_v2  ;;  %v6249_v11 = vunpack.c.l.b16 %v6121_v46  ;;  %v5464_v33 = vrot.slane %v5463_v19, 1  ;;  %v5470_v35 = vmax.f32 %v5468_v41, %v5469_v51 }
 0x579   : > { %v6250_v26 = vunpack.c.l.b16 %v6122_v32  ;;  %v6315_v43 = vsel %vm6290_vm9, %v6248_v54, %v6314_v59  ;;  %v5475_v0 = vmax.f32 %v5473_v3, %v5474_v5  ;;  %v4416_v7 = vadd.f32 %v10273_v13, %v10114_v55  ;;  %v4365_v55 = vpop.f32.mrf.mxu0 }
 0x57a   : > { %v6251_v23 = vunpack.c.l.b16 %v6123_v18  ;;  %v6316_v17 = vsel %vm6292_vm10, %v6249_v11, %v6315_v43  ;;  %v5458_v53 = vmax.f32 %v5456_v12, %v5457_v34  ;;  %v5471_v45 = vrot.slane %v5470_v35, 1 }
 0x57b   : > { %v6317_v37 = vsel %vm6294_vm11, %v6250_v26, %v6316_v17  ;;  %v5476_v8 = vrot.slane %v5475_v0, 2  ;;  %v4733_v9 = vadd.f32 %v10143_v29, %v4697_v40  ;;  %v4417_v52 = vadd.f32 %v10294_v28, %v10125_v4 }
 0x57c   : > { %v6318_v59 = vsel %vm6296_vm12, %v6251_v23, %v6317_v37  ;;  %v5465_v1 = vmax.f32 %v5463_v19, %v5464_v33  ;;  %v5472_v61 = vmax.f32 %v5470_v35, %v5471_v45  ;;  %v4698_v10 = vadd.f32 %v4638_v20, %v4416_v7 }
 0x57d   : > { %v6350_v13 = vpack.c.b16 %v6318_v59, %v6318_v59  ;;  %v5477_v24 = vmax.f32 %v5475_v0, %v5476_v8  ;;  %v4765_v30 = vmax.f32 %v4733_v9, 0.0  ;;  %v10322_v63 = vadd.f32 %v4362_v47, %v10133_v31 }
 0x57e   : > { %v10325_v44 = vsel %vm2149_vm4, %v5458_v53, -inf  ;;  %v4734_v40 = vadd.f32 %v10143_v29, %v4698_v10  ;;  %v4699_v56 = vadd.f32 %v4641_v21, %v4417_v52  ;;  %v10329_v4 = vadd.f32 %v4365_v55, %v10141_v6 }
 0x57f   : > { %6367 = vst.msk [vmem:[%s9997_s30 + $0xc] sm:$0xf] %vm6363_vm13, %v6350_v13  ;;  %v5478_v28 = vrot.slane %v5477_v24, 1  ;;  %v4863_v3 = vrot.slane %v4765_v30, 2  ;;  %v4864_v15 = vrot.slane %v4765_v30, 4  ;;  %v4865_v38 = vrot.slane %v4765_v30, 6 }
 0x580   : > { %v10334_v58 = vsel %vm2149_vm4, %v5465_v1, -inf  ;;  %v10337_v31 = vsel %vm2149_vm4, %v5472_v61, -inf  ;;  %v5480_v47 = vsel %vm2152_vm5, %v4765_v30, -inf  ;;  %v4766_v48 = vmax.f32 %v4734_v40, 0.0 }
 0x581   : > { %v5481_v20 = vrot.slane %v5480_v47, 4  ;;  %v5487_v14 = vsel %vm2152_vm5, %v4863_v3, -inf  ;;  %v5494_v6 = vsel %vm2152_vm5, %v4864_v15, -inf  ;;  %v4735_v27 = vadd.f32 %v10143_v29, %v4699_v56 }
 0x582   : > { %v5488_v36 = vrot.slane %v5487_v14, 4  ;;  %v5495_v41 = vrot.slane %v5494_v6, 4  ;;  %v5501_v22 = vsel %vm2152_vm5, %v4865_v38, -inf  ;;  %v4866_v16 = vrot.slane %v4766_v48, 2 }
 0x583   : > { %v5479_v25 = vmax.f32 %v5477_v24, %v5478_v28  ;;  %v5482_v12 = vmax.f32 %v5480_v47, %v5481_v20  ;;  %v5502_v2 = vrot.slane %v5501_v22, 4  ;;  %v4867_v46 = vrot.slane %v4766_v48, 4  ;;  %v10349_v20 = vpop.f32.mrf.mxu0 }
 0x584   : > { %v5489_v19 = vmax.f32 %v5487_v14, %v5488_v36  ;;  %v5496_v51 = vmax.f32 %v5494_v6, %v5495_v41  ;;  %v4868_v32 = vrot.slane %v4766_v48, 6  ;;  %v5508_v54 = vsel %vm2152_vm5, %v4766_v48, -inf }
 0x585   : > { %v5483_v34 = vrot.slane %v5482_v12, 2  ;;  %v5503_v5 = vmax.f32 %v5501_v22, %v5502_v2  ;;  %v5509_v18 = vrot.slane %v5508_v54, 4  ;;  %v5515_v11 = vsel %vm2152_vm5, %v4866_v16, -inf  ;;  %v4644_v22 = vpop.f32.mrf.mxu1 }
 0x586   : > { %v5490_v29 = vrot.slane %v5489_v19, 2  ;;  %v5497_v33 = vrot.slane %v5496_v51, 2  ;;  %v5516_v35 = vrot.slane %v5515_v11, 4  ;;  %v5522_v26 = vsel %vm2152_vm5, %v4867_v46, -inf }
 0x587   : > { %v5484_v43 = vmax.f32 %v5482_v12, %v5483_v34  ;;  %v5504_v0 = vrot.slane %v5503_v5, 2  ;;  %v5510_v7 = vmax.f32 %v5508_v54, %v5509_v18  ;;  %v5523_v23 = vrot.slane %v5522_v26, 4 }
 0x588   : > { %v5491_v17 = vmax.f32 %v5489_v19, %v5490_v29  ;;  %v5498_v53 = vmax.f32 %v5496_v51, %v5497_v33  ;;  %v5517_v45 = vmax.f32 %v5515_v11, %v5516_v35  ;;  %v5529_v37 = vsel %vm2152_vm5, %v4868_v32, -inf }
 0x589   : > { %v5485_v8 = vrot.slane %v5484_v43, 1  ;;  %v5505_v9 = vmax.f32 %v5503_v5, %v5504_v0  ;;  %v5511_v52 = vrot.slane %v5510_v7, 2  ;;  %v5524_v59 = vmax.f32 %v5522_v26, %v5523_v23 }
 0x58a   : > { %v5492_v1 = vrot.slane %v5491_v17, 1  ;;  %v5499_v61 = vrot.slane %v5498_v53, 1  ;;  %v5518_v10 = vrot.slane %v5517_v45, 2  ;;  %v5530_v55 = vrot.slane %v5529_v37, 4 }
 0x58b   : > { %v5486_v13 = vmax.f32 %v5484_v43, %v5485_v8  ;;  %v5506_v24 = vrot.slane %v5505_v9, 1  ;;  %v5512_v30 = vmax.f32 %v5510_v7, %v5511_v52  ;;  %v5525_v21 = vrot.slane %v5524_v59, 2 }
 0x58c   : > { %v5493_v40 = vmax.f32 %v5491_v17, %v5492_v1  ;;  %v5500_v56 = vmax.f32 %v5498_v53, %v5499_v61  ;;  %v5519_v28 = vmax.f32 %v5517_v45, %v5518_v10  ;;  %v5531_v3 = vmax.f32 %v5529_v37, %v5530_v55  ;;  %v10375_v55 = vpop.f32.mrf.mxu0 }
 0x58d   : > { %v6005_v15 = vsel %vm2149_vm4, %v5479_v25, -inf  ;;  %v5507_v38 = vmax.f32 %v5505_v9, %v5506_v24  ;;  %v5513_v47 = vrot.slane %v5512_v30, 1  ;;  %v5526_v48 = vmax.f32 %v5524_v59, %v5525_v21 }
 0x58e   : > { %v10352_v14 = vsel %vm2149_vm4, %v5486_v13, -inf  ;;  %v10355_v6 = vsel %vm2149_vm4, %v5493_v40, -inf  ;;  %v5520_v36 = vrot.slane %v5519_v28, 1  ;;  %v5532_v41 = vrot.slane %v5531_v3, 2  ;;  %v4647_v40 = vpop.f32.mrf.mxu1 }
 0x58f   : > { %v10358_v16 = vsel %vm2149_vm4, %v5500_v56, -inf  ;;  %v5514_v12 = vmax.f32 %v5512_v30, %v5513_v47  ;;  %v5527_v2 = vrot.slane %v5526_v48, 1  ;;  %v4767_v25 = vmax.f32 %v4735_v27, 0.0  ;;  %v10377_v30 = vld [vmem:[#allocation8] ss:$0 sm:$0xff] }
 0x590   : > { %v10361_v46 = vsel %vm2149_vm4, %v5507_v38, -inf  ;;  %v5521_v19 = vmax.f32 %v5519_v28, %v5520_v36  ;;  %v5533_v51 = vmax.f32 %v5531_v3, %v5532_v41  ;;  %v4700_v32 = vadd.f32 %v4644_v22, %v10322_v63 }
 0x591   : > { %v5528_v54 = vmax.f32 %v5526_v48, %v5527_v2  ;;  %v5997_v34 = vsel %vm2149_vm4, %v5514_v12, -inf  ;;  %v4869_v5 = vrot.slane %v4767_v25, 2  ;;  %v4870_v18 = vrot.slane %v4767_v25, 4 }
 0x592   : > { %v5534_v11 = vrot.slane %v5533_v51, 1  ;;  %v5998_v29 = vmax.f32 %v10325_v44, %v5997_v34  ;;  %v6000_v33 = vsel %vm2149_vm4, %v5521_v19, -inf  ;;  %v4871_v35 = vrot.slane %v4767_v25, 6 }
 0x593   : > { %v6001_v27 = vmax.f32 %v10334_v58, %v6000_v33  ;;  %v6003_v26 = vsel %vm2149_vm4, %v5528_v54, -inf  ;;  %v5536_v43 = vsel %vm2152_vm5, %v4767_v25, -inf  ;;  %v5543_v0 = vsel %vm2152_vm5, %v4869_v5, -inf }
 0x594   : > { %v5535_v63 = vmax.f32 %v5533_v51, %v5534_v11  ;;  %v6004_v7 = vmax.f32 %v10337_v31, %v6003_v26  ;;  %v6124_v23 = vpack.c.bf16 %v5998_v29, %v5998_v29  ;;  %v5537_v17 = vrot.slane %v5536_v43, 4 }
 0x595   : > { %v6125_v53 = vpack.c.bf16 %v6001_v27, %v6001_v27  ;;  %v5544_v45 = vrot.slane %v5543_v0, 4  ;;  %v5550_v44 = vsel %vm2152_vm5, %v4870_v18, -inf  ;;  %v5557_v37 = vsel %vm2152_vm5, %v4871_v35, -inf }
 0x596   : > { %v6006_v8 = vsel %vm2149_vm4, %v5535_v63, -inf  ;;  %v6126_v58 = vpack.c.bf16 %v6004_v7, %v6004_v7  ;;  %v6252_v9 = vunpack.c.l.b16 %v6124_v23  ;;  %v5538_v52 = vmax.f32 %v5536_v43, %v5537_v17 }
 0x597   : > { %v6007_v59 = vmax.f32 %v6005_v15, %v6006_v8  ;;  %v6253_v1 = vunpack.c.l.b16 %v6125_v53  ;;  %v5545_v61 = vmax.f32 %v5543_v0, %v5544_v45  ;;  %v5551_v10 = vrot.slane %v5550_v44, 4 }
 0x598   : > { %v6254_v31 = vunpack.c.l.b16 %v6126_v58  ;;  %v5539_v13 = vrot.slane %v5538_v52, 2  ;;  %v5558_v24 = vrot.slane %v5557_v37, 4  ;;  %v4736_v21 = vadd.f32 %v10377_v30, %v4700_v32 }
 0x599   : > { %v6127_v56 = vpack.c.bf16 %v6007_v59, %v6007_v59  ;;  %v6319_v28 = vsel %vm6284_vm6, %v6253_v1, %v6252_v9  ;;  %v5546_v3 = vrot.slane %v5545_v61, 2  ;;  %v5552_v38 = vmax.f32 %v5550_v44, %v5551_v10 }
 0x59a   : > { %v6320_v15 = vsel %vm6286_vm7, %v6254_v31, %v6319_v28  ;;  %v5540_v47 = vmax.f32 %v5538_v52, %v5539_v13  ;;  %v5559_v48 = vmax.f32 %v5557_v37, %v5558_v24  ;;  %v4768_v36 = vmax.f32 %v4736_v21, 0.0  ;;  %v4374_v37 = vpop.f32.mrf.mxu0 }
 0x59b   : > { %v6255_v41 = vunpack.c.l.b16 %v6127_v56  ;;  %v5547_v22 = vmax.f32 %v5545_v61, %v5546_v3  ;;  %v5553_v12 = vrot.slane %v5552_v38, 2  ;;  %v4701_v2 = vadd.f32 %v4647_v40, %v10329_v4  ;;  %v3824_v3 = vpop.f32.mrf.mxu2 }
 0x59c   : > { %v5541_v25 = vrot.slane %v5540_v47, 1  ;;  %v5560_v19 = vrot.slane %v5559_v48, 2  ;;  %v4872_v51 = vrot.slane %v4768_v36, 2  ;;  %v4873_v32 = vrot.slane %v4768_v36, 4 }
 0x59d   : > { %v6321_v54 = vsel %vm6288_vm8, %v6255_v41, %v6320_v15  ;;  %v5548_v34 = vrot.slane %v5547_v22, 1  ;;  %v5554_v5 = vmax.f32 %v5552_v38, %v5553_v12  ;;  %v4874_v18 = vrot.slane %v4768_v36, 6 }
 0x59e   : > { %v5542_v11 = vmax.f32 %v5540_v47, %v5541_v25  ;;  %v5561_v29 = vmax.f32 %v5559_v48, %v5560_v19  ;;  %v5564_v33 = vsel %vm2152_vm5, %v4768_v36, -inf  ;;  %v5571_v35 = vsel %vm2152_vm5, %v4872_v51, -inf  ;;  %v10962_v51 = vld [vmem:[#allocation29_spill] sm:$0xff] }
 0x59f   : > { %v5549_v27 = vmax.f32 %v5547_v22, %v5548_v34  ;;  %v5555_v26 = vrot.slane %v5554_v5, 1  ;;  %v5565_v43 = vrot.slane %v5564_v33, 4  ;;  %v5572_v0 = vrot.slane %v5571_v35, 4 }
 0x5a0   : > { %v5562_v4 = vrot.slane %v5561_v29, 1  ;;  %v6009_v63 = vsel %vm2149_vm4, %v5542_v11, -inf  ;;  %v5578_v7 = vsel %vm2152_vm5, %v4873_v32, -inf  ;;  %v5585_v23 = vsel %vm2152_vm5, %v4874_v18, -inf }
 0x5a1   : > { %v5556_v17 = vmax.f32 %v5554_v5, %v5555_v26  ;;  %v6010_v53 = vmax.f32 %v10352_v14, %v6009_v63  ;;  %v6012_v45 = vsel %vm2149_vm4, %v5549_v27, -inf  ;;  %v5566_v44 = vmax.f32 %v5564_v33, %v5565_v43 }
 0x5a2   : > { %v5563_v8 = vmax.f32 %v5561_v29, %v5562_v4  ;;  %v6013_v58 = vmax.f32 %v10355_v6, %v6012_v45  ;;  %v5573_v9 = vmax.f32 %v5571_v35, %v5572_v0  ;;  %v5579_v52 = vrot.slane %v5578_v7, 4 }
 0x5a3   : > { %v6015_v59 = vsel %vm2149_vm4, %v5556_v17, -inf  ;;  %v6128_v1 = vpack.c.bf16 %v6010_v53, %v6010_v53  ;;  %v5567_v61 = vrot.slane %v5566_v44, 2  ;;  %v5586_v10 = vrot.slane %v5585_v23, 4 }
 0x5a4   : > { %v6016_v31 = vmax.f32 %v10358_v16, %v6015_v59  ;;  %v6018_v13 = vsel %vm2149_vm4, %v5563_v8, -inf  ;;  %v6129_v24 = vpack.c.bf16 %v6013_v58, %v6013_v58  ;;  %v5574_v14 = vrot.slane %v5573_v9, 2  ;;  %v4650_v16 = vpop.f32.mrf.mxu1 }
 0x5a5   : > { %v6019_v21 = vmax.f32 %v10361_v46, %v6018_v13  ;;  %v6256_v40 = vunpack.c.l.b16 %v6128_v1  ;;  %v5568_v56 = vmax.f32 %v5566_v44, %v5567_v61  ;;  %v5580_v28 = vmax.f32 %v5578_v7, %v5579_v52 }
 0x5a6   : > { %v6130_v6 = vpack.c.bf16 %v6016_v31, %v6016_v31  ;;  %v6257_v38 = vunpack.c.l.b16 %v6129_v24  ;;  %v5575_v15 = vmax.f32 %v5573_v9, %v5574_v14  ;;  %v5587_v47 = vmax.f32 %v5585_v23, %v5586_v10 }
 0x5a7   : > { %v6131_v48 = vpack.c.bf16 %v6019_v21, %v6019_v21  ;;  %v6322_v36 = vsel %vm6290_vm9, %v6256_v40, %v6321_v54  ;;  %v5569_v41 = vrot.slane %v5568_v56, 1  ;;  %v5581_v22 = vrot.slane %v5580_v28, 2 }
 0x5a8   : > { %v6258_v12 = vunpack.c.l.b16 %v6130_v6  ;;  %v6323_v25 = vsel %vm6292_vm10, %v6257_v38, %v6322_v36  ;;  %v5588_v19 = vrot.slane %v5587_v47, 2  ;;  %v4420_v46 = vadd.f32 %v10349_v20, %v10147_v42  ;;  %v4377_v20 = vpop.f32.mrf.mxu0 }
 0x5a9   : > { %v10401_v32 = vadd.f32 %v3824_v3, %v10962_v51  ;;  %v6259_v34 = vunpack.c.l.b16 %v6131_v48  ;;  %v5582_v5 = vmax.f32 %v5580_v28, %v5581_v22  ;;  %v4737_v18 = vadd.f32 %v10377_v30, %v4701_v2 }
 0x5aa   : > { %v6324_v11 = vsel %vm6294_vm11, %v6258_v12, %v6323_v25  ;;  %v5570_v54 = vmax.f32 %v5568_v56, %v5569_v41  ;;  %v5576_v29 = vrot.slane %v5575_v15, 1  ;;  %v4702_v33 = vadd.f32 %v4650_v16, %v4420_v46 }
 0x5ab   : > { %v6325_v35 = vsel %vm6296_vm12, %v6259_v34, %v6324_v11  ;;  %v5589_v27 = vmax.f32 %v5587_v47, %v5588_v19  ;;  %v4769_v26 = vmax.f32 %v4737_v18, 0.0  ;;  %v4421_v42 = vadd.f32 %v10375_v55, %v10231_v50 }
 0x5ac   : > { %v6351_v43 = vpack.c.b16 %v6325_v35, %v6325_v35  ;;  %v5583_v0 = vrot.slane %v5582_v5, 1  ;;  %v4738_v4 = vadd.f32 %v10377_v30, %v4702_v33  ;;  %v10410_v2 = vadd.f32 %v4374_v37, %v10238_v62  ;;  %v4653_v47 = vpop.f32.mrf.mxu1 }
 0x5ad   : > { %v4875_v63 = vrot.slane %v4769_v26, 2  ;;  %v4876_v7 = vrot.slane %v4769_v26, 4  ;;  %v4877_v23 = vrot.slane %v4769_v26, 6  ;;  %v10413_v17 = vadd.f32 %v4377_v20, %v10241_v49 }
 0x5ae   : > { %6368 = vst.msk [vmem:[%s9997_s30 + $0x10] sm:$0xf] %vm6363_vm13, %v6351_v43  ;;  %v5577_v53 = vmax.f32 %v5575_v15, %v5576_v29  ;;  %v10418_v45 = vsel %vm2149_vm4, %v5570_v54, -inf  ;;  %v5592_v50 = vsel %vm2152_vm5, %v4769_v26, -inf  ;;  %v4770_v55 = vmax.f32 %v4738_v4, 0.0 }
 0x5af   : > { %v5590_v44 = vrot.slane %v5589_v27, 1  ;;  %v5593_v8 = vrot.slane %v5592_v50, 4  ;;  %v5599_v62 = vsel %vm2152_vm5, %v4875_v63, -inf  ;;  %v5606_v37 = vsel %vm2152_vm5, %v4876_v7, -inf }
 0x5b0   : > { %v5584_v58 = vmax.f32 %v5582_v5, %v5583_v0  ;;  %v5600_v9 = vrot.slane %v5599_v62, 4  ;;  %v5607_v52 = vrot.slane %v5606_v37, 4  ;;  %v5613_v49 = vsel %vm2152_vm5, %v4877_v23, -inf }
 0x5b1   : > { %v5594_v59 = vmax.f32 %v5592_v50, %v5593_v8  ;;  %v5614_v1 = vrot.slane %v5613_v49, 4  ;;  %v4878_v61 = vrot.slane %v4770_v55, 2  ;;  %v4879_v10 = vrot.slane %v4770_v55, 4 }
 0x5b2   : > { %v5601_v31 = vmax.f32 %v5599_v62, %v5600_v9  ;;  %v5608_v13 = vmax.f32 %v5606_v37, %v5607_v52  ;;  %v4880_v24 = vrot.slane %v4770_v55, 6  ;;  %v5620_v14 = vsel %vm2152_vm5, %v4770_v55, -inf }
 0x5b3   : > { %v5595_v21 = vrot.slane %v5594_v59, 2  ;;  %v5615_v40 = vmax.f32 %v5613_v49, %v5614_v1  ;;  %v5621_v56 = vrot.slane %v5620_v14, 4  ;;  %v5627_v28 = vsel %vm2152_vm5, %v4878_v61, -inf }
 0x5b4   : > { %v5602_v3 = vrot.slane %v5601_v31, 2  ;;  %v5609_v6 = vrot.slane %v5608_v13, 2  ;;  %v5628_v38 = vrot.slane %v5627_v28, 4  ;;  %v5634_v15 = vsel %vm2152_vm5, %v4879_v10, -inf  ;;  %v4656_v61 = vpop.f32.mrf.mxu1 }
 0x5b5   : > { %v5596_v48 = vmax.f32 %v5594_v59, %v5595_v21  ;;  %v5616_v36 = vrot.slane %v5615_v40, 2  ;;  %v5622_v41 = vmax.f32 %v5620_v14, %v5621_v56  ;;  %v5635_v22 = vrot.slane %v5634_v15, 4 }
 0x5b6   : > { %v5603_v16 = vmax.f32 %v5601_v31, %v5602_v3  ;;  %v5610_v12 = vmax.f32 %v5608_v13, %v5609_v6  ;;  %v5629_v25 = vmax.f32 %v5627_v28, %v5628_v38  ;;  %v5641_v19 = vsel %vm2152_vm5, %v4880_v24, -inf }
 0x5b7   : > { %v5597_v46 = vrot.slane %v5596_v48, 1  ;;  %v5617_v51 = vmax.f32 %v5615_v40, %v5616_v36  ;;  %v5623_v34 = vrot.slane %v5622_v41, 2  ;;  %v5636_v5 = vmax.f32 %v5634_v15, %v5635_v22 }
 0x5b8   : > { %v5591_v18 = vmax.f32 %v5589_v27, %v5590_v44  ;;  %v5604_v11 = vrot.slane %v5603_v16, 1  ;;  %v5630_v54 = vrot.slane %v5629_v25, 2  ;;  %v5642_v29 = vrot.slane %v5641_v19, 4 }
 0x5b9   : > { %v5611_v33 = vrot.slane %v5610_v12, 1  ;;  %v5624_v35 = vmax.f32 %v5622_v41, %v5623_v34  ;;  %v5637_v26 = vrot.slane %v5636_v5, 2  ;;  %v4703_v20 = vadd.f32 %v4653_v47, %v4421_v42 }
 0x5ba   : > { %v5598_v43 = vmax.f32 %v5596_v48, %v5597_v46  ;;  %v5618_v0 = vrot.slane %v5617_v51, 1  ;;  %v5631_v4 = vmax.f32 %v5629_v25, %v5630_v54  ;;  %v5643_v63 = vmax.f32 %v5641_v19, %v5642_v29 }
 0x5bb   : > { %v6023_v7 = vsel %vm2149_vm4, %v5577_v53, -inf  ;;  %v5605_v23 = vmax.f32 %v5603_v16, %v5604_v11  ;;  %v5625_v50 = vrot.slane %v5624_v35, 1  ;;  %v5638_v55 = vmax.f32 %v5636_v5, %v5637_v26  ;;  %v10448_v16 = vpop.f32.mrf.mxu3 }
 0x5bc   : > { %v6026_v8 = vsel %vm2149_vm4, %v5584_v58, -inf  ;;  %v6029_v27 = vsel %vm2149_vm4, %v5591_v18, -inf  ;;  %v5632_v44 = vrot.slane %v5631_v4, 1  ;;  %v5644_v62 = vrot.slane %v5643_v63, 2  ;;  %v10451_v18 = vpop.f32.mrf.mxu0 }
 0x5bd   : > { %v5612_v37 = vmax.f32 %v5610_v12, %v5611_v33  ;;  %v5626_v9 = vmax.f32 %v5624_v35, %v5625_v50  ;;  %v5639_v52 = vrot.slane %v5638_v55, 1  ;;  %v4739_v42 = vadd.f32 %v10377_v30, %v4703_v20 }
 0x5be   : > { %v10432_v49 = vmax.f32 %v5617_v51, %v5618_v0  ;;  %v10435_v59 = vsel %vm2149_vm4, %v5598_v43, -inf  ;;  %v5633_v53 = vmax.f32 %v5631_v4, %v5632_v44  ;;  %v5645_v1 = vmax.f32 %v5643_v63, %v5644_v62 }
 0x5bf   : > { %v10438_v10 = vsel %vm2149_vm4, %v5605_v23, -inf  ;;  %v5640_v58 = vmax.f32 %v5638_v55, %v5639_v52  ;;  %v6021_v31 = vsel %vm2149_vm4, %v5626_v9, -inf  ;;  %v4771_v13 = vmax.f32 %v4739_v42, 0.0 }
 0x5c0   : > { %v5646_v24 = vrot.slane %v5645_v1, 1  ;;  %v6022_v14 = vmax.f32 %v10418_v45, %v6021_v31  ;;  %v6024_v21 = vsel %vm2149_vm4, %v5633_v53, -inf  ;;  %v4704_v40 = vadd.f32 %v4656_v61, %v10410_v2 }
 0x5c1   : > { %v6025_v56 = vmax.f32 %v6023_v7, %v6024_v21  ;;  %v6027_v28 = vsel %vm2149_vm4, %v5640_v58, -inf  ;;  %v4881_v3 = vrot.slane %v4771_v13, 2  ;;  %v4882_v6 = vrot.slane %v4771_v13, 4 }
 0x5c2   : > { %v5647_v38 = vmax.f32 %v5645_v1, %v5646_v24  ;;  %v6028_v15 = vmax.f32 %v6026_v8, %v6027_v28  ;;  %v6132_v47 = vpack.c.bf16 %v6022_v14, %v6022_v14  ;;  %v4883_v48 = vrot.slane %v4771_v13, 6  ;;  %v3827_v24 = vpop.f32.mrf.mxu2 }
 0x5c3   : > { %v6133_v36 = vpack.c.bf16 %v6025_v56, %v6025_v56  ;;  %v5648_v41 = vsel %vm2152_vm5, %v4771_v13, -inf  ;;  %v5655_v22 = vsel %vm2152_vm5, %v4881_v3, -inf  ;;  %v5662_v45 = vsel %vm2152_vm5, %v4882_v6, -inf  ;;  %v4659_v56 = vpop.f32.mrf.mxu1  ;;  %v4107_v28 = vpop.f32.mrf.mxu3 }
 0x5c4   : > { %v6030_v2 = vsel %vm2149_vm4, %v5647_v38, -inf  ;;  %v6134_v12 = vpack.c.bf16 %v6028_v15, %v6028_v15  ;;  %v6260_v25 = vunpack.c.l.b16 %v6132_v47  ;;  %v5649_v19 = vrot.slane %v5648_v41, 4 }
 0x5c5   : > { %v6031_v46 = vmax.f32 %v6029_v27, %v6030_v2  ;;  %v6261_v51 = vunpack.c.l.b16 %v6133_v36  ;;  %v5656_v34 = vrot.slane %v5655_v22, 4  ;;  %v5663_v5 = vrot.slane %v5662_v45, 4 }
 0x5c6   : > { %v6262_v11 = vunpack.c.l.b16 %v6134_v12  ;;  %v5650_v54 = vmax.f32 %v5648_v41, %v5649_v19  ;;  %v5669_v29 = vsel %vm2152_vm5, %v4883_v48, -inf  ;;  %v4740_v33 = vadd.f32 %v10377_v30, %v4704_v40 }
 0x5c7   : > { %v6135_v35 = vpack.c.bf16 %v6031_v46, %v6031_v46  ;;  %v6326_v26 = vsel %vm6284_vm6, %v6261_v51, %v6260_v25  ;;  %v5657_v20 = vmax.f32 %v5655_v22, %v5656_v34  ;;  %v5664_v43 = vmax.f32 %v5662_v45, %v5663_v5  ;;  %v4383_v22 = vpop.f32.mrf.mxu0 }
 0x5c8   : > { %v6327_v0 = vsel %vm6286_vm7, %v6262_v11, %v6326_v26  ;;  %v5651_v4 = vrot.slane %v5650_v54, 2  ;;  %v5670_v63 = vrot.slane %v5669_v29, 4  ;;  %v4772_v7 = vmax.f32 %v4740_v33, 0.0 }
 0x5c9   : > { %v6038_v23 = vsel %vm2149_vm4, %v5612_v37, -inf  ;;  %v6263_v50 = vunpack.c.l.b16 %v6135_v35  ;;  %v5658_v55 = vrot.slane %v5657_v20, 2  ;;  %v5665_v8 = vrot.slane %v5664_v43, 2 }
 0x5ca   : > { %v5652_v27 = vmax.f32 %v5650_v54, %v5651_v4  ;;  %v5671_v44 = vmax.f32 %v5669_v29, %v5670_v63  ;;  %v4884_v62 = vrot.slane %v4772_v7, 2  ;;  %v4885_v9 = vrot.slane %v4772_v7, 4  ;;  %v10963_v63 = vld [vmem:[#allocation30_spill] sm:$0xff] }
 0x5cb   : > { %v6328_v52 = vsel %vm6288_vm8, %v6263_v50, %v6327_v0  ;;  %v5659_v42 = vmax.f32 %v5657_v20, %v5658_v55  ;;  %v5666_v53 = vmax.f32 %v5664_v43, %v5665_v8  ;;  %v4886_v1 = vrot.slane %v4772_v7, 6 }
 0x5cc   : > { %v5653_v61 = vrot.slane %v5652_v27, 1  ;;  %v5672_v58 = vrot.slane %v5671_v44, 2  ;;  %v5676_v31 = vsel %vm2152_vm5, %v4772_v7, -inf  ;;  %v5683_v13 = vsel %vm2152_vm5, %v4884_v62, -inf }
 0x5cd   : > { %v5660_v37 = vrot.slane %v5659_v42, 1  ;;  %v5667_v14 = vrot.slane %v5666_v53, 1  ;;  %v5677_v21 = vrot.slane %v5676_v31, 4  ;;  %v5684_v40 = vrot.slane %v5683_v13, 4 }
 0x5ce   : > { %v5654_v3 = vmax.f32 %v5652_v27, %v5653_v61  ;;  %v5673_v6 = vmax.f32 %v5671_v44, %v5672_v58  ;;  %v5690_v38 = vsel %vm2152_vm5, %v4885_v9, -inf  ;;  %v5697_v15 = vsel %vm2152_vm5, %v4886_v1, -inf  ;;  %v4662_v1 = vpop.f32.mrf.mxu1 }
 0x5cf   : > { %v5661_v47 = vmax.f32 %v5659_v42, %v5660_v37  ;;  %v5668_v48 = vmax.f32 %v5666_v53, %v5667_v14  ;;  %v5678_v36 = vmax.f32 %v5676_v31, %v5677_v21  ;;  %v5685_v41 = vmax.f32 %v5683_v13, %v5684_v40  ;;  %v4386_v37 = vpop.f32.mrf.mxu0  ;;  %v10964_v14 = vld [vmem:[#allocation33_spill] sm:$0xff] }
 0x5d0   : > { %v5674_v45 = vrot.slane %v5673_v6, 1  ;;  %v6033_v2 = vsel %vm2149_vm4, %v5654_v3, -inf  ;;  %v5691_v12 = vrot.slane %v5690_v38, 4  ;;  %v5698_v25 = vrot.slane %v5697_v15, 4 }
 0x5d1   : > { %v6034_v19 = vmax.f32 %v10435_v59, %v6033_v2  ;;  %v6036_v46 = vsel %vm2149_vm4, %v5661_v47, -inf  ;;  %v6039_v51 = vsel %vm2149_vm4, %v5668_v48, -inf  ;;  %v5679_v34 = vrot.slane %v5678_v36, 2 }
 0x5d2   : > { %v5675_v5 = vmax.f32 %v5673_v6, %v5674_v45  ;;  %v6037_v11 = vmax.f32 %v10438_v10, %v6036_v46  ;;  %v6040_v54 = vmax.f32 %v6038_v23, %v6039_v51  ;;  %v5686_v29 = vrot.slane %v5685_v41, 2  ;;  %v4110_v23 = vpop.f32.mrf.mxu3 }
 0x5d3   : > { %v6041_v33 = vsel %vm2149_vm4, %v10432_v49, -inf  ;;  %v6136_v35 = vpack.c.bf16 %v6034_v19, %v6034_v19  ;;  %v5680_v26 = vmax.f32 %v5678_v36, %v5679_v34  ;;  %v4705_v20 = vadd.f32 %v4659_v56, %v10413_v17  ;;  %v3830_v17 = vpop.f32.mrf.mxu2 }
 0x5d4   : > { %v6042_v43 = vsel %vm2149_vm4, %v5675_v5, -inf  ;;  %v6137_v59 = vpack.c.bf16 %v6037_v11, %v6037_v11  ;;  %v6138_v0 = vpack.c.bf16 %v6040_v54, %v6040_v54  ;;  %v5692_v4 = vmax.f32 %v5690_v38, %v5691_v12 }
 0x5d5   : > { %v3863_v7 = vadd.f32 %v3827_v24, %v10963_v63  ;;  %v6043_v50 = vmax.f32 %v6041_v33, %v6042_v43  ;;  %v6264_v55 = vunpack.c.l.b16 %v6136_v35  ;;  %v5687_v8 = vmax.f32 %v5685_v41, %v5686_v29 }
 0x5d6   : > { %v4144_v10 = vadd.f32 %v10448_v16, %v10253_v57  ;;  %v6265_v27 = vunpack.c.l.b16 %v6137_v59  ;;  %v6266_v49 = vunpack.c.l.b16 %v6138_v0  ;;  %v5699_v44 = vmax.f32 %v5697_v15, %v5698_v25 }
 0x5d7   : > { %v10476_v62 = vadd.f32 %v4107_v28, %v10401_v32  ;;  %v6139_v9 = vpack.c.bf16 %v6043_v50, %v6043_v50  ;;  %v6329_v42 = vsel %vm6290_vm9, %v6264_v55, %v6328_v52  ;;  %v5681_v53 = vrot.slane %v5680_v26, 1 }
 0x5d8   : > { %v6330_v61 = vsel %vm6292_vm10, %v6265_v27, %v6329_v42  ;;  %v5693_v58 = vrot.slane %v5692_v4, 2  ;;  %v4741_v31 = vadd.f32 %v10377_v30, %v4705_v20  ;;  %v4424_v57 = vadd.f32 %v10451_v18, %v10244_v39  ;;  %v4665_v27 = vpop.f32.mrf.mxu1 }
 0x5d9   : > { %v10483_v16 = vadd.f32 %v4110_v23, %v3863_v7  ;;  %v6267_v13 = vunpack.c.l.b16 %v6139_v9  ;;  %v6331_v32 = vsel %vm6294_vm11, %v6266_v49, %v6330_v61  ;;  %v5688_v24 = vrot.slane %v5687_v8, 1 }
 0x5da   : > { %v10487_v21 = vadd.f32 %v3830_v17, %v10964_v14  ;;  %v5700_v52 = vrot.slane %v5699_v44, 2  ;;  %v4773_v40 = vmax.f32 %v4741_v31, 0.0  ;;  %v4706_v56 = vadd.f32 %v4662_v1, %v4424_v57 }
 0x5db   : > { %v6332_v28 = vsel %vm6296_vm12, %v6267_v13, %v6331_v32  ;;  %v5682_v3 = vmax.f32 %v5680_v26, %v5681_v53  ;;  %v4425_v6 = vadd.f32 %v4383_v22, %v10248_v60  ;;  %v10491_v39 = vadd.f32 %v4386_v37, %v4144_v10 }
 0x5dc   : > { %v6352_v18 = vpack.c.b16 %v6332_v28, %v6332_v28  ;;  %v5694_v38 = vmax.f32 %v5692_v4, %v5693_v58  ;;  %v4887_v15 = vrot.slane %v4773_v40, 2  ;;  %v4888_v47 = vrot.slane %v4773_v40, 4 }
 0x5dd   : > { %v5689_v48 = vmax.f32 %v5687_v8, %v5688_v24  ;;  %v4889_v36 = vrot.slane %v4773_v40, 6  ;;  %v5704_v41 = vsel %vm2152_vm5, %v4773_v40, -inf  ;;  %v4742_v45 = vadd.f32 %v10377_v30, %v4706_v56 }
 0x5de   : > { %6369 = vst.msk [vmem:[%s9997_s30 + $0x14] sm:$0xf] %vm6363_vm13, %v6352_v18  ;;  %v5701_v2 = vmax.f32 %v5699_v44, %v5700_v52  ;;  %v5705_v12 = vrot.slane %v5704_v41, 4  ;;  %v5711_v25 = vsel %vm2152_vm5, %v4887_v15, -inf  ;;  %v5718_v60 = vsel %vm2152_vm5, %v4888_v47, -inf  ;;  %v4389_v52 = vpop.f32.mrf.mxu0 }
 0x5df   : > { %v5712_v22 = vrot.slane %v5711_v25, 4  ;;  %v5719_v19 = vrot.slane %v5718_v60, 4  ;;  %v5725_v46 = vsel %vm2152_vm5, %v4889_v36, -inf  ;;  %v4774_v51 = vmax.f32 %v4742_v45, 0.0 }
 0x5e0   : > { %v5695_v34 = vrot.slane %v5694_v38, 1  ;;  %v10501_v5 = vsel %vm2149_vm4, %v5682_v3, -inf  ;;  %v5706_v11 = vmax.f32 %v5704_v41, %v5705_v12  ;;  %v5726_v54 = vrot.slane %v5725_v46, 4 }
 0x5e1   : > { %v5713_v29 = vmax.f32 %v5711_v25, %v5712_v22  ;;  %v5720_v33 = vmax.f32 %v5718_v60, %v5719_v19  ;;  %v4890_v35 = vrot.slane %v4774_v51, 2  ;;  %v4891_v26 = vrot.slane %v4774_v51, 4 }
 0x5e2   : > { %v5707_v20 = vrot.slane %v5706_v11, 2  ;;  %v5727_v43 = vmax.f32 %v5725_v46, %v5726_v54  ;;  %v4892_v59 = vrot.slane %v4774_v51, 6  ;;  %v5732_v0 = vsel %vm2152_vm5, %v4774_v51, -inf  ;;  %v4668_v54 = vpop.f32.mrf.mxu1 }
 0x5e3   : > { %v5714_v4 = vrot.slane %v5713_v29, 2  ;;  %v5721_v63 = vrot.slane %v5720_v33, 2  ;;  %v5733_v7 = vrot.slane %v5732_v0, 4  ;;  %v5739_v50 = vsel %vm2152_vm5, %v4890_v35, -inf }
 0x5e4   : > { %v5702_v55 = vrot.slane %v5701_v2, 1  ;;  %v5728_v8 = vrot.slane %v5727_v43, 2  ;;  %v5740_v10 = vrot.slane %v5739_v50, 4  ;;  %v5746_v23 = vsel %vm2152_vm5, %v4891_v26, -inf }
 0x5e5   : > { %v5708_v49 = vmax.f32 %v5706_v11, %v5707_v20  ;;  %v5715_v44 = vmax.f32 %v5713_v29, %v5714_v4  ;;  %v5734_v17 = vmax.f32 %v5732_v0, %v5733_v7  ;;  %v5747_v9 = vrot.slane %v5746_v23, 4 }
 0x5e6   : > { %v6047_v42 = vsel %vm2149_vm4, %v5689_v48, -inf  ;;  %v5722_v53 = vmax.f32 %v5720_v33, %v5721_v63  ;;  %v5741_v1 = vmax.f32 %v5739_v50, %v5740_v10  ;;  %v5753_v61 = vsel %vm2152_vm5, %v4892_v59, -inf }
 0x5e7   : > { %v5696_v58 = vmax.f32 %v5694_v38, %v5695_v34  ;;  %v5729_v31 = vmax.f32 %v5727_v43, %v5728_v8  ;;  %v5735_v57 = vrot.slane %v5734_v17, 2  ;;  %v5748_v13 = vmax.f32 %v5746_v23, %v5747_v9 }
 0x5e8   : > { %v5703_v32 = vmax.f32 %v5701_v2, %v5702_v55  ;;  %v5742_v24 = vrot.slane %v5741_v1, 2  ;;  %v5754_v37 = vrot.slane %v5753_v61, 4  ;;  %v4707_v14 = vadd.f32 %v4665_v27, %v4425_v6 }
 0x5e9   : > { %v5709_v40 = vrot.slane %v5708_v49, 1  ;;  %v5716_v56 = vrot.slane %v5715_v44, 1  ;;  %v5736_v28 = vmax.f32 %v5734_v17, %v5735_v57  ;;  %v5749_v3 = vrot.slane %v5748_v13, 2 }
 0x5ea   : > { %v5723_v18 = vrot.slane %v5722_v53, 1  ;;  %v5743_v15 = vmax.f32 %v5741_v1, %v5742_v24  ;;  %v5755_v47 = vmax.f32 %v5753_v61, %v5754_v37  ;;  %v10509_v48 = vadd.f32 %v4389_v52, %v10476_v62 }
 0x5eb   : > { %v6050_v38 = vsel %vm2149_vm4, %v5696_v58, -inf  ;;  %v5730_v36 = vrot.slane %v5729_v31, 1  ;;  %v5737_v41 = vrot.slane %v5736_v28, 1  ;;  %v5750_v45 = vmax.f32 %v5748_v13, %v5749_v3 }
 0x5ec   : > { %v6053_v2 = vsel %vm2149_vm4, %v5703_v32, -inf  ;;  %v5744_v12 = vrot.slane %v5743_v15, 1  ;;  %v5756_v6 = vrot.slane %v5755_v47, 2  ;;  %v4743_v25 = vadd.f32 %v10377_v30, %v4707_v14 }
 0x5ed   : > { %v5710_v60 = vmax.f32 %v5708_v49, %v5709_v40  ;;  %v10514_v22 = vmax.f32 %v5715_v44, %v5716_v56  ;;  %v5738_v19 = vmax.f32 %v5736_v28, %v5737_v41  ;;  %v5751_v46 = vrot.slane %v5750_v45, 1 }
 0x5ee   : > { %v10516_v51 = vmax.f32 %v5722_v53, %v5723_v18  ;;  %v5745_v62 = vmax.f32 %v5743_v15, %v5744_v12  ;;  %v5757_v34 = vmax.f32 %v5755_v47, %v5756_v6  ;;  %v4775_v11 = vmax.f32 %v4743_v25, 0.0 }
 0x5ef   : > { %v10518_v29 = vmax.f32 %v5729_v31, %v5730_v36  ;;  %v5752_v33 = vmax.f32 %v5750_v45, %v5751_v46  ;;  %v6045_v35 = vsel %vm2149_vm4, %v5738_v19, -inf  ;;  %v4708_v26 = vadd.f32 %v4668_v54, %v10491_v39  ;;  %v4671_v54 = vpop.f32.mrf.mxu1 }
 0x5f0   : > { %v5758_v20 = vrot.slane %v5757_v34, 1  ;;  %v6046_v43 = vmax.f32 %v10501_v5, %v6045_v35  ;;  %v6048_v59 = vsel %vm2149_vm4, %v5745_v62, -inf  ;;  %v4893_v0 = vrot.slane %v4775_v11, 2 }
 0x5f1   : > { %v6049_v4 = vmax.f32 %v6047_v42, %v6048_v59  ;;  %v6051_v63 = vsel %vm2149_vm4, %v5752_v33, -inf  ;;  %v4894_v7 = vrot.slane %v4775_v11, 4  ;;  %v4895_v50 = vrot.slane %v4775_v11, 6 }
 0x5f2   : > { %v5759_v55 = vmax.f32 %v5757_v34, %v5758_v20  ;;  %v6052_v8 = vmax.f32 %v6050_v38, %v6051_v63  ;;  %v6140_v10 = vpack.c.bf16 %v6046_v43, %v6046_v43  ;;  %v5760_v23 = vsel %vm2152_vm5, %v4775_v11, -inf  ;;  %v4392_v20 = vpop.f32.mrf.mxu0 }
 0x5f3   : > { %v6141_v27 = vpack.c.bf16 %v6049_v4, %v6049_v4  ;;  %v5761_v49 = vrot.slane %v5760_v23, 4  ;;  %v5767_v39 = vsel %vm2152_vm5, %v4893_v0, -inf  ;;  %v5774_v44 = vsel %vm2152_vm5, %v4894_v7, -inf }
 0x5f4   : > { %v6054_v5 = vsel %vm2149_vm4, %v5759_v55, -inf  ;;  %v6142_v17 = vpack.c.bf16 %v6052_v8, %v6052_v8  ;;  %v6268_v9 = vunpack.c.l.b16 %v6140_v10  ;;  %v5768_v42 = vrot.slane %v5767_v39, 4 }
 0x5f5   : > { %v6055_v53 = vmax.f32 %v6053_v2, %v6054_v5  ;;  %v6269_v1 = vunpack.c.l.b16 %v6141_v27  ;;  %v5762_v61 = vmax.f32 %v5760_v23, %v5761_v49  ;;  %v5775_v58 = vrot.slane %v5774_v44, 4 }
 0x5f6   : > { %v6270_v31 = vunpack.c.l.b16 %v6142_v17  ;;  %v5769_v57 = vmax.f32 %v5767_v39, %v5768_v42  ;;  %v5781_v13 = vsel %vm2152_vm5, %v4895_v50, -inf  ;;  %v4744_v32 = vadd.f32 %v10377_v30, %v4708_v26 }
 0x5f7   : > { %v6143_v24 = vpack.c.bf16 %v6055_v53, %v6055_v53  ;;  %v6333_v37 = vsel %vm6284_vm6, %v6269_v1, %v6268_v9  ;;  %v5763_v14 = vrot.slane %v5762_v61, 2  ;;  %v5776_v52 = vmax.f32 %v5774_v44, %v5775_v58 }
 0x5f8   : > { %v6334_v40 = vsel %vm6286_vm7, %v6270_v31, %v6333_v37  ;;  %v5770_v56 = vrot.slane %v5769_v57, 2  ;;  %v5782_v28 = vrot.slane %v5781_v13, 4  ;;  %v4776_v3 = vmax.f32 %v4744_v32, 0.0  ;;  %v4113_v31 = vpop.f32.mrf.mxu3 }
 0x5f9   : > { %v6056_v18 = vsel %vm2149_vm4, %v5710_v60, -inf  ;;  %v6271_v15 = vunpack.c.l.b16 %v6143_v24  ;;  %v5764_v47 = vmax.f32 %v5762_v61, %v5763_v14  ;;  %v5777_v38 = vrot.slane %v5776_v52, 2 }
 0x5fa   : > { %v5771_v36 = vmax.f32 %v5769_v57, %v5770_v56  ;;  %v5783_v41 = vmax.f32 %v5781_v13, %v5782_v28  ;;  %v4896_v45 = vrot.slane %v4776_v3, 2  ;;  %v4897_v2 = vrot.slane %v4776_v3, 4  ;;  %v4674_v56 = vpop.f32.mrf.mxu1 }
 0x5fb   : > { %v6335_v12 = vsel %vm6288_vm8, %v6271_v15, %v6334_v40  ;;  %v5765_v6 = vrot.slane %v5764_v47, 1  ;;  %v5778_v25 = vmax.f32 %v5776_v52, %v5777_v38  ;;  %v4898_v19 = vrot.slane %v4776_v3, 6  ;;  %v4395_v15 = vpop.f32.mrf.mxu0 }
 0x5fc   : > { %v5772_v46 = vrot.slane %v5771_v36, 1  ;;  %v5784_v62 = vrot.slane %v5783_v41, 2  ;;  %v5788_v34 = vsel %vm2152_vm5, %v4776_v3, -inf  ;;  %v5795_v11 = vsel %vm2152_vm5, %v4896_v45, -inf }
 0x5fd   : > { %v5766_v60 = vmax.f32 %v5764_v47, %v5765_v6  ;;  %v5779_v33 = vrot.slane %v5778_v25, 1  ;;  %v5789_v35 = vrot.slane %v5788_v34, 4  ;;  %v5796_v26 = vrot.slane %v5795_v11, 4 }
 0x5fe   : > { %v6059_v43 = vsel %vm2149_vm4, %v10514_v22, -inf  ;;  %v5773_v59 = vmax.f32 %v5771_v36, %v5772_v46  ;;  %v5785_v0 = vmax.f32 %v5783_v41, %v5784_v62  ;;  %v5802_v4 = vsel %vm2152_vm5, %v4897_v2, -inf }
 0x5ff   : > { %v5780_v63 = vmax.f32 %v5778_v25, %v5779_v33  ;;  %v6057_v7 = vsel %vm2149_vm4, %v5766_v60, -inf  ;;  %v5790_v50 = vmax.f32 %v5788_v34, %v5789_v35  ;;  %v5809_v55 = vsel %vm2152_vm5, %v4898_v19, -inf }
 0x600   : > { %v5786_v8 = vrot.slane %v5785_v0, 1  ;;  %v6058_v10 = vmax.f32 %v6056_v18, %v6057_v7  ;;  %v6060_v23 = vsel %vm2149_vm4, %v5773_v59, -inf  ;;  %v5797_v27 = vmax.f32 %v5795_v11, %v5796_v26 }
 0x601   : > { %v6062_v49 = vsel %vm2149_vm4, %v10516_v51, -inf  ;;  %v6065_v22 = vsel %vm2149_vm4, %v10518_v29, -inf  ;;  %v6061_v39 = vmax.f32 %v6059_v43, %v6060_v23  ;;  %v6063_v44 = vsel %vm2149_vm4, %v5780_v63, -inf }
 0x602   : > { %v5787_v5 = vmax.f32 %v5785_v0, %v5786_v8  ;;  %v6064_v17 = vmax.f32 %v6062_v49, %v6063_v44  ;;  %v6144_v9 = vpack.c.bf16 %v6058_v10, %v6058_v10  ;;  %v5803_v42 = vrot.slane %v5802_v4, 4 }
 0x603   : > { %v6145_v53 = vpack.c.bf16 %v6061_v39, %v6061_v39  ;;  %v5791_v1 = vrot.slane %v5790_v50, 2  ;;  %v5810_v61 = vrot.slane %v5809_v55, 4  ;;  %v4709_v58 = vadd.f32 %v4671_v54, %v10509_v48 }
 0x604   : > { %v6066_v57 = vsel %vm2149_vm4, %v5787_v5, -inf  ;;  %v6146_v13 = vpack.c.bf16 %v6064_v17, %v6064_v17  ;;  %v6272_v51 = vunpack.c.l.b16 %v6144_v9  ;;  %v5798_v32 = vrot.slane %v5797_v27, 2 }
 0x605   : > { %v6067_v24 = vmax.f32 %v6065_v22, %v6066_v57  ;;  %v6273_v29 = vunpack.c.l.b16 %v6145_v53  ;;  %v5804_v52 = vmax.f32 %v5802_v4, %v5803_v42  ;;  %v5811_v40 = vmax.f32 %v5809_v55, %v5810_v61  ;;  %v4677_v22 = vpop.f32.mrf.mxu1 }
 0x606   : > { %v6274_v37 = vunpack.c.l.b16 %v6146_v13  ;;  %v6336_v14 = vsel %vm6290_vm9, %v6272_v51, %v6335_v12  ;;  %v4428_v28 = vadd.f32 %v4392_v20, %v10483_v16  ;;  %v4147_v3 = vadd.f32 %v4113_v31, %v10487_v21 }
 0x607   : > { %v6147_v18 = vpack.c.bf16 %v6067_v24, %v6067_v24  ;;  %v6337_v48 = vsel %vm6292_vm10, %v6273_v29, %v6336_v14  ;;  %v5792_v38 = vmax.f32 %v5790_v50, %v5791_v1  ;;  %v5799_v36 = vmax.f32 %v5797_v27, %v5798_v32 }
 0x608   : > { %v6338_v47 = vsel %vm6294_vm11, %v6274_v37, %v6337_v48  ;;  %v4745_v41 = vadd.f32 %v10377_v30, %v4709_v58  ;;  %v4710_v2 = vadd.f32 %v4674_v56, %v4428_v28  ;;  %v5805_v12 = vrot.slane %v5804_v52, 2 }
 0x609   : > { %v6275_v45 = vunpack.c.l.b16 %v6147_v18  ;;  %v5812_v6 = vrot.slane %v5811_v40, 2  ;;  %v4429_v19 = vadd.f32 %v4395_v15, %v4147_v3  ;;  %v5793_v62 = vrot.slane %v5792_v38, 1 }
 0x60a   : > { %v4777_v25 = vmax.f32 %v4745_v41, 0.0  ;;  %v4746_v21 = vadd.f32 %v10377_v30, %v4710_v2  ;;  %v5800_v34 = vrot.slane %v5799_v36, 1  ;;  %v5806_v26 = vmax.f32 %v5804_v52, %v5805_v12 }
 0x60b   : > { %v6339_v16 = vsel %vm6296_vm12, %v6275_v45, %v6338_v47  ;;  %v5813_v20 = vmax.f32 %v5811_v40, %v5812_v6  ;;  %v5794_v7 = vmax.f32 %v5792_v38, %v5793_v62  ;;  %v4711_v57 = vadd.f32 %v4677_v22, %v4429_v19  ;;  %v7163_v47 = vld [vmem:[#allocation8] ss:$0 sm:$0xff] }
 0x60c   : > { %v6353_v46 = vpack.c.b16 %v6339_v16, %v6339_v16  ;;  %v4899_v11 = vrot.slane %v4777_v25, 2  ;;  %v4900_v54 = vrot.slane %v4777_v25, 4  ;;  %v4901_v60 = vrot.slane %v4777_v25, 6 }
 0x60d   : > { %v5816_v33 = vsel %vm2152_vm5, %v4777_v25, -inf  ;;  %v4778_v35 = vmax.f32 %v4746_v21, 0.0  ;;  %v5801_v39 = vmax.f32 %v5799_v36, %v5800_v34  ;;  %v5807_v44 = vrot.slane %v5806_v26, 1 }
 0x60e   : > { %6370 = vst.msk [vmem:[%s9997_s30 + $0x18] sm:$0xf] %vm6363_vm13, %v6353_v46  ;;  %v5817_v43 = vrot.slane %v5816_v33, 4  ;;  %v5823_v59 = vsel %vm2152_vm5, %v4899_v11, -inf  ;;  %v5830_v4 = vsel %vm2152_vm5, %v4900_v54, -inf  ;;  %v5837_v30 = vsel %vm2152_vm5, %v4901_v60, -inf }
 0x60f   : > { %v5824_v0 = vrot.slane %v5823_v59, 4  ;;  %v4902_v63 = vrot.slane %v4778_v35, 2  ;;  %v5831_v55 = vrot.slane %v5830_v4, 4  ;;  %v5838_v8 = vrot.slane %v5837_v30, 4 }
 0x610   : > { %v5818_v50 = vmax.f32 %v5816_v33, %v5817_v43  ;;  %v4903_v23 = vrot.slane %v4778_v35, 4  ;;  %v4904_v27 = vrot.slane %v4778_v35, 6  ;;  %v5844_v49 = vsel %vm2152_vm5, %v4778_v35, -inf }
 0x611   : > { %v5825_v10 = vmax.f32 %v5823_v59, %v5824_v0  ;;  %v5814_v5 = vrot.slane %v5813_v20, 1  ;;  %v5845_v17 = vrot.slane %v5844_v49, 4  ;;  %v5851_v42 = vsel %vm2152_vm5, %v4902_v63, -inf }
 0x612   : > { %v5819_v9 = vrot.slane %v5818_v50, 2  ;;  %v5858_v53 = vsel %vm2152_vm5, %v4903_v23, -inf  ;;  %v5865_v1 = vsel %vm2152_vm5, %v4904_v27, -inf  ;;  %v5832_v61 = vmax.f32 %v5830_v4, %v5831_v55 }
 0x613   : > { %v5839_v58 = vmax.f32 %v5837_v30, %v5838_v8  ;;  %v5846_v31 = vmax.f32 %v5844_v49, %v5845_v17  ;;  %v5826_v13 = vrot.slane %v5825_v10, 2  ;;  %v5852_v51 = vrot.slane %v5851_v42, 4 }
 0x614   : > { %v5859_v32 = vrot.slane %v5858_v53, 4  ;;  %v5866_v24 = vrot.slane %v5865_v1, 4  ;;  %v5808_v29 = vmax.f32 %v5806_v26, %v5807_v44  ;;  %v5815_v37 = vmax.f32 %v5813_v20, %v5814_v5 }
 0x615   : > { %v6068_v14 = vsel %vm2149_vm4, %v5794_v7, -inf  ;;  %v5847_v52 = vrot.slane %v5846_v31, 2  ;;  %v10569_v40 = vmax.f32 %v5818_v50, %v5819_v9  ;;  %v5853_v56 = vmax.f32 %v5851_v42, %v5852_v51 }
 0x616   : > { %v5860_v28 = vmax.f32 %v5858_v53, %v5859_v32  ;;  %v5867_v3 = vmax.f32 %v5865_v1, %v5866_v24  ;;  %v5833_v18 = vrot.slane %v5832_v61, 2  ;;  %v5840_v48 = vrot.slane %v5839_v58, 2 }
 0x617   : > { %v5848_v15 = vmax.f32 %v5846_v31, %v5847_v52  ;;  %v4747_v38 = vadd.f32 %v7163_v47, %v4711_v57  ;;  %v5827_v36 = vmax.f32 %v5825_v10, %v5826_v13  ;;  %v5854_v41 = vrot.slane %v5853_v56, 2 }
 0x618   : > { %v5861_v45 = vrot.slane %v5860_v28, 2  ;;  %v5868_v2 = vrot.slane %v5867_v3, 2  ;;  %v6071_v12 = vsel %vm2149_vm4, %v5801_v39, -inf  ;;  %v6074_v6 = vsel %vm2149_vm4, %v5808_v29, -inf }
 0x619   : > { %v6077_v25 = vsel %vm2149_vm4, %v5815_v37, -inf  ;;  %v5849_v19 = vrot.slane %v5848_v15, 1  ;;  %v5821_v16 = vrot.slane %v10569_v40, 1  ;;  %v5855_v21 = vmax.f32 %v5853_v56, %v5854_v41 }
 0x61a   : > { %v5862_v46 = vmax.f32 %v5860_v28, %v5861_v45  ;;  %v5869_v62 = vmax.f32 %v5867_v3, %v5868_v2  ;;  %v5834_v34 = vmax.f32 %v5832_v61, %v5833_v18  ;;  %v5841_v11 = vmax.f32 %v5839_v58, %v5840_v48 }
 0x61b   : > { %v5850_v54 = vmax.f32 %v5848_v15, %v5849_v19  ;;  %v4779_v60 = vmax.f32 %v4747_v38, 0.0  ;;  %v5828_v33 = vrot.slane %v5827_v36, 1  ;;  %v5856_v35 = vrot.slane %v5855_v21, 1 }
 0x61c   : > { %v5863_v26 = vrot.slane %v5862_v46, 1  ;;  %v5870_v20 = vrot.slane %v5869_v62, 1  ;;  %v5835_v42 = vrot.slane %v5834_v34, 1  ;;  %v5842_v51 = vrot.slane %v5841_v11, 1 }
 0x61d   : > { %v6069_v43 = vsel %vm2149_vm4, %v5850_v54, -inf  ;;  %v4905_v59 = vrot.slane %v4779_v60, 2  ;;  %v4906_v0 = vrot.slane %v4779_v60, 4  ;;  %v4907_v4 = vrot.slane %v4779_v60, 6 }
 0x61e   : > { %v5857_v30 = vmax.f32 %v5855_v21, %v5856_v35  ;;  %v5864_v63 = vmax.f32 %v5862_v46, %v5863_v26  ;;  %v5871_v7 = vmax.f32 %v5869_v62, %v5870_v20  ;;  %v6070_v50 = vmax.f32 %v6068_v14, %v6069_v43 }
 0x61f   : > { %v5872_v55 = vsel %vm2152_vm5, %v4779_v60, -inf  ;;  %v5879_v8 = vsel %vm2152_vm5, %v4905_v59, -inf  ;;  %v5886_v10 = vsel %vm2152_vm5, %v4906_v0, -inf  ;;  %v5893_v23 = vsel %vm2152_vm5, %v4907_v4, -inf }
 0x620   : > { %v6072_v27 = vsel %vm2149_vm4, %v5857_v30, -inf  ;;  %v6075_v49 = vsel %vm2149_vm4, %v5864_v63, -inf  ;;  %v6078_v22 = vsel %vm2149_vm4, %v5871_v7, -inf  ;;  %v6148_v39 = vpack.c.bf16 %v6070_v50, %v6070_v50 }
 0x621   : > { %v6073_v44 = vmax.f32 %v6071_v12, %v6072_v27  ;;  %v6076_v5 = vmax.f32 %v6074_v6, %v6075_v49  ;;  %v6079_v17 = vmax.f32 %v6077_v25, %v6078_v22  ;;  %v5873_v9 = vrot.slane %v5872_v55, 4 }
 0x622   : > { %v5880_v53 = vrot.slane %v5879_v8, 4  ;;  %v5887_v1 = vrot.slane %v5886_v10, 4  ;;  %v5894_v61 = vrot.slane %v5893_v23, 4  ;;  %v6276_v37 = vunpack.c.l.b16 %v6148_v39 }
 0x623   : > { %v6149_v58 = vpack.c.bf16 %v6073_v44, %v6073_v44  ;;  %v6150_v31 = vpack.c.bf16 %v6076_v5, %v6076_v5  ;;  %v6151_v57 = vpack.c.bf16 %v6079_v17, %v6079_v17  ;;  %v5874_v13 = vmax.f32 %v5872_v55, %v5873_v9 }
 0x624   : > { %v5881_v32 = vmax.f32 %v5879_v8, %v5880_v53  ;;  %v5888_v24 = vmax.f32 %v5886_v10, %v5887_v1  ;;  %v5895_v29 = vmax.f32 %v5893_v23, %v5894_v61  ;;  %v5822_v28 = vmax.f32 %v10569_v40, %v5821_v16 }
 0x625   : > { %v6277_v14 = vunpack.c.l.b16 %v6149_v58  ;;  %v6278_v52 = vunpack.c.l.b16 %v6150_v31  ;;  %v5875_v56 = vrot.slane %v5874_v13, 2  ;;  %v5829_v15 = vmax.f32 %v5827_v36, %v5828_v33 }
 0x626   : > { %v5882_v3 = vrot.slane %v5881_v32, 2  ;;  %v5889_v18 = vrot.slane %v5888_v24, 2  ;;  %v5896_v48 = vrot.slane %v5895_v29, 2  ;;  %v6279_v47 = vunpack.c.l.b16 %v6151_v57 }
 0x627   : > { %v6340_v38 = vsel %vm6284_vm6, %v6277_v14, %v6276_v37  ;;  %v5876_v41 = vmax.f32 %v5874_v13, %v5875_v56  ;;  %v5836_v25 = vmax.f32 %v5834_v34, %v5835_v42  ;;  %v5843_v19 = vmax.f32 %v5841_v11, %v5842_v51 }
 0x628   : > { %v6341_v45 = vsel %vm6286_vm7, %v6278_v52, %v6340_v38  ;;  %v5883_v2 = vmax.f32 %v5881_v32, %v5882_v3  ;;  %v5890_v12 = vmax.f32 %v5888_v24, %v5889_v18  ;;  %v5897_v6 = vmax.f32 %v5895_v29, %v5896_v48 }
 0x629   : > { %v6342_v21 = vsel %vm6288_vm8, %v6279_v47, %v6341_v45  ;;  %v5877_v46 = vrot.slane %v5876_v41, 1  ;;  %v6080_v36 = vsel %vm2149_vm4, %v5822_v28, -inf  ;;  %v6083_v26 = vsel %vm2149_vm4, %v5829_v15, -inf }
 0x62a   : > { %v5884_v62 = vrot.slane %v5883_v2, 1  ;;  %v5891_v40 = vrot.slane %v5890_v12, 1  ;;  %v5898_v16 = vrot.slane %v5897_v6, 1  ;;  %v6086_v20 = vsel %vm2149_vm4, %v5836_v25, -inf }
 0x62b   : > { %v5878_v54 = vmax.f32 %v5876_v41, %v5877_v46  ;;  %v6089_v43 = vsel %vm2149_vm4, %v5843_v19, -inf }
 0x62c   : > { %v5885_v60 = vmax.f32 %v5883_v2, %v5884_v62  ;;  %v5892_v33 = vmax.f32 %v5890_v12, %v5891_v40  ;;  %v5899_v35 = vmax.f32 %v5897_v6, %v5898_v16 }
 0x62d   : > { %v6081_v34 = vsel %vm2149_vm4, %v5878_v54, -inf }
 0x62e   : > { %v6082_v11 = vmax.f32 %v6080_v36, %v6081_v34  ;;  %v6084_v59 = vsel %vm2149_vm4, %v5885_v60, -inf  ;;  %v6087_v0 = vsel %vm2149_vm4, %v5892_v33, -inf  ;;  %v6090_v4 = vsel %vm2149_vm4, %v5899_v35, -inf }
 0x62f   : > { %v6085_v30 = vmax.f32 %v6083_v26, %v6084_v59  ;;  %v6088_v63 = vmax.f32 %v6086_v20, %v6087_v0  ;;  %v6091_v7 = vmax.f32 %v6089_v43, %v6090_v4 }
 0x630   : > { %v6152_v50 = vpack.c.bf16 %v6082_v11, %v6082_v11 }
 0x631   : > { %v6153_v55 = vpack.c.bf16 %v6085_v30, %v6085_v30  ;;  %v6154_v8 = vpack.c.bf16 %v6088_v63, %v6088_v63  ;;  %v6155_v10 = vpack.c.bf16 %v6091_v7, %v6091_v7 }
 0x632   : > { %v6280_v23 = vunpack.c.l.b16 %v6152_v50 }
 0x633   : > { %v6281_v27 = vunpack.c.l.b16 %v6153_v55  ;;  %v6282_v49 = vunpack.c.l.b16 %v6154_v8  ;;  %v6283_v39 = vunpack.c.l.b16 %v6155_v10 }
 0x634   : > { %v6343_v22 = vsel %vm6290_vm9, %v6280_v23, %v6342_v21 }
 0x635   : > { %v6344_v44 = vsel %vm6292_vm10, %v6281_v27, %v6343_v22 }
 0x636   : > { %v6345_v5 = vsel %vm6294_vm11, %v6282_v49, %v6344_v44 }
 0x637   : > { %v6346_v17 = vsel %vm6296_vm12, %v6283_v39, %v6345_v5 }
 0x638   : > { %v6354_v9 = vpack.c.b16 %v6346_v17, %v6346_v17 }
 0x63a   : > { %6371 = vst.msk [vmem:[%s9997_s30 + $0x1c] sm:$0xf] %vm6363_vm13, %v6354_v9 }
 0x63b PF: > { %s18_s18 = sadd.s32 1, %s7302_s18  }
 0x63c   : > { %p15_p7 = scmp.ge.s32.totalorder %s18_s18, 4  }
 0x63e   :  { %17 = sbr.rel (!%p15_p7) target bundleno = 3 (0x3), region = 105 }
 0x643   :  { %6393 = vsyncpa [#allocation4], 1 }
 0x644   :  { %6395 = vsyncpa [#allocation4 + $0x1], 1 }
 0x645   :  { %6396 = vsyncpa [#allocation6], 1 }
 0x646   :  { %6397 = vsyncpa [#allocation9], 1 }

</bundles_post_ra>
